<compile_context>
chip_gen: v7x
topology: tpu7x:2x2x1
jax: 0.10.0
libtpu: 0.0.40
codegen_flags: <defaults>
</compile_context>

<pallas_src>
import functools

import jax
import jax.numpy as jnp
from jax.experimental import pallas as pl
from jax.experimental.pallas import tpu as pltpu


# ----------------------------- helpers --------------------------------------

def _pick_tile(dim, cap, align, min_tiles=1):
    """Largest align-multiple tile <= cap dividing dim; optionally force >= min_tiles tiles."""
    if dim % align != 0:
        return dim
    limit = min(cap, dim)
    if min_tiles > 1 and dim // min_tiles >= align:
        limit = min(limit, dim // min_tiles)
    t = (limit // align) * align
    while t >= align:
        if dim % t == 0:
            return t
        t -= align
    return dim


def _full_spec(shape):
    nd = len(shape)
    return pl.BlockSpec(shape, lambda i, _nd=nd: (0,) * _nd)


@functools.lru_cache(maxsize=None)
def _vmem_limit_bytes():
    """Scoped-VMEM request with headroom: 64 MiB on 128-MiB parts, 48 MiB on v7x (64 MiB)."""
    cap = 128 * 1024 * 1024
    try:
        cap = int(getattr(pltpu.get_tpu_info(), "vmem_capacity_bytes", cap))
    except Exception:
        pass
    return min(64 * 1024 * 1024, (cap * 3) // 4)


def _cparams(dim_sem):
    return pltpu.CompilerParams(dimension_semantics=dim_sem,
                                vmem_limit_bytes=_vmem_limit_bytes())


# ----------------------------- Pallas kernels -------------------------------

def conv_relu_bn_pool_kernel(p_ref, w_ref, b_ref, scale_ref, shift_ref, o_ref):
    """Fused 3x3 conv + bias + ReLU + eval-BN + 2x2 max-pool for one tile of pooled pixels.

    p_ref:  (tm, 16*Cin)       shared 4x4-window patches (bf16), one row per pooled pixel
    w_ref:  (4, 16*Cin, Cout)  per-pool-quadrant zero-padded conv weights (bf16)
    b_ref, scale_ref, shift_ref: (1, Cout) f32
    o_ref:  (tm, Cout)         pooled output rows (bf16)
    """
    p = p_ref[...]
    bias, scale, shift = b_ref[...], scale_ref[...], shift_ref[...]

    def quad(qi):
        y = jnp.dot(p, w_ref[qi], preferred_element_type=jnp.float32)
        # conv bias + ReLU + folded eval-mode BN, applied PRE-pool (exact even for scale<0)
        return jnp.maximum(y + bias, 0.0) * scale + shift

    pooled = jnp.maximum(jnp.maximum(quad(0), quad(1)), jnp.maximum(quad(2), quad(3)))
    # TODO(synk): for Cout=32/64 this store is lane-masked (<128 lanes); the suggested
    #             lane-dense (tm*Cout/128, 128) relayout before the store is not applied
    #             to avoid reshape-lowering risk at the small, non-8-aligned tiles here.
    o_ref[...] = pooled.astype(o_ref.dtype)


def matmul_bias_kernel(x_ref, w_ref, b_ref, o_ref, acc_ref):
    """Tiled (M,K)@(K,N) + bias with f32 accumulator (hoisted LSTM input projection)."""
    @pl.when(pl.program_id(2) == 0)
    def _():
        acc_ref[...] = jnp.zeros_like(acc_ref)

    acc_ref[...] += jnp.dot(x_ref[...], w_ref[...], preferred_element_type=jnp.float32)

    @pl.when(pl.program_id(2) == pl.num_programs(2) - 1)
    def _():
        o_ref[...] = (acc_ref[...] + b_ref[...]).astype(o_ref.dtype)


def lstm_seq_kernel(gx_ref, whh_ref, o_ref):
    """Whole forward LSTM recurrence in ONE kernel invocation.

    gx_ref:  (T, B, 4H) f32   precomputed x_t @ W_ih + b_ih + b_hh (VMEM resident)
    whh_ref: (H, 4H)    bf16  recurrent weight
    o_ref:   (B, H)     f32   final hidden state, written once after the loop
    """
    t_steps, bsz, _ = gx_ref.shape
    hd = whh_ref.shape[0]
    whh = whh_ref[...]                                  # hoisted out of the loop

    def step(t, carry):
        h, c = carry
        gates = gx_ref[t] + jnp.dot(h.astype(whh.dtype), whh,
                                    preferred_element_type=jnp.float32)  # (B,4H) i,f,g,o
        i = jax.nn.sigmoid(gates[:, 0:hd])
        f = jax.nn.sigmoid(gates[:, hd:2 * hd])
        g = jnp.tanh(gates[:, 2 * hd:3 * hd])
        o = jax.nn.sigmoid(gates[:, 3 * hd:4 * hd])
        c = f * c + i * g
        h = o * jnp.tanh(c)
        return h, c

    h0 = jnp.zeros((bsz, hd), jnp.float32)
    c0 = jnp.zeros((bsz, hd), jnp.float32)
    unroll = t_steps if t_steps <= 16 else 8
    h_last, _ = jax.lax.fori_loop(0, t_steps, step, (h0, c0), unroll=unroll)
    o_ref[...] = h_last                                 # single HBM writeback


def bwd_proj_cell_fc_kernel(hf_ref, xb_ref, wihb_ref, bb_ref,
                            w1_ref, b1_ref, w2_ref, b2_ref, o_ref):
    """Fused tail: backward-dir input projection + zero-state LSTM cell + concat + FC head.

    hf_ref: (B, H)  forward-direction final hidden state
    xb_ref: (B, F)  last-frame features (bf16); wihb_ref: (F, 4H); bb_ref: (1, 4H)
    """
    hd = hf_ref.shape[1]
    g = jnp.dot(xb_ref[...], wihb_ref[...], preferred_element_type=jnp.float32) + bb_ref[...]
    i = jax.nn.sigmoid(g[:, 0:hd])
    # forget gate is dead work: c0 = 0 so f * c0 == 0
    gg = jnp.tanh(g[:, 2 * hd:3 * hd])
    o = jax.nn.sigmoid(g[:, 3 * hd:4 * hd])
    hb = o * jnp.tanh(i * gg)                           # backward half of lstm_out[:, -1, :]

    hcat = jnp.concatenate([hf_ref[...], hb], axis=-1)  # (B, 2H)
    h1 = jnp.dot(hcat.astype(w1_ref.dtype), w1_ref[...],
                 preferred_element_type=jnp.float32) + b1_ref[...]
    h1 = jnp.maximum(h1, 0.0)
    # TODO(synk): Dropout(0.5) is identity at inference.
    o_ref[...] = (jnp.dot(h1.astype(w2_ref.dtype), w2_ref[...],
                          preferred_element_type=jnp.float32) + b2_ref[...]).astype(o_ref.dtype)


# ------------------------------ wrappers -------------------------------------

def _quadrant_weights(w):
    """(3,3,Cin,Cout) conv weight -> (4, 16*Cin, Cout): zero-padded 4x4 kernel per pool quadrant."""
    _, _, cin, cout = w.shape
    quads = []
    for a in (0, 1):
        for b in (0, 1):
            wq = jnp.zeros((4, 4, cin, cout), w.dtype)
            wq = wq.at[a:a + 3, b:b + 3].set(w)
            quads.append(wq.reshape(16 * cin, cout))
    return jnp.stack(quads, axis=0)


def _im2col_pool16(x):
    """x: (N,H,W,C) -> (N*(H/2)*(W/2), 16*C): the 4x4 input window feeding each pooled pixel.

    All four pooling quadrants share this patch tensor (4x HBM blow-up instead of 9x
    per-quadrant 3x3 im2col).
    TODO(synk): patches are still materialized by XLA; a fully in-kernel tap gather on
                padded NHWC tiles would cut HBM traffic further but is not implemented.
    """
    n, h, w, c = x.shape
    hh, wh = h // 2, w // 2
    xpad = jnp.pad(x, ((0, 0), (1, 1), (1, 1), (0, 0)))
    taps = []
    for p in range(4):
        for q in range(4):
            taps.append(xpad[:, p:p + 2 * hh:2, q:q + 2 * wh:2, :])
    return jnp.concatenate(taps, axis=-1).reshape(n * hh * wh, 16 * c)


def conv_block(patches, wq, bias, scale, shift):
    m, k = patches.shape
    cout = wq.shape[-1]
    # >= 2 M-tiles whenever possible so ("parallel",) can split across v7x's two TensorCores.
    tm = _pick_tile(m, 512, 8, min_tiles=2)
    return pl.pallas_call(
        conv_relu_bn_pool_kernel,
        out_shape=jax.ShapeDtypeStruct((m, cout), jnp.bfloat16),
        grid=(m // tm,),
        in_specs=[pl.BlockSpec((tm, k), lambda i: (i, 0)),
                  pl.BlockSpec((4, k, cout), lambda i: (0, 0, 0)),
                  pl.BlockSpec((1, cout), lambda i: (0, 0)),
                  pl.BlockSpec((1, cout), lambda i: (0, 0)),
                  pl.BlockSpec((1, cout), lambda i: (0, 0))],
        out_specs=pl.BlockSpec((tm, cout), lambda i: (i, 0)),
        compiler_params=_cparams(("parallel",)),
    )(patches, wq, bias, scale, shift)


def matmul_bias(x, w, b, out_dtype=jnp.float32):
    m, k = x.shape
    n = w.shape[1]
    tm = _pick_tile(m, 256, 8)
    tn = _pick_tile(n, 512, 128)
    tk = _pick_tile(k, 512, 128)
    return pl.pallas_call(
        matmul_bias_kernel,
        out_shape=jax.ShapeDtypeStruct((m, n), out_dtype),
        grid=(m // tm, n // tn, k // tk),
        in_specs=[pl.BlockSpec((tm, tk), lambda i, j, kk: (i, kk)),
                  pl.BlockSpec((tk, tn), lambda i, j, kk: (kk, j)),
                  pl.BlockSpec((1, tn), lambda i, j, kk: (0, j))],
        out_specs=pl.BlockSpec((tm, tn), lambda i, j, kk: (i, j)),
        scratch_shapes=[pltpu.VMEM((tm, tn), jnp.float32)],
        compiler_params=_cparams(("parallel", "parallel", "arbitrary")),
    )(x, w, b)


def lstm_scan_last(gx_tb4h, whh):
    """Run the T-step forward recurrence in one kernel; return the final hidden state (B, H)."""
    t, b, h4 = gx_tb4h.shape
    hd = h4 // 4
    return pl.pallas_call(
        lstm_seq_kernel,
        out_shape=jax.ShapeDtypeStruct((b, hd), jnp.float32),
        grid=(1,),
        in_specs=[_full_spec((t, b, h4)), _full_spec((hd, h4))],
        out_specs=_full_spec((b, hd)),
        compiler_params=_cparams(("arbitrary",)),
    )(gx_tb4h, whh)


def head(h_fwd_last, x_bwd, wih_b, bias_b, fc):
    b = h_fwd_last.shape[0]
    ncls = fc["w2"].shape[1]
    return pl.pallas_call(
        bwd_proj_cell_fc_kernel,
        out_shape=jax.ShapeDtypeStruct((b, ncls), jnp.float32),
        grid=(1,),
        in_specs=[_full_spec(h_fwd_last.shape), _full_spec(x_bwd.shape),
                  _full_spec(wih_b.shape), _full_spec(bias_b.shape),
                  _full_spec(fc["w1"].shape), _full_spec(fc["b1"].shape),
                  _full_spec(fc["w2"].shape), _full_spec(fc["b2"].shape)],
        out_specs=_full_spec((b, ncls)),
        compiler_params=_cparams(("arbitrary",)),
    )(h_fwd_last, x_bwd, wih_b, bias_b, fc["w1"], fc["b1"], fc["w2"], fc["b2"])


def cnn_lstm_forward(x, params):
    """x: (B, T, C, H, W) float32 — same call signature as CNNLSTM.forward (eval mode)."""
    bsz, t, c, h, w = x.shape
    feat = x.reshape(bsz * t, c, h, w).transpose(0, 2, 3, 1).astype(jnp.bfloat16)  # NCHW -> NHWC
    for layer in params["cnn"]:
        n, hc, wc, _ = feat.shape
        patches = _im2col_pool16(feat)                           # (M, 16*Cin) bf16
        wq = _quadrant_weights(layer["w"])                       # (4, 16*Cin, Cout) bf16
        out = conv_block(patches, wq, layer["bias"], layer["scale"], layer["shift"])
        feat = out.reshape(n, hc // 2, wc // 2, -1)

    n, hf, wf, cf = feat.shape
    # flatten in torch NCHW order to match x.view(batch, seq, -1)
    feat = jnp.transpose(feat, (0, 3, 1, 2)).reshape(bsz, t, cf * hf * wf)

    fdim = feat.shape[-1]
    hd = params["lstm_fwd"]["whh_t"].shape[0]

    # Forward direction: input projection hoisted into one tiled matmul (MXU rows = T*B);
    # the recurrence itself runs as a single kernel with the whole gate tensor in VMEM.
    x_tbf = jnp.transpose(feat, (1, 0, 2))                       # (T, B, F)
    gx_fwd = matmul_bias(x_tbf.reshape(t * bsz, fdim),
                         params["lstm_fwd"]["wih_t"],
                         params["lstm_fwd"]["bias"]).reshape(t, bsz, 4 * hd)
    h_fwd_last = lstm_scan_last(gx_fwd, params["lstm_fwd"]["whh_t"])

    # Backward half of lstm_out[:, -1, :] depends only on x[T-1] with zero initial state;
    # its input projection is fused into the head kernel (one launch, no gate HBM roundtrip).
    x_last = feat[:, t - 1, :]                                   # (B, F) bf16
    wih_b = params["lstm_bwd"]["wih_t"]
    bias_b = params["lstm_bwd"]["bias"]
    if wih_b.size * wih_b.dtype.itemsize > 8 * 1024 * 1024:
        # W_ih_bwd too large to keep VMEM-resident: project via the tiled matmul and feed
        # the fused head an identity projection instead.
        gxb = matmul_bias(x_last, wih_b, bias_b).astype(jnp.bfloat16)
        x_last, wih_b = gxb, jnp.eye(gxb.shape[1], dtype=jnp.bfloat16)
        bias_b = jnp.zeros_like(bias_b)
    return head(h_fwd_last, x_last, wih_b, bias_b, params["fc"])


# ---------------------------- parameter init ---------------------------------

def init_params(key, in_channels, height, width, hidden=128, num_classes=2):
    eps = 1e-5
    keys = iter(jax.random.split(key, 64))

    def nrm(shape, s=0.05):
        return s * jax.random.normal(next(keys), shape, jnp.float32)

    cnn = []
    cin = in_channels
    for cout in (32, 64, 128):
        w = nrm((3, 3, cin, cout))
        bias = nrm((1, cout))
        gamma = 1.0 + nrm((1, cout))
        beta = nrm((1, cout))
        run_mean = nrm((1, cout))
        run_var = jnp.abs(nrm((1, cout))) + 1.0
        scale = gamma / jnp.sqrt(run_var + eps)
        shift = beta - run_mean * scale
        cnn.append({"w": w.astype(jnp.bfloat16), "bias": bias, "scale": scale, "shift": shift})
        cin = cout

    feat_dim = 128 * (height // 8) * (width // 8)   # cnn_output_size for this spatial size

    def lstm_dir():
        return {"wih_t": nrm((feat_dim, 4 * hidden)).astype(jnp.bfloat16),
                "whh_t": nrm((hidden, 4 * hidden)).astype(jnp.bfloat16),
                "bias": nrm((1, 4 * hidden)) + nrm((1, 4 * hidden))}   # b_ih + b_hh

    fc = {"w1": nrm((2 * hidden, 64)).astype(jnp.bfloat16), "b1": nrm((1, 64)),
          "w2": nrm((64, num_classes)).astype(jnp.bfloat16), "b2": nrm((1, num_classes))}

    return {"cnn": cnn, "lstm_fwd": lstm_dir(), "lstm_bwd": lstm_dir(), "fc": fc}


# --------------------------------- main ---------------------------------------

if __name__ == "__main__":
    B, T, C, H, W = 2, 8, 3, 16, 16          # 16x16 -> 2x2x128 = 512 CNN features per frame
    key = jax.random.PRNGKey(0)
    kx, kp = jax.random.split(key)
    x = jax.random.normal(kx, (B, T, C, H, W), dtype=jnp.float32)
    params = init_params(kp, C, H, W, hidden=128, num_classes=2)

    fwd = jax.jit(cnn_lstm_forward)
    out = jax.block_until_ready(fwd(x, params))
    assert out.shape == (B, 2) and out.dtype == jnp.float32
    print("KERNEL_OK")
</pallas_src>

<mosaic_0001>
module attributes {stable_mosaic.version = 11 : i64} {
  func.func @conv_relu_bn_pool_kernel(%arg0: i32, %arg1: memref<512x48xbf16, #tpu.memory_space<vmem>>, %arg2: memref<4x48x32xbf16, #tpu.memory_space<vmem>>, %arg3: memref<1x32xf32, #tpu.memory_space<vmem>>, %arg4: memref<1x32xf32, #tpu.memory_space<vmem>>, %arg5: memref<1x32xf32, #tpu.memory_space<vmem>>, %arg6: memref<512x32xbf16, #tpu.memory_space<vmem>>) attributes {dimension_semantics = [#tpu.dimension_semantics<parallel>], iteration_bounds = array<i64: 2>, scalar_prefetch = 0 : i64, scratch_operands = 0 : i64, tpu.core_type = #tpu.core_type<tc>, window_params = [{transform_indices = @transform_0, window_bounds = array<i64: 512, 48>}, {pipeline_mode = #tpu.pipeline_mode<synchronous>, transform_indices = @transform_1, window_bounds = array<i64: 4, 48, 32>}, {pipeline_mode = #tpu.pipeline_mode<synchronous>, transform_indices = @transform_2, window_bounds = array<i64: 1, 32>}, {pipeline_mode = #tpu.pipeline_mode<synchronous>, transform_indices = @transform_3, window_bounds = array<i64: 1, 32>}, {pipeline_mode = #tpu.pipeline_mode<synchronous>, transform_indices = @transform_4, window_bounds = array<i64: 1, 32>}, {transform_indices = @transform_5, window_bounds = array<i64: 512, 32>}]} {
    %c0 = arith.constant 0 : index
    %c0_0 = arith.constant 0 : index
    %0 = vector.load %arg1[%c0, %c0_0] : memref<512x48xbf16, #tpu.memory_space<vmem>>, vector<512x48xbf16>
    %c0_1 = arith.constant 0 : index
    %c0_2 = arith.constant 0 : index
    %1 = vector.load %arg3[%c0_1, %c0_2] : memref<1x32xf32, #tpu.memory_space<vmem>>, vector<1x32xf32>
    %c0_3 = arith.constant 0 : index
    %c0_4 = arith.constant 0 : index
    %2 = vector.load %arg4[%c0_3, %c0_4] : memref<1x32xf32, #tpu.memory_space<vmem>>, vector<1x32xf32>
    %c0_5 = arith.constant 0 : index
    %c0_6 = arith.constant 0 : index
    %3 = vector.load %arg5[%c0_5, %c0_6] : memref<1x32xf32, #tpu.memory_space<vmem>>, vector<1x32xf32>
    %c0_7 = arith.constant 0 : index
    %c0_8 = arith.constant 0 : index
    %c0_9 = arith.constant 0 : index
    %4 = vector.load %arg2[%c0_7, %c0_8, %c0_9] : memref<4x48x32xbf16, #tpu.memory_space<vmem>>, vector<1x48x32xbf16>
    %5 = vector.shape_cast %4 : vector<1x48x32xbf16> to vector<48x32xbf16>
    %cst = arith.constant dense<0.000000e+00> : vector<512x32xf32>
    %6 = tpu.matmul %0, %5, %cst {dimension_numbers = #tpu.dot_dimension_numbers<[1], [0], [0], [1], [0, 0, 1, 1], [], []>} : vector<512x48xbf16>, vector<48x32xbf16>, vector<512x32xf32> -> vector<512x32xf32>
    %7 = vector.broadcast %1 : vector<1x32xf32> to vector<512x32xf32>
    %8 = arith.addf %6, %7 : vector<512x32xf32>
    %cst_10 = arith.constant 0.000000e+00 : f32
    %9 = vector.broadcast %cst_10 : f32 to vector<512x32xf32>
    %10 = arith.maximumf %8, %9 : vector<512x32xf32>
    %11 = vector.broadcast %2 : vector<1x32xf32> to vector<512x32xf32>
    %12 = arith.mulf %10, %11 : vector<512x32xf32>
    %13 = vector.broadcast %3 : vector<1x32xf32> to vector<512x32xf32>
    %14 = arith.addf %12, %13 : vector<512x32xf32>
    %c1 = arith.constant 1 : index
    %c0_11 = arith.constant 0 : index
    %c0_12 = arith.constant 0 : index
    %15 = vector.load %arg2[%c1, %c0_11, %c0_12] : memref<4x48x32xbf16, #tpu.memory_space<vmem>>, vector<1x48x32xbf16>
    %16 = vector.shape_cast %15 : vector<1x48x32xbf16> to vector<48x32xbf16>
    %cst_13 = arith.constant dense<0.000000e+00> : vector<512x32xf32>
    %17 = tpu.matmul %0, %16, %cst_13 {dimension_numbers = #tpu.dot_dimension_numbers<[1], [0], [0], [1], [0, 0, 1, 1], [], []>} : vector<512x48xbf16>, vector<48x32xbf16>, vector<512x32xf32> -> vector<512x32xf32>
    %18 = vector.broadcast %1 : vector<1x32xf32> to vector<512x32xf32>
    %19 = arith.addf %17, %18 : vector<512x32xf32>
    %cst_14 = arith.constant 0.000000e+00 : f32
    %20 = vector.broadcast %cst_14 : f32 to vector<512x32xf32>
    %21 = arith.maximumf %19, %20 : vector<512x32xf32>
    %22 = vector.broadcast %2 : vector<1x32xf32> to vector<512x32xf32>
    %23 = arith.mulf %21, %22 : vector<512x32xf32>
    %24 = vector.broadcast %3 : vector<1x32xf32> to vector<512x32xf32>
    %25 = arith.addf %23, %24 : vector<512x32xf32>
    %26 = arith.maximumf %14, %25 : vector<512x32xf32>
    %c2 = arith.constant 2 : index
    %c0_15 = arith.constant 0 : index
    %c0_16 = arith.constant 0 : index
    %27 = vector.load %arg2[%c2, %c0_15, %c0_16] : memref<4x48x32xbf16, #tpu.memory_space<vmem>>, vector<1x48x32xbf16>
    %28 = vector.shape_cast %27 : vector<1x48x32xbf16> to vector<48x32xbf16>
    %cst_17 = arith.constant dense<0.000000e+00> : vector<512x32xf32>
    %29 = tpu.matmul %0, %28, %cst_17 {dimension_numbers = #tpu.dot_dimension_numbers<[1], [0], [0], [1], [0, 0, 1, 1], [], []>} : vector<512x48xbf16>, vector<48x32xbf16>, vector<512x32xf32> -> vector<512x32xf32>
    %30 = vector.broadcast %1 : vector<1x32xf32> to vector<512x32xf32>
    %31 = arith.addf %29, %30 : vector<512x32xf32>
    %cst_18 = arith.constant 0.000000e+00 : f32
    %32 = vector.broadcast %cst_18 : f32 to vector<512x32xf32>
    %33 = arith.maximumf %31, %32 : vector<512x32xf32>
    %34 = vector.broadcast %2 : vector<1x32xf32> to vector<512x32xf32>
    %35 = arith.mulf %33, %34 : vector<512x32xf32>
    %36 = vector.broadcast %3 : vector<1x32xf32> to vector<512x32xf32>
    %37 = arith.addf %35, %36 : vector<512x32xf32>
    %c3 = arith.constant 3 : index
    %c0_19 = arith.constant 0 : index
    %c0_20 = arith.constant 0 : index
    %38 = vector.load %arg2[%c3, %c0_19, %c0_20] : memref<4x48x32xbf16, #tpu.memory_space<vmem>>, vector<1x48x32xbf16>
    %39 = vector.shape_cast %38 : vector<1x48x32xbf16> to vector<48x32xbf16>
    %cst_21 = arith.constant dense<0.000000e+00> : vector<512x32xf32>
    %40 = tpu.matmul %0, %39, %cst_21 {dimension_numbers = #tpu.dot_dimension_numbers<[1], [0], [0], [1], [0, 0, 1, 1], [], []>} : vector<512x48xbf16>, vector<48x32xbf16>, vector<512x32xf32> -> vector<512x32xf32>
    %41 = vector.broadcast %1 : vector<1x32xf32> to vector<512x32xf32>
    %42 = arith.addf %40, %41 : vector<512x32xf32>
    %cst_22 = arith.constant 0.000000e+00 : f32
    %43 = vector.broadcast %cst_22 : f32 to vector<512x32xf32>
    %44 = arith.maximumf %42, %43 : vector<512x32xf32>
    %45 = vector.broadcast %2 : vector<1x32xf32> to vector<512x32xf32>
    %46 = arith.mulf %44, %45 : vector<512x32xf32>
    %47 = vector.broadcast %3 : vector<1x32xf32> to vector<512x32xf32>
    %48 = arith.addf %46, %47 : vector<512x32xf32>
    %49 = arith.maximumf %37, %48 : vector<512x32xf32>
    %50 = arith.maximumf %26, %49 : vector<512x32xf32>
    %51 = arith.truncf %50 : vector<512x32xf32> to vector<512x32xbf16>
    %c0_23 = arith.constant 0 : index
    %c0_24 = arith.constant 0 : index
    %52 = vector.load %arg6[%c0_23, %c0_24] : memref<512x32xbf16, #tpu.memory_space<vmem>>, vector<512x32xbf16>
    tpu.vector_store %arg6[%c0_23, %c0_24], %51 {strides = array<i32>} : memref<512x32xbf16, #tpu.memory_space<vmem>>, vector<512x32xbf16>,
    return
  }
  func.func @transform_0(%arg0: i32) -> (i32, i32) {
    %c0_i32 = arith.constant 0 : i32
    %c0_i32_0 = arith.constant 0 : i32
    return %arg0, %c0_i32 : i32, i32
  }
  func.func @transform_1(%arg0: i32) -> (i32, i32, i32) {
    %c0_i32 = arith.constant 0 : i32
    %c0_i32_0 = arith.constant 0 : i32
    %c0_i32_1 = arith.constant 0 : i32
    %c0_i32_2 = arith.constant 0 : i32
    return %c0_i32, %c0_i32_0, %c0_i32_1 : i32, i32, i32
  }
  func.func @transform_2(%arg0: i32) -> (i32, i32) {
    %c0_i32 = arith.constant 0 : i32
    %c0_i32_0 = arith.constant 0 : i32
    %c0_i32_1 = arith.constant 0 : i32
    return %c0_i32, %c0_i32_0 : i32, i32
  }
  func.func @transform_3(%arg0: i32) -> (i32, i32) {
    %c0_i32 = arith.constant 0 : i32
    %c0_i32_0 = arith.constant 0 : i32
    %c0_i32_1 = arith.constant 0 : i32
    return %c0_i32, %c0_i32_0 : i32, i32
  }
  func.func @transform_4(%arg0: i32) -> (i32, i32) {
    %c0_i32 = arith.constant 0 : i32
    %c0_i32_0 = arith.constant 0 : i32
    %c0_i32_1 = arith.constant 0 : i32
    return %c0_i32, %c0_i32_0 : i32, i32
  }
  func.func @transform_5(%arg0: i32) -> (i32, i32) {
    %c0_i32 = arith.constant 0 : i32
    %c0_i32_0 = arith.constant 0 : i32
    return %arg0, %c0_i32 : i32, i32
  }
}

module attributes {stable_mosaic.version = 11 : i64} {
  func.func @conv_relu_bn_pool_kernel(%arg0: i32, %arg1: memref<128x512xbf16, #tpu.memory_space<vmem>>, %arg2: memref<4x512x64xbf16, #tpu.memory_space<vmem>>, %arg3: memref<1x64xf32, #tpu.memory_space<vmem>>, %arg4: memref<1x64xf32, #tpu.memory_space<vmem>>, %arg5: memref<1x64xf32, #tpu.memory_space<vmem>>, %arg6: memref<128x64xbf16, #tpu.memory_space<vmem>>) attributes {dimension_semantics = [#tpu.dimension_semantics<parallel>], iteration_bounds = array<i64: 2>, scalar_prefetch = 0 : i64, scratch_operands = 0 : i64, tpu.core_type = #tpu.core_type<tc>, window_params = [{transform_indices = @transform_0, window_bounds = array<i64: 128, 512>}, {pipeline_mode = #tpu.pipeline_mode<synchronous>, transform_indices = @transform_1, window_bounds = array<i64: 4, 512, 64>}, {pipeline_mode = #tpu.pipeline_mode<synchronous>, transform_indices = @transform_2, window_bounds = array<i64: 1, 64>}, {pipeline_mode = #tpu.pipeline_mode<synchronous>, transform_indices = @transform_3, window_bounds = array<i64: 1, 64>}, {pipeline_mode = #tpu.pipeline_mode<synchronous>, transform_indices = @transform_4, window_bounds = array<i64: 1, 64>}, {transform_indices = @transform_5, window_bounds = array<i64: 128, 64>}]} {
    %c0 = arith.constant 0 : index
    %c0_0 = arith.constant 0 : index
    %0 = vector.load %arg1[%c0, %c0_0] : memref<128x512xbf16, #tpu.memory_space<vmem>>, vector<128x512xbf16>
    %c0_1 = arith.constant 0 : index
    %c0_2 = arith.constant 0 : index
    %1 = vector.load %arg3[%c0_1, %c0_2] : memref<1x64xf32, #tpu.memory_space<vmem>>, vector<1x64xf32>
    %c0_3 = arith.constant 0 : index
    %c0_4 = arith.constant 0 : index
    %2 = vector.load %arg4[%c0_3, %c0_4] : memref<1x64xf32, #tpu.memory_space<vmem>>, vector<1x64xf32>
    %c0_5 = arith.constant 0 : index
    %c0_6 = arith.constant 0 : index
    %3 = vector.load %arg5[%c0_5, %c0_6] : memref<1x64xf32, #tpu.memory_space<vmem>>, vector<1x64xf32>
    %c0_7 = arith.constant 0 : index
    %c0_8 = arith.constant 0 : index
    %c0_9 = arith.constant 0 : index
    %4 = vector.load %arg2[%c0_7, %c0_8, %c0_9] : memref<4x512x64xbf16, #tpu.memory_space<vmem>>, vector<1x512x64xbf16>
    %5 = vector.shape_cast %4 : vector<1x512x64xbf16> to vector<512x64xbf16>
    %cst = arith.constant dense<0.000000e+00> : vector<128x64xf32>
    %6 = tpu.matmul %0, %5, %cst {dimension_numbers = #tpu.dot_dimension_numbers<[1], [0], [0], [1], [0, 0, 1, 1], [], []>} : vector<128x512xbf16>, vector<512x64xbf16>, vector<128x64xf32> -> vector<128x64xf32>
    %7 = vector.broadcast %1 : vector<1x64xf32> to vector<128x64xf32>
    %8 = arith.addf %6, %7 : vector<128x64xf32>
    %cst_10 = arith.constant 0.000000e+00 : f32
    %9 = vector.broadcast %cst_10 : f32 to vector<128x64xf32>
    %10 = arith.maximumf %8, %9 : vector<128x64xf32>
    %11 = vector.broadcast %2 : vector<1x64xf32> to vector<128x64xf32>
    %12 = arith.mulf %10, %11 : vector<128x64xf32>
    %13 = vector.broadcast %3 : vector<1x64xf32> to vector<128x64xf32>
    %14 = arith.addf %12, %13 : vector<128x64xf32>
    %c1 = arith.constant 1 : index
    %c0_11 = arith.constant 0 : index
    %c0_12 = arith.constant 0 : index
    %15 = vector.load %arg2[%c1, %c0_11, %c0_12] : memref<4x512x64xbf16, #tpu.memory_space<vmem>>, vector<1x512x64xbf16>
    %16 = vector.shape_cast %15 : vector<1x512x64xbf16> to vector<512x64xbf16>
    %cst_13 = arith.constant dense<0.000000e+00> : vector<128x64xf32>
    %17 = tpu.matmul %0, %16, %cst_13 {dimension_numbers = #tpu.dot_dimension_numbers<[1], [0], [0], [1], [0, 0, 1, 1], [], []>} : vector<128x512xbf16>, vector<512x64xbf16>, vector<128x64xf32> -> vector<128x64xf32>
    %18 = vector.broadcast %1 : vector<1x64xf32> to vector<128x64xf32>
    %19 = arith.addf %17, %18 : vector<128x64xf32>
    %cst_14 = arith.constant 0.000000e+00 : f32
    %20 = vector.broadcast %cst_14 : f32 to vector<128x64xf32>
    %21 = arith.maximumf %19, %20 : vector<128x64xf32>
    %22 = vector.broadcast %2 : vector<1x64xf32> to vector<128x64xf32>
    %23 = arith.mulf %21, %22 : vector<128x64xf32>
    %24 = vector.broadcast %3 : vector<1x64xf32> to vector<128x64xf32>
    %25 = arith.addf %23, %24 : vector<128x64xf32>
    %26 = arith.maximumf %14, %25 : vector<128x64xf32>
    %c2 = arith.constant 2 : index
    %c0_15 = arith.constant 0 : index
    %c0_16 = arith.constant 0 : index
    %27 = vector.load %arg2[%c2, %c0_15, %c0_16] : memref<4x512x64xbf16, #tpu.memory_space<vmem>>, vector<1x512x64xbf16>
    %28 = vector.shape_cast %27 : vector<1x512x64xbf16> to vector<512x64xbf16>
    %cst_17 = arith.constant dense<0.000000e+00> : vector<128x64xf32>
    %29 = tpu.matmul %0, %28, %cst_17 {dimension_numbers = #tpu.dot_dimension_numbers<[1], [0], [0], [1], [0, 0, 1, 1], [], []>} : vector<128x512xbf16>, vector<512x64xbf16>, vector<128x64xf32> -> vector<128x64xf32>
    %30 = vector.broadcast %1 : vector<1x64xf32> to vector<128x64xf32>
    %31 = arith.addf %29, %30 : vector<128x64xf32>
    %cst_18 = arith.constant 0.000000e+00 : f32
    %32 = vector.broadcast %cst_18 : f32 to vector<128x64xf32>
    %33 = arith.maximumf %31, %32 : vector<128x64xf32>
    %34 = vector.broadcast %2 : vector<1x64xf32> to vector<128x64xf32>
    %35 = arith.mulf %33, %34 : vector<128x64xf32>
    %36 = vector.broadcast %3 : vector<1x64xf32> to vector<128x64xf32>
    %37 = arith.addf %35, %36 : vector<128x64xf32>
    %c3 = arith.constant 3 : index
    %c0_19 = arith.constant 0 : index
    %c0_20 = arith.constant 0 : index
    %38 = vector.load %arg2[%c3, %c0_19, %c0_20] : memref<4x512x64xbf16, #tpu.memory_space<vmem>>, vector<1x512x64xbf16>
    %39 = vector.shape_cast %38 : vector<1x512x64xbf16> to vector<512x64xbf16>
    %cst_21 = arith.constant dense<0.000000e+00> : vector<128x64xf32>
    %40 = tpu.matmul %0, %39, %cst_21 {dimension_numbers = #tpu.dot_dimension_numbers<[1], [0], [0], [1], [0, 0, 1, 1], [], []>} : vector<128x512xbf16>, vector<512x64xbf16>, vector<128x64xf32> -> vector<128x64xf32>
    %41 = vector.broadcast %1 : vector<1x64xf32> to vector<128x64xf32>
    %42 = arith.addf %40, %41 : vector<128x64xf32>
    %cst_22 = arith.constant 0.000000e+00 : f32
    %43 = vector.broadcast %cst_22 : f32 to vector<128x64xf32>
    %44 = arith.maximumf %42, %43 : vector<128x64xf32>
    %45 = vector.broadcast %2 : vector<1x64xf32> to vector<128x64xf32>
    %46 = arith.mulf %44, %45 : vector<128x64xf32>
    %47 = vector.broadcast %3 : vector<1x64xf32> to vector<128x64xf32>
    %48 = arith.addf %46, %47 : vector<128x64xf32>
    %49 = arith.maximumf %37, %48 : vector<128x64xf32>
    %50 = arith.maximumf %26, %49 : vector<128x64xf32>
    %51 = arith.truncf %50 : vector<128x64xf32> to vector<128x64xbf16>
    %c0_23 = arith.constant 0 : index
    %c0_24 = arith.constant 0 : index
    %52 = vector.load %arg6[%c0_23, %c0_24] : memref<128x64xbf16, #tpu.memory_space<vmem>>, vector<128x64xbf16>
    tpu.vector_store %arg6[%c0_23, %c0_24], %51 {strides = array<i32>} : memref<128x64xbf16, #tpu.memory_space<vmem>>, vector<128x64xbf16>,
    return
  }
  func.func @transform_0(%arg0: i32) -> (i32, i32) {
    %c0_i32 = arith.constant 0 : i32
    %c0_i32_0 = arith.constant 0 : i32
    return %arg0, %c0_i32 : i32, i32
  }
  func.func @transform_1(%arg0: i32) -> (i32, i32, i32) {
    %c0_i32 = arith.constant 0 : i32
    %c0_i32_0 = arith.constant 0 : i32
    %c0_i32_1 = arith.constant 0 : i32
    %c0_i32_2 = arith.constant 0 : i32
    return %c0_i32, %c0_i32_0, %c0_i32_1 : i32, i32, i32
  }
  func.func @transform_2(%arg0: i32) -> (i32, i32) {
    %c0_i32 = arith.constant 0 : i32
    %c0_i32_0 = arith.constant 0 : i32
    %c0_i32_1 = arith.constant 0 : i32
    return %c0_i32, %c0_i32_0 : i32, i32
  }
  func.func @transform_3(%arg0: i32) -> (i32, i32) {
    %c0_i32 = arith.constant 0 : i32
    %c0_i32_0 = arith.constant 0 : i32
    %c0_i32_1 = arith.constant 0 : i32
    return %c0_i32, %c0_i32_0 : i32, i32
  }
  func.func @transform_4(%arg0: i32) -> (i32, i32) {
    %c0_i32 = arith.constant 0 : i32
    %c0_i32_0 = arith.constant 0 : i32
    %c0_i32_1 = arith.constant 0 : i32
    return %c0_i32, %c0_i32_0 : i32, i32
  }
  func.func @transform_5(%arg0: i32) -> (i32, i32) {
    %c0_i32 = arith.constant 0 : i32
    %c0_i32_0 = arith.constant 0 : i32
    return %arg0, %c0_i32 : i32, i32
  }
}

module attributes {stable_mosaic.version = 11 : i64} {
  func.func @conv_relu_bn_pool_kernel(%arg0: i32, %arg1: memref<32x1024xbf16, #tpu.memory_space<vmem>>, %arg2: memref<4x1024x128xbf16, #tpu.memory_space<vmem>>, %arg3: memref<1x128xf32, #tpu.memory_space<vmem>>, %arg4: memref<1x128xf32, #tpu.memory_space<vmem>>, %arg5: memref<1x128xf32, #tpu.memory_space<vmem>>, %arg6: memref<32x128xbf16, #tpu.memory_space<vmem>>) attributes {dimension_semantics = [#tpu.dimension_semantics<parallel>], iteration_bounds = array<i64: 2>, scalar_prefetch = 0 : i64, scratch_operands = 0 : i64, tpu.core_type = #tpu.core_type<tc>, window_params = [{transform_indices = @transform_0, window_bounds = array<i64: 32, 1024>}, {pipeline_mode = #tpu.pipeline_mode<synchronous>, transform_indices = @transform_1, window_bounds = array<i64: 4, 1024, 128>}, {pipeline_mode = #tpu.pipeline_mode<synchronous>, transform_indices = @transform_2, window_bounds = array<i64: 1, 128>}, {pipeline_mode = #tpu.pipeline_mode<synchronous>, transform_indices = @transform_3, window_bounds = array<i64: 1, 128>}, {pipeline_mode = #tpu.pipeline_mode<synchronous>, transform_indices = @transform_4, window_bounds = array<i64: 1, 128>}, {transform_indices = @transform_5, window_bounds = array<i64: 32, 128>}]} {
    %c0 = arith.constant 0 : index
    %c0_0 = arith.constant 0 : index
    %0 = vector.load %arg1[%c0, %c0_0] : memref<32x1024xbf16, #tpu.memory_space<vmem>>, vector<32x1024xbf16>
    %c0_1 = arith.constant 0 : index
    %c0_2 = arith.constant 0 : index
    %1 = vector.load %arg3[%c0_1, %c0_2] : memref<1x128xf32, #tpu.memory_space<vmem>>, vector<1x128xf32>
    %c0_3 = arith.constant 0 : index
    %c0_4 = arith.constant 0 : index
    %2 = vector.load %arg4[%c0_3, %c0_4] : memref<1x128xf32, #tpu.memory_space<vmem>>, vector<1x128xf32>
    %c0_5 = arith.constant 0 : index
    %c0_6 = arith.constant 0 : index
    %3 = vector.load %arg5[%c0_5, %c0_6] : memref<1x128xf32, #tpu.memory_space<vmem>>, vector<1x128xf32>
    %c0_7 = arith.constant 0 : index
    %c0_8 = arith.constant 0 : index
    %c0_9 = arith.constant 0 : index
    %4 = vector.load %arg2[%c0_7, %c0_8, %c0_9] : memref<4x1024x128xbf16, #tpu.memory_space<vmem>>, vector<1x1024x128xbf16>
    %5 = vector.shape_cast %4 : vector<1x1024x128xbf16> to vector<1024x128xbf16>
    %cst = arith.constant dense<0.000000e+00> : vector<32x128xf32>
    %6 = tpu.matmul %0, %5, %cst {dimension_numbers = #tpu.dot_dimension_numbers<[1], [0], [0], [1], [0, 0, 1, 1], [], []>} : vector<32x1024xbf16>, vector<1024x128xbf16>, vector<32x128xf32> -> vector<32x128xf32>
    %7 = vector.broadcast %1 : vector<1x128xf32> to vector<32x128xf32>
    %8 = arith.addf %6, %7 : vector<32x128xf32>
    %cst_10 = arith.constant 0.000000e+00 : f32
    %9 = vector.broadcast %cst_10 : f32 to vector<32x128xf32>
    %10 = arith.maximumf %8, %9 : vector<32x128xf32>
    %11 = vector.broadcast %2 : vector<1x128xf32> to vector<32x128xf32>
    %12 = arith.mulf %10, %11 : vector<32x128xf32>
    %13 = vector.broadcast %3 : vector<1x128xf32> to vector<32x128xf32>
    %14 = arith.addf %12, %13 : vector<32x128xf32>
    %c1 = arith.constant 1 : index
    %c0_11 = arith.constant 0 : index
    %c0_12 = arith.constant 0 : index
    %15 = vector.load %arg2[%c1, %c0_11, %c0_12] : memref<4x1024x128xbf16, #tpu.memory_space<vmem>>, vector<1x1024x128xbf16>
    %16 = vector.shape_cast %15 : vector<1x1024x128xbf16> to vector<1024x128xbf16>
    %cst_13 = arith.constant dense<0.000000e+00> : vector<32x128xf32>
    %17 = tpu.matmul %0, %16, %cst_13 {dimension_numbers = #tpu.dot_dimension_numbers<[1], [0], [0], [1], [0, 0, 1, 1], [], []>} : vector<32x1024xbf16>, vector<1024x128xbf16>, vector<32x128xf32> -> vector<32x128xf32>
    %18 = vector.broadcast %1 : vector<1x128xf32> to vector<32x128xf32>
    %19 = arith.addf %17, %18 : vector<32x128xf32>
    %cst_14 = arith.constant 0.000000e+00 : f32
    %20 = vector.broadcast %cst_14 : f32 to vector<32x128xf32>
    %21 = arith.maximumf %19, %20 : vector<32x128xf32>
    %22 = vector.broadcast %2 : vector<1x128xf32> to vector<32x128xf32>
    %23 = arith.mulf %21, %22 : vector<32x128xf32>
    %24 = vector.broadcast %3 : vector<1x128xf32> to vector<32x128xf32>
    %25 = arith.addf %23, %24 : vector<32x128xf32>
    %26 = arith.maximumf %14, %25 : vector<32x128xf32>
    %c2 = arith.constant 2 : index
    %c0_15 = arith.constant 0 : index
    %c0_16 = arith.constant 0 : index
    %27 = vector.load %arg2[%c2, %c0_15, %c0_16] : memref<4x1024x128xbf16, #tpu.memory_space<vmem>>, vector<1x1024x128xbf16>
    %28 = vector.shape_cast %27 : vector<1x1024x128xbf16> to vector<1024x128xbf16>
    %cst_17 = arith.constant dense<0.000000e+00> : vector<32x128xf32>
    %29 = tpu.matmul %0, %28, %cst_17 {dimension_numbers = #tpu.dot_dimension_numbers<[1], [0], [0], [1], [0, 0, 1, 1], [], []>} : vector<32x1024xbf16>, vector<1024x128xbf16>, vector<32x128xf32> -> vector<32x128xf32>
    %30 = vector.broadcast %1 : vector<1x128xf32> to vector<32x128xf32>
    %31 = arith.addf %29, %30 : vector<32x128xf32>
    %cst_18 = arith.constant 0.000000e+00 : f32
    %32 = vector.broadcast %cst_18 : f32 to vector<32x128xf32>
    %33 = arith.maximumf %31, %32 : vector<32x128xf32>
    %34 = vector.broadcast %2 : vector<1x128xf32> to vector<32x128xf32>
    %35 = arith.mulf %33, %34 : vector<32x128xf32>
    %36 = vector.broadcast %3 : vector<1x128xf32> to vector<32x128xf32>
    %37 = arith.addf %35, %36 : vector<32x128xf32>
    %c3 = arith.constant 3 : index
    %c0_19 = arith.constant 0 : index
    %c0_20 = arith.constant 0 : index
    %38 = vector.load %arg2[%c3, %c0_19, %c0_20] : memref<4x1024x128xbf16, #tpu.memory_space<vmem>>, vector<1x1024x128xbf16>
    %39 = vector.shape_cast %38 : vector<1x1024x128xbf16> to vector<1024x128xbf16>
    %cst_21 = arith.constant dense<0.000000e+00> : vector<32x128xf32>
    %40 = tpu.matmul %0, %39, %cst_21 {dimension_numbers = #tpu.dot_dimension_numbers<[1], [0], [0], [1], [0, 0, 1, 1], [], []>} : vector<32x1024xbf16>, vector<1024x128xbf16>, vector<32x128xf32> -> vector<32x128xf32>
    %41 = vector.broadcast %1 : vector<1x128xf32> to vector<32x128xf32>
    %42 = arith.addf %40, %41 : vector<32x128xf32>
    %cst_22 = arith.constant 0.000000e+00 : f32
    %43 = vector.broadcast %cst_22 : f32 to vector<32x128xf32>
    %44 = arith.maximumf %42, %43 : vector<32x128xf32>
    %45 = vector.broadcast %2 : vector<1x128xf32> to vector<32x128xf32>
    %46 = arith.mulf %44, %45 : vector<32x128xf32>
    %47 = vector.broadcast %3 : vector<1x128xf32> to vector<32x128xf32>
    %48 = arith.addf %46, %47 : vector<32x128xf32>
    %49 = arith.maximumf %37, %48 : vector<32x128xf32>
    %50 = arith.maximumf %26, %49 : vector<32x128xf32>
    %51 = arith.truncf %50 : vector<32x128xf32> to vector<32x128xbf16>
    %c0_23 = arith.constant 0 : index
    %c0_24 = arith.constant 0 : index
    %52 = vector.load %arg6[%c0_23, %c0_24] : memref<32x128xbf16, #tpu.memory_space<vmem>>, vector<32x128xbf16>
    tpu.vector_store %arg6[%c0_23, %c0_24], %51 {strides = array<i32>} : memref<32x128xbf16, #tpu.memory_space<vmem>>, vector<32x128xbf16>,
    return
  }
  func.func @transform_0(%arg0: i32) -> (i32, i32) {
    %c0_i32 = arith.constant 0 : i32
    %c0_i32_0 = arith.constant 0 : i32
    return %arg0, %c0_i32 : i32, i32
  }
  func.func @transform_1(%arg0: i32) -> (i32, i32, i32) {
    %c0_i32 = arith.constant 0 : i32
    %c0_i32_0 = arith.constant 0 : i32
    %c0_i32_1 = arith.constant 0 : i32
    %c0_i32_2 = arith.constant 0 : i32
    return %c0_i32, %c0_i32_0, %c0_i32_1 : i32, i32, i32
  }
  func.func @transform_2(%arg0: i32) -> (i32, i32) {
    %c0_i32 = arith.constant 0 : i32
    %c0_i32_0 = arith.constant 0 : i32
    %c0_i32_1 = arith.constant 0 : i32
    return %c0_i32, %c0_i32_0 : i32, i32
  }
  func.func @transform_3(%arg0: i32) -> (i32, i32) {
    %c0_i32 = arith.constant 0 : i32
    %c0_i32_0 = arith.constant 0 : i32
    %c0_i32_1 = arith.constant 0 : i32
    return %c0_i32, %c0_i32_0 : i32, i32
  }
  func.func @transform_4(%arg0: i32) -> (i32, i32) {
    %c0_i32 = arith.constant 0 : i32
    %c0_i32_0 = arith.constant 0 : i32
    %c0_i32_1 = arith.constant 0 : i32
    return %c0_i32, %c0_i32_0 : i32, i32
  }
  func.func @transform_5(%arg0: i32) -> (i32, i32) {
    %c0_i32 = arith.constant 0 : i32
    %c0_i32_0 = arith.constant 0 : i32
    return %arg0, %c0_i32 : i32, i32
  }
}

module attributes {stable_mosaic.version = 11 : i64} {
  func.func @matmul_bias_kernel(%arg0: i32, %arg1: i32, %arg2: i32, %arg3: memref<16x512xbf16, #tpu.memory_space<vmem>>, %arg4: memref<512x512xbf16, #tpu.memory_space<vmem>>, %arg5: memref<1x512xf32, #tpu.memory_space<vmem>>, %arg6: memref<16x512xf32, #tpu.memory_space<vmem>>, %arg7: memref<16x512xf32, #tpu.memory_space<vmem>>) attributes {dimension_semantics = [#tpu.dimension_semantics<parallel>, #tpu.dimension_semantics<parallel>, #tpu.dimension_semantics<arbitrary>], iteration_bounds = array<i64: 1, 1, 1>, scalar_prefetch = 0 : i64, scratch_operands = 1 : i64, tpu.core_type = #tpu.core_type<tc>, window_params = [{transform_indices = @transform_0, window_bounds = array<i64: 16, 512>}, {transform_indices = @transform_1, window_bounds = array<i64: 512, 512>}, {transform_indices = @transform_2, window_bounds = array<i64: 1, 512>}, {transform_indices = @transform_3, window_bounds = array<i64: 16, 512>}]} {
    %c0_i32 = arith.constant 0 : i32
    %0 = arith.cmpi eq, %arg2, %c0_i32 : i32
    %1 = arith.extui %0 : i1 to i32
    %c0_i32_0 = arith.constant 0 : i32
    %2 = arith.cmpi ne, %1, %c0_i32_0 : i32
    scf.if %2 {
      %cst_10 = arith.constant 0.000000e+00 : f32
      %12 = vector.broadcast %cst_10 : f32 to vector<16x512xf32>
      %c0_11 = arith.constant 0 : index
      %c0_12 = arith.constant 0 : index
      %13 = vector.load %arg7[%c0_11, %c0_12] : memref<16x512xf32, #tpu.memory_space<vmem>>, vector<16x512xf32>
      tpu.vector_store %arg7[%c0_11, %c0_12], %12 {strides = array<i32>} : memref<16x512xf32, #tpu.memory_space<vmem>>, vector<16x512xf32>,
    } else {
    }
    %c0 = arith.constant 0 : index
    %c0_1 = arith.constant 0 : index
    %3 = vector.load %arg7[%c0, %c0_1] : memref<16x512xf32, #tpu.memory_space<vmem>>, vector<16x512xf32>
    %c0_2 = arith.constant 0 : index
    %c0_3 = arith.constant 0 : index
    %4 = vector.load %arg3[%c0_2, %c0_3] : memref<16x512xbf16, #tpu.memory_space<vmem>>, vector<16x512xbf16>
    %c0_4 = arith.constant 0 : index
    %c0_5 = arith.constant 0 : index
    %5 = vector.load %arg4[%c0_4, %c0_5] : memref<512x512xbf16, #tpu.memory_space<vmem>>, vector<512x512xbf16>
    %cst = arith.constant dense<0.000000e+00> : vector<16x512xf32>
    %6 = tpu.matmul %4, %5, %cst {dimension_numbers = #tpu.dot_dimension_numbers<[1], [0], [0], [1], [0, 0, 1, 1], [], []>} : vector<16x512xbf16>, vector<512x512xbf16>, vector<16x512xf32> -> vector<16x512xf32>
    %7 = arith.addf %3, %6 : vector<16x512xf32>
    %c0_6 = arith.constant 0 : index
    %c0_7 = arith.constant 0 : index
    %8 = vector.load %arg7[%c0_6, %c0_7] : memref<16x512xf32, #tpu.memory_space<vmem>>, vector<16x512xf32>
    tpu.vector_store %arg7[%c0_6, %c0_7], %7 {strides = array<i32>} : memref<16x512xf32, #tpu.memory_space<vmem>>, vector<16x512xf32>,
    %c0_i32_8 = arith.constant 0 : i32
    %9 = arith.cmpi eq, %arg2, %c0_i32_8 : i32
    %10 = arith.extui %9 : i1 to i32
    %c0_i32_9 = arith.constant 0 : i32
    %11 = arith.cmpi ne, %10, %c0_i32_9 : i32
    scf.if %11 {
      %c0_10 = arith.constant 0 : index
      %c0_11 = arith.constant 0 : index
      %12 = vector.load %arg7[%c0_10, %c0_11] : memref<16x512xf32, #tpu.memory_space<vmem>>, vector<16x512xf32>
      %c0_12 = arith.constant 0 : index
      %c0_13 = arith.constant 0 : index
      %13 = vector.load %arg5[%c0_12, %c0_13] : memref<1x512xf32, #tpu.memory_space<vmem>>, vector<1x512xf32>
      %14 = vector.broadcast %13 : vector<1x512xf32> to vector<16x512xf32>
      %15 = arith.addf %12, %14 : vector<16x512xf32>
      %c0_14 = arith.constant 0 : index
      %c0_15 = arith.constant 0 : index
      %16 = vector.load %arg6[%c0_14, %c0_15] : memref<16x512xf32, #tpu.memory_space<vmem>>, vector<16x512xf32>
      tpu.vector_store %arg6[%c0_14, %c0_15], %15 {strides = array<i32>} : memref<16x512xf32, #tpu.memory_space<vmem>>, vector<16x512xf32>,
    } else {
    }
    return
  }
  func.func @transform_0(%arg0: i32, %arg1: i32, %arg2: i32) -> (i32, i32) {
    %c0_i32 = arith.constant 0 : i32
    return %arg0, %arg2 : i32, i32
  }
  func.func @transform_1(%arg0: i32, %arg1: i32, %arg2: i32) -> (i32, i32) {
    %c0_i32 = arith.constant 0 : i32
    return %arg2, %arg1 : i32, i32
  }
  func.func @transform_2(%arg0: i32, %arg1: i32, %arg2: i32) -> (i32, i32) {
    %c0_i32 = arith.constant 0 : i32
    %c0_i32_0 = arith.constant 0 : i32
    return %c0_i32, %arg1 : i32, i32
  }
  func.func @transform_3(%arg0: i32, %arg1: i32, %arg2: i32) -> (i32, i32) {
    %c0_i32 = arith.constant 0 : i32
    return %arg0, %arg1 : i32, i32
  }
}

module attributes {stable_mosaic.version = 11 : i64} {
  func.func @lstm_seq_kernel(%arg0: i32, %arg1: memref<8x2x512xf32, #tpu.memory_space<vmem>>, %arg2: memref<128x512xbf16, #tpu.memory_space<vmem>>, %arg3: memref<2x128xf32, #tpu.memory_space<vmem>>) attributes {dimension_semantics = [#tpu.dimension_semantics<arbitrary>], iteration_bounds = array<i64: 1>, scalar_prefetch = 0 : i64, scratch_operands = 0 : i64, tpu.core_type = #tpu.core_type<tc>, window_params = [{pipeline_mode = #tpu.pipeline_mode<synchronous>, transform_indices = @transform_0, window_bounds = array<i64: 8, 2, 512>}, {pipeline_mode = #tpu.pipeline_mode<synchronous>, transform_indices = @transform_1, window_bounds = array<i64: 128, 512>}, {pipeline_mode = #tpu.pipeline_mode<synchronous>, transform_indices = @transform_2, window_bounds = array<i64: 2, 128>}]} {
    %c0 = arith.constant 0 : index
    %c0_0 = arith.constant 0 : index
    %0 = vector.load %arg2[%c0, %c0_0] : memref<128x512xbf16, #tpu.memory_space<vmem>>, vector<128x512xbf16>
    %cst = arith.constant 0.000000e+00 : f32
    %1 = vector.broadcast %cst : f32 to vector<2x128xf32>
    %cst_1 = arith.constant 0.000000e+00 : f32
    %2 = vector.broadcast %cst_1 : f32 to vector<2x128xf32>
    %c0_i32 = arith.constant 0 : i32
    %3 = arith.index_cast %c0_i32 : i32 to index
    %c0_2 = arith.constant 0 : index
    %c0_3 = arith.constant 0 : index
    %4 = vector.load %arg1[%3, %c0_2, %c0_3] : memref<8x2x512xf32, #tpu.memory_space<vmem>>, vector<1x2x512xf32>
    %5 = vector.shape_cast %4 : vector<1x2x512xf32> to vector<2x512xf32>
    %6 = arith.truncf %1 : vector<2x128xf32> to vector<2x128xbf16>
    %cst_4 = arith.constant dense<0.000000e+00> : vector<2x512xf32>
    %7 = tpu.matmul %6, %0, %cst_4 {dimension_numbers = #tpu.dot_dimension_numbers<[1], [0], [0], [1], [0, 0, 1, 1], [], []>} : vector<2x128xbf16>, vector<128x512xbf16>, vector<2x512xf32> -> vector<2x512xf32>
    %8 = arith.addf %5, %7 : vector<2x512xf32>
    %9 = vector.extract_strided_slice %8 {offsets = [0, 0], sizes = [2, 128], strides = [1, 1]} : vector<2x512xf32> to vector<2x128xf32>
    %10 = arith.negf %9 : vector<2x128xf32>
    %11 = math.exp %10 : vector<2x128xf32>
    %cst_5 = arith.constant 1.000000e+00 : f32
    %12 = vector.broadcast %cst_5 : f32 to vector<2x128xf32>
    %13 = arith.addf %12, %11 : vector<2x128xf32>
    %14 = arith.divf %12, %13 : vector<2x128xf32>
    %15 = vector.extract_strided_slice %8 {offsets = [0, 128], sizes = [2, 128], strides = [1, 1]} : vector<2x512xf32> to vector<2x128xf32>
    %16 = arith.negf %15 : vector<2x128xf32>
    %17 = math.exp %16 : vector<2x128xf32>
    %cst_6 = arith.constant 1.000000e+00 : f32
    %18 = vector.broadcast %cst_6 : f32 to vector<2x128xf32>
    %19 = arith.addf %18, %17 : vector<2x128xf32>
    %20 = arith.divf %18, %19 : vector<2x128xf32>
    %21 = vector.extract_strided_slice %8 {offsets = [0, 256], sizes = [2, 128], strides = [1, 1]} : vector<2x512xf32> to vector<2x128xf32>
    %22 = math.tanh %21 : vector<2x128xf32>
    %23 = vector.extract_strided_slice %8 {offsets = [0, 384], sizes = [2, 128], strides = [1, 1]} : vector<2x512xf32> to vector<2x128xf32>
    %24 = arith.negf %23 : vector<2x128xf32>
    %25 = math.exp %24 : vector<2x128xf32>
    %cst_7 = arith.constant 1.000000e+00 : f32
    %26 = vector.broadcast %cst_7 : f32 to vector<2x128xf32>
    %27 = arith.addf %26, %25 : vector<2x128xf32>
    %28 = arith.divf %26, %27 : vector<2x128xf32>
    %29 = arith.mulf %20, %2 : vector<2x128xf32>
    %30 = arith.mulf %14, %22 : vector<2x128xf32>
    %31 = arith.addf %29, %30 : vector<2x128xf32>
    %32 = math.tanh %31 : vector<2x128xf32>
    %33 = arith.mulf %28, %32 : vector<2x128xf32>
    %c1_i32 = arith.constant 1 : i32
    %34 = arith.index_cast %c1_i32 : i32 to index
    %c0_8 = arith.constant 0 : index
    %c0_9 = arith.constant 0 : index
    %35 = vector.load %arg1[%34, %c0_8, %c0_9] : memref<8x2x512xf32, #tpu.memory_space<vmem>>, vector<1x2x512xf32>
    %36 = vector.shape_cast %35 : vector<1x2x512xf32> to vector<2x512xf32>
    %37 = arith.truncf %33 : vector<2x128xf32> to vector<2x128xbf16>
    %cst_10 = arith.constant dense<0.000000e+00> : vector<2x512xf32>
    %38 = tpu.matmul %37, %0, %cst_10 {dimension_numbers = #tpu.dot_dimension_numbers<[1], [0], [0], [1], [0, 0, 1, 1], [], []>} : vector<2x128xbf16>, vector<128x512xbf16>, vector<2x512xf32> -> vector<2x512xf32>
    %39 = arith.addf %36, %38 : vector<2x512xf32>
    %40 = vector.extract_strided_slice %39 {offsets = [0, 0], sizes = [2, 128], strides = [1, 1]} : vector<2x512xf32> to vector<2x128xf32>
    %41 = arith.negf %40 : vector<2x128xf32>
    %42 = math.exp %41 : vector<2x128xf32>
    %cst_11 = arith.constant 1.000000e+00 : f32
    %43 = vector.broadcast %cst_11 : f32 to vector<2x128xf32>
    %44 = arith.addf %43, %42 : vector<2x128xf32>
    %45 = arith.divf %43, %44 : vector<2x128xf32>
    %46 = vector.extract_strided_slice %39 {offsets = [0, 128], sizes = [2, 128], strides = [1, 1]} : vector<2x512xf32> to vector<2x128xf32>
    %47 = arith.negf %46 : vector<2x128xf32>
    %48 = math.exp %47 : vector<2x128xf32>
    %cst_12 = arith.constant 1.000000e+00 : f32
    %49 = vector.broadcast %cst_12 : f32 to vector<2x128xf32>
    %50 = arith.addf %49, %48 : vector<2x128xf32>
    %51 = arith.divf %49, %50 : vector<2x128xf32>
    %52 = vector.extract_strided_slice %39 {offsets = [0, 256], sizes = [2, 128], strides = [1, 1]} : vector<2x512xf32> to vector<2x128xf32>
    %53 = math.tanh %52 : vector<2x128xf32>
    %54 = vector.extract_strided_slice %39 {offsets = [0, 384], sizes = [2, 128], strides = [1, 1]} : vector<2x512xf32> to vector<2x128xf32>
    %55 = arith.negf %54 : vector<2x128xf32>
    %56 = math.exp %55 : vector<2x128xf32>
    %cst_13 = arith.constant 1.000000e+00 : f32
    %57 = vector.broadcast %cst_13 : f32 to vector<2x128xf32>
    %58 = arith.addf %57, %56 : vector<2x128xf32>
    %59 = arith.divf %57, %58 : vector<2x128xf32>
    %60 = arith.mulf %51, %31 : vector<2x128xf32>
    %61 = arith.mulf %45, %53 : vector<2x128xf32>
    %62 = arith.addf %60, %61 : vector<2x128xf32>
    %63 = math.tanh %62 : vector<2x128xf32>
    %64 = arith.mulf %59, %63 : vector<2x128xf32>
    %c2_i32 = arith.constant 2 : i32
    %65 = arith.index_cast %c2_i32 : i32 to index
    %c0_14 = arith.constant 0 : index
    %c0_15 = arith.constant 0 : index
    %66 = vector.load %arg1[%65, %c0_14, %c0_15] : memref<8x2x512xf32, #tpu.memory_space<vmem>>, vector<1x2x512xf32>
    %67 = vector.shape_cast %66 : vector<1x2x512xf32> to vector<2x512xf32>
    %68 = arith.truncf %64 : vector<2x128xf32> to vector<2x128xbf16>
    %cst_16 = arith.constant dense<0.000000e+00> : vector<2x512xf32>
    %69 = tpu.matmul %68, %0, %cst_16 {dimension_numbers = #tpu.dot_dimension_numbers<[1], [0], [0], [1], [0, 0, 1, 1], [], []>} : vector<2x128xbf16>, vector<128x512xbf16>, vector<2x512xf32> -> vector<2x512xf32>
    %70 = arith.addf %67, %69 : vector<2x512xf32>
    %71 = vector.extract_strided_slice %70 {offsets = [0, 0], sizes = [2, 128], strides = [1, 1]} : vector<2x512xf32> to vector<2x128xf32>
    %72 = arith.negf %71 : vector<2x128xf32>
    %73 = math.exp %72 : vector<2x128xf32>
    %cst_17 = arith.constant 1.000000e+00 : f32
    %74 = vector.broadcast %cst_17 : f32 to vector<2x128xf32>
    %75 = arith.addf %74, %73 : vector<2x128xf32>
    %76 = arith.divf %74, %75 : vector<2x128xf32>
    %77 = vector.extract_strided_slice %70 {offsets = [0, 128], sizes = [2, 128], strides = [1, 1]} : vector<2x512xf32> to vector<2x128xf32>
    %78 = arith.negf %77 : vector<2x128xf32>
    %79 = math.exp %78 : vector<2x128xf32>
    %cst_18 = arith.constant 1.000000e+00 : f32
    %80 = vector.broadcast %cst_18 : f32 to vector<2x128xf32>
    %81 = arith.addf %80, %79 : vector<2x128xf32>
    %82 = arith.divf %80, %81 : vector<2x128xf32>
    %83 = vector.extract_strided_slice %70 {offsets = [0, 256], sizes = [2, 128], strides = [1, 1]} : vector<2x512xf32> to vector<2x128xf32>
    %84 = math.tanh %83 : vector<2x128xf32>
    %85 = vector.extract_strided_slice %70 {offsets = [0, 384], sizes = [2, 128], strides = [1, 1]} : vector<2x512xf32> to vector<2x128xf32>
    %86 = arith.negf %85 : vector<2x128xf32>
    %87 = math.exp %86 : vector<2x128xf32>
    %cst_19 = arith.constant 1.000000e+00 : f32
    %88 = vector.broadcast %cst_19 : f32 to vector<2x128xf32>
    %89 = arith.addf %88, %87 : vector<2x128xf32>
    %90 = arith.divf %88, %89 : vector<2x128xf32>
    %91 = arith.mulf %82, %62 : vector<2x128xf32>
    %92 = arith.mulf %76, %84 : vector<2x128xf32>
    %93 = arith.addf %91, %92 : vector<2x128xf32>
    %94 = math.tanh %93 : vector<2x128xf32>
    %95 = arith.mulf %90, %94 : vector<2x128xf32>
    %c3_i32 = arith.constant 3 : i32
    %96 = arith.index_cast %c3_i32 : i32 to index
    %c0_20 = arith.constant 0 : index
    %c0_21 = arith.constant 0 : index
    %97 = vector.load %arg1[%96, %c0_20, %c0_21] : memref<8x2x512xf32, #tpu.memory_space<vmem>>, vector<1x2x512xf32>
    %98 = vector.shape_cast %97 : vector<1x2x512xf32> to vector<2x512xf32>
    %99 = arith.truncf %95 : vector<2x128xf32> to vector<2x128xbf16>
    %cst_22 = arith.constant dense<0.000000e+00> : vector<2x512xf32>
    %100 = tpu.matmul %99, %0, %cst_22 {dimension_numbers = #tpu.dot_dimension_numbers<[1], [0], [0], [1], [0, 0, 1, 1], [], []>} : vector<2x128xbf16>, vector<128x512xbf16>, vector<2x512xf32> -> vector<2x512xf32>
    %101 = arith.addf %98, %100 : vector<2x512xf32>
    %102 = vector.extract_strided_slice %101 {offsets = [0, 0], sizes = [2, 128], strides = [1, 1]} : vector<2x512xf32> to vector<2x128xf32>
    %103 = arith.negf %102 : vector<2x128xf32>
    %104 = math.exp %103 : vector<2x128xf32>
    %cst_23 = arith.constant 1.000000e+00 : f32
    %105 = vector.broadcast %cst_23 : f32 to vector<2x128xf32>
    %106 = arith.addf %105, %104 : vector<2x128xf32>
    %107 = arith.divf %105, %106 : vector<2x128xf32>
    %108 = vector.extract_strided_slice %101 {offsets = [0, 128], sizes = [2, 128], strides = [1, 1]} : vector<2x512xf32> to vector<2x128xf32>
    %109 = arith.negf %108 : vector<2x128xf32>
    %110 = math.exp %109 : vector<2x128xf32>
    %cst_24 = arith.constant 1.000000e+00 : f32
    %111 = vector.broadcast %cst_24 : f32 to vector<2x128xf32>
    %112 = arith.addf %111, %110 : vector<2x128xf32>
    %113 = arith.divf %111, %112 : vector<2x128xf32>
    %114 = vector.extract_strided_slice %101 {offsets = [0, 256], sizes = [2, 128], strides = [1, 1]} : vector<2x512xf32> to vector<2x128xf32>
    %115 = math.tanh %114 : vector<2x128xf32>
    %116 = vector.extract_strided_slice %101 {offsets = [0, 384], sizes = [2, 128], strides = [1, 1]} : vector<2x512xf32> to vector<2x128xf32>
    %117 = arith.negf %116 : vector<2x128xf32>
    %118 = math.exp %117 : vector<2x128xf32>
    %cst_25 = arith.constant 1.000000e+00 : f32
    %119 = vector.broadcast %cst_25 : f32 to vector<2x128xf32>
    %120 = arith.addf %119, %118 : vector<2x128xf32>
    %121 = arith.divf %119, %120 : vector<2x128xf32>
    %122 = arith.mulf %113, %93 : vector<2x128xf32>
    %123 = arith.mulf %107, %115 : vector<2x128xf32>
    %124 = arith.addf %122, %123 : vector<2x128xf32>
    %125 = math.tanh %124 : vector<2x128xf32>
    %126 = arith.mulf %121, %125 : vector<2x128xf32>
    %c4_i32 = arith.constant 4 : i32
    %127 = arith.index_cast %c4_i32 : i32 to index
    %c0_26 = arith.constant 0 : index
    %c0_27 = arith.constant 0 : index
    %128 = vector.load %arg1[%127, %c0_26, %c0_27] : memref<8x2x512xf32, #tpu.memory_space<vmem>>, vector<1x2x512xf32>
    %129 = vector.shape_cast %128 : vector<1x2x512xf32> to vector<2x512xf32>
    %130 = arith.truncf %126 : vector<2x128xf32> to vector<2x128xbf16>
    %cst_28 = arith.constant dense<0.000000e+00> : vector<2x512xf32>
    %131 = tpu.matmul %130, %0, %cst_28 {dimension_numbers = #tpu.dot_dimension_numbers<[1], [0], [0], [1], [0, 0, 1, 1], [], []>} : vector<2x128xbf16>, vector<128x512xbf16>, vector<2x512xf32> -> vector<2x512xf32>
    %132 = arith.addf %129, %131 : vector<2x512xf32>
    %133 = vector.extract_strided_slice %132 {offsets = [0, 0], sizes = [2, 128], strides = [1, 1]} : vector<2x512xf32> to vector<2x128xf32>
    %134 = arith.negf %133 : vector<2x128xf32>
    %135 = math.exp %134 : vector<2x128xf32>
    %cst_29 = arith.constant 1.000000e+00 : f32
    %136 = vector.broadcast %cst_29 : f32 to vector<2x128xf32>
    %137 = arith.addf %136, %135 : vector<2x128xf32>
    %138 = arith.divf %136, %137 : vector<2x128xf32>
    %139 = vector.extract_strided_slice %132 {offsets = [0, 128], sizes = [2, 128], strides = [1, 1]} : vector<2x512xf32> to vector<2x128xf32>
    %140 = arith.negf %139 : vector<2x128xf32>
    %141 = math.exp %140 : vector<2x128xf32>
    %cst_30 = arith.constant 1.000000e+00 : f32
    %142 = vector.broadcast %cst_30 : f32 to vector<2x128xf32>
    %143 = arith.addf %142, %141 : vector<2x128xf32>
    %144 = arith.divf %142, %143 : vector<2x128xf32>
    %145 = vector.extract_strided_slice %132 {offsets = [0, 256], sizes = [2, 128], strides = [1, 1]} : vector<2x512xf32> to vector<2x128xf32>
    %146 = math.tanh %145 : vector<2x128xf32>
    %147 = vector.extract_strided_slice %132 {offsets = [0, 384], sizes = [2, 128], strides = [1, 1]} : vector<2x512xf32> to vector<2x128xf32>
    %148 = arith.negf %147 : vector<2x128xf32>
    %149 = math.exp %148 : vector<2x128xf32>
    %cst_31 = arith.constant 1.000000e+00 : f32
    %150 = vector.broadcast %cst_31 : f32 to vector<2x128xf32>
    %151 = arith.addf %150, %149 : vector<2x128xf32>
    %152 = arith.divf %150, %151 : vector<2x128xf32>
    %153 = arith.mulf %144, %124 : vector<2x128xf32>
    %154 = arith.mulf %138, %146 : vector<2x128xf32>
    %155 = arith.addf %153, %154 : vector<2x128xf32>
    %156 = math.tanh %155 : vector<2x128xf32>
    %157 = arith.mulf %152, %156 : vector<2x128xf32>
    %c5_i32 = arith.constant 5 : i32
    %158 = arith.index_cast %c5_i32 : i32 to index
    %c0_32 = arith.constant 0 : index
    %c0_33 = arith.constant 0 : index
    %159 = vector.load %arg1[%158, %c0_32, %c0_33] : memref<8x2x512xf32, #tpu.memory_space<vmem>>, vector<1x2x512xf32>
    %160 = vector.shape_cast %159 : vector<1x2x512xf32> to vector<2x512xf32>
    %161 = arith.truncf %157 : vector<2x128xf32> to vector<2x128xbf16>
    %cst_34 = arith.constant dense<0.000000e+00> : vector<2x512xf32>
    %162 = tpu.matmul %161, %0, %cst_34 {dimension_numbers = #tpu.dot_dimension_numbers<[1], [0], [0], [1], [0, 0, 1, 1], [], []>} : vector<2x128xbf16>, vector<128x512xbf16>, vector<2x512xf32> -> vector<2x512xf32>
    %163 = arith.addf %160, %162 : vector<2x512xf32>
    %164 = vector.extract_strided_slice %163 {offsets = [0, 0], sizes = [2, 128], strides = [1, 1]} : vector<2x512xf32> to vector<2x128xf32>
    %165 = arith.negf %164 : vector<2x128xf32>
    %166 = math.exp %165 : vector<2x128xf32>
    %cst_35 = arith.constant 1.000000e+00 : f32
    %167 = vector.broadcast %cst_35 : f32 to vector<2x128xf32>
    %168 = arith.addf %167, %166 : vector<2x128xf32>
    %169 = arith.divf %167, %168 : vector<2x128xf32>
    %170 = vector.extract_strided_slice %163 {offsets = [0, 128], sizes = [2, 128], strides = [1, 1]} : vector<2x512xf32> to vector<2x128xf32>
    %171 = arith.negf %170 : vector<2x128xf32>
    %172 = math.exp %171 : vector<2x128xf32>
    %cst_36 = arith.constant 1.000000e+00 : f32
    %173 = vector.broadcast %cst_36 : f32 to vector<2x128xf32>
    %174 = arith.addf %173, %172 : vector<2x128xf32>
    %175 = arith.divf %173, %174 : vector<2x128xf32>
    %176 = vector.extract_strided_slice %163 {offsets = [0, 256], sizes = [2, 128], strides = [1, 1]} : vector<2x512xf32> to vector<2x128xf32>
    %177 = math.tanh %176 : vector<2x128xf32>
    %178 = vector.extract_strided_slice %163 {offsets = [0, 384], sizes = [2, 128], strides = [1, 1]} : vector<2x512xf32> to vector<2x128xf32>
    %179 = arith.negf %178 : vector<2x128xf32>
    %180 = math.exp %179 : vector<2x128xf32>
    %cst_37 = arith.constant 1.000000e+00 : f32
    %181 = vector.broadcast %cst_37 : f32 to vector<2x128xf32>
    %182 = arith.addf %181, %180 : vector<2x128xf32>
    %183 = arith.divf %181, %182 : vector<2x128xf32>
    %184 = arith.mulf %175, %155 : vector<2x128xf32>
    %185 = arith.mulf %169, %177 : vector<2x128xf32>
    %186 = arith.addf %184, %185 : vector<2x128xf32>
    %187 = math.tanh %186 : vector<2x128xf32>
    %188 = arith.mulf %183, %187 : vector<2x128xf32>
    %c6_i32 = arith.constant 6 : i32
    %189 = arith.index_cast %c6_i32 : i32 to index
    %c0_38 = arith.constant 0 : index
    %c0_39 = arith.constant 0 : index
    %190 = vector.load %arg1[%189, %c0_38, %c0_39] : memref<8x2x512xf32, #tpu.memory_space<vmem>>, vector<1x2x512xf32>
    %191 = vector.shape_cast %190 : vector<1x2x512xf32> to vector<2x512xf32>
    %192 = arith.truncf %188 : vector<2x128xf32> to vector<2x128xbf16>
    %cst_40 = arith.constant dense<0.000000e+00> : vector<2x512xf32>
    %193 = tpu.matmul %192, %0, %cst_40 {dimension_numbers = #tpu.dot_dimension_numbers<[1], [0], [0], [1], [0, 0, 1, 1], [], []>} : vector<2x128xbf16>, vector<128x512xbf16>, vector<2x512xf32> -> vector<2x512xf32>
    %194 = arith.addf %191, %193 : vector<2x512xf32>
    %195 = vector.extract_strided_slice %194 {offsets = [0, 0], sizes = [2, 128], strides = [1, 1]} : vector<2x512xf32> to vector<2x128xf32>
    %196 = arith.negf %195 : vector<2x128xf32>
    %197 = math.exp %196 : vector<2x128xf32>
    %cst_41 = arith.constant 1.000000e+00 : f32
    %198 = vector.broadcast %cst_41 : f32 to vector<2x128xf32>
    %199 = arith.addf %198, %197 : vector<2x128xf32>
    %200 = arith.divf %198, %199 : vector<2x128xf32>
    %201 = vector.extract_strided_slice %194 {offsets = [0, 128], sizes = [2, 128], strides = [1, 1]} : vector<2x512xf32> to vector<2x128xf32>
    %202 = arith.negf %201 : vector<2x128xf32>
    %203 = math.exp %202 : vector<2x128xf32>
    %cst_42 = arith.constant 1.000000e+00 : f32
    %204 = vector.broadcast %cst_42 : f32 to vector<2x128xf32>
    %205 = arith.addf %204, %203 : vector<2x128xf32>
    %206 = arith.divf %204, %205 : vector<2x128xf32>
    %207 = vector.extract_strided_slice %194 {offsets = [0, 256], sizes = [2, 128], strides = [1, 1]} : vector<2x512xf32> to vector<2x128xf32>
    %208 = math.tanh %207 : vector<2x128xf32>
    %209 = vector.extract_strided_slice %194 {offsets = [0, 384], sizes = [2, 128], strides = [1, 1]} : vector<2x512xf32> to vector<2x128xf32>
    %210 = arith.negf %209 : vector<2x128xf32>
    %211 = math.exp %210 : vector<2x128xf32>
    %cst_43 = arith.constant 1.000000e+00 : f32
    %212 = vector.broadcast %cst_43 : f32 to vector<2x128xf32>
    %213 = arith.addf %212, %211 : vector<2x128xf32>
    %214 = arith.divf %212, %213 : vector<2x128xf32>
    %215 = arith.mulf %206, %186 : vector<2x128xf32>
    %216 = arith.mulf %200, %208 : vector<2x128xf32>
    %217 = arith.addf %215, %216 : vector<2x128xf32>
    %218 = math.tanh %217 : vector<2x128xf32>
    %219 = arith.mulf %214, %218 : vector<2x128xf32>
    %c7_i32 = arith.constant 7 : i32
    %220 = arith.index_cast %c7_i32 : i32 to index
    %c0_44 = arith.constant 0 : index
    %c0_45 = arith.constant 0 : index
    %221 = vector.load %arg1[%220, %c0_44, %c0_45] : memref<8x2x512xf32, #tpu.memory_space<vmem>>, vector<1x2x512xf32>
    %222 = vector.shape_cast %221 : vector<1x2x512xf32> to vector<2x512xf32>
    %223 = arith.truncf %219 : vector<2x128xf32> to vector<2x128xbf16>
    %cst_46 = arith.constant dense<0.000000e+00> : vector<2x512xf32>
    %224 = tpu.matmul %223, %0, %cst_46 {dimension_numbers = #tpu.dot_dimension_numbers<[1], [0], [0], [1], [0, 0, 1, 1], [], []>} : vector<2x128xbf16>, vector<128x512xbf16>, vector<2x512xf32> -> vector<2x512xf32>
    %225 = arith.addf %222, %224 : vector<2x512xf32>
    %226 = vector.extract_strided_slice %225 {offsets = [0, 0], sizes = [2, 128], strides = [1, 1]} : vector<2x512xf32> to vector<2x128xf32>
    %227 = arith.negf %226 : vector<2x128xf32>
    %228 = math.exp %227 : vector<2x128xf32>
    %cst_47 = arith.constant 1.000000e+00 : f32
    %229 = vector.broadcast %cst_47 : f32 to vector<2x128xf32>
    %230 = arith.addf %229, %228 : vector<2x128xf32>
    %231 = arith.divf %229, %230 : vector<2x128xf32>
    %232 = vector.extract_strided_slice %225 {offsets = [0, 128], sizes = [2, 128], strides = [1, 1]} : vector<2x512xf32> to vector<2x128xf32>
    %233 = arith.negf %232 : vector<2x128xf32>
    %234 = math.exp %233 : vector<2x128xf32>
    %cst_48 = arith.constant 1.000000e+00 : f32
    %235 = vector.broadcast %cst_48 : f32 to vector<2x128xf32>
    %236 = arith.addf %235, %234 : vector<2x128xf32>
    %237 = arith.divf %235, %236 : vector<2x128xf32>
    %238 = vector.extract_strided_slice %225 {offsets = [0, 256], sizes = [2, 128], strides = [1, 1]} : vector<2x512xf32> to vector<2x128xf32>
    %239 = math.tanh %238 : vector<2x128xf32>
    %240 = vector.extract_strided_slice %225 {offsets = [0, 384], sizes = [2, 128], strides = [1, 1]} : vector<2x512xf32> to vector<2x128xf32>
    %241 = arith.negf %240 : vector<2x128xf32>
    %242 = math.exp %241 : vector<2x128xf32>
    %cst_49 = arith.constant 1.000000e+00 : f32
    %243 = vector.broadcast %cst_49 : f32 to vector<2x128xf32>
    %244 = arith.addf %243, %242 : vector<2x128xf32>
    %245 = arith.divf %243, %244 : vector<2x128xf32>
    %246 = arith.mulf %237, %217 : vector<2x128xf32>
    %247 = arith.mulf %231, %239 : vector<2x128xf32>
    %248 = arith.addf %246, %247 : vector<2x128xf32>
    %249 = math.tanh %248 : vector<2x128xf32>
    %250 = arith.mulf %245, %249 : vector<2x128xf32>
    %c8_i32 = arith.constant 8 : i32
    %c0_50 = arith.constant 0 : index
    %c0_51 = arith.constant 0 : index
    %251 = vector.load %arg3[%c0_50, %c0_51] : memref<2x128xf32, #tpu.memory_space<vmem>>, vector<2x128xf32>
    tpu.vector_store %arg3[%c0_50, %c0_51], %250 {strides = array<i32>} : memref<2x128xf32, #tpu.memory_space<vmem>>, vector<2x128xf32>,
    return
  }
  func.func @transform_0(%arg0: i32) -> (i32, i32, i32) {
    %c0_i32 = arith.constant 0 : i32
    %c0_i32_0 = arith.constant 0 : i32
    %c0_i32_1 = arith.constant 0 : i32
    %c0_i32_2 = arith.constant 0 : i32
    return %c0_i32, %c0_i32_0, %c0_i32_1 : i32, i32, i32
  }
  func.func @transform_1(%arg0: i32) -> (i32, i32) {
    %c0_i32 = arith.constant 0 : i32
    %c0_i32_0 = arith.constant 0 : i32
    %c0_i32_1 = arith.constant 0 : i32
    return %c0_i32, %c0_i32_0 : i32, i32
  }
  func.func @transform_2(%arg0: i32) -> (i32, i32) {
    %c0_i32 = arith.constant 0 : i32
    %c0_i32_0 = arith.constant 0 : i32
    %c0_i32_1 = arith.constant 0 : i32
    return %c0_i32, %c0_i32_0 : i32, i32
  }
}

module attributes {stable_mosaic.version = 11 : i64} {
  func.func @bwd_proj_cell_fc_kernel(%arg0: i32, %arg1: memref<2x128xf32, #tpu.memory_space<vmem>>, %arg2: memref<2x512xbf16, #tpu.memory_space<vmem>>, %arg3: memref<512x512xbf16, #tpu.memory_space<vmem>>, %arg4: memref<1x512xf32, #tpu.memory_space<vmem>>, %arg5: memref<256x64xbf16, #tpu.memory_space<vmem>>, %arg6: memref<1x64xf32, #tpu.memory_space<vmem>>, %arg7: memref<64x2xbf16, #tpu.memory_space<vmem>>, %arg8: memref<1x2xf32, #tpu.memory_space<vmem>>, %arg9: memref<2x2xf32, #tpu.memory_space<vmem>>) attributes {dimension_semantics = [#tpu.dimension_semantics<arbitrary>], iteration_bounds = array<i64: 1>, scalar_prefetch = 0 : i64, scratch_operands = 0 : i64, tpu.core_type = #tpu.core_type<tc>, window_params = [{pipeline_mode = #tpu.pipeline_mode<synchronous>, transform_indices = @transform_0, window_bounds = array<i64: 2, 128>}, {pipeline_mode = #tpu.pipeline_mode<synchronous>, transform_indices = @transform_1, window_bounds = array<i64: 2, 512>}, {pipeline_mode = #tpu.pipeline_mode<synchronous>, transform_indices = @transform_2, window_bounds = array<i64: 512, 512>}, {pipeline_mode = #tpu.pipeline_mode<synchronous>, transform_indices = @transform_3, window_bounds = array<i64: 1, 512>}, {pipeline_mode = #tpu.pipeline_mode<synchronous>, transform_indices = @transform_4, window_bounds = array<i64: 256, 64>}, {pipeline_mode = #tpu.pipeline_mode<synchronous>, transform_indices = @transform_5, window_bounds = array<i64: 1, 64>}, {pipeline_mode = #tpu.pipeline_mode<synchronous>, transform_indices = @transform_6, window_bounds = array<i64: 64, 2>}, {pipeline_mode = #tpu.pipeline_mode<synchronous>, transform_indices = @transform_7, window_bounds = array<i64: 1, 2>}, {pipeline_mode = #tpu.pipeline_mode<synchronous>, transform_indices = @transform_8, window_bounds = array<i64: 2, 2>}]} {
    %c0 = arith.constant 0 : index
    %c0_0 = arith.constant 0 : index
    %0 = vector.load %arg2[%c0, %c0_0] : memref<2x512xbf16, #tpu.memory_space<vmem>>, vector<2x512xbf16>
    %c0_1 = arith.constant 0 : index
    %c0_2 = arith.constant 0 : index
    %1 = vector.load %arg3[%c0_1, %c0_2] : memref<512x512xbf16, #tpu.memory_space<vmem>>, vector<512x512xbf16>
    %cst = arith.constant dense<0.000000e+00> : vector<2x512xf32>
    %2 = tpu.matmul %0, %1, %cst {dimension_numbers = #tpu.dot_dimension_numbers<[1], [0], [0], [1], [0, 0, 1, 1], [], []>} : vector<2x512xbf16>, vector<512x512xbf16>, vector<2x512xf32> -> vector<2x512xf32>
    %c0_3 = arith.constant 0 : index
    %c0_4 = arith.constant 0 : index
    %3 = vector.load %arg4[%c0_3, %c0_4] : memref<1x512xf32, #tpu.memory_space<vmem>>, vector<1x512xf32>
    %4 = vector.broadcast %3 : vector<1x512xf32> to vector<2x512xf32>
    %5 = arith.addf %2, %4 : vector<2x512xf32>
    %6 = vector.extract_strided_slice %5 {offsets = [0, 0], sizes = [2, 128], strides = [1, 1]} : vector<2x512xf32> to vector<2x128xf32>
    %7 = arith.negf %6 : vector<2x128xf32>
    %8 = math.exp %7 : vector<2x128xf32>
    %cst_5 = arith.constant 1.000000e+00 : f32
    %9 = vector.broadcast %cst_5 : f32 to vector<2x128xf32>
    %10 = arith.addf %9, %8 : vector<2x128xf32>
    %11 = arith.divf %9, %10 : vector<2x128xf32>
    %12 = vector.extract_strided_slice %5 {offsets = [0, 256], sizes = [2, 128], strides = [1, 1]} : vector<2x512xf32> to vector<2x128xf32>
    %13 = math.tanh %12 : vector<2x128xf32>
    %14 = vector.extract_strided_slice %5 {offsets = [0, 384], sizes = [2, 128], strides = [1, 1]} : vector<2x512xf32> to vector<2x128xf32>
    %15 = arith.negf %14 : vector<2x128xf32>
    %16 = math.exp %15 : vector<2x128xf32>
    %cst_6 = arith.constant 1.000000e+00 : f32
    %17 = vector.broadcast %cst_6 : f32 to vector<2x128xf32>
    %18 = arith.addf %17, %16 : vector<2x128xf32>
    %19 = arith.divf %17, %18 : vector<2x128xf32>
    %20 = arith.mulf %11, %13 : vector<2x128xf32>
    %21 = math.tanh %20 : vector<2x128xf32>
    %22 = arith.mulf %19, %21 : vector<2x128xf32>
    %c0_7 = arith.constant 0 : index
    %c0_8 = arith.constant 0 : index
    %23 = vector.load %arg1[%c0_7, %c0_8] : memref<2x128xf32, #tpu.memory_space<vmem>>, vector<2x128xf32>
    %24 = tpu.concatenate %23, %22 in 1 : vector<2x128xf32>, vector<2x128xf32> -> vector<2x256xf32>
    %25 = arith.truncf %24 : vector<2x256xf32> to vector<2x256xbf16>
    %c0_9 = arith.constant 0 : index
    %c0_10 = arith.constant 0 : index
    %26 = vector.load %arg5[%c0_9, %c0_10] : memref<256x64xbf16, #tpu.memory_space<vmem>>, vector<256x64xbf16>
    %cst_11 = arith.constant dense<0.000000e+00> : vector<2x64xf32>
    %27 = tpu.matmul %25, %26, %cst_11 {dimension_numbers = #tpu.dot_dimension_numbers<[1], [0], [0], [1], [0, 0, 1, 1], [], []>} : vector<2x256xbf16>, vector<256x64xbf16>, vector<2x64xf32> -> vector<2x64xf32>
    %c0_12 = arith.constant 0 : index
    %c0_13 = arith.constant 0 : index
    %28 = vector.load %arg6[%c0_12, %c0_13] : memref<1x64xf32, #tpu.memory_space<vmem>>, vector<1x64xf32>
    %29 = vector.broadcast %28 : vector<1x64xf32> to vector<2x64xf32>
    %30 = arith.addf %27, %29 : vector<2x64xf32>
    %cst_14 = arith.constant 0.000000e+00 : f32
    %31 = vector.broadcast %cst_14 : f32 to vector<2x64xf32>
    %32 = arith.maximumf %30, %31 : vector<2x64xf32>
    %33 = arith.truncf %32 : vector<2x64xf32> to vector<2x64xbf16>
    %c0_15 = arith.constant 0 : index
    %c0_16 = arith.constant 0 : index
    %34 = vector.load %arg7[%c0_15, %c0_16] : memref<64x2xbf16, #tpu.memory_space<vmem>>, vector<64x2xbf16>
    %cst_17 = arith.constant dense<0.000000e+00> : vector<2x2xf32>
    %35 = tpu.matmul %33, %34, %cst_17 {dimension_numbers = #tpu.dot_dimension_numbers<[1], [0], [0], [1], [0, 0, 1, 1], [], []>} : vector<2x64xbf16>, vector<64x2xbf16>, vector<2x2xf32> -> vector<2x2xf32>
    %c0_18 = arith.constant 0 : index
    %c0_19 = arith.constant 0 : index
    %36 = vector.load %arg8[%c0_18, %c0_19] : memref<1x2xf32, #tpu.memory_space<vmem>>, vector<1x2xf32>
    %37 = vector.broadcast %36 : vector<1x2xf32> to vector<2x2xf32>
    %38 = arith.addf %35, %37 : vector<2x2xf32>
    %c0_20 = arith.constant 0 : index
    %c0_21 = arith.constant 0 : index
    %39 = vector.load %arg9[%c0_20, %c0_21] : memref<2x2xf32, #tpu.memory_space<vmem>>, vector<2x2xf32>
    tpu.vector_store %arg9[%c0_20, %c0_21], %38 {strides = array<i32>} : memref<2x2xf32, #tpu.memory_space<vmem>>, vector<2x2xf32>,
    return
  }
  func.func @transform_0(%arg0: i32) -> (i32, i32) {
    %c0_i32 = arith.constant 0 : i32
    %c0_i32_0 = arith.constant 0 : i32
    %c0_i32_1 = arith.constant 0 : i32
    return %c0_i32, %c0_i32_0 : i32, i32
  }
  func.func @transform_1(%arg0: i32) -> (i32, i32) {
    %c0_i32 = arith.constant 0 : i32
    %c0_i32_0 = arith.constant 0 : i32
    %c0_i32_1 = arith.constant 0 : i32
    return %c0_i32, %c0_i32_0 : i32, i32
  }
  func.func @transform_2(%arg0: i32) -> (i32, i32) {
    %c0_i32 = arith.constant 0 : i32
    %c0_i32_0 = arith.constant 0 : i32
    %c0_i32_1 = arith.constant 0 : i32
    return %c0_i32, %c0_i32_0 : i32, i32
  }
  func.func @transform_3(%arg0: i32) -> (i32, i32) {
    %c0_i32 = arith.constant 0 : i32
    %c0_i32_0 = arith.constant 0 : i32
    %c0_i32_1 = arith.constant 0 : i32
    return %c0_i32, %c0_i32_0 : i32, i32
  }
  func.func @transform_4(%arg0: i32) -> (i32, i32) {
    %c0_i32 = arith.constant 0 : i32
    %c0_i32_0 = arith.constant 0 : i32
    %c0_i32_1 = arith.constant 0 : i32
    return %c0_i32, %c0_i32_0 : i32, i32
  }
  func.func @transform_5(%arg0: i32) -> (i32, i32) {
    %c0_i32 = arith.constant 0 : i32
    %c0_i32_0 = arith.constant 0 : i32
    %c0_i32_1 = arith.constant 0 : i32
    return %c0_i32, %c0_i32_0 : i32, i32
  }
  func.func @transform_6(%arg0: i32) -> (i32, i32) {
    %c0_i32 = arith.constant 0 : i32
    %c0_i32_0 = arith.constant 0 : i32
    %c0_i32_1 = arith.constant 0 : i32
    return %c0_i32, %c0_i32_0 : i32, i32
  }
  func.func @transform_7(%arg0: i32) -> (i32, i32) {
    %c0_i32 = arith.constant 0 : i32
    %c0_i32_0 = arith.constant 0 : i32
    %c0_i32_1 = arith.constant 0 : i32
    return %c0_i32, %c0_i32_0 : i32, i32
  }
  func.func @transform_8(%arg0: i32) -> (i32, i32) {
    %c0_i32 = arith.constant 0 : i32
    %c0_i32_0 = arith.constant 0 : i32
    %c0_i32_1 = arith.constant 0 : i32
    return %c0_i32, %c0_i32_0 : i32, i32
  }
}

</mosaic_0001>

<bundles_post_ra>
// kernel: cnn_lstm_forward.6
= control target key start
LH: loop header
LB: loop body
LE: loop exit
PB: predicated region body
PF: predicated region fallthrough
CT: control target
= control target key end

     0   :  { %10 = vsyncpa [#allocation3], 0  ;;  %s7039_s0 = inlined_call_operand.hbm [shape: bf16[1024,48], index: 0, kind: input, shape index: {}]   ;;  %s7040_s1 = inlined_call_operand.hbm [shape: bf16[4,48,32], index: 1, kind: input, shape index: {}]   ;;  %s7041_s2 = inlined_call_operand.hbm [shape: f32[1,32], index: 2, kind: input, shape index: {}]   ;;  %s7042_s3 = inlined_call_operand.hbm [shape: f32[1,32], index: 3, kind: input, shape index: {}]   ;;  %s7043_s4 = inlined_call_operand.hbm [shape: f32[1,32], index: 4, kind: input, shape index: {}]   ;;  %s7044_s5 = inlined_call_operand.hbm [shape: bf16[1024,32], index: 5, kind: output, shape index: {}]  }
   0x1   :  { %12 = vsyncpa [#allocation3 + $0x1], 0 }
   0x2   :  { %13 = vsyncpa [#allocation6], 0 }
   0x3   :  { %14 = vsyncpa [#allocation9], 0 }
   0x4   :  { %15 = vsyncpa [#allocation4], 0 }
   0x5   :  { %17 = vsyncpa [#allocation4 + $0x1], 0  ;;  %s4450_s18 = smov 0   ;;  %s4452_s19 = smov 0  }
   0x6   :  { %s4454_s20 = smov 0   ;;  %s4456_s21 = smov 0  }
   0x7 LB: > { %s4471_s22 = sadd.s32 4294967295, %s4408_s21   ;;  %s3301_s23 = sadd.s32 4294967294, %s4408_s21   ;;  %s4408_s21 = sphi %s4456_s21, %s7468_s21   ;;  %s4404_s20 = sphi %s4454_s20, %s7467_s20   ;;  %s4400_s19 = sphi %s4452_s19, %s7466_s19   ;;  %s4396_s18 = sphi %s4450_s18, %s7465_s18  }
   0x8   : > { %p43_p0 = scmp.ne.s32.totalorder %s4400_s19, %s4396_s18  ;;  %p7045_p1 = scmp.eq.s32.totalorder %s4471_s22, 0 }
   0x9   : > { %p157_p3 = scmp.eq.s32.totalorder %s3301_s23, 1  ;;  %p3302_p5 = scmp.ge.s32.totalorder %s4408_s21, 1 }
   0xa   : > { %p4480_p4 = por %p7045_p1, %p43_p0  ;;  %p164_p7 = scmp.lt.s32.totalorder %s4408_s21, 3 }
   0xb   : > { %p4485_p6 = por %p157_p3, %p43_p0  ;;  %s4410_s27 = smov [#allocation5]  }
   0xc   : > { %s7155_s24 = scalar_select %p4480_p4, 1, 0 }
   0xd   : > { %s7156_s25 = scalar_select %p4485_p6, 1, 0 }
   0xe   : > { %p4490_p8 = pnand %p3302_p5, %p164_p7  ;;  %s176_s28 = sshll.u32 %s4410_s27, 4  ;;  %s4494_s28 = int_to_ptr.vmem [resolvable:$true] %s176_s28 }
   0xf   : > { %s4411_s30 = smov [#allocation8]   ;;  %s4412_s7 = smov [#allocation7]  }
  0x10   : > { %s7157_s26 = scalar_select %p4490_p8, 1, 0 }
  0x11   : > { %p4068_p9 = pneg %p4490_p8  ;;  %s201_s6 = sshll.u32 %s4411_s30, 4  ;;  %s4505_s6 = int_to_ptr.vmem [resolvable:$true] %s201_s6 }
  0x12   : > { %s4507_s8 = sshll.u32 %s4412_s7, 4  ;;  %s4192_s11 = scalar_lea.hbm %s7040_s1, 1536  ;;  %s191_s8 = int_to_ptr.vmem [resolvable:$true] %s4507_s8 }
  0x13   : > { %p4501_p11 = pnand %p4068_p9, %p7045_p1  ;;  %p4193_p12 = scmp.ne.s32.totalorder %s7040_s1, %s4192_s11 }
  0x14   : > { %p4199_p5 = scmp.lt.u32.totalorder %s4192_s11, %s7040_s1 }
  0x15   : > { %p4517_p13 = pneg %p4501_p11 }
  0x17   : > { %p4195_p0 = pnand %p4517_p13, %p4193_p12 }
  0x19   : > { %p4196_p3 = pneg %p4195_p0 }
  0x1b   : > { %p4201_p7 = pnand %p4199_p5, %p4196_p3 }
  0x1d   : > { %4204 = shalt.err (!%p4201_p7)
}
  0x1e   : > { %s4205_s17 = scalar_lea.vmem %s4494_s28, 1536  ;;  %p4213_p2 = scmp.lt.s32.totalorder %s4494_s28, %s4494_s28 }
  0x1f   : > { %p4206_p9 = scmp.ne.s32.totalorder %s4494_s28, %s4205_s17  ;;  %p4214_p6 = scmp.lt.s32.totalorder %s4205_s17, %s4205_s17 }
  0x21   : > { %p4208_p10 = pnand %p4206_p9, %p4517_p13  ;;  %p4215_p12 = por %p4214_p6, %p4213_p2 }
  0x23   : > { %p4209_p1 = pneg %p4208_p10 }
  0x25   : > { %p4216_p0 = pnand %p4215_p12, %p4209_p1 }
  0x27   : > { %4219 = shalt.err (!%p4216_p0)
}
  0x28   : > { %s4413_s23 = smov 64   ;;  %s4414_s27 = smov 4  }
  0x29   : > { %4071 = dma.hbm_to_vmem [thread:$0]  (!%p4501_p11), %s7040_s1, 1536, %s4494_s28, [#allocation6], %s4413_s23, %s4413_s23, %s4414_s27  }
  0x2a   : > { %s4220_s11 = scalar_lea.hbm %s7042_s3, 16 }
  0x2b   : > { %p4221_p1 = scmp.ne.s32.totalorder %s7042_s3, %s4220_s11  ;;  %p4227_p10 = scmp.lt.u32.totalorder %s4220_s11, %s7042_s3 }
  0x2d   : > { %p4223_p2 = pnand %p4221_p1, %p4517_p13 }
  0x2f   : > { %p4224_p6 = pneg %p4223_p2 }
  0x31   : > { %p4229_p3 = pnand %p4227_p10, %p4224_p6 }
  0x33   : > { %4232 = shalt.err (!%p4229_p3)
}
  0x34   : > { %s4233_s28 = scalar_lea.vmem %s4505_s6, 16  ;;  %s4240_s17 = scalar_lea.vmem %s4505_s6, 32 }
  0x35   : > { %p4234_p5 = scmp.ne.s32.totalorder %s4505_s6, %s4233_s28  ;;  %p4241_p12 = scmp.lt.s32.totalorder %s4505_s6, %s4505_s6 }
  0x36   : > { %p4242_p0 = scmp.lt.s32.totalorder %s4240_s17, %s4233_s28 }
  0x37   : > { %p4236_p7 = pnand %p4234_p5, %p4517_p13 }
  0x38   : > { %p4243_p1 = por %p4242_p0, %p4241_p12 }
  0x39   : > { %p4237_p9 = pneg %p4236_p7 }
  0x3b   : > { %p4244_p2 = pnand %p4243_p1, %p4237_p9 }
  0x3d   : > { %4247 = shalt.err (!%p4244_p2)
}
  0x3e   : > { %4077 = dma.hbm_to_vmem [thread:$0]  (!%p4501_p11), %s7042_s3, 16, %s4505_s6, [#allocation9]  }
  0x3f   : > { %s4248_s11 = scalar_lea.hbm %s7041_s2, 16 }
  0x40   : > { %p4249_p6 = scmp.ne.s32.totalorder %s7041_s2, %s4248_s11  ;;  %p4255_p5 = scmp.lt.u32.totalorder %s4248_s11, %s7041_s2 }
  0x42   : > { %p4251_p10 = pnand %p4249_p6, %p4517_p13 }
  0x44   : > { %p4252_p3 = pneg %p4251_p10 }
  0x46   : > { %p4257_p7 = pnand %p4255_p5, %p4252_p3 }
  0x48   : > { %4260 = shalt.err (!%p4257_p7)
}
  0x49   : > { %s4261_s28 = scalar_lea.vmem %s191_s8, 16  ;;  %s4268_s6 = scalar_lea.vmem %s191_s8, 32 }
  0x4a   : > { %p4262_p9 = scmp.ne.s32.totalorder %s191_s8, %s4261_s28  ;;  %p4269_p1 = scmp.lt.s32.totalorder %s191_s8, %s191_s8 }
  0x4b   : > { %p4270_p2 = scmp.lt.s32.totalorder %s4268_s6, %s4261_s28 }
  0x4c   : > { %p4264_p12 = pnand %p4262_p9, %p4517_p13 }
  0x4d   : > { %p4271_p4 = por %p4270_p2, %p4269_p1 }
  0x4e   : > { %p4265_p0 = pneg %p4264_p12 }
  0x50   : > { %p4272_p8 = pnand %p4271_p4, %p4265_p0 }
  0x52   : > { %4275 = shalt.err (!%p4272_p8)
}
  0x53   : > { %4074 = dma.hbm_to_vmem [thread:$0]  (!%p4501_p11), %s7041_s2, 16, %s191_s8, [#allocation6]  }
  0x54   : > { %s4415_s7 = smov [#allocation10]   ;;  %s4276_s12 = scalar_lea.hbm %s7043_s4, 16 }
  0x55   : > { %s212_s9 = sshll.u32 %s4415_s7, 4  ;;  %p4277_p6 = scmp.ne.s32.totalorder %s7043_s4, %s4276_s12  ;;  %s213_s9 = int_to_ptr.vmem [resolvable:$true] %s212_s9 }
  0x56   : > { %p4283_p10 = scmp.lt.u32.totalorder %s4276_s12, %s7043_s4 }
  0x57   : > { %p4279_p4 = pnand %p4277_p6, %p4517_p13 }
  0x59   : > { %p4280_p8 = pneg %p4279_p4 }
  0x5b   : > { %p4285_p3 = pnand %p4283_p10, %p4280_p8 }
  0x5d   : > { %4288 = shalt.err (!%p4285_p3)
}
  0x5e   : > { %s4289_s8 = scalar_lea.vmem %s213_s9, 16  ;;  %s4296_s6 = scalar_lea.vmem %s213_s9, 32 }
  0x5f   : > { %p4290_p5 = scmp.ne.s32.totalorder %s213_s9, %s4289_s8  ;;  %p4297_p12 = scmp.lt.s32.totalorder %s213_s9, %s213_s9 }
  0x60   : > { %p4298_p0 = scmp.lt.s32.totalorder %s4296_s6, %s4289_s8 }
  0x61   : > { %p4292_p7 = pnand %p4290_p5, %p4517_p13 }
  0x62   : > { %p4299_p1 = por %p4298_p0, %p4297_p12 }
  0x63   : > { %p4293_p9 = pneg %p4292_p7 }
  0x65   : > { %p4300_p2 = pnand %p4299_p1, %p4293_p9 }
  0x67   : > { %4303 = shalt.err (!%p4300_p2)
}
  0x68   : > { %4080 = dma.hbm_to_vmem [thread:$0]  (!%p4501_p11), %s7043_s4, 16, %s213_s9, [#allocation9]  }
  0x69   : > { %s4603_s14 = sadd.s32 1, %s4408_s21   ;;  %s30_s7 = sadd.s32 1, %s4404_s20 }
  0x6a   : > { %s27_s29 = ssub.s32 %s4408_s21, %s4603_s14  ;;  %p37_p13 = scmp.ne.s32.totalorder %s4404_s20, %s4400_s19 }
  0x6b   : > { %p28_p6 = scmp.eq.s32.totalorder %s27_s29, 0  ;;  %p38_p4 = scmp.eq.s32.totalorder %s4408_s21, 0 }
  0x6c   : > { %p7160_p8 = scmp.eq.s32.totalorder %s4471_s22, 1  ;;  %p4093_p3 = scmp.lt.s32.totalorder %s4408_s21, 2 }
  0x6d   : > { %s4619_s11 = scalar_select %p28_p6, %s4404_s20, %s30_s7  }
  0x6e   : > { %p4613_p10 = por %p7160_p8, %p37_p13  ;;  %p39_p5 = por %p38_p4, %p37_p13 }
  0x6f   : > { %s223_s12 = sand.u32 1, %s4404_s20   ;;  %s3562_s9 = sshll.u32 %s4408_s21, 12 }
  0x70   : > { %s3308_s13 = sshll.u32 %s223_s12, 8  ;;  %s4626_s28 = scalar_lea.hbm %s7039_s0, %s3562_s9 }
  0x71   : > { %s227_s8 = scalar_lea.vmem [#allocation2], %s3308_s13  ;;  %p4630_p11 = pnand %p4093_p3, %p39_p5 }
  0x72   : > { %s234_s6 = sshll.u32 %s227_s8, 4  ;;  %s4634_s30 = scalar_lea.sflag [#allocation3], %s223_s12  ;;  %s4628_s6 = int_to_ptr.vmem [resolvable:$true] %s234_s6 }
  0x73   : > { %s4304_s7 = scalar_lea.hbm %s4626_s28, 4096  ;;  %p4306_p9 = pneg %p4630_p11 }
  0x74   : > { %p4305_p7 = scmp.ne.s32.totalorder %s4626_s28, %s4304_s7  ;;  %s4309_s9 = scalar_lea.hbm %s7039_s0, 8192 }
  0x75   : > { %p4310_p1 = scmp.lt.u32.totalorder %s4626_s28, %s7039_s0  ;;  %p4311_p2 = scmp.lt.u32.totalorder %s4309_s9, %s4304_s7 }
  0x76   : > { %p4307_p12 = pnand %p4306_p9, %p4305_p7  ;;  %p4313_p6 = scmp.lt.u32.totalorder %s4304_s7, %s4626_s28 }
  0x77   : > { %p4312_p13 = por %p4311_p2, %p4310_p1 }
  0x78   : > { %p4308_p0 = pneg %p4307_p12 }
  0x79   : > { %p4314_p4 = por %p4313_p6, %p4312_p13 }
  0x7b   : > { %p4315_p8 = pnand %p4314_p4, %p4308_p0 }
  0x7d   : > { %4318 = shalt.err (!%p4315_p8)
}
  0x7e   : > { %s4319_s12 = scalar_lea.vmem %s4628_s6, 4096  ;;  %s4416_s8 = smov [#allocation2]  }
  0x7f   : > { %p4320_p3 = scmp.ne.s32.totalorder %s4628_s6, %s4319_s12  ;;  %s4324_s29 = sshll.u32 %s4416_s8, 4  ;;  %s4325_s29 = int_to_ptr.vmem [resolvable:$false] %s4324_s29 }
  0x80   : > { %s4326_s13 = scalar_lea.vmem %s4325_s29, 8192  ;;  %p4327_p12 = scmp.lt.s32.totalorder %s4628_s6, %s4325_s29 }
  0x81   : > { %p4322_p5 = pnand %p4320_p3, %p4306_p9  ;;  %p4328_p1 = scmp.lt.s32.totalorder %s4326_s13, %s4319_s12 }
  0x83   : > { %p4323_p7 = pneg %p4322_p5  ;;  %p4329_p2 = por %p4328_p1, %p4327_p12 }
  0x85   : > { %p4330_p13 = pnand %p4329_p2, %p4323_p7 }
  0x87   : > { %4333 = shalt.err (!%p4330_p13)
}
  0x88   : > { %4084 = dma.hbm_to_vmem [thread:$0]  (!%p4630_p11), %s4626_s28, 4096, %s4628_s6, %s4634_s30, %s4413_s23, %s4413_s23, %s4414_s27  }
  0x89   : > { %p7163_p9 = scmp.ne.s32.totalorder %s7157_s26, 0 }
  0x8b   : > { %246 = sbr.rel (%p7163_p9) target bundleno = 730 (0x2da), region = 40 }
  0x92   : > { %s4668_s7 = sand.u32 1, %s4400_s19   ;;  %p7164_p0 = scmp.ne.s32.totalorder %s7155_s24, 0 }
  0x93   : > { %s3312_s9 = sshll.u32 %s4668_s7, 8  ;;  %s249_s15 = scalar_lea.sflag [#allocation3], %s4668_s7 }
  0x94   : > { %s4674_s17 = scalar_lea.vmem [#allocation2], %s3312_s9 }
  0x95   : > { %4379 = dma.done.wait (%p7164_p0), %s249_s15, 4096  }
  0x96   : > { %4381 = vsyncadd (%p7164_p0), %s249_s15, 4294963200  ;;  %p7165_p11 = scmp.eq.s32.totalorder %s4471_s22, 0 }
  0x98   : > { %4383 = dma.done.wait (%p7165_p11), [#allocation6], 1552   ;;  %p7166_p6 = pmov %p7165_p11 }
  0x9a   : > { %4385 = vsyncadd (%p7166_p6), [#allocation6], 4294965744  ;;  %p7167_p4 = pmov %p7166_p6 }
  0x9c   : > { %4387 = dma.done.wait (%p7167_p4), [#allocation9], 32   ;;  %p7168_p8 = pmov %p7167_p4 }
  0x9d   : > { %v4139_v0 = vld [vmem:[#allocation5] sm:$0xff]   ;;  %v4140_v1 = vld [vmem:[#allocation5 + $0x18] sm:$0xff]   ;;  %v4141_v2 = vld [vmem:[#allocation5 + $0x8] sm:$0xff]   ;;  %vm555_vm0 = vcmask 392192   ;;  %vm3111_vm1 = vcmask 257024   ;;  %s6037_s24 = scalar_lea.vmem [#allocation11], %s3312_s9 }
  0x9e   : > { %4389 = vsyncadd (%p7168_p8), [#allocation9], 4294967264  ;;  %3768 = vmatprep.subr.bf16.mxu0 %v4139_v0  ;;  %3838 = vmatprep.subr.bf16.mxu1 %v4140_v1  ;;  %v4142_v3 = vld [vmem:[#allocation5 + $0x20] sm:$0xff]   ;;  %v4143_v4 = vld [vmem:[#allocation5 + $0x10] sm:$0xff]   ;;  %s3627_s26 = sshll.u32 %s4471_s22, 12  ;;  %s3190_s23 = sshll.u32 %s6037_s24, 4  ;;  %s6993_s23 = int_to_ptr.vmem [resolvable:$true] %s3190_s23 }
  0x9f   : > { %3769 = vmatpush3.bf16.msra.mxu0 %v4139_v0  ;;  %3839 = vmatpush3.bf16.msra.mxu1 %v4140_v1  ;;  %v4144_v5 = vld [vmem:[#allocation5 + $0x28] sm:$0xff]   ;;  %v4689_v6 = vld [vmem:[%s4674_s17] sm:$0xff]   ;;  %v4147_v7 = vld [vmem:[#allocation5 + $0x30] sm:$0xff]   ;;  %s6991_s6 = scalar_lea.hbm %s7044_s5, %s3627_s26  ;;  %s3177_s22 = scalar_lea.sflag [#allocation4], %s4668_s7 }
  0xa0   : > { %3770 = vmatprep.subr.bf16.mxu0 %v4141_v2  ;;  %3840 = vmatprep.subr.bf16.mxu1 %v4142_v3  ;;  %v4148_v8 = vld [vmem:[#allocation5 + $0x48] sm:$0xff]   ;;  %v4699_v10 = vld [vmem:[%s4674_s17 + $0x10] sm:$0xff]   ;;  %v4710_v11 = vld [vmem:[%s4674_s17 + $0x18] sm:$0xff]   ;;  %s4334_s30 = scalar_lea.vmem %s6993_s23, 4096  ;;  %s4417_s16 = smov [#allocation11]  }
  0xa1   : > { %3774 = vmatprep.mubr.msk.bf16.mxu0 %vm555_vm0, %v4689_v6  ;;  %3844 = vmatprep.mubr.msk.bf16.mxu1 %vm555_vm0, %v4689_v6  ;;  %v4696_v9 = vld [vmem:[%s4674_s17 + $0x8] sm:$0xff]   ;;  %v4713_v12 = vld [vmem:[%s4674_s17 + $0x20] sm:$0xff]   ;;  %v4159_v13 = vld [vmem:[#allocation5 + $0x38] sm:$0xff]   ;;  %p4335_p3 = scmp.ne.s32.totalorder %s6993_s23, %s4334_s30  ;;  %s4338_s12 = sshll.u32 %s4417_s16, 4  ;;  %s4339_s12 = int_to_ptr.vmem [resolvable:$false] %s4338_s12 }
  0xa2   : > { %v4160_v14 = vld [vmem:[#allocation5 + $0x50] sm:$0xff]   ;;  %v4724_v15 = vld [vmem:[%s4674_s17 + $0x28] sm:$0xff]   ;;  %v4171_v17 = vld [vmem:[#allocation5 + $0x40] sm:$0xff]   ;;  %s4340_s8 = scalar_lea.vmem %s4339_s12, 8192  ;;  %p4341_p12 = scmp.lt.s32.totalorder %s6993_s23, %s4339_s12 }
  0xa3   : > { %3771 = vmatpush3.bf16.msra.mxu0 %v4141_v2  ;;  %3841 = vmatpush3.bf16.msra.mxu1 %v4142_v3  ;;  %v4727_v16 = vld [vmem:[%s4674_s17 + $0x30] sm:$0xff]   ;;  %v4172_v18 = vld [vmem:[#allocation5 + $0x58] sm:$0xff]   ;;  %v4741_v20 = vld [vmem:[%s4674_s17 + $0x40] sm:$0xff]   ;;  %p4336_p5 = pnand %p4335_p3, %p4613_p10  ;;  %p4342_p1 = scmp.lt.s32.totalorder %s4340_s8, %s4334_s30 }
  0xa4   : > { %3772 = vmatprep.subr.bf16.mxu0 %v4143_v4  ;;  %3842 = vmatprep.subr.bf16.mxu1 %v4144_v5  ;;  %v4738_v19 = vld [vmem:[%s4674_s17 + $0x38] sm:$0xff]   ;;  %v4752_v21 = vld [vmem:[%s4674_s17 + $0x48] sm:$0xff]   ;;  %v4755_v22 = vld [vmem:[%s4674_s17 + $0x50] sm:$0xff]  }
  0xa5   : > { %v4766_v23 = vld [vmem:[%s4674_s17 + $0x58] sm:$0xff]   ;;  %v4769_v24 = vld [vmem:[%s4674_s17 + $0x60] sm:$0xff]   ;;  %v4780_v25 = vld [vmem:[%s4674_s17 + $0x68] sm:$0xff]   ;;  %p4337_p7 = pneg %p4336_p5  ;;  %p4343_p2 = por %p4342_p1, %p4341_p12 }
  0xa6   : > { %v4783_v26 = vld [vmem:[%s4674_s17 + $0x70] sm:$0xff]   ;;  %v4794_v27 = vld [vmem:[%s4674_s17 + $0x78] sm:$0xff]   ;;  %v4797_v28 = vld [vmem:[%s4674_s17 + $0x80] sm:$0xff]  }
  0xa7   : > { %3773 = vmatpush3.bf16.msra.mxu0 %v4143_v4  ;;  %3843 = vmatpush3.bf16.msra.mxu1 %v4144_v5  ;;  %v4808_v29 = vld [vmem:[%s4674_s17 + $0x88] sm:$0xff]   ;;  %v4811_v30 = vld [vmem:[%s4674_s17 + $0x90] sm:$0xff]   ;;  %v4822_v31 = vld [vmem:[%s4674_s17 + $0x98] sm:$0xff]   ;;  %p4344_p13 = pnand %p4343_p2, %p4337_p7 }
  0xa8   : > { %3908 = vmatprep.subr.bf16.mxu0 %v4147_v7  ;;  %3978 = vmatprep.subr.bf16.mxu1 %v4148_v8  ;;  %v4825_v32 = vld [vmem:[%s4674_s17 + $0xa0] sm:$0xff]   ;;  %v4836_v33 = vld [vmem:[%s4674_s17 + $0xa8] sm:$0xff]   ;;  %v4839_v34 = vld [vmem:[%s4674_s17 + $0xb0] sm:$0xff]  }
  0xa9   : > { %v4850_v35 = vld [vmem:[%s4674_s17 + $0xb8] sm:$0xff]   ;;  %v4853_v36 = vld [vmem:[%s4674_s17 + $0xc0] sm:$0xff]   ;;  %v4864_v37 = vld [vmem:[%s4674_s17 + $0xc8] sm:$0xff]  }
  0xaa   : > { %3775 = vmatmul.mubr.msk.bf16.vlgmr.msra.gmra.mrb[0].mxu0 %vm555_vm0, %v4696_v9  ;;  %3845 = vmatmul.mubr.msk.bf16.vlgmr.msra.gmra.mrb[0].mxu1 %vm555_vm0, %v4696_v9  ;;  %v4867_v38 = vld [vmem:[%s4674_s17 + $0xd0] sm:$0xff]   ;;  %v4878_v39 = vld [vmem:[%s4674_s17 + $0xd8] sm:$0xff]   ;;  %v4881_v40 = vld [vmem:[%s4674_s17 + $0xe0] sm:$0xff]  }
  0xab   : > { %3909 = vmatpush3.bf16.msra.mxu0 %v4147_v7  ;;  %3979 = vmatpush3.bf16.msra.mxu1 %v4148_v8  ;;  %v4892_v41 = vld [vmem:[%s4674_s17 + $0xe8] sm:$0xff]   ;;  %v4895_v42 = vld [vmem:[%s4674_s17 + $0xf0] sm:$0xff]   ;;  %v4906_v43 = vld [vmem:[%s4674_s17 + $0xf8] sm:$0xff]  }
  0xac   : > { %3778 = vmatprep.mubr.msk.bf16.mxu0 %vm555_vm0, %v4699_v10  ;;  %3848 = vmatprep.mubr.msk.bf16.mxu1 %vm555_vm0, %v4699_v10  ;;  %v5000_v44 = vld [vmem:[#allocation7] ss:$0 sm:$0xff]  ;;  %v5007_v49 = vld [vmem:[#allocation8] ss:$0 sm:$0xff]  ;;  %v5013_v59 = vld [vmem:[#allocation10] ss:$0 sm:$0xff] }
  0xad   : > { %3910 = vmatprep.subr.bf16.mxu0 %v4159_v13  ;;  %3980 = vmatprep.subr.bf16.mxu1 %v4160_v14 }
  0xaf   : > { %3911 = vmatpush3.bf16.msra.mxu0 %v4159_v13  ;;  %3981 = vmatpush3.bf16.msra.mxu1 %v4160_v14 }
  0xb0   : > { %3912 = vmatprep.subr.bf16.mxu0 %v4171_v17  ;;  %3982 = vmatprep.subr.bf16.mxu1 %v4172_v18 }
  0xb2   : > { %3779 = vmatmul.mubr.msk.bf16.gmra.mrb[4].mxu0 %vm555_vm0, %v4710_v11  ;;  %3849 = vmatmul.mubr.msk.bf16.gmra.mrb[4].mxu1 %vm555_vm0, %v4710_v11 }
  0xb3   : > { %3782 = vmatprep.mubr.msk.bf16.mxu0 %vm555_vm0, %v4713_v12  ;;  %3852 = vmatprep.mubr.msk.bf16.mxu1 %vm555_vm0, %v4713_v12 }
  0xb4   : > { %3913 = vmatpush3.bf16.msra.mxu0 %v4171_v17  ;;  %3983 = vmatpush3.bf16.msra.mxu1 %v4172_v18 }
  0xba   : > { %3783 = vmatmul.mubr.msk.bf16.gmra.mrb[8].mxu0 %vm555_vm0, %v4724_v15  ;;  %3853 = vmatmul.mubr.msk.bf16.gmra.mrb[8].mxu1 %vm555_vm0, %v4724_v15 }
  0xbb   : > { %3786 = vmatprep.mubr.msk.bf16.mxu0 %vm555_vm0, %v4727_v16  ;;  %3856 = vmatprep.mubr.msk.bf16.mxu1 %vm555_vm0, %v4727_v16 }
  0xc2   : > { %3787 = vmatmul.mubr.msk.bf16.gmra.mrb[12].mxu0 %vm555_vm0, %v4738_v19  ;;  %3857 = vmatmul.mubr.msk.bf16.gmra.mrb[12].mxu1 %vm555_vm0, %v4738_v19 }
  0xc3   : > { %3790 = vmatprep.mubr.msk.bf16.mxu0 %vm555_vm0, %v4741_v20  ;;  %3860 = vmatprep.mubr.msk.bf16.mxu1 %vm555_vm0, %v4741_v20 }
  0xca   : > { %3791 = vmatmul.mubr.msk.bf16.gmra.mrb[16].mxu0 %vm555_vm0, %v4752_v21  ;;  %3861 = vmatmul.mubr.msk.bf16.gmra.mrb[16].mxu1 %vm555_vm0, %v4752_v21 }
  0xcb   : > { %3794 = vmatprep.mubr.msk.bf16.mxu0 %vm555_vm0, %v4755_v22  ;;  %3864 = vmatprep.mubr.msk.bf16.mxu1 %vm555_vm0, %v4755_v22 }
  0xd2   : > { %3795 = vmatmul.mubr.msk.bf16.gmra.mrb[20].mxu0 %vm555_vm0, %v4766_v23  ;;  %3865 = vmatmul.mubr.msk.bf16.gmra.mrb[20].mxu1 %vm555_vm0, %v4766_v23 }
  0xd3   : > { %3798 = vmatprep.mubr.msk.bf16.mxu0 %vm555_vm0, %v4769_v24  ;;  %3868 = vmatprep.mubr.msk.bf16.mxu1 %vm555_vm0, %v4769_v24 }
  0xda   : > { %3799 = vmatmul.mubr.msk.bf16.gmra.mrb[24].mxu0 %vm555_vm0, %v4780_v25  ;;  %3869 = vmatmul.mubr.msk.bf16.gmra.mrb[24].mxu1 %vm555_vm0, %v4780_v25 }
  0xdb   : > { %3802 = vmatprep.mubr.msk.bf16.mxu0 %vm555_vm0, %v4783_v26  ;;  %3872 = vmatprep.mubr.msk.bf16.mxu1 %vm555_vm0, %v4783_v26 }
  0xe2   : > { %3803 = vmatmul.mubr.msk.bf16.gmra.mrb[28].mxu0 %vm555_vm0, %v4794_v27  ;;  %3873 = vmatmul.mubr.msk.bf16.gmra.mrb[28].mxu1 %vm555_vm0, %v4794_v27 }
  0xe3   : > { %3806 = vmatprep.mubr.msk.bf16.mxu0 %vm555_vm0, %v4797_v28  ;;  %3876 = vmatprep.mubr.msk.bf16.mxu1 %vm555_vm0, %v4797_v28 }
  0xea   : > { %3807 = vmatmul.mubr.msk.bf16.gmra.mrb[32].mxu0 %vm555_vm0, %v4808_v29  ;;  %3877 = vmatmul.mubr.msk.bf16.gmra.mrb[32].mxu1 %vm555_vm0, %v4808_v29 }
  0xeb   : > { %3810 = vmatprep.mubr.msk.bf16.mxu0 %vm555_vm0, %v4811_v30  ;;  %3880 = vmatprep.mubr.msk.bf16.mxu1 %vm555_vm0, %v4811_v30 }
  0xf2   : > { %3811 = vmatmul.mubr.msk.bf16.gmra.mrb[36].mxu0 %vm555_vm0, %v4822_v31  ;;  %3881 = vmatmul.mubr.msk.bf16.gmra.mrb[36].mxu1 %vm555_vm0, %v4822_v31 }
  0xf3   : > { %3814 = vmatprep.mubr.msk.bf16.mxu0 %vm555_vm0, %v4825_v32  ;;  %3884 = vmatprep.mubr.msk.bf16.mxu1 %vm555_vm0, %v4825_v32 }
  0xfa   : > { %3815 = vmatmul.mubr.msk.bf16.gmra.mrb[40].mxu0 %vm555_vm0, %v4836_v33  ;;  %3885 = vmatmul.mubr.msk.bf16.gmra.mrb[40].mxu1 %vm555_vm0, %v4836_v33 }
  0xfb   : > { %3818 = vmatprep.mubr.msk.bf16.mxu0 %vm555_vm0, %v4839_v34  ;;  %3888 = vmatprep.mubr.msk.bf16.mxu1 %vm555_vm0, %v4839_v34 }
 0x102   : > { %3819 = vmatmul.mubr.msk.bf16.gmra.mrb[44].mxu0 %vm555_vm0, %v4850_v35  ;;  %3889 = vmatmul.mubr.msk.bf16.gmra.mrb[44].mxu1 %vm555_vm0, %v4850_v35 }
 0x103   : > { %3822 = vmatprep.mubr.msk.bf16.mxu0 %vm555_vm0, %v4853_v36  ;;  %3892 = vmatprep.mubr.msk.bf16.mxu1 %vm555_vm0, %v4853_v36 }
 0x10a   : > { %3823 = vmatmul.mubr.msk.bf16.gmra.mrb[48].mxu0 %vm555_vm0, %v4864_v37  ;;  %3893 = vmatmul.mubr.msk.bf16.gmra.mrb[48].mxu1 %vm555_vm0, %v4864_v37 }
 0x10b   : > { %3826 = vmatprep.mubr.msk.bf16.mxu0 %vm555_vm0, %v4867_v38  ;;  %3896 = vmatprep.mubr.msk.bf16.mxu1 %vm555_vm0, %v4867_v38 }
 0x112   : > { %3827 = vmatmul.mubr.msk.bf16.gmra.mrb[52].mxu0 %vm555_vm0, %v4878_v39  ;;  %3897 = vmatmul.mubr.msk.bf16.gmra.mrb[52].mxu1 %vm555_vm0, %v4878_v39 }
 0x113   : > { %3830 = vmatprep.mubr.msk.bf16.mxu0 %vm555_vm0, %v4881_v40  ;;  %3900 = vmatprep.mubr.msk.bf16.mxu1 %vm555_vm0, %v4881_v40 }
 0x11a   : > { %3831 = vmatmul.mubr.msk.bf16.gmra.mrb[56].mxu0 %vm555_vm0, %v4892_v41  ;;  %3901 = vmatmul.mubr.msk.bf16.gmra.mrb[56].mxu1 %vm555_vm0, %v4892_v41 }
 0x11b   : > { %3834 = vmatprep.mubr.msk.bf16.mxu0 %vm555_vm0, %v4895_v42  ;;  %3904 = vmatprep.mubr.msk.bf16.mxu1 %vm555_vm0, %v4895_v42 }
 0x122   : > { %3835 = vmatmul.mubr.msk.bf16.gmra.mrb[60].mxu0 %vm555_vm0, %v4906_v43  ;;  %3905 = vmatmul.mubr.msk.bf16.gmra.mrb[60].mxu1 %vm555_vm0, %v4906_v43 }
 0x123   : > { %3914 = vmatprep.mubr.msk.bf16.mxu0 %vm555_vm0, %v4689_v6  ;;  %3984 = vmatprep.mubr.msk.bf16.mxu1 %vm555_vm0, %v4689_v6 }
 0x12a   : > { %3915 = vmatmul.mubr.msk.bf16.vlgmr.msra.gmra.mrb[64].mxu0 %vm555_vm0, %v4696_v9  ;;  %3985 = vmatmul.mubr.msk.bf16.vlgmr.msra.gmra.mrb[64].mxu1 %vm555_vm0, %v4696_v9 }
 0x12b   : > { %3918 = vmatprep.mubr.msk.bf16.mxu0 %vm555_vm0, %v4699_v10  ;;  %3988 = vmatprep.mubr.msk.bf16.mxu1 %vm555_vm0, %v4699_v10 }
 0x132   : > { %3919 = vmatmul.mubr.msk.bf16.gmra.mrb[68].mxu0 %vm555_vm0, %v4710_v11  ;;  %3989 = vmatmul.mubr.msk.bf16.gmra.mrb[68].mxu1 %vm555_vm0, %v4710_v11 }
 0x133   : > { %3922 = vmatprep.mubr.msk.bf16.mxu0 %vm555_vm0, %v4713_v12  ;;  %3992 = vmatprep.mubr.msk.bf16.mxu1 %vm555_vm0, %v4713_v12 }
 0x13a   : > { %3923 = vmatmul.mubr.msk.bf16.gmra.mrb[72].mxu0 %vm555_vm0, %v4724_v15  ;;  %3993 = vmatmul.mubr.msk.bf16.gmra.mrb[72].mxu1 %vm555_vm0, %v4724_v15 }
 0x13b   : > { %3926 = vmatprep.mubr.msk.bf16.mxu0 %vm555_vm0, %v4727_v16  ;;  %3996 = vmatprep.mubr.msk.bf16.mxu1 %vm555_vm0, %v4727_v16 }
 0x142   : > { %3927 = vmatmul.mubr.msk.bf16.gmra.mrb[76].mxu0 %vm555_vm0, %v4738_v19  ;;  %3997 = vmatmul.mubr.msk.bf16.gmra.mrb[76].mxu1 %vm555_vm0, %v4738_v19 }
 0x143   : > { %3930 = vmatprep.mubr.msk.bf16.mxu0 %vm555_vm0, %v4741_v20  ;;  %4000 = vmatprep.mubr.msk.bf16.mxu1 %vm555_vm0, %v4741_v20 }
 0x14a   : > { %3931 = vmatmul.mubr.msk.bf16.gmra.mrb[80].mxu0 %vm555_vm0, %v4752_v21  ;;  %4001 = vmatmul.mubr.msk.bf16.gmra.mrb[80].mxu1 %vm555_vm0, %v4752_v21 }
 0x14b   : > { %3934 = vmatprep.mubr.msk.bf16.mxu0 %vm555_vm0, %v4755_v22  ;;  %4004 = vmatprep.mubr.msk.bf16.mxu1 %vm555_vm0, %v4755_v22 }
 0x152   : > { %3935 = vmatmul.mubr.msk.bf16.gmra.mrb[84].mxu0 %vm555_vm0, %v4766_v23  ;;  %4005 = vmatmul.mubr.msk.bf16.gmra.mrb[84].mxu1 %vm555_vm0, %v4766_v23 }
 0x153   : > { %3938 = vmatprep.mubr.msk.bf16.mxu0 %vm555_vm0, %v4769_v24  ;;  %4008 = vmatprep.mubr.msk.bf16.mxu1 %vm555_vm0, %v4769_v24 }
 0x15a   : > { %3939 = vmatmul.mubr.msk.bf16.gmra.mrb[88].mxu0 %vm555_vm0, %v4780_v25  ;;  %4009 = vmatmul.mubr.msk.bf16.gmra.mrb[88].mxu1 %vm555_vm0, %v4780_v25 }
 0x15b   : > { %3942 = vmatprep.mubr.msk.bf16.mxu0 %vm555_vm0, %v4783_v26  ;;  %4012 = vmatprep.mubr.msk.bf16.mxu1 %vm555_vm0, %v4783_v26 }
 0x162   : > { %3943 = vmatmul.mubr.msk.bf16.gmra.mrb[92].mxu0 %vm555_vm0, %v4794_v27  ;;  %4013 = vmatmul.mubr.msk.bf16.gmra.mrb[92].mxu1 %vm555_vm0, %v4794_v27 }
 0x163   : > { %3946 = vmatprep.mubr.msk.bf16.mxu0 %vm555_vm0, %v4797_v28  ;;  %4016 = vmatprep.mubr.msk.bf16.mxu1 %vm555_vm0, %v4797_v28 }
 0x16a   : > { %3947 = vmatmul.mubr.msk.bf16.gmra.mrb[96].mxu0 %vm555_vm0, %v4808_v29  ;;  %4017 = vmatmul.mubr.msk.bf16.gmra.mrb[96].mxu1 %vm555_vm0, %v4808_v29 }
 0x16b   : > { %3950 = vmatprep.mubr.msk.bf16.mxu0 %vm555_vm0, %v4811_v30  ;;  %4020 = vmatprep.mubr.msk.bf16.mxu1 %vm555_vm0, %v4811_v30 }
 0x172   : > { %3951 = vmatmul.mubr.msk.bf16.gmra.mrb[100].mxu0 %vm555_vm0, %v4822_v31  ;;  %4021 = vmatmul.mubr.msk.bf16.gmra.mrb[100].mxu1 %vm555_vm0, %v4822_v31 }
 0x173   : > { %3954 = vmatprep.mubr.msk.bf16.mxu0 %vm555_vm0, %v4825_v32  ;;  %4024 = vmatprep.mubr.msk.bf16.mxu1 %vm555_vm0, %v4825_v32 }
 0x17a   : > { %3955 = vmatmul.mubr.msk.bf16.gmra.mrb[104].mxu0 %vm555_vm0, %v4836_v33  ;;  %4025 = vmatmul.mubr.msk.bf16.gmra.mrb[104].mxu1 %vm555_vm0, %v4836_v33 }
 0x17b   : > { %3958 = vmatprep.mubr.msk.bf16.mxu0 %vm555_vm0, %v4839_v34  ;;  %4028 = vmatprep.mubr.msk.bf16.mxu1 %vm555_vm0, %v4839_v34 }
 0x17d   : > { %v3776_v45 = vpop.f32.mrb[0].mxu0  ;;  %v3846_v47 = vpop.f32.mrb[0].mxu1 }
 0x17e   : > { %v695_v46 = vadd.f32 %v3776_v45, %v5000_v44  ;;  %v686_v48 = vpop.f32.mrb[1].mxu0  ;;  %v1213_v50 = vadd.f32 %v3846_v47, %v5000_v44  ;;  %v1204_v52 = vpop.f32.mrb[1].mxu1 }
 0x17f   : > { %v687_v51 = vadd.f32 %v5000_v44, %v686_v48  ;;  %v3777_v53 = vpop.f32.mrb[2].mxu0  ;;  %v1205_v55 = vadd.f32 %v5000_v44, %v1204_v52  ;;  %v3847_v57 = vpop.f32.mrb[2].mxu1 }
 0x180   : > { %v943_v54 = vmax.f32 %v695_v46, 0.0  ;;  %v698_v56 = vadd.f32 %v3777_v53, %v5000_v44  ;;  %v689_v58 = vpop.f32.mrb[3].mxu0  ;;  %v1461_v60 = vmax.f32 %v1213_v50, 0.0  ;;  %v1216_v62 = vadd.f32 %v3847_v57, %v5000_v44  ;;  %v1207_v0 = vpop.f32.mrb[3].mxu1 }
 0x181   : > { %v941_v61 = vmax.f32 %v687_v51, 0.0  ;;  %v690_v63 = vadd.f32 %v5000_v44, %v689_v58  ;;  %v1459_v2 = vmax.f32 %v1205_v55, 0.0  ;;  %v1208_v4 = vadd.f32 %v5000_v44, %v1207_v0 }
 0x182   : > { %v1013_v1 = vmul.f32 %v5007_v49, %v943_v54  ;;  %v944_v3 = vmax.f32 %v698_v56, 0.0  ;;  %3959 = vmatmul.mubr.msk.bf16.gmra.mrb[108].mxu0 %vm555_vm0, %v4850_v35  ;;  %v1525_v5 = vmul.f32 %v5007_v49, %v1461_v60  ;;  %v1462_v7 = vmax.f32 %v1216_v62, 0.0  ;;  %4029 = vmatmul.mubr.msk.bf16.gmra.mrb[108].mxu1 %vm555_vm0, %v4850_v35 }
 0x183   : > { %v1011_v6 = vmul.f32 %v5007_v49, %v941_v61  ;;  %v942_v8 = vmax.f32 %v690_v63, 0.0  ;;  %3962 = vmatprep.mubr.msk.bf16.mxu0 %vm555_vm0, %v4853_v36  ;;  %v1523_v10 = vmul.f32 %v5007_v49, %v1459_v2  ;;  %v1460_v12 = vmax.f32 %v1208_v4, 0.0  ;;  %4032 = vmatprep.mubr.msk.bf16.mxu1 %vm555_vm0, %v4853_v36 }
 0x184   : > { %v5028_v9 = vadd.f32 %v5013_v59, %v1013_v1  ;;  %v1014_v11 = vmul.f32 %v5007_v49, %v944_v3  ;;  %v5035_v13 = vadd.f32 %v5013_v59, %v1525_v5  ;;  %v1526_v15 = vmul.f32 %v5007_v49, %v1462_v7 }
 0x185   : > { %v5038_v14 = vadd.f32 %v5013_v59, %v1011_v6  ;;  %v1012_v16 = vmul.f32 %v5007_v49, %v942_v8  ;;  %v3780_v17 = vpop.f32.mrb[4].mxu0  ;;  %v5043_v18 = vadd.f32 %v5013_v59, %v1523_v10  ;;  %v1524_v20 = vmul.f32 %v5007_v49, %v1460_v12  ;;  %v3850_v22 = vpop.f32.mrb[4].mxu1 }
 0x186   : > { %v5046_v19 = vadd.f32 %v5013_v59, %v1014_v11  ;;  %v711_v21 = vadd.f32 %v3780_v17, %v5000_v44  ;;  %v702_v23 = vpop.f32.mrb[5].mxu0  ;;  %v5053_v25 = vadd.f32 %v5013_v59, %v1526_v15  ;;  %v1229_v27 = vadd.f32 %v3850_v22, %v5000_v44  ;;  %v1220_v28 = vpop.f32.mrb[5].mxu1 }
 0x187   : > { %v5056_v26 = vadd.f32 %v5013_v59, %v1012_v16  ;;  %v3781_v29 = vpop.f32.mrb[6].mxu0  ;;  %v5062_v31 = vadd.f32 %v5013_v59, %v1524_v20  ;;  %v703_v33 = vadd.f32 %v5000_v44, %v702_v23  ;;  %v3851_v34 = vpop.f32.mrb[6].mxu1  ;;  %v1221_v46 = vadd.f32 %v5000_v44, %v1220_v28 }
 0x188   : > { %v947_v32 = vmax.f32 %v711_v21, 0.0  ;;  %v705_v35 = vpop.f32.mrb[7].mxu0  ;;  %v1465_v45 = vmax.f32 %v1229_v27, 0.0  ;;  %v714_v47 = vadd.f32 %v3781_v29, %v5000_v44  ;;  %v1223_v48 = vpop.f32.mrb[7].mxu1  ;;  %v1232_v53 = vadd.f32 %v3851_v34, %v5000_v44 }
 0x189   : > { %v945_v52 = vmax.f32 %v703_v33, 0.0  ;;  %v1463_v55 = vmax.f32 %v1221_v46, 0.0  ;;  %v706_v57 = vadd.f32 %v5000_v44, %v705_v35  ;;  %v1224_v62 = vadd.f32 %v5000_v44, %v1223_v48 }
 0x18a   : > { %v1017_v51 = vmul.f32 %v5007_v49, %v947_v32  ;;  %3963 = vmatmul.mubr.msk.bf16.gmra.mrb[112].mxu0 %vm555_vm0, %v4864_v37  ;;  %v1529_v54 = vmul.f32 %v5007_v49, %v1465_v45  ;;  %v948_v56 = vmax.f32 %v714_v47, 0.0  ;;  %4033 = vmatmul.mubr.msk.bf16.gmra.mrb[112].mxu1 %vm555_vm0, %v4864_v37  ;;  %v1466_v61 = vmax.f32 %v1232_v53, 0.0 }
 0x18b   : > { %3966 = vmatprep.mubr.msk.bf16.mxu0 %vm555_vm0, %v4867_v38  ;;  %v1015_v60 = vmul.f32 %v5007_v49, %v945_v52  ;;  %4036 = vmatprep.mubr.msk.bf16.mxu1 %vm555_vm0, %v4867_v38  ;;  %v1527_v0 = vmul.f32 %v5007_v49, %v1463_v55  ;;  %v946_v1 = vmax.f32 %v706_v57, 0.0  ;;  %v1464_v5 = vmax.f32 %v1224_v62, 0.0 }
 0x18c   : > { %v5082_v58 = vadd.f32 %v5013_v59, %v1017_v51  ;;  %v5089_v63 = vadd.f32 %v5013_v59, %v1529_v54  ;;  %v1018_v37 = vmul.f32 %v5007_v49, %v948_v56  ;;  %v1530_v4 = vmul.f32 %v5007_v49, %v1466_v61 }
 0x18d   : > { %v3784_v2 = vpop.f32.mrb[8].mxu0  ;;  %v5094_v3 = vadd.f32 %v5013_v59, %v1015_v60  ;;  %v3854_v7 = vpop.f32.mrb[8].mxu1  ;;  %v5101_v10 = vadd.f32 %v5013_v59, %v1527_v0  ;;  %v1016_v12 = vmul.f32 %v5007_v49, %v946_v1  ;;  %v1528_v20 = vmul.f32 %v5007_v49, %v1464_v5 }
 0x18e   : > { %v727_v6 = vadd.f32 %v3784_v2, %v5000_v44  ;;  %v718_v8 = vpop.f32.mrb[9].mxu0  ;;  %v5104_v11 = vadd.f32 %v5013_v59, %v1018_v37  ;;  %v1236_v15 = vpop.f32.mrb[9].mxu1  ;;  %v5108_v17 = vadd.f32 %v5013_v59, %v1530_v4  ;;  %v1245_v22 = vadd.f32 %v3854_v7, %v5000_v44 }
 0x18f   : > { %v3785_v16 = vpop.f32.mrb[10].mxu0  ;;  %v3855_v23 = vpop.f32.mrb[10].mxu1  ;;  %v5115_v29 = vadd.f32 %v5013_v59, %v1016_v12  ;;  %v719_v32 = vadd.f32 %v5000_v44, %v718_v8  ;;  %v1237_v33 = vadd.f32 %v5000_v44, %v1236_v15  ;;  %v5122_v45 = vadd.f32 %v5013_v59, %v1528_v20 }
 0x190   : > { %v951_v21 = vmax.f32 %v727_v6, 0.0  ;;  %v721_v27 = vpop.f32.mrb[11].mxu0  ;;  %v1239_v34 = vpop.f32.mrb[11].mxu1  ;;  %v1469_v47 = vmax.f32 %v1245_v22, 0.0  ;;  %v730_v52 = vadd.f32 %v3785_v16, %v5000_v44  ;;  %v1248_v53 = vadd.f32 %v3855_v23, %v5000_v44 }
 0x191   : > { %v949_v48 = vmax.f32 %v719_v32, 0.0  ;;  %v1467_v51 = vmax.f32 %v1237_v33, 0.0  ;;  %v722_v57 = vadd.f32 %v5000_v44, %v721_v27  ;;  %v1240_v2 = vadd.f32 %v5000_v44, %v1239_v34 }
 0x192   : > { %v1021_v46 = vmul.f32 %v5007_v49, %v951_v21  ;;  %3967 = vmatmul.mubr.msk.bf16.gmra.mrb[116].mxu0 %vm555_vm0, %v4878_v39  ;;  %4037 = vmatmul.mubr.msk.bf16.gmra.mrb[116].mxu1 %vm555_vm0, %v4878_v39  ;;  %v1533_v56 = vmul.f32 %v5007_v49, %v1469_v47  ;;  %v952_v61 = vmax.f32 %v730_v52, 0.0  ;;  %v1470_v62 = vmax.f32 %v1248_v53, 0.0 }
 0x193   : > { %3970 = vmatprep.mubr.msk.bf16.mxu0 %vm555_vm0, %v4881_v40  ;;  %4040 = vmatprep.mubr.msk.bf16.mxu1 %vm555_vm0, %v4881_v40  ;;  %v1019_v60 = vmul.f32 %v5007_v49, %v949_v48  ;;  %v1531_v39 = vmul.f32 %v5007_v49, %v1467_v51  ;;  %v950_v1 = vmax.f32 %v722_v57, 0.0  ;;  %v1468_v22 = vmax.f32 %v1240_v2, 0.0 }
 0x194   : > { %v5136_v55 = vadd.f32 %v5013_v59, %v1021_v46  ;;  %v5145_v37 = vadd.f32 %v5013_v59, %v1533_v56  ;;  %v1022_v8 = vmul.f32 %v5007_v49, %v952_v61  ;;  %v1534_v12 = vmul.f32 %v5007_v49, %v1470_v62 }
 0x195   : > { %v3788_v0 = vpop.f32.mrb[12].mxu0  ;;  %v3858_v5 = vpop.f32.mrb[12].mxu1  ;;  %v5150_v7 = vadd.f32 %v5013_v59, %v1019_v60  ;;  %v5153_v40 = vadd.f32 %v5013_v59, %v1531_v39  ;;  %v1020_v21 = vmul.f32 %v5007_v49, %v950_v1  ;;  %v1532_v52 = vmul.f32 %v5007_v49, %v1468_v22 }
 0x196   : > { %v743_v4 = vadd.f32 %v3788_v0, %v5000_v44  ;;  %v734_v6 = vpop.f32.mrb[13].mxu0  ;;  %v1252_v15 = vpop.f32.mrb[13].mxu1  ;;  %v5163_v34 = vadd.f32 %v5013_v59, %v1022_v8  ;;  %v5166_v46 = vadd.f32 %v5013_v59, %v1534_v12  ;;  %v1261_v47 = vadd.f32 %v3858_v5, %v5000_v44 }
 0x197   : > { %v3789_v16 = vpop.f32.mrb[14].mxu0  ;;  %v3859_v27 = vpop.f32.mrb[14].mxu1  ;;  %v5170_v51 = vadd.f32 %v5013_v59, %v1020_v21  ;;  %v735_v56 = vadd.f32 %v5000_v44, %v734_v6  ;;  %v1253_v39 = vadd.f32 %v5000_v44, %v1252_v15  ;;  %v5186_v62 = vadd.f32 %v5013_v59, %v1532_v52 }
 0x198   : > { %v955_v23 = vmax.f32 %v743_v4, 0.0  ;;  %v737_v32 = vpop.f32.mrb[15].mxu0  ;;  %7169 = vst [vmem:[#allocation16_spill] sm:$0xff] %v5166_v46  ;;  %v1255_v48 = vpop.f32.mrb[15].mxu1  ;;  %v1473_v60 = vmax.f32 %v1261_v47, 0.0  ;;  %v746_v61 = vadd.f32 %v3789_v16, %v5000_v44  ;;  %v1264_v2 = vadd.f32 %v3859_v27, %v5000_v44 }
 0x199   : > { %7170 = vst [vmem:[#allocation17_spill] sm:$0xff] %v5170_v51  ;;  %7171 = vst [vmem:[#allocation18_spill] sm:$0xff] %v5186_v62  ;;  %v953_v1 = vmax.f32 %v735_v56, 0.0  ;;  %v1471_v5 = vmax.f32 %v1253_v39, 0.0  ;;  %v1256_v21 = vadd.f32 %v5000_v44, %v1255_v48 }
 0x19a   : > { %v1025_v53 = vmul.f32 %v5007_v49, %v955_v23  ;;  %3971 = vmatmul.mubr.msk.bf16.gmra.mrb[120].mxu0 %vm555_vm0, %v4892_v41  ;;  %4041 = vmatmul.mubr.msk.bf16.gmra.mrb[120].mxu1 %vm555_vm0, %v4892_v41  ;;  %v1537_v4 = vmul.f32 %v5007_v49, %v1473_v60  ;;  %v956_v6 = vmax.f32 %v746_v61, 0.0  ;;  %v738_v41 = vadd.f32 %v5000_v44, %v737_v32 }
 0x19b   : > { %3974 = vmatprep.mubr.msk.bf16.mxu0 %vm555_vm0, %v4895_v42  ;;  %4044 = vmatprep.mubr.msk.bf16.mxu1 %vm555_vm0, %v4895_v42  ;;  %v1023_v15 = vmul.f32 %v5007_v49, %v953_v1  ;;  %v1474_v16 = vmax.f32 %v1264_v2, 0.0  ;;  %v1535_v42 = vmul.f32 %v5007_v49, %v1471_v5  ;;  %v1472_v39 = vmax.f32 %v1256_v21, 0.0 }
 0x19c   : > { %v5189_v0 = vadd.f32 %v5013_v59, %v1025_v53  ;;  %v5201_v27 = vadd.f32 %v5013_v59, %v1537_v4  ;;  %v1026_v47 = vmul.f32 %v5007_v49, %v956_v6  ;;  %v954_v52 = vmax.f32 %v738_v41, 0.0 }
 0x19d   : > { %v3792_v8 = vpop.f32.mrb[16].mxu0  ;;  %v3862_v22 = vpop.f32.mrb[16].mxu1  ;;  %v5206_v56 = vadd.f32 %v5013_v59, %v1023_v15  ;;  %v1538_v60 = vmul.f32 %v5007_v49, %v1474_v16  ;;  %v5213_v4 = vadd.f32 %v5013_v59, %v1535_v42  ;;  %v1536_v16 = vmul.f32 %v5007_v49, %v1472_v39 }
 0x19e   : > { %7172 = vst [vmem:[#allocation19_spill] sm:$0xff] %v5189_v0  ;;  %v750_v23 = vpop.f32.mrb[17].mxu0  ;;  %7173 = vst [vmem:[#allocation20_spill] sm:$0xff] %v5201_v27  ;;  %v1268_v32 = vpop.f32.mrb[17].mxu1  ;;  %v759_v48 = vadd.f32 %v3792_v8, %v5000_v44  ;;  %v5216_v5 = vadd.f32 %v5013_v59, %v1026_v47  ;;  %v1024_v6 = vmul.f32 %v5007_v49, %v954_v52 }
 0x19f   : > { %v3793_v53 = vpop.f32.mrb[18].mxu0  ;;  %7174 = vst [vmem:[#allocation21_spill] sm:$0xff] %v5206_v56  ;;  %v3863_v61 = vpop.f32.mrb[18].mxu1  ;;  %7175 = vst [vmem:[#allocation22_spill] sm:$0xff] %v5213_v4  ;;  %v5220_v15 = vadd.f32 %v5013_v59, %v1538_v60  ;;  %v1277_v21 = vadd.f32 %v3862_v22, %v5000_v44  ;;  %v751_v52 = vadd.f32 %v5000_v44, %v750_v23 }
 0x1a0   : > { %v753_v1 = vpop.f32.mrb[19].mxu0  ;;  %7176 = vst [vmem:[#allocation23_spill] sm:$0xff] %v5216_v5  ;;  %v1271_v41 = vpop.f32.mrb[19].mxu1  ;;  %v959_v8 = vmax.f32 %v759_v48, 0.0  ;;  %v5229_v47 = vadd.f32 %v5013_v59, %v1024_v6  ;;  %v1269_v2 = vadd.f32 %v5000_v44, %v1268_v32  ;;  %v5238_v22 = vadd.f32 %v5013_v59, %v1536_v16 }
 0x1a1   : > { %7177 = vst [vmem:[#allocation24_spill] sm:$0xff] %v5220_v15  ;;  %v1477_v48 = vmax.f32 %v1277_v21, 0.0  ;;  %v957_v42 = vmax.f32 %v751_v52, 0.0  ;;  %v762_v6 = vadd.f32 %v3793_v53, %v5000_v44  ;;  %v1280_v23 = vadd.f32 %v3863_v61, %v5000_v44 }
 0x1a2   : > { %3975 = vmatmul.mubr.msk.bf16.gmra.mrb[124].mxu0 %vm555_vm0, %v4906_v43  ;;  %7178 = vst [vmem:[#allocation25_spill] sm:$0xff] %v5229_v47  ;;  %4045 = vmatmul.mubr.msk.bf16.gmra.mrb[124].mxu1 %vm555_vm0, %v4906_v43  ;;  %7179 = vst [vmem:[#allocation26_spill] sm:$0xff] %v5238_v22  ;;  %v1029_v39 = vmul.f32 %v5007_v49, %v959_v8  ;;  %v1475_v12 = vmax.f32 %v1269_v2, 0.0  ;;  %v754_v16 = vadd.f32 %v5000_v44, %v753_v1 }
 0x1a3   : > { %v1541_v60 = vmul.f32 %v5007_v49, %v1477_v48  ;;  %v1027_v21 = vmul.f32 %v5007_v49, %v957_v42  ;;  %v960_v53 = vmax.f32 %v762_v6, 0.0  ;;  %v1478_v52 = vmax.f32 %v1280_v23, 0.0 }
 0x1a4   : > { %v5246_v43 = vadd.f32 %v5013_v59, %v1029_v39  ;;  %v1539_v2 = vmul.f32 %v5007_v49, %v1475_v12  ;;  %v958_v32 = vmax.f32 %v754_v16, 0.0  ;;  %v1272_v39 = vadd.f32 %v5000_v44, %v1271_v41 }
 0x1a5   : > { %v3796_v57 = vpop.f32.mrb[20].mxu0  ;;  %v3866_v33 = vpop.f32.mrb[20].mxu1  ;;  %v5253_v54 = vadd.f32 %v5013_v59, %v1541_v60  ;;  %v5258_v28 = vadd.f32 %v5013_v59, %v1027_v21  ;;  %v1030_v12 = vmul.f32 %v5007_v49, %v960_v53  ;;  %v1542_v6 = vmul.f32 %v5007_v49, %v1478_v52 }
 0x1a6   : > { %7180 = vst [vmem:[#allocation27_spill] sm:$0xff] %v5246_v43  ;;  %v766_v8 = vpop.f32.mrb[21].mxu0  ;;  %v1284_v61 = vpop.f32.mrb[21].mxu1  ;;  %v775_v48 = vadd.f32 %v3796_v57, %v5000_v44  ;;  %v5261_v42 = vadd.f32 %v5013_v59, %v1539_v2  ;;  %v1028_v41 = vmul.f32 %v5007_v49, %v958_v32  ;;  %v1476_v16 = vmax.f32 %v1272_v39, 0.0 }
 0x1a7   : > { %v3797_v20 = vpop.f32.mrb[22].mxu0  ;;  %7181 = vst [vmem:[#allocation28_spill] sm:$0xff] %v5253_v54  ;;  %v3867_v35 = vpop.f32.mrb[22].mxu1  ;;  %7182 = vst [vmem:[#allocation29_spill] sm:$0xff] %v5258_v28  ;;  %v5271_v21 = vadd.f32 %v5013_v59, %v1030_v12  ;;  %v5274_v2 = vadd.f32 %v5013_v59, %v1542_v6  ;;  %v1293_v53 = vadd.f32 %v3866_v33, %v5000_v44 }
 0x1a8   : > { %v769_v1 = vpop.f32.mrb[23].mxu0  ;;  %7183 = vst [vmem:[#allocation30_spill] sm:$0xff] %v5261_v42  ;;  %v1287_v23 = vpop.f32.mrb[23].mxu1  ;;  %v963_v57 = vmax.f32 %v775_v48, 0.0  ;;  %v5278_v52 = vadd.f32 %v5013_v59, %v1028_v41  ;;  %v1540_v60 = vmul.f32 %v5007_v49, %v1476_v16  ;;  %v767_v39 = vadd.f32 %v5000_v44, %v766_v8 }
 0x1a9   : > { %7184 = vst [vmem:[#allocation31_spill] sm:$0xff] %v5271_v21  ;;  %7185 = vst [vmem:[#allocation32_spill] sm:$0xff] %v5274_v2  ;;  %v1481_v38 = vmax.f32 %v1293_v53, 0.0  ;;  %v1285_v12 = vadd.f32 %v5000_v44, %v1284_v61  ;;  %v778_v6 = vadd.f32 %v3797_v20, %v5000_v44  ;;  %v770_v61 = vadd.f32 %v5000_v44, %v769_v1 }
 0x1aa   : > { %7186 = vst [vmem:[#allocation33_spill] sm:$0xff] %v5278_v52  ;;  %v1033_v32 = vmul.f32 %v5007_v49, %v963_v57  ;;  %v5288_v33 = vadd.f32 %v5013_v59, %v1540_v60  ;;  %v961_v16 = vmax.f32 %v767_v39, 0.0  ;;  %v1296_v57 = vadd.f32 %v3867_v35, %v5000_v44 }
 0x1ab   : > { %v1545_v30 = vmul.f32 %v5007_v49, %v1481_v38  ;;  %v1479_v48 = vmax.f32 %v1285_v12, 0.0  ;;  %v964_v53 = vmax.f32 %v778_v6, 0.0  ;;  %v1288_v39 = vadd.f32 %v5000_v44, %v1287_v23 }
 0x1ac   : > { %7187 = vst [vmem:[#allocation34_spill] sm:$0xff] %v5288_v33  ;;  %v5291_v41 = vadd.f32 %v5013_v59, %v1033_v32  ;;  %v1031_v2 = vmul.f32 %v5007_v49, %v961_v16  ;;  %v1482_v32 = vmax.f32 %v1296_v57, 0.0  ;;  %v962_v1 = vmax.f32 %v770_v61, 0.0 }
 0x1ad   : > { %v3800_v50 = vpop.f32.mrb[24].mxu0  ;;  %v3870_v36 = vpop.f32.mrb[24].mxu1  ;;  %v5301_v42 = vadd.f32 %v5013_v59, %v1545_v30  ;;  %v1543_v38 = vmul.f32 %v5007_v49, %v1479_v48  ;;  %v1034_v12 = vmul.f32 %v5007_v49, %v964_v53  ;;  %v1480_v16 = vmax.f32 %v1288_v39, 0.0 }
 0x1ae   : > { %7188 = vst [vmem:[#allocation35_spill] sm:$0xff] %v5291_v41  ;;  %v782_v8 = vpop.f32.mrb[25].mxu0  ;;  %v1300_v24 = vpop.f32.mrb[25].mxu1  ;;  %v5306_v28 = vadd.f32 %v5013_v59, %v1031_v2  ;;  %v1546_v60 = vmul.f32 %v5007_v49, %v1482_v32  ;;  %v791_v57 = vadd.f32 %v3800_v50, %v5000_v44  ;;  %v1032_v53 = vmul.f32 %v5007_v49, %v962_v1 }
 0x1af   : > { %v3801_v20 = vpop.f32.mrb[26].mxu0  ;;  %v3871_v21 = vpop.f32.mrb[26].mxu1  ;;  %7189 = vst [vmem:[#allocation36_spill] sm:$0xff] %v5301_v42  ;;  %v5313_v30 = vadd.f32 %v5013_v59, %v1543_v38  ;;  %v5316_v48 = vadd.f32 %v5013_v59, %v1034_v12  ;;  %v1544_v2 = vmul.f32 %v5007_v49, %v1480_v16  ;;  %v1309_v39 = vadd.f32 %v3870_v36, %v5000_v44 }
 0x1b0   : > { %v785_v35 = vpop.f32.mrb[27].mxu0  ;;  %v1303_v6 = vpop.f32.mrb[27].mxu1  ;;  %7190 = vst [vmem:[#allocation37_spill] sm:$0xff] %v5306_v28  ;;  %v5320_v61 = vadd.f32 %v5013_v59, %v1546_v60  ;;  %v967_v32 = vmax.f32 %v791_v57, 0.0  ;;  %v5327_v23 = vadd.f32 %v5013_v59, %v1032_v53  ;;  %v783_v38 = vadd.f32 %v5000_v44, %v782_v8 }
 0x1b1   : > { %7191 = vst [vmem:[#allocation38_spill] sm:$0xff] %v5313_v30  ;;  %7192 = vst [vmem:[#allocation39_spill] sm:$0xff] %v5316_v48  ;;  %v1301_v12 = vadd.f32 %v5000_v44, %v1300_v24  ;;  %v5334_v1 = vadd.f32 %v5013_v59, %v1544_v2  ;;  %v1485_v36 = vmax.f32 %v1309_v39, 0.0  ;;  %v794_v53 = vadd.f32 %v3801_v20, %v5000_v44 }
 0x1b2   : > { %7193 = vst [vmem:[#allocation40_spill] sm:$0xff] %v5320_v61  ;;  %7194 = vst [vmem:[#allocation41_spill] sm:$0xff] %v5327_v23  ;;  %v1037_v16 = vmul.f32 %v5007_v49, %v967_v32  ;;  %v965_v50 = vmax.f32 %v783_v38, 0.0  ;;  %v1312_v8 = vadd.f32 %v3871_v21, %v5000_v44  ;;  %v786_v32 = vadd.f32 %v5000_v44, %v785_v35 }
 0x1b3   : > { %7195 = vst [vmem:[#allocation42_spill] sm:$0xff] %v5334_v1  ;;  %v1483_v30 = vmax.f32 %v1301_v12, 0.0  ;;  %v1549_v2 = vmul.f32 %v5007_v49, %v1485_v36  ;;  %v968_v12 = vmax.f32 %v794_v53, 0.0 }
 0x1b4   : > { %v5342_v60 = vadd.f32 %v5013_v59, %v1037_v16  ;;  %v1035_v38 = vmul.f32 %v5007_v49, %v965_v50  ;;  %v1486_v21 = vmax.f32 %v1312_v8, 0.0  ;;  %v966_v33 = vmax.f32 %v786_v32, 0.0 }
 0x1b5   : > { %v3804_v42 = vpop.f32.mrb[28].mxu0  ;;  %v3874_v57 = vpop.f32.mrb[28].mxu1  ;;  %v1547_v20 = vmul.f32 %v5007_v49, %v1483_v30  ;;  %v5349_v52 = vadd.f32 %v5013_v59, %v1549_v2  ;;  %v1304_v16 = vadd.f32 %v5000_v44, %v1303_v6  ;;  %v1038_v50 = vmul.f32 %v5007_v49, %v968_v12 }
 0x1b6   : > { %v798_v41 = vpop.f32.mrb[29].mxu0  ;;  %v1316_v28 = vpop.f32.mrb[29].mxu1  ;;  %7196 = vst [vmem:[#allocation43_spill] sm:$0xff] %v5342_v60  ;;  %v807_v1 = vadd.f32 %v3804_v42, %v5000_v44  ;;  %v5354_v36 = vadd.f32 %v5013_v59, %v1035_v38  ;;  %v1550_v30 = vmul.f32 %v5007_v49, %v1486_v21  ;;  %v1036_v8 = vmul.f32 %v5007_v49, %v966_v33 }
 0x1b7   : > { %v3805_v24 = vpop.f32.mrb[30].mxu0  ;;  %v3875_v39 = vpop.f32.mrb[30].mxu1  ;;  %7197 = vst [vmem:[#allocation44_spill] sm:$0xff] %v5349_v52  ;;  %v5357_v35 = vadd.f32 %v5013_v59, %v1547_v20  ;;  %v1484_v2 = vmax.f32 %v1304_v16, 0.0  ;;  %v5367_v6 = vadd.f32 %v5013_v59, %v1038_v50  ;;  %v1325_v20 = vadd.f32 %v3874_v57, %v5000_v44 }
 0x1b8   : > { %v801_v61 = vpop.f32.mrb[31].mxu0  ;;  %v1319_v48 = vpop.f32.mrb[31].mxu1  ;;  %7198 = vst [vmem:[#allocation45_spill] sm:$0xff] %v5354_v36  ;;  %v971_v32 = vmax.f32 %v807_v1, 0.0  ;;  %v5370_v38 = vadd.f32 %v5013_v59, %v1550_v30  ;;  %v5374_v21 = vadd.f32 %v5013_v59, %v1036_v8  ;;  %v799_v1 = vadd.f32 %v5000_v44, %v798_v41 }
 0x1b9   : > { %7199 = vst [vmem:[#allocation46_spill] sm:$0xff] %v5357_v35  ;;  %7200 = vst [vmem:[#allocation47_spill] sm:$0xff] %v5367_v6  ;;  %v1548_v53 = vmul.f32 %v5007_v49, %v1484_v2  ;;  %v1489_v35 = vmax.f32 %v1325_v20, 0.0  ;;  %v1317_v30 = vadd.f32 %v5000_v44, %v1316_v28  ;;  %v810_v57 = vadd.f32 %v3805_v24, %v5000_v44 }
 0x1ba   : > { %7201 = vst [vmem:[#allocation48_spill] sm:$0xff] %v5370_v38  ;;  %7202 = vst [vmem:[#allocation49_spill] sm:$0xff] %v5374_v21  ;;  %v1041_v33 = vmul.f32 %v5007_v49, %v971_v32  ;;  %v969_v32 = vmax.f32 %v799_v1, 0.0  ;;  %v1328_v41 = vadd.f32 %v3875_v39, %v5000_v44  ;;  %v802_v28 = vadd.f32 %v5000_v44, %v801_v61 }
 0x1bb   : > { %v5384_v8 = vadd.f32 %v5013_v59, %v1548_v53  ;;  %v1553_v50 = vmul.f32 %v5007_v49, %v1489_v35  ;;  %v1487_v20 = vmax.f32 %v1317_v30, 0.0  ;;  %v972_v38 = vmax.f32 %v810_v57, 0.0 }
 0x1bc   : > { %v5387_v2 = vadd.f32 %v5013_v59, %v1041_v33  ;;  %v1039_v53 = vmul.f32 %v5007_v49, %v969_v32  ;;  %v1490_v54 = vmax.f32 %v1328_v41, 0.0  ;;  %v1320_v33 = vadd.f32 %v5000_v44, %v1319_v48 }
 0x1bd   : > { %v3808_v12 = vpop.f32.mrb[32].mxu0  ;;  %v3878_v16 = vpop.f32.mrb[32].mxu1  ;;  %7203 = vst [vmem:[#allocation50_spill] sm:$0xff] %v5384_v8  ;;  %v5397_v1 = vadd.f32 %v5013_v59, %v1553_v50  ;;  %v1551_v39 = vmul.f32 %v5007_v49, %v1487_v20  ;;  %v1042_v35 = vmul.f32 %v5007_v49, %v972_v38  ;;  %v970_v30 = vmax.f32 %v802_v28, 0.0 }
 0x1be   : > { %v814_v42 = vpop.f32.mrb[33].mxu0  ;;  %v1332_v36 = vpop.f32.mrb[33].mxu1  ;;  %7204 = vst [vmem:[#allocation51_spill] sm:$0xff] %v5387_v2  ;;  %v5402_v57 = vadd.f32 %v5013_v59, %v1039_v53  ;;  %v1554_v61 = vmul.f32 %v5007_v49, %v1490_v54  ;;  %v1488_v43 = vmax.f32 %v1320_v33, 0.0  ;;  %v823_v6 = vadd.f32 %v3808_v12, %v5000_v44 }
 0x1bf   : > { %v3809_v52 = vpop.f32.mrb[34].mxu0  ;;  %v3879_v60 = vpop.f32.mrb[34].mxu1  ;;  %7205 = vst [vmem:[#allocation52_spill] sm:$0xff] %v5397_v1  ;;  %v5409_v48 = vadd.f32 %v5013_v59, %v1551_v39  ;;  %v5412_v50 = vadd.f32 %v5013_v59, %v1042_v35  ;;  %v1040_v38 = vmul.f32 %v5007_v49, %v970_v30  ;;  %v1341_v12 = vadd.f32 %v3878_v16, %v5000_v44 }
 0x1c0   : > { %v817_v23 = vpop.f32.mrb[35].mxu0  ;;  %v1335_v24 = vpop.f32.mrb[35].mxu1  ;;  %7206 = vst [vmem:[#allocation53_spill] sm:$0xff] %v5402_v57  ;;  %v5416_v20 = vadd.f32 %v5013_v59, %v1554_v61  ;;  %v1552_v54 = vmul.f32 %v5007_v49, %v1488_v43  ;;  %v975_v28 = vmax.f32 %v823_v6, 0.0  ;;  %v815_v35 = vadd.f32 %v5000_v44, %v814_v42 }
 0x1c1   : > { %7207 = vst [vmem:[#allocation54_spill] sm:$0xff] %v5409_v48  ;;  %7208 = vst [vmem:[#allocation55_spill] sm:$0xff] %v5412_v50  ;;  %v5423_v32 = vadd.f32 %v5013_v59, %v1040_v38  ;;  %v1333_v30 = vadd.f32 %v5000_v44, %v1332_v36  ;;  %v1493_v2 = vmax.f32 %v1341_v12, 0.0  ;;  %v826_v57 = vadd.f32 %v3809_v52, %v5000_v44 }
 0x1c2   : > { %7209 = vst [vmem:[#allocation56_spill] sm:$0xff] %v5416_v20  ;;  %v5430_v6 = vadd.f32 %v5013_v59, %v1552_v54  ;;  %v1045_v16 = vmul.f32 %v5007_v49, %v975_v28  ;;  %v973_v48 = vmax.f32 %v815_v35, 0.0  ;;  %v1344_v42 = vadd.f32 %v3879_v60, %v5000_v44 }
 0x1c3   : > { %7210 = vst [vmem:[#allocation57_spill] sm:$0xff] %v5423_v32  ;;  %v1491_v38 = vmax.f32 %v1333_v30, 0.0  ;;  %v1557_v54 = vmul.f32 %v5007_v49, %v1493_v2  ;;  %v818_v28 = vadd.f32 %v5000_v44, %v817_v23  ;;  %v976_v30 = vmax.f32 %v826_v57, 0.0 }
 0x1c4   : > { %7211 = vst [vmem:[#allocation58_spill] sm:$0xff] %v5430_v6  ;;  %v5438_v43 = vadd.f32 %v5013_v59, %v1045_v16  ;;  %v1043_v12 = vmul.f32 %v5007_v49, %v973_v48  ;;  %v1494_v20 = vmax.f32 %v1344_v42, 0.0  ;;  %v1336_v50 = vadd.f32 %v5000_v44, %v1335_v24 }
 0x1c5   : > { %v3812_v41 = vpop.f32.mrb[36].mxu0  ;;  %v3882_v53 = vpop.f32.mrb[36].mxu1  ;;  %v1555_v35 = vmul.f32 %v5007_v49, %v1491_v38  ;;  %v5445_v52 = vadd.f32 %v5013_v59, %v1557_v54  ;;  %v974_v60 = vmax.f32 %v818_v28, 0.0  ;;  %v1046_v23 = vmul.f32 %v5007_v49, %v976_v30 }
 0x1c6   : > { %v830_v33 = vpop.f32.mrb[37].mxu0  ;;  %v1348_v1 = vpop.f32.mrb[37].mxu1  ;;  %7212 = vst [vmem:[#allocation59_spill] sm:$0xff] %v5438_v43  ;;  %v839_v21 = vadd.f32 %v3812_v41, %v5000_v44  ;;  %v5450_v16 = vadd.f32 %v5013_v59, %v1043_v12  ;;  %v1558_v48 = vmul.f32 %v5007_v49, %v1494_v20  ;;  %v1492_v54 = vmax.f32 %v1336_v50, 0.0 }
 0x1c7   : > { %v3813_v61 = vpop.f32.mrb[38].mxu0  ;;  %v3883_v8 = vpop.f32.mrb[38].mxu1  ;;  %7213 = vst [vmem:[#allocation60_spill] sm:$0xff] %v5445_v52  ;;  %v5453_v2 = vadd.f32 %v5013_v59, %v1555_v35  ;;  %v1044_v42 = vmul.f32 %v5007_v49, %v974_v60  ;;  %v5463_v35 = vadd.f32 %v5013_v59, %v1046_v23  ;;  %v1357_v20 = vadd.f32 %v3882_v53, %v5000_v44 }
 0x1c8   : > { %v833_v39 = vpop.f32.mrb[39].mxu0  ;;  %v1351_v36 = vpop.f32.mrb[39].mxu1  ;;  %7214 = vst [vmem:[#allocation61_spill] sm:$0xff] %v5450_v16  ;;  %v979_v24 = vmax.f32 %v839_v21, 0.0  ;;  %v5466_v30 = vadd.f32 %v5013_v59, %v1558_v48  ;;  %v1556_v21 = vmul.f32 %v5007_v49, %v1492_v54  ;;  %v831_v60 = vadd.f32 %v5000_v44, %v830_v33 }
 0x1c9   : > { %7215 = vst [vmem:[#allocation62_spill] sm:$0xff] %v5453_v2  ;;  %7216 = vst [vmem:[#allocation63_spill] sm:$0xff] %v5463_v35  ;;  %v5470_v38 = vadd.f32 %v5013_v59, %v1044_v42  ;;  %v1497_v48 = vmax.f32 %v1357_v20, 0.0  ;;  %v1349_v16 = vadd.f32 %v5000_v44, %v1348_v1  ;;  %v842_v53 = vadd.f32 %v3813_v61, %v5000_v44 }
 0x1ca   : > { %7217 = vst [vmem:[#allocation64_spill] sm:$0xff] %v5466_v30  ;;  %v1049_v50 = vmul.f32 %v5007_v49, %v979_v24  ;;  %v5480_v42 = vadd.f32 %v5013_v59, %v1556_v21  ;;  %v977_v24 = vmax.f32 %v831_v60, 0.0  ;;  %v1360_v33 = vadd.f32 %v3883_v8, %v5000_v44 }
 0x1cb   : > { %7218 = vst [vmem:[#allocation65_spill] sm:$0xff] %v5470_v38  ;;  %v1561_v43 = vmul.f32 %v5007_v49, %v1497_v48  ;;  %v1495_v22 = vmax.f32 %v1349_v16, 0.0  ;;  %v980_v47 = vmax.f32 %v842_v53, 0.0  ;;  %v834_v20 = vadd.f32 %v5000_v44, %v833_v39 }
 0x1cc   : > { %7219 = vst [vmem:[#allocation66_spill] sm:$0xff] %v5480_v42  ;;  %v5483_v54 = vadd.f32 %v5013_v59, %v1049_v50  ;;  %v1047_v61 = vmul.f32 %v5007_v49, %v977_v24  ;;  %v1498_v23 = vmax.f32 %v1360_v33, 0.0  ;;  %v1352_v21 = vadd.f32 %v5000_v44, %v1351_v36 }
 0x1cd   : > { %v3816_v57 = vpop.f32.mrb[40].mxu0  ;;  %v3886_v28 = vpop.f32.mrb[40].mxu1  ;;  %v5493_v50 = vadd.f32 %v5013_v59, %v1561_v43  ;;  %v1559_v60 = vmul.f32 %v5007_v49, %v1495_v22  ;;  %v1050_v8 = vmul.f32 %v5007_v49, %v980_v47  ;;  %v978_v48 = vmax.f32 %v834_v20, 0.0 }
 0x1ce   : > { %v846_v41 = vpop.f32.mrb[41].mxu0  ;;  %v1364_v6 = vpop.f32.mrb[41].mxu1  ;;  %7220 = vst [vmem:[#allocation67_spill] sm:$0xff] %v5483_v54  ;;  %v5498_v53 = vadd.f32 %v5013_v59, %v1047_v61  ;;  %v1562_v39 = vmul.f32 %v5007_v49, %v1498_v23  ;;  %v1496_v1 = vmax.f32 %v1352_v21, 0.0  ;;  %v855_v24 = vadd.f32 %v3816_v57, %v5000_v44 }
 0x1cf   : > { %v3817_v32 = vpop.f32.mrb[42].mxu0  ;;  %v3887_v12 = vpop.f32.mrb[42].mxu1  ;;  %7221 = vst [vmem:[#allocation68_spill] sm:$0xff] %v5493_v50  ;;  %v5507_v22 = vadd.f32 %v5013_v59, %v1559_v60  ;;  %v5510_v47 = vadd.f32 %v5013_v59, %v1050_v8  ;;  %v1048_v36 = vmul.f32 %v5007_v49, %v978_v48  ;;  %v1373_v38 = vadd.f32 %v3886_v28, %v5000_v44 }
 0x1d0   : > { %v849_v2 = vpop.f32.mrb[43].mxu0  ;;  %v1367_v52 = vpop.f32.mrb[43].mxu1  ;;  %7222 = vst [vmem:[#allocation69_spill] sm:$0xff] %v5498_v53  ;;  %v5514_v23 = vadd.f32 %v5013_v59, %v1562_v39  ;;  %v1560_v57 = vmul.f32 %v5007_v49, %v1496_v1  ;;  %v983_v21 = vmax.f32 %v855_v24, 0.0  ;;  %v847_v48 = vadd.f32 %v5000_v44, %v846_v41 }
 0x1d1   : > { %7223 = vst [vmem:[#allocation70_spill] sm:$0xff] %v5507_v22  ;;  %7224 = vst [vmem:[#allocation71_spill] sm:$0xff] %v5510_v47  ;;  %v5523_v8 = vadd.f32 %v5013_v59, %v1048_v36  ;;  %v1365_v50 = vadd.f32 %v5000_v44, %v1364_v6  ;;  %v1501_v54 = vmax.f32 %v1373_v38, 0.0  ;;  %v858_v36 = vadd.f32 %v3817_v32, %v5000_v44  ;;  %v5582_v47 = vld [vmem:[#allocation7] ss:$0 sm:$0xff] }
 0x1d2   : > { %7225 = vst [vmem:[#allocation72_spill] sm:$0xff] %v5514_v23  ;;  %v5532_v28 = vadd.f32 %v5013_v59, %v1560_v57  ;;  %v1053_v24 = vmul.f32 %v5007_v49, %v983_v21  ;;  %v981_v35 = vmax.f32 %v847_v48, 0.0  ;;  %v1376_v22 = vadd.f32 %v3887_v12, %v5000_v44 }
 0x1d3   : > { %7226 = vst [vmem:[#allocation73_spill] sm:$0xff] %v5523_v8  ;;  %v1499_v60 = vmax.f32 %v1365_v50, 0.0  ;;  %v1565_v1 = vmul.f32 %v5007_v49, %v1501_v54  ;;  %v850_v57 = vadd.f32 %v5000_v44, %v849_v2  ;;  %v984_v21 = vmax.f32 %v858_v36, 0.0 }
 0x1d4   : > { %7227 = vst [vmem:[#allocation74_spill] sm:$0xff] %v5532_v28  ;;  %v5540_v41 = vadd.f32 %v5013_v59, %v1053_v24  ;;  %v1051_v23 = vmul.f32 %v5007_v49, %v981_v35  ;;  %v1502_v50 = vmax.f32 %v1376_v22, 0.0  ;;  %v1368_v6 = vadd.f32 %v5000_v44, %v1367_v52 }
 0x1d5   : > { %v3820_v16 = vpop.f32.mrb[44].mxu0  ;;  %v3890_v33 = vpop.f32.mrb[44].mxu1  ;;  %v1563_v38 = vmul.f32 %v5007_v49, %v1499_v60  ;;  %v5547_v32 = vadd.f32 %v5013_v59, %v1565_v1  ;;  %v982_v12 = vmax.f32 %v850_v57, 0.0  ;;  %v1054_v22 = vmul.f32 %v5007_v49, %v984_v21 }
 0x1d6   : > { %v5502_v42 = vpop.f32.mrb[45].mxu0  ;;  %v1380_v20 = vpop.f32.mrb[45].mxu1  ;;  %7228 = vst [vmem:[#allocation75_spill] sm:$0xff] %v5540_v41  ;;  %v871_v24 = vadd.f32 %v3820_v16, %v5000_v44  ;;  %v5556_v2 = vadd.f32 %v5013_v59, %v1051_v23  ;;  %v1566_v60 = vmul.f32 %v5007_v49, %v1502_v50  ;;  %v1500_v16 = vmax.f32 %v1368_v6, 0.0 }
 0x1d7   : > { %v3821_v61 = vpop.f32.mrb[46].mxu0  ;;  %v3891_v30 = vpop.f32.mrb[46].mxu1  ;;  %7229 = vst [vmem:[#allocation76_spill] sm:$0xff] %v5547_v32  ;;  %v5559_v35 = vadd.f32 %v5013_v59, %v1563_v38  ;;  %v1052_v52 = vmul.f32 %v5007_v49, %v982_v12  ;;  %v5577_v21 = vadd.f32 %v5013_v59, %v1054_v22  ;;  %v1389_v44 = vadd.f32 %v5582_v47, %v3890_v33  ;;  %v5590_v12 = vld [vmem:[#allocation8] ss:$0 sm:$0xff] }
 0x1d8   : > { %v5518_v43 = vpop.f32.mrb[47].mxu0  ;;  %v5527_v39 = vpop.f32.mrb[47].mxu1  ;;  %7230 = vst [vmem:[#allocation77_spill] sm:$0xff] %v5556_v2  ;;  %v987_v57 = vmax.f32 %v871_v24, 0.0  ;;  %v5580_v50 = vadd.f32 %v5013_v59, %v1566_v60  ;;  %v1564_v24 = vmul.f32 %v5590_v12, %v1500_v16  ;;  %v863_v22 = vadd.f32 %v5582_v47, %v5502_v42  ;;  %v5600_v32 = vld [vmem:[#allocation10] ss:$0 sm:$0xff] }
 0x1d9   : > { %7231 = vst [vmem:[#allocation78_spill] sm:$0xff] %v5559_v35  ;;  %7232 = vst [vmem:[#allocation79_spill] sm:$0xff] %v5577_v21  ;;  %v5588_v6 = vadd.f32 %v5013_v59, %v1052_v52  ;;  %v1505_v35 = vmax.f32 %v1389_v44, 0.0  ;;  %v1381_v33 = vadd.f32 %v5582_v47, %v1380_v20  ;;  %v874_v2 = vadd.f32 %v5582_v47, %v3821_v61 }
 0x1da   : > { %7233 = vst [vmem:[#allocation80_spill] sm:$0xff] %v5580_v50  ;;  %v1057_v38 = vmul.f32 %v5590_v12, %v987_v57  ;;  %v5603_v59 = vadd.f32 %v5600_v32, %v1564_v24  ;;  %v985_v16 = vmax.f32 %v863_v22, 0.0  ;;  %v1392_v57 = vadd.f32 %v5582_v47, %v3891_v30 }
 0x1db   : > { %7234 = vst [vmem:[#allocation81_spill] sm:$0xff] %v5588_v6  ;;  %v1569_v42 = vmul.f32 %v5590_v12, %v1505_v35  ;;  %v1503_v41 = vmax.f32 %v1381_v33, 0.0  ;;  %v988_v60 = vmax.f32 %v874_v2, 0.0  ;;  %v866_v20 = vadd.f32 %v5582_v47, %v5518_v43 }
 0x1dc   : > { %7235 = vst [vmem:[#allocation82_spill] sm:$0xff] %v5603_v59  ;;  %v5606_v52 = vadd.f32 %v5600_v32, %v1057_v38  ;;  %v1055_v24 = vmul.f32 %v5590_v12, %v985_v16  ;;  %v1506_v50 = vmax.f32 %v1392_v57, 0.0  ;;  %v1384_v38 = vadd.f32 %v5582_v47, %v5527_v39 }
 0x1dd   : > { %v3824_v48 = vpop.f32.mrb[48].mxu0  ;;  %v5551_v28 = vpop.f32.mrb[48].mxu1  ;;  %v5622_v35 = vadd.f32 %v5600_v32, %v1569_v42  ;;  %v1567_v2 = vmul.f32 %v5590_v12, %v1503_v41  ;;  %v1058_v43 = vmul.f32 %v5590_v12, %v988_v60  ;;  %v986_v33 = vmax.f32 %v866_v20, 0.0 }
 0x1de   : > { %v5553_v54 = vpop.f32.mrb[49].mxu0  ;;  %v5563_v1 = vpop.f32.mrb[49].mxu1  ;;  %7236 = vst [vmem:[#allocation83_spill] sm:$0xff] %v5606_v52  ;;  %v5631_v16 = vadd.f32 %v5600_v32, %v1055_v24  ;;  %v1570_v39 = vmul.f32 %v5590_v12, %v1506_v50  ;;  %v1504_v57 = vmax.f32 %v1384_v38, 0.0  ;;  %v887_v59 = vadd.f32 %v5582_v47, %v3824_v48 }
 0x1df   : > { %v5565_v36 = vpop.f32.mrb[50].mxu0  ;;  %v5570_v23 = vpop.f32.mrb[50].mxu1  ;;  %7237 = vst [vmem:[#allocation84_spill] sm:$0xff] %v5622_v35  ;;  %v5642_v60 = vadd.f32 %v5600_v32, %v1567_v2  ;;  %v5645_v20 = vadd.f32 %v5600_v32, %v1058_v43  ;;  %v1056_v24 = vmul.f32 %v5590_v12, %v986_v33  ;;  %v1405_v15 = vadd.f32 %v5582_v47, %v5551_v28 }
 0x1e0   : > { %v5572_v8 = vpop.f32.mrb[51].mxu0  ;;  %v5585_v49 = vpop.f32.mrb[51].mxu1  ;;  %7238 = vst [vmem:[#allocation85_spill] sm:$0xff] %v5631_v16  ;;  %v5651_v50 = vadd.f32 %v5600_v32, %v1570_v39  ;;  %v1568_v48 = vmul.f32 %v5590_v12, %v1504_v57  ;;  %v991_v38 = vmax.f32 %v887_v59, 0.0  ;;  %v879_v43 = vadd.f32 %v5582_v47, %v5553_v54 }
 0x1e1   : > { %7239 = vst [vmem:[#allocation86_spill] sm:$0xff] %v5642_v60  ;;  %7240 = vst [vmem:[#allocation87_spill] sm:$0xff] %v5645_v20  ;;  %v5659_v41 = vadd.f32 %v5600_v32, %v1056_v24  ;;  %v1397_v33 = vadd.f32 %v5582_v47, %v5563_v1  ;;  %v1509_v57 = vmax.f32 %v1405_v15, 0.0  ;;  %v890_v24 = vadd.f32 %v5582_v47, %v5565_v36 }
 0x1e2   : > { %7241 = vst [vmem:[#allocation88_spill] sm:$0xff] %v5651_v50  ;;  %v5668_v59 = vadd.f32 %v5600_v32, %v1568_v48  ;;  %v1061_v28 = vmul.f32 %v5590_v12, %v991_v38  ;;  %v989_v35 = vmax.f32 %v879_v43, 0.0  ;;  %v1408_v54 = vadd.f32 %v5582_v47, %v5570_v23 }
 0x1e3   : > { %7242 = vst [vmem:[#allocation89_spill] sm:$0xff] %v5659_v41  ;;  %v1507_v2 = vmax.f32 %v1397_v33, 0.0  ;;  %v1573_v48 = vmul.f32 %v5590_v12, %v1509_v57  ;;  %v882_v15 = vadd.f32 %v5582_v47, %v5572_v8  ;;  %v992_v33 = vmax.f32 %v890_v24, 0.0 }
 0x1e4   : > { %7243 = vst [vmem:[#allocation90_spill] sm:$0xff] %v5668_v59  ;;  %v5680_v39 = vadd.f32 %v5600_v32, %v1061_v28  ;;  %v1059_v36 = vmul.f32 %v5590_v12, %v989_v35  ;;  %v1510_v50 = vmax.f32 %v1408_v54, 0.0  ;;  %v1400_v8 = vadd.f32 %v5582_v47, %v5585_v49 }
 0x1e5   : > { %v3828_v44 = vpop.f32.mrb[52].mxu0  ;;  %v5617_v22 = vpop.f32.mrb[52].mxu1  ;;  %v1571_v23 = vmul.f32 %v5590_v12, %v1507_v2  ;;  %v5696_v28 = vadd.f32 %v5600_v32, %v1573_v48  ;;  %v990_v57 = vmax.f32 %v882_v15, 0.0  ;;  %v1062_v54 = vmul.f32 %v5590_v12, %v992_v33 }
 0x1e6   : > { %v5619_v30 = vpop.f32.mrb[53].mxu0  ;;  %v5626_v21 = vpop.f32.mrb[53].mxu1  ;;  %7244 = vst [vmem:[#allocation91_spill] sm:$0xff] %v5680_v39  ;;  %v903_v59 = vadd.f32 %v5582_v47, %v3828_v44  ;;  %v5706_v2 = vadd.f32 %v5600_v32, %v1059_v36  ;;  %v1574_v48 = vmul.f32 %v5590_v12, %v1510_v50  ;;  %v1508_v16 = vmax.f32 %v1400_v8, 0.0 }
 0x1e7   : > { %v5628_v61 = vpop.f32.mrb[54].mxu0  ;;  %v5635_v6 = vpop.f32.mrb[54].mxu1  ;;  %7245 = vst [vmem:[#allocation92_spill] sm:$0xff] %v5696_v28  ;;  %v5709_v24 = vadd.f32 %v5600_v32, %v1571_v23  ;;  %v1060_v44 = vmul.f32 %v5590_v12, %v990_v57  ;;  %v5721_v5 = vadd.f32 %v5600_v32, %v1062_v54  ;;  %v1421_v50 = vadd.f32 %v5582_v47, %v5617_v22 }
 0x1e8   : > { %v5637_v42 = vpop.f32.mrb[55].mxu0  ;;  %v5648_v53 = vpop.f32.mrb[55].mxu1  ;;  %7246 = vst [vmem:[#allocation93_spill] sm:$0xff] %v5706_v2  ;;  %v995_v52 = vmax.f32 %v903_v59, 0.0  ;;  %v5724_v23 = vadd.f32 %v5600_v32, %v1574_v48  ;;  %v1572_v49 = vmul.f32 %v5590_v12, %v1508_v16  ;;  %v895_v59 = vadd.f32 %v5582_v47, %v5619_v30 }
 0x1e9   : > { %7247 = vst [vmem:[#allocation94_spill] sm:$0xff] %v5709_v24  ;;  %7248 = vst [vmem:[#allocation95_spill] sm:$0xff] %v5721_v5  ;;  %v5729_v33 = vadd.f32 %v5600_v32, %v1060_v44  ;;  %v1513_v54 = vmax.f32 %v1421_v50, 0.0  ;;  %v1413_v48 = vadd.f32 %v5582_v47, %v5626_v21  ;;  %v906_v22 = vadd.f32 %v5582_v47, %v5628_v61 }
 0x1ea   : > { %7249 = vst [vmem:[#allocation96_spill] sm:$0xff] %v5724_v23  ;;  %v1065_v57 = vmul.f32 %v5590_v12, %v995_v52  ;;  %v5744_v44 = vadd.f32 %v5600_v32, %v1572_v49  ;;  %v993_v16 = vmax.f32 %v895_v59, 0.0  ;;  %v1424_v30 = vadd.f32 %v5582_v47, %v5635_v6 }
 0x1eb   : > { %7250 = vst [vmem:[#allocation97_spill] sm:$0xff] %v5729_v33  ;;  %v1577_v21 = vmul.f32 %v5590_v12, %v1513_v54  ;;  %v1511_v23 = vmax.f32 %v1413_v48, 0.0  ;;  %v996_v61 = vmax.f32 %v906_v22, 0.0  ;;  %v898_v5 = vadd.f32 %v5582_v47, %v5637_v42 }
 0x1ec   : > { %7251 = vst [vmem:[#allocation98_spill] sm:$0xff] %v5744_v44  ;;  %v5747_v52 = vadd.f32 %v5600_v32, %v1065_v57  ;;  %v1063_v6 = vmul.f32 %v5590_v12, %v993_v16  ;;  %v1514_v59 = vmax.f32 %v1424_v30, 0.0  ;;  %v1416_v2 = vadd.f32 %v5582_v47, %v5648_v53 }
 0x1ed   : > { %v5675_v60 = vpop.f32.mrb[56].mxu0  ;;  %v5685_v38 = vpop.f32.mrb[56].mxu1  ;;  %v5772_v48 = vadd.f32 %v5600_v32, %v1577_v21  ;;  %v1575_v42 = vmul.f32 %v5590_v12, %v1511_v23  ;;  %v1066_v22 = vmul.f32 %v5590_v12, %v996_v61  ;;  %v994_v39 = vmax.f32 %v898_v5, 0.0 }
 0x1ee   : > { %v5687_v43 = vpop.f32.mrb[57].mxu0  ;;  %v5691_v20 = vpop.f32.mrb[57].mxu1  ;;  %7252 = vst [vmem:[#allocation99_spill] sm:$0xff] %v5747_v52  ;;  %v5779_v16 = vadd.f32 %v5600_v32, %v1063_v6  ;;  %v1578_v30 = vmul.f32 %v5590_v12, %v1514_v59  ;;  %v1512_v53 = vmax.f32 %v1416_v2, 0.0  ;;  %v919_v57 = vadd.f32 %v5582_v47, %v5675_v60 }
 0x1ef   : > { %v5693_v1 = vpop.f32.mrb[58].mxu0  ;;  %v5701_v41 = vpop.f32.mrb[58].mxu1  ;;  %7253 = vst [vmem:[#allocation100_spill] sm:$0xff] %v5772_v48  ;;  %v5787_v44 = vadd.f32 %v5600_v32, %v1575_v42  ;;  %v5790_v23 = vadd.f32 %v5600_v32, %v1066_v22  ;;  %v1064_v5 = vmul.f32 %v5590_v12, %v994_v39  ;;  %v1437_v60 = vadd.f32 %v5582_v47, %v5685_v38 }
 0x1f0   : > { %v5703_v35 = vpop.f32.mrb[59].mxu0  ;;  %v5713_v15 = vpop.f32.mrb[59].mxu1  ;;  %7254 = vst [vmem:[#allocation101_spill] sm:$0xff] %v5779_v16  ;;  %v5794_v61 = vadd.f32 %v5600_v32, %v1578_v30  ;;  %v1576_v6 = vmul.f32 %v5590_v12, %v1512_v53  ;;  %v999_v2 = vmax.f32 %v919_v57, 0.0  ;;  %v911_v22 = vadd.f32 %v5582_v47, %v5687_v43 }
 0x1f1   : > { %7255 = vst [vmem:[#allocation102_spill] sm:$0xff] %v5787_v44  ;;  %7256 = vst [vmem:[#allocation103_spill] sm:$0xff] %v5790_v23  ;;  %v5802_v42 = vadd.f32 %v5600_v32, %v1064_v5  ;;  %v1429_v39 = vadd.f32 %v5582_v47, %v5691_v20  ;;  %v1517_v59 = vmax.f32 %v1437_v60, 0.0  ;;  %v922_v20 = vadd.f32 %v5582_v47, %v5693_v1 }
 0x1f2   : > { %7257 = vst [vmem:[#allocation104_spill] sm:$0xff] %v5794_v61  ;;  %v5813_v53 = vadd.f32 %v5600_v32, %v1576_v6  ;;  %v1069_v38 = vmul.f32 %v5590_v12, %v999_v2  ;;  %v997_v44 = vmax.f32 %v911_v22, 0.0  ;;  %v1440_v16 = vadd.f32 %v5582_v47, %v5701_v41 }
 0x1f3   : > { %7258 = vst [vmem:[#allocation105_spill] sm:$0xff] %v5802_v42  ;;  %v1515_v43 = vmax.f32 %v1429_v39, 0.0  ;;  %v1581_v60 = vmul.f32 %v5590_v12, %v1517_v59  ;;  %v914_v22 = vadd.f32 %v5582_v47, %v5703_v35  ;;  %v1000_v23 = vmax.f32 %v922_v20, 0.0 }
 0x1f4   : > { %7259 = vst [vmem:[#allocation106_spill] sm:$0xff] %v5813_v53  ;;  %v5831_v2 = vadd.f32 %v5600_v32, %v1069_v38  ;;  %v1067_v41 = vmul.f32 %v5590_v12, %v997_v44  ;;  %v1518_v52 = vmax.f32 %v1440_v16, 0.0  ;;  %v1432_v59 = vadd.f32 %v5582_v47, %v5713_v15 }
 0x1f5   : > { %v5741_v36 = vpop.f32.mrb[60].mxu0  ;;  %v5751_v8 = vpop.f32.mrb[60].mxu1  ;;  %v1579_v61 = vmul.f32 %v5590_v12, %v1515_v43  ;;  %v5845_v38 = vadd.f32 %v5600_v32, %v1581_v60  ;;  %v998_v6 = vmax.f32 %v914_v22, 0.0  ;;  %v1070_v16 = vmul.f32 %v5590_v12, %v1000_v23 }
 0x1f6   : > { %v5753_v50 = vpop.f32.mrb[61].mxu0  ;;  %v5758_v49 = vpop.f32.mrb[61].mxu1  ;;  %7260 = vst [vmem:[#allocation107_spill] sm:$0xff] %v5831_v2  ;;  %v935_v35 = vadd.f32 %v5582_v47, %v5741_v36  ;;  %v5852_v53 = vadd.f32 %v5600_v32, %v1067_v41  ;;  %v1582_v43 = vmul.f32 %v5590_v12, %v1518_v52  ;;  %v1516_v22 = vmax.f32 %v1432_v59, 0.0 }
 0x1f7   : > { %v5760_v24 = vpop.f32.mrb[62].mxu0  ;;  %v5767_v28 = vpop.f32.mrb[62].mxu1  ;;  %7261 = vst [vmem:[#allocation108_spill] sm:$0xff] %v5845_v38  ;;  %v5855_v44 = vadd.f32 %v5600_v32, %v1579_v61  ;;  %v1068_v60 = vmul.f32 %v5590_v12, %v998_v6  ;;  %v5865_v41 = vadd.f32 %v5600_v32, %v1070_v16  ;;  %v1453_v23 = vadd.f32 %v5582_v47, %v5751_v8 }
 0x1f8   : > { %v5769_v54 = vpop.f32.mrb[63].mxu0  ;;  %v5776_v4 = vpop.f32.mrb[63].mxu1  ;;  %7262 = vst [vmem:[#allocation109_spill] sm:$0xff] %v5852_v53  ;;  %v1003_v15 = vmax.f32 %v935_v35, 0.0  ;;  %v5868_v61 = vadd.f32 %v5600_v32, %v1582_v43  ;;  %v1580_v6 = vmul.f32 %v5590_v12, %v1516_v22  ;;  %v927_v35 = vadd.f32 %v5582_v47, %v5753_v50 }
 0x1f9   : > { %7263 = vst [vmem:[#allocation110_spill] sm:$0xff] %v5855_v44  ;;  %7264 = vst [vmem:[#allocation111_spill] sm:$0xff] %v5865_v41  ;;  %v5875_v20 = vadd.f32 %v5600_v32, %v1068_v60  ;;  %v1521_v8 = vmax.f32 %v1453_v23, 0.0  ;;  %v1445_v44 = vadd.f32 %v5582_v47, %v5758_v49  ;;  %v938_v60 = vadd.f32 %v5582_v47, %v5760_v24 }
 0x1fa   : > { %7265 = vst [vmem:[#allocation112_spill] sm:$0xff] %v5868_v61  ;;  %v1073_v59 = vmul.f32 %v5590_v12, %v1003_v15  ;;  %v5896_v50 = vadd.f32 %v5600_v32, %v1580_v6  ;;  %v1001_v38 = vmax.f32 %v927_v35, 0.0  ;;  %v1456_v23 = vadd.f32 %v5582_v47, %v5767_v28 }
 0x1fb   : > { %7266 = vst [vmem:[#allocation113_spill] sm:$0xff] %v5875_v20  ;;  %v1585_v24 = vmul.f32 %v5590_v12, %v1521_v8  ;;  %v1519_v61 = vmax.f32 %v1445_v44, 0.0  ;;  %v1004_v41 = vmax.f32 %v938_v60, 0.0  ;;  %v930_v2 = vadd.f32 %v5582_v47, %v5769_v54 }
 0x1fc   : > { %7267 = vst [vmem:[#allocation114_spill] sm:$0xff] %v5896_v50  ;;  %v5899_v53 = vadd.f32 %v5600_v32, %v1073_v59  ;;  %v1071_v35 = vmul.f32 %v5590_v12, %v1001_v38  ;;  %v1522_v42 = vmax.f32 %v1456_v23, 0.0  ;;  %v1448_v28 = vadd.f32 %v5582_v47, %v5776_v4 }
 0x1fd   : > { %v5808_v30 = vpop.f32.mrb[64].mxu0  ;;  %v5816_v21 = vpop.f32.mrb[64].mxu1  ;;  %v5918_v56 = vadd.f32 %v5600_v32, %v1585_v24  ;;  %v1583_v44 = vmul.f32 %v5590_v12, %v1519_v61  ;;  %v1074_v8 = vmul.f32 %v5590_v12, %v1004_v41  ;;  %v1002_v60 = vmax.f32 %v930_v2, 0.0 }
 0x1fe   : > { %v5818_v5 = vpop.f32.mrb[65].mxu0  ;;  %v5824_v48 = vpop.f32.mrb[65].mxu1  ;;  %7268 = vst [vmem:[#allocation115_spill] sm:$0xff] %v5899_v53  ;;  %v5923_v54 = vadd.f32 %v5600_v32, %v1071_v35  ;;  %v1586_v27 = vmul.f32 %v5590_v12, %v1522_v42  ;;  %v1520_v59 = vmax.f32 %v1448_v28, 0.0  ;;  %v1783_v38 = vadd.f32 %v5582_v47, %v5808_v30 }
 0x1ff   : > { %v5826_v57 = vpop.f32.mrb[66].mxu0  ;;  %v5836_v39 = vpop.f32.mrb[66].mxu1  ;;  %7269 = vst [vmem:[#allocation116_spill] sm:$0xff] %v5918_v56  ;;  %v5931_v23 = vadd.f32 %v5600_v32, %v1583_v44  ;;  %v5934_v61 = vadd.f32 %v5600_v32, %v1074_v8  ;;  %v1072_v2 = vmul.f32 %v5590_v12, %v1002_v60  ;;  %v2289_v30 = vadd.f32 %v5582_v47, %v5816_v21 }
 0x200   : > { %v5838_v1 = vpop.f32.mrb[67].mxu0  ;;  %v5842_v33 = vpop.f32.mrb[67].mxu1  ;;  %7270 = vst [vmem:[#allocation117_spill] sm:$0xff] %v5923_v54  ;;  %v5940_v24 = vadd.f32 %v5600_v32, %v1586_v27  ;;  %v1584_v42 = vmul.f32 %v5590_v12, %v1520_v59  ;;  %v2031_v35 = vmax.f32 %v1783_v38, 0.0  ;;  %v1775_v27 = vadd.f32 %v5582_v47, %v5818_v5 }
 0x201   : > { %7271 = vst [vmem:[#allocation118_spill] sm:$0xff] %v5931_v23  ;;  %7272 = vst [vmem:[#allocation119_spill] sm:$0xff] %v5934_v61  ;;  %v5952_v60 = vadd.f32 %v5600_v32, %v1072_v2  ;;  %v2537_v53 = vmax.f32 %v2289_v30, 0.0  ;;  %v2281_v5 = vadd.f32 %v5582_v47, %v5824_v48  ;;  %v1786_v54 = vadd.f32 %v5582_v47, %v5826_v57 }
 0x202   : > { %7273 = vst [vmem:[#allocation120_spill] sm:$0xff] %v5940_v24  ;;  %v5963_v38 = vadd.f32 %v5600_v32, %v1584_v42  ;;  %v2095_v56 = vmul.f32 %v5590_v12, %v2031_v35  ;;  %v2029_v23 = vmax.f32 %v1775_v27, 0.0  ;;  %v2292_v21 = vadd.f32 %v5582_v47, %v5836_v39 }
 0x203   : > { %7274 = vst [vmem:[#allocation121_spill] sm:$0xff] %v5952_v60  ;;  %v2601_v24 = vmul.f32 %v5590_v12, %v2537_v53  ;;  %v1778_v27 = vadd.f32 %v5582_v47, %v5838_v1  ;;  %v2535_v61 = vmax.f32 %v2281_v5, 0.0  ;;  %v2032_v50 = vmax.f32 %v1786_v54, 0.0 }
 0x204   : > { %7275 = vst [vmem:[#allocation122_spill] sm:$0xff] %v5963_v38  ;;  %v2159_v30 = vadd.f32 %v5600_v32, %v2095_v56  ;;  %v2093_v48 = vmul.f32 %v5590_v12, %v2029_v23  ;;  %v2538_v57 = vmax.f32 %v2292_v21, 0.0  ;;  %v2284_v0 = vadd.f32 %v5582_v47, %v5842_v33 }
 0x205   : > { %v5872_v52 = vpop.f32.mrb[68].mxu0  ;;  %v5881_v16 = vpop.f32.mrb[68].mxu1  ;;  %v2665_v20 = vadd.f32 %v5600_v32, %v2601_v24  ;;  %v2030_v39 = vmax.f32 %v1778_v27, 0.0  ;;  %v2599_v53 = vmul.f32 %v5590_v12, %v2535_v61  ;;  %v2096_v1 = vmul.f32 %v5590_v12, %v2032_v50 }
 0x206   : > { %v5883_v36 = vpop.f32.mrb[69].mxu0  ;;  %v5891_v22 = vpop.f32.mrb[69].mxu1  ;;  %v1799_v35 = vadd.f32 %v5582_v47, %v5872_v52  ;;  %v2157_v56 = vadd.f32 %v5600_v32, %v2093_v48  ;;  %v2602_v23 = vmul.f32 %v5590_v12, %v2538_v57  ;;  %v2536_v21 = vmax.f32 %v2284_v0, 0.0 }
 0x207   : > { %v5893_v15 = vpop.f32.mrb[70].mxu0  ;;  %v5903_v43 = vpop.f32.mrb[70].mxu1  ;;  %v2729_v54 = vmax.f32 %v2159_v30, %v2665_v20  ;;  %v2094_v24 = vmul.f32 %v5590_v12, %v2030_v39  ;;  %v2663_v52 = vadd.f32 %v5600_v32, %v2599_v53  ;;  %v2160_v48 = vadd.f32 %v5600_v32, %v2096_v1 }
 0x208   : > { %v5905_v49 = vpop.f32.mrb[71].mxu0  ;;  %v5910_v6 = vpop.f32.mrb[71].mxu1  ;;  %v2035_v27 = vmax.f32 %v1799_v35, 0.0  ;;  %v2666_v61 = vadd.f32 %v5600_v32, %v2602_v23  ;;  %v2305_v50 = vadd.f32 %v5582_v47, %v5881_v16  ;;  %v7276_v0 = vmax.f32 %v5028_v9, %v5035_v13 }
 0x209   : > { %v2158_v30 = vadd.f32 %v5600_v32, %v2094_v24  ;;  %v2600_v39 = vmul.f32 %v5590_v12, %v2536_v21  ;;  %v2727_v16 = vmax.f32 %v2157_v56, %v2663_v52  ;;  %v1791_v51 = vadd.f32 %v5582_v47, %v5883_v36 }
 0x20a   : > { %v2793_v35 = vmax.f32 %v7276_v0, %v2729_v54  ;;  %v2099_v53 = vmul.f32 %v5590_v12, %v2035_v27  ;;  %v2730_v60 = vmax.f32 %v2160_v48, %v2666_v61  ;;  %v2541_v62 = vmax.f32 %v2305_v50, 0.0 }
 0x20b   : > { %v2664_v13 = vadd.f32 %v5600_v32, %v2600_v39  ;;  %v2297_v24 = vadd.f32 %v5582_v47, %v5891_v22  ;;  %v7277_v21 = vmax.f32 %v5038_v14, %v5043_v18  ;;  %v7278_v56 = vmax.f32 %v5046_v19, %v5053_v25 }
 0x20c   : > { %v3565_v9 = vpack.c.bf16 %v2793_v35, %v2793_v35  ;;  %v2163_v54 = vadd.f32 %v5600_v32, %v2099_v53  ;;  %v2605_v36 = vmul.f32 %v5590_v12, %v2541_v62  ;;  %v2033_v48 = vmax.f32 %v1791_v51, 0.0 }
 0x20d   : > { %v5937_v41 = vpop.f32.mrb[72].mxu0  ;;  %v5945_v28 = vpop.f32.mrb[72].mxu1  ;;  %v2791_v27 = vmax.f32 %v7277_v21, %v2727_v16  ;;  %v2794_v52 = vmax.f32 %v7278_v56, %v2730_v60  ;;  %v2728_v61 = vmax.f32 %v2158_v30, %v2664_v13  ;;  %v2539_v22 = vmax.f32 %v2297_v24, 0.0 }
 0x20e   : > { %v5947_v44 = vpop.f32.mrb[73].mxu0  ;;  %v5956_v4 = vpop.f32.mrb[73].mxu1  ;;  %3114 = vst.msk [vmem:[%s6037_s24 + $0x8] sm:$0xf] %vm3111_vm1, %v3565_v9  ;;  %v1802_v14 = vadd.f32 %v5582_v47, %v5893_v15  ;;  %v2308_v18 = vadd.f32 %v5582_v47, %v5903_v43  ;;  %v2669_v51 = vadd.f32 %v5600_v32, %v2605_v36  ;;  %v2097_v62 = vmul.f32 %v5590_v12, %v2033_v48 }
 0x20f   : > { %v5958_v59 = vpop.f32.mrb[74].mxu0  ;;  %v5966_v8 = vpop.f32.mrb[74].mxu1  ;;  %v3563_v19 = vpack.c.bf16 %v2791_v27, %v2791_v27  ;;  %v3566_v25 = vpack.c.bf16 %v2794_v52, %v2794_v52  ;;  %v7279_v50 = vmax.f32 %v5056_v26, %v5062_v31  ;;  %v2603_v35 = vmul.f32 %v5590_v12, %v2539_v22 }
 0x210   : > { %v5968_v2 = vpop.f32.mrb[75].mxu0  ;;  %v5976_v42 = vpop.f32.mrb[75].mxu1  ;;  %v2036_v30 = vmax.f32 %v1802_v14, 0.0  ;;  %v2542_v39 = vmax.f32 %v2308_v18, 0.0  ;;  %v2733_v43 = vmax.f32 %v2163_v54, %v2669_v51  ;;  %v2161_v16 = vadd.f32 %v5600_v32, %v2097_v62 }
 0x211   : > { %v2792_v0 = vmax.f32 %v7279_v50, %v2728_v61  ;;  %3112 = vst.msk [vmem:[%s6037_s24] sm:$0xf] %vm3111_vm1, %v3563_v19  ;;  %3115 = vst.msk [vmem:[%s6037_s24 + $0xc] sm:$0xf] %vm3111_vm1, %v3566_v25  ;;  %v1794_v26 = vadd.f32 %v5582_v47, %v5905_v49  ;;  %v2300_v31 = vadd.f32 %v5582_v47, %v5910_v6 }
 0x212   : > { %v2667_v21 = vadd.f32 %v5600_v32, %v2603_v35  ;;  %v2100_v27 = vmul.f32 %v5590_v12, %v2036_v30  ;;  %v2606_v54 = vmul.f32 %v5590_v12, %v2542_v39  ;;  %v7280_v49 = vmax.f32 %v5082_v58, %v5089_v63 }
 0x213   : > { %v3564_v24 = vpack.c.bf16 %v2792_v0, %v2792_v0  ;;  %v2034_v6 = vmax.f32 %v1794_v26, 0.0  ;;  %v2540_v48 = vmax.f32 %v2300_v31, 0.0  ;;  %v1815_v61 = vadd.f32 %v5582_v47, %v5937_v41 }
 0x214   : > { %v2797_v36 = vmax.f32 %v7280_v49, %v2733_v43  ;;  %v2731_v14 = vmax.f32 %v2161_v16, %v2667_v21  ;;  %v2164_v18 = vadd.f32 %v5600_v32, %v2100_v27  ;;  %v2670_v19 = vadd.f32 %v5600_v32, %v2606_v54 }
 0x215   : > { %v5994_v5 = vpop.f32.mrb[76].mxu0  ;;  %v5997_v38 = vpop.f32.mrb[76].mxu1  ;;  %3113 = vst.msk [vmem:[%s6037_s24 + $0x4] sm:$0xf] %vm3111_vm1, %v3564_v24  ;;  %v2321_v25 = vadd.f32 %v5582_v47, %v5945_v28  ;;  %v2098_v63 = vmul.f32 %v5590_v12, %v2034_v6  ;;  %v2604_v51 = vmul.f32 %v5590_v12, %v2540_v48  ;;  %v2039_v62 = vmax.f32 %v1815_v61, 0.0 }
 0x216   : > { %v5999_v33 = vpop.f32.mrb[77].mxu0  ;;  %v6006_v57 = vpop.f32.mrb[77].mxu1  ;;  %v3569_v58 = vpack.c.bf16 %v2797_v36, %v2797_v36  ;;  %v7281_v41 = vmax.f32 %v5094_v3, %v5101_v10  ;;  %v2734_v0 = vmax.f32 %v2164_v18, %v2670_v19  ;;  %v1807_v30 = vadd.f32 %v5582_v47, %v5947_v44 }
 0x217   : > { %v6008_v20 = vpop.f32.mrb[78].mxu0  ;;  %v6016_v1 = vpop.f32.mrb[78].mxu1  ;;  %v2545_v35 = vmax.f32 %v2321_v25, 0.0  ;;  %v2162_v39 = vadd.f32 %v5600_v32, %v2098_v63  ;;  %v2668_v28 = vadd.f32 %v5600_v32, %v2604_v51  ;;  %v2103_v43 = vmul.f32 %v5590_v12, %v2039_v62 }
 0x218   : > { %v6018_v23 = vpop.f32.mrb[79].mxu0  ;;  %v6022_v46 = vpop.f32.mrb[79].mxu1  ;;  %v2795_v50 = vmax.f32 %v7281_v41, %v2731_v14  ;;  %3118 = vst.msk [vmem:[%s6037_s24 + $0x18] sm:$0xf] %vm3111_vm1, %v3569_v58  ;;  %v2313_v16 = vadd.f32 %v5582_v47, %v5956_v4  ;;  %v7282_v10 = vmax.f32 %v5104_v11, %v5108_v17  ;;  %v2037_v24 = vmax.f32 %v1807_v30, 0.0 }
 0x219   : > { %v2609_v44 = vmul.f32 %v5590_v12, %v2545_v35  ;;  %v2732_v54 = vmax.f32 %v2162_v39, %v2668_v28  ;;  %v2167_v49 = vadd.f32 %v5600_v32, %v2103_v43  ;;  %v1818_v4 = vadd.f32 %v5582_v47, %v5958_v59 }
 0x21a   : > { %v3567_v3 = vpack.c.bf16 %v2795_v50, %v2795_v50  ;;  %v2798_v31 = vmax.f32 %v7282_v10, %v2734_v0  ;;  %v2543_v36 = vmax.f32 %v2313_v16, 0.0  ;;  %v2101_v61 = vmul.f32 %v5590_v12, %v2037_v24 }
 0x21b   : > { %v2673_v17 = vadd.f32 %v5600_v32, %v2609_v44  ;;  %v2324_v14 = vadd.f32 %v5582_v47, %v5966_v8  ;;  %v7283_v59 = vmax.f32 %v5115_v29, %v5122_v45  ;;  %v2040_v63 = vmax.f32 %v1818_v4, 0.0 }
 0x21c   : > { %3116 = vst.msk [vmem:[%s6037_s24 + $0x10] sm:$0xf] %vm3111_vm1, %v3567_v3  ;;  %v3570_v11 = vpack.c.bf16 %v2798_v31, %v2798_v31  ;;  %v2607_v58 = vmul.f32 %v5590_v12, %v2543_v36  ;;  %v1810_v51 = vadd.f32 %v5582_v47, %v5968_v2  ;;  %v2165_v41 = vadd.f32 %v5600_v32, %v2101_v61 }
 0x21d   : > { %v6047_v60 = vpop.f32.mrb[80].mxu0  ;;  %v6053_v15 = vpop.f32.mrb[80].mxu1  ;;  %v2796_v25 = vmax.f32 %v7283_v59, %v2732_v54  ;;  %v2737_v8 = vmax.f32 %v2167_v49, %v2673_v17  ;;  %v2546_v50 = vmax.f32 %v2324_v14, 0.0  ;;  %v2316_v0 = vadd.f32 %v5582_v47, %v5976_v42 }
 0x21e   : > { %v6055_v53 = vpop.f32.mrb[81].mxu0  ;;  %v6066_v9 = vpop.f32.mrb[81].mxu1  ;;  %3119 = vst.msk [vmem:[%s6037_s24 + $0x1c] sm:$0xf] %vm3111_vm1, %v3570_v11  ;;  %v2671_v45 = vadd.f32 %v5600_v32, %v2607_v58  ;;  %v2104_v35 = vmul.f32 %v5590_v12, %v2040_v63  ;;  %v2038_v30 = vmax.f32 %v1810_v51, 0.0  ;;  %v7284_v2 = vmax.f32 %v5136_v55, %v5145_v37 }
 0x21f   : > { %v6068_v13 = vpop.f32.mrb[82].mxu0  ;;  %v6073_v56 = vpop.f32.mrb[82].mxu1  ;;  %v3568_v29 = vpack.c.bf16 %v2796_v25, %v2796_v25  ;;  %v2610_v28 = vmul.f32 %v5590_v12, %v2546_v50  ;;  %v2544_v43 = vmax.f32 %v2316_v0, 0.0  ;;  %v1831_v16 = vadd.f32 %v5582_v47, %v5994_v5  ;;  %v7286_v0 = vld [vmem:[#allocation16_spill] sm:$0xff] }
 0x220   : > { %v6075_v52 = vpop.f32.mrb[83].mxu0  ;;  %v6082_v22 = vpop.f32.mrb[83].mxu1  ;;  %v2801_v39 = vmax.f32 %v7284_v2, %v2737_v8  ;;  %v2735_v3 = vmax.f32 %v2165_v41, %v2671_v45  ;;  %v2168_v42 = vadd.f32 %v5600_v32, %v2104_v35  ;;  %v2102_v10 = vmul.f32 %v5590_v12, %v2038_v30 }
 0x221   : > { %3117 = vst.msk [vmem:[%s6037_s24 + $0x14] sm:$0xf] %vm3111_vm1, %v3568_v29  ;;  %v2337_v31 = vadd.f32 %v5582_v47, %v5997_v38  ;;  %v2674_v37 = vadd.f32 %v5600_v32, %v2610_v28  ;;  %v2608_v24 = vmul.f32 %v5590_v12, %v2544_v43  ;;  %v2043_v54 = vmax.f32 %v1831_v16, 0.0  ;;  %v7288_v16 = vld [vmem:[#allocation17_spill] sm:$0xff] }
 0x222   : > { %v3573_v55 = vpack.c.bf16 %v2801_v39, %v2801_v39  ;;  %v7285_v36 = vmax.f32 %v5150_v7, %v5153_v40  ;;  %v2166_v11 = vadd.f32 %v5600_v32, %v2102_v10  ;;  %v1823_v38 = vadd.f32 %v5582_v47, %v5999_v33 }
 0x223   : > { %v2549_v17 = vmax.f32 %v2337_v31, 0.0  ;;  %v2738_v59 = vmax.f32 %v2168_v42, %v2674_v37  ;;  %v2672_v25 = vadd.f32 %v5600_v32, %v2608_v24  ;;  %v2107_v58 = vmul.f32 %v5590_v12, %v2043_v54 }
 0x224   : > { %v2799_v4 = vmax.f32 %v7285_v36, %v2735_v3  ;;  %3122 = vst.msk [vmem:[%s6037_s24 + $0x28] sm:$0xf] %vm3111_vm1, %v3573_v55  ;;  %v2329_v7 = vadd.f32 %v5582_v47, %v6006_v57  ;;  %v2041_v8 = vmax.f32 %v1823_v38, 0.0  ;;  %v1834_v41 = vadd.f32 %v5582_v47, %v6008_v20  ;;  %v7289_v3 = vld [vmem:[#allocation18_spill] sm:$0xff] }
 0x225   : > { %v6104_v26 = vpop.f32.mrb[84].mxu0  ;;  %v6110_v21 = vpop.f32.mrb[84].mxu1  ;;  %v2613_v51 = vmul.f32 %v5590_v12, %v2549_v17  ;;  %v7287_v29 = vmax.f32 %v5163_v34, %v7286_v0  ;;  %v2736_v35 = vmax.f32 %v2166_v11, %v2672_v25  ;;  %v2171_v57 = vadd.f32 %v5600_v32, %v2107_v58  ;;  %v7292_v25 = vld [vmem:[#allocation20_spill] sm:$0xff] }
 0x226   : > { %v6112_v27 = vpop.f32.mrb[85].mxu0  ;;  %v6117_v6 = vpop.f32.mrb[85].mxu1  ;;  %v3571_v33 = vpack.c.bf16 %v2799_v4, %v2799_v4  ;;  %v2547_v30 = vmax.f32 %v2329_v7, 0.0  ;;  %v2105_v39 = vmul.f32 %v5590_v12, %v2041_v8  ;;  %v2044_v28 = vmax.f32 %v1834_v41, 0.0 }
 0x227   : > { %v6119_v48 = vpop.f32.mrb[86].mxu0  ;;  %v6127_v18 = vpop.f32.mrb[86].mxu1  ;;  %v2802_v45 = vmax.f32 %v7287_v29, %v2738_v59  ;;  %v2677_v2 = vadd.f32 %v5600_v32, %v2613_v51  ;;  %v2340_v20 = vadd.f32 %v5582_v47, %v6016_v1  ;;  %v7290_v34 = vmax.f32 %v7288_v16, %v7289_v3  ;;  %v7291_v59 = vld [vmem:[#allocation19_spill] sm:$0xff]  ;;  %v7295_v16 = vld [vmem:[#allocation22_spill] sm:$0xff] }
 0x228   : > { %v6129_v19 = vpop.f32.mrb[87].mxu0  ;;  %v6137_v62 = vpop.f32.mrb[87].mxu1  ;;  %3120 = vst.msk [vmem:[%s6037_s24 + $0x20] sm:$0xf] %vm3111_vm1, %v3571_v33  ;;  %v2611_v10 = vmul.f32 %v5590_v12, %v2547_v30  ;;  %v1826_v31 = vadd.f32 %v5582_v47, %v6018_v23  ;;  %v2169_v37 = vadd.f32 %v5600_v32, %v2105_v39  ;;  %v2108_v24 = vmul.f32 %v5590_v12, %v2044_v28 }
 0x229   : > { %v3574_v43 = vpack.c.bf16 %v2802_v45, %v2802_v45  ;;  %v2800_v42 = vmax.f32 %v7290_v34, %v2736_v35  ;;  %v2741_v55 = vmax.f32 %v2171_v57, %v2677_v2  ;;  %v2550_v54 = vmax.f32 %v2340_v20, 0.0 }
 0x22a   : > { %v2675_v4 = vadd.f32 %v5600_v32, %v2611_v10  ;;  %v2042_v11 = vmax.f32 %v1826_v31, 0.0  ;;  %v2332_v17 = vadd.f32 %v5582_v47, %v6022_v46  ;;  %v7293_v58 = vmax.f32 %v7291_v59, %v7292_v25 }
 0x22b   : > { %3123 = vst.msk [vmem:[%s6037_s24 + $0x2c] sm:$0xf] %vm3111_vm1, %v3574_v43  ;;  %v3572_v1 = vpack.c.bf16 %v2800_v42, %v2800_v42  ;;  %v2172_v33 = vadd.f32 %v5600_v32, %v2108_v24  ;;  %v2614_v51 = vmul.f32 %v5590_v12, %v2550_v54  ;;  %v1847_v8 = vadd.f32 %v5582_v47, %v6047_v60  ;;  %v7294_v43 = vld [vmem:[#allocation21_spill] sm:$0xff] }
 0x22c   : > { %v2805_v7 = vmax.f32 %v7293_v58, %v2741_v55  ;;  %v2739_v46 = vmax.f32 %v2169_v37, %v2675_v4  ;;  %v2106_v29 = vmul.f32 %v5590_v12, %v2042_v11  ;;  %v2548_v45 = vmax.f32 %v2332_v17, 0.0  ;;  %v7297_v11 = vld [vmem:[#allocation23_spill] sm:$0xff]  ;;  %v7298_v17 = vld [vmem:[#allocation24_spill] sm:$0xff] }
 0x22d   : > { %v6158_v44 = vpop.f32.mrb[88].mxu0  ;;  %v6162_v5 = vpop.f32.mrb[88].mxu1  ;;  %3121 = vst.msk [vmem:[%s6037_s24 + $0x24] sm:$0xf] %vm3111_vm1, %v3572_v1  ;;  %v2353_v35 = vadd.f32 %v5582_v47, %v6053_v15  ;;  %v2678_v60 = vadd.f32 %v5600_v32, %v2614_v51  ;;  %v2047_v39 = vmax.f32 %v1847_v8, 0.0  ;;  %v1839_v28 = vadd.f32 %v5582_v47, %v6055_v53 }
 0x22e   : > { %v6164_v49 = vpop.f32.mrb[89].mxu0  ;;  %v6172_v61 = vpop.f32.mrb[89].mxu1  ;;  %v3577_v2 = vpack.c.bf16 %v2805_v7, %v2805_v7  ;;  %v7296_v3 = vmax.f32 %v7294_v43, %v7295_v16  ;;  %v2170_v42 = vadd.f32 %v5600_v32, %v2106_v29  ;;  %v2612_v15 = vmul.f32 %v5590_v12, %v2548_v45  ;;  %v7300_v16 = vld [vmem:[#allocation25_spill] sm:$0xff] }
 0x22f   : > { %v6174_v14 = vpop.f32.mrb[90].mxu0  ;;  %v6182_v40 = vpop.f32.mrb[90].mxu1  ;;  %v2553_v10 = vmax.f32 %v2353_v35, 0.0  ;;  %v2742_v31 = vmax.f32 %v2172_v33, %v2678_v60  ;;  %v2111_v55 = vmul.f32 %v5590_v12, %v2047_v39  ;;  %v2045_v37 = vmax.f32 %v1839_v28, 0.0 }
 0x230   : > { %v6184_v63 = vpop.f32.mrb[91].mxu0  ;;  %v6189_v50 = vpop.f32.mrb[91].mxu1  ;;  %v2803_v34 = vmax.f32 %v7296_v3, %v2739_v46  ;;  %3126 = vst.msk [vmem:[%s6037_s24 + $0x38] sm:$0xf] %vm3111_vm1, %v3577_v2  ;;  %v2345_v53 = vadd.f32 %v5582_v47, %v6066_v9  ;;  %v2676_v54 = vadd.f32 %v5600_v32, %v2612_v15  ;;  %v1850_v4 = vadd.f32 %v5582_v47, %v6068_v13  ;;  %v7301_v3 = vld [vmem:[#allocation26_spill] sm:$0xff] }
 0x231   : > { %v2617_v1 = vmul.f32 %v5590_v12, %v2553_v10  ;;  %v7299_v59 = vmax.f32 %v7297_v11, %v7298_v17  ;;  %v2175_v58 = vadd.f32 %v5600_v32, %v2111_v55  ;;  %v2109_v7 = vmul.f32 %v5590_v12, %v2045_v37  ;;  %v7304_v11 = vld [vmem:[#allocation28_spill] sm:$0xff] }
 0x232   : > { %v3575_v24 = vpack.c.bf16 %v2803_v34, %v2803_v34  ;;  %v2551_v33 = vmax.f32 %v2345_v53, 0.0  ;;  %v2740_v9 = vmax.f32 %v2170_v42, %v2676_v54  ;;  %v2048_v46 = vmax.f32 %v1850_v4, 0.0  ;;  %v7303_v4 = vld [vmem:[#allocation27_spill] sm:$0xff] }
 0x233   : > { %v2806_v25 = vmax.f32 %v7299_v59, %v2742_v31  ;;  %v2681_v8 = vadd.f32 %v5600_v32, %v2617_v1  ;;  %v2356_v13 = vadd.f32 %v5582_v47, %v6073_v56  ;;  %v2173_v2 = vadd.f32 %v5600_v32, %v2109_v7 }
 0x234   : > { %3124 = vst.msk [vmem:[%s6037_s24 + $0x30] sm:$0xf] %vm3111_vm1, %v3575_v24  ;;  %v2615_v60 = vmul.f32 %v5590_v12, %v2551_v33  ;;  %v1842_v39 = vadd.f32 %v5582_v47, %v6075_v52  ;;  %v7302_v34 = vmax.f32 %v7300_v16, %v7301_v3  ;;  %v2112_v15 = vmul.f32 %v5590_v12, %v2048_v46 }
 0x235   : > { %v6209_v36 = vpop.f32.mrb[92].mxu0  ;;  %v6216_v38 = vpop.f32.mrb[92].mxu1  ;;  %v3578_v35 = vpack.c.bf16 %v2806_v25, %v2806_v25  ;;  %v2745_v42 = vmax.f32 %v2175_v58, %v2681_v8  ;;  %v2554_v10 = vmax.f32 %v2356_v13, 0.0  ;;  %v2348_v53 = vadd.f32 %v5582_v47, %v6082_v22 }
 0x236   : > { %v6218_v23 = vpop.f32.mrb[93].mxu0  ;;  %v6227_v41 = vpop.f32.mrb[93].mxu1  ;;  %v2804_v56 = vmax.f32 %v7302_v34, %v2740_v9  ;;  %v2679_v52 = vadd.f32 %v5600_v32, %v2615_v60  ;;  %v2046_v37 = vmax.f32 %v1842_v39, 0.0  ;;  %v1863_v24 = vadd.f32 %v5582_v47, %v6104_v26  ;;  %v7307_v60 = vld [vmem:[#allocation30_spill] sm:$0xff] }
 0x237   : > { %v6229_v0 = vpop.f32.mrb[94].mxu0  ;;  %v6236_v57 = vpop.f32.mrb[94].mxu1  ;;  %3127 = vst.msk [vmem:[%s6037_s24 + $0x3c] sm:$0xf] %vm3111_vm1, %v3578_v35  ;;  %v7305_v17 = vmax.f32 %v7303_v4, %v7304_v11  ;;  %v2176_v25 = vadd.f32 %v5600_v32, %v2112_v15  ;;  %v2618_v58 = vmul.f32 %v5590_v12, %v2554_v10  ;;  %v2552_v9 = vmax.f32 %v2348_v53, 0.0  ;;  %v7306_v35 = vld [vmem:[#allocation29_spill] sm:$0xff] }
 0x238   : > { %v6238_v30 = vpop.f32.mrb[95].mxu0  ;;  %v6243_v20 = vpop.f32.mrb[95].mxu1  ;;  %v3576_v1 = vpack.c.bf16 %v2804_v56, %v2804_v56  ;;  %v2743_v7 = vmax.f32 %v2173_v2, %v2679_v52  ;;  %v2110_v33 = vmul.f32 %v5590_v12, %v2046_v37  ;;  %v2051_v22 = vmax.f32 %v1863_v24, 0.0  ;;  %v6323_v10 = vld [vmem:[#allocation7] ss:$0 sm:$0xff]  ;;  %v7310_v11 = vld [vmem:[#allocation32_spill] sm:$0xff] }
 0x239   : > { %v2809_v59 = vmax.f32 %v7305_v17, %v2745_v42  ;;  %v2682_v8 = vadd.f32 %v5600_v32, %v2618_v58  ;;  %v2369_v46 = vadd.f32 %v5582_v47, %v6110_v21  ;;  %v1855_v13 = vadd.f32 %v5582_v47, %v6112_v27  ;;  %v6331_v37 = vld [vmem:[#allocation10] ss:$0 sm:$0xff] }
 0x23a   : > { %3125 = vst.msk [vmem:[%s6037_s24 + $0x34] sm:$0xf] %vm3111_vm1, %v3576_v1  ;;  %v7308_v39 = vmax.f32 %v7306_v35, %v7307_v60  ;;  %v2174_v2 = vadd.f32 %v5600_v32, %v2110_v33  ;;  %v2616_v3 = vmul.f32 %v5590_v12, %v2552_v9  ;;  %v2115_v34 = vmul.f32 %v5590_v12, %v2051_v22 }
 0x23b   : > { %v3581_v26 = vpack.c.bf16 %v2809_v59, %v2809_v59  ;;  %v2746_v42 = vmax.f32 %v2176_v25, %v2682_v8  ;;  %v2557_v15 = vmax.f32 %v2369_v46, 0.0  ;;  %v2049_v21 = vmax.f32 %v1855_v13, 0.0  ;;  %v6344_v25 = vld [vmem:[#allocation8] ss:$0 sm:$0xff] }
 0x23c   : > { %v2807_v16 = vmax.f32 %v7308_v39, %v2743_v7  ;;  %v2361_v47 = vadd.f32 %v6323_v10, %v6117_v6  ;;  %v2680_v12 = vadd.f32 %v6331_v37, %v2616_v3  ;;  %v2179_v53 = vadd.f32 %v6331_v37, %v2115_v34  ;;  %v7309_v6 = vld [vmem:[#allocation31_spill] sm:$0xff]  ;;  %v7312_v3 = vld [vmem:[#allocation33_spill] sm:$0xff]  ;;  %v7313_v34 = vld [vmem:[#allocation34_spill] sm:$0xff] }
 0x23d   : > { %v6264_v51 = vpop.f32.mrb[96].mxu0  ;;  %v6271_v29 = vpop.f32.mrb[96].mxu1  ;;  %3130 = vst.msk [vmem:[%s6037_s24 + $0x48] sm:$0xf] %vm3111_vm1, %v3581_v26  ;;  %v1866_v24 = vadd.f32 %v6323_v10, %v6119_v48  ;;  %v7311_v17 = vmax.f32 %v7309_v6, %v7310_v11  ;;  %v2621_v58 = vmul.f32 %v6344_v25, %v2557_v15  ;;  %v2113_v7 = vmul.f32 %v6344_v25, %v2049_v21 }
 0x23e   : > { %v6273_v45 = vpop.f32.mrb[97].mxu0  ;;  %v6279_v28 = vpop.f32.mrb[97].mxu1  ;;  %v3579_v52 = vpack.c.bf16 %v2807_v16, %v2807_v16  ;;  %v2555_v33 = vmax.f32 %v2361_v47, 0.0  ;;  %v2744_v48 = vmax.f32 %v2174_v2, %v2680_v12  ;;  %v2372_v8 = vadd.f32 %v6323_v10, %v6127_v18 }
 0x23f   : > { %v6281_v43 = vpop.f32.mrb[98].mxu0  ;;  %v6287_v31 = vpop.f32.mrb[98].mxu1  ;;  %v2810_v59 = vmax.f32 %v7311_v17, %v2746_v42  ;;  %v2052_v26 = vmax.f32 %v1866_v24, 0.0  ;;  %v1858_v46 = vadd.f32 %v6323_v10, %v6129_v19  ;;  %v2685_v60 = vadd.f32 %v6331_v37, %v2621_v58  ;;  %v7315_v58 = vld [vmem:[#allocation35_spill] sm:$0xff] }
 0x240   : > { %v6289_v55 = vpop.f32.mrb[99].mxu0  ;;  %v6298_v54 = vpop.f32.mrb[99].mxu1  ;;  %3128 = vst.msk [vmem:[%s6037_s24 + $0x40] sm:$0xf] %vm3111_vm1, %v3579_v52  ;;  %v2177_v39 = vadd.f32 %v6331_v37, %v2113_v7  ;;  %v2619_v16 = vmul.f32 %v6344_v25, %v2555_v33  ;;  %v7314_v42 = vmax.f32 %v7312_v3, %v7313_v34  ;;  %v2558_v21 = vmax.f32 %v2372_v8, 0.0  ;;  %v7316_v7 = vld [vmem:[#allocation36_spill] sm:$0xff] }
 0x241   : > { %v3582_v35 = vpack.c.bf16 %v2810_v59, %v2810_v59  ;;  %v2116_v15 = vmul.f32 %v6344_v25, %v2052_v26  ;;  %v2050_v18 = vmax.f32 %v1858_v46, 0.0  ;;  %v2749_v19 = vmax.f32 %v2179_v53, %v2685_v60 }
 0x242   : > { %v2808_v2 = vmax.f32 %v7314_v42, %v2744_v48  ;;  %v2683_v47 = vadd.f32 %v6331_v37, %v2619_v16  ;;  %v2364_v52 = vadd.f32 %v6323_v10, %v6137_v62  ;;  %v1879_v12 = vadd.f32 %v6323_v10, %v6158_v44  ;;  %v7318_v42 = vld [vmem:[#allocation37_spill] sm:$0xff] }
 0x243   : > { %3131 = vst.msk [vmem:[%s6037_s24 + $0x4c] sm:$0xf] %vm3111_vm1, %v3582_v35  ;;  %v2180_v6 = vadd.f32 %v6331_v37, %v2116_v15  ;;  %v2622_v11 = vmul.f32 %v6344_v25, %v2558_v21  ;;  %v2114_v17 = vmul.f32 %v6344_v25, %v2050_v18  ;;  %v7317_v53 = vmax.f32 %v7315_v58, %v7316_v7 }
 0x244   : > { %v3580_v24 = vpack.c.bf16 %v2808_v2, %v2808_v2  ;;  %v2747_v48 = vmax.f32 %v2177_v39, %v2683_v47  ;;  %v2556_v26 = vmax.f32 %v2364_v52, 0.0  ;;  %v2055_v8 = vmax.f32 %v1879_v12, 0.0  ;;  %v7319_v2 = vld [vmem:[#allocation38_spill] sm:$0xff] }
 0x245   : > { %v6319_v56 = vpop.f32.mrb[100].mxu0  ;;  %v6327_v27 = vpop.f32.mrb[100].mxu1  ;;  %v2813_v33 = vmax.f32 %v7317_v53, %v2749_v19  ;;  %v2686_v44 = vadd.f32 %v6331_v37, %v2622_v11  ;;  %v2178_v35 = vadd.f32 %v6331_v37, %v2114_v17  ;;  %v2385_v60 = vadd.f32 %v6323_v10, %v6162_v5 }
 0x246   : > { %v6329_v32 = vpop.f32.mrb[101].mxu0  ;;  %v6337_v1 = vpop.f32.mrb[101].mxu1  ;;  %3129 = vst.msk [vmem:[%s6037_s24 + $0x44] sm:$0xf] %vm3111_vm1, %v3580_v24  ;;  %v1871_v16 = vadd.f32 %v6323_v10, %v6164_v49  ;;  %v7320_v15 = vmax.f32 %v7318_v42, %v7319_v2  ;;  %v2620_v18 = vmul.f32 %v6344_v25, %v2556_v26  ;;  %v2119_v19 = vmul.f32 %v6344_v25, %v2055_v8 }
 0x247   : > { %v6339_v4 = vpop.f32.mrb[102].mxu0  ;;  %v6348_v9 = vpop.f32.mrb[102].mxu1  ;;  %v3585_v34 = vpack.c.bf16 %v2813_v33, %v2813_v33  ;;  %v2750_v52 = vmax.f32 %v2180_v6, %v2686_v44  ;;  %v2561_v49 = vmax.f32 %v2385_v60, 0.0  ;;  %v2377_v24 = vadd.f32 %v6323_v10, %v6172_v61  ;;  %v7321_v33 = vld [vmem:[#allocation39_spill] sm:$0xff] }
 0x248   : > { %v6350_v22 = vpop.f32.mrb[103].mxu0  ;;  %v6358_v13 = vpop.f32.mrb[103].mxu1  ;;  %v2811_v21 = vmax.f32 %v7320_v15, %v2747_v48  ;;  %v2053_v12 = vmax.f32 %v1871_v16, 0.0  ;;  %v2684_v58 = vadd.f32 %v6331_v37, %v2620_v18  ;;  %v2183_v7 = vadd.f32 %v6331_v37, %v2119_v19  ;;  %v7322_v48 = vld [vmem:[#allocation40_spill] sm:$0xff]  ;;  %v7324_v19 = vld [vmem:[#allocation41_spill] sm:$0xff] }
 0x249   : > { %3134 = vst.msk [vmem:[%s6037_s24 + $0x58] sm:$0xf] %vm3111_vm1, %v3585_v34  ;;  %v1882_v53 = vadd.f32 %v6323_v10, %v6174_v14  ;;  %v7323_v6 = vmax.f32 %v7321_v33, %v7322_v48  ;;  %v2625_v8 = vmul.f32 %v6344_v25, %v2561_v49  ;;  %v2559_v44 = vmax.f32 %v2377_v24, 0.0 }
 0x24a   : > { %v3583_v17 = vpack.c.bf16 %v2811_v21, %v2811_v21  ;;  %v2117_v61 = vmul.f32 %v6344_v25, %v2053_v12  ;;  %v2748_v60 = vmax.f32 %v2178_v35, %v2684_v58  ;;  %v2388_v34 = vadd.f32 %v6323_v10, %v6182_v40 }
 0x24b   : > { %v2814_v26 = vmax.f32 %v7323_v6, %v2750_v52  ;;  %v2056_v16 = vmax.f32 %v1882_v53, 0.0  ;;  %v1874_v14 = vadd.f32 %v6323_v10, %v6184_v63  ;;  %v2689_v2 = vadd.f32 %v6331_v37, %v2625_v8  ;;  %v7325_v52 = vld [vmem:[#allocation42_spill] sm:$0xff] }
 0x24c   : > { %3132 = vst.msk [vmem:[%s6037_s24 + $0x50] sm:$0xf] %vm3111_vm1, %v3583_v17  ;;  %v2181_v15 = vadd.f32 %v6331_v37, %v2117_v61  ;;  %v2623_v21 = vmul.f32 %v6344_v25, %v2559_v44  ;;  %v7326_v49 = vmax.f32 %v7324_v19, %v7325_v52  ;;  %v2562_v24 = vmax.f32 %v2388_v34, 0.0  ;;  %v7327_v34 = vld [vmem:[#allocation43_spill] sm:$0xff] }
 0x24d   : > { %v6377_v59 = vpop.f32.mrb[104].mxu0  ;;  %v6382_v62 = vpop.f32.mrb[104].mxu1  ;;  %v3586_v42 = vpack.c.bf16 %v2814_v26, %v2814_v26  ;;  %v2120_v12 = vmul.f32 %v6344_v25, %v2056_v16  ;;  %v2054_v40 = vmax.f32 %v1874_v14, 0.0  ;;  %v2753_v58 = vmax.f32 %v2183_v7, %v2689_v2 }
 0x24e   : > { %v6384_v46 = vpop.f32.mrb[105].mxu0  ;;  %v6394_v39 = vpop.f32.mrb[105].mxu1  ;;  %v2812_v35 = vmax.f32 %v7326_v49, %v2748_v60  ;;  %v2687_v53 = vadd.f32 %v6331_v37, %v2623_v21  ;;  %v2380_v33 = vadd.f32 %v6323_v10, %v6189_v50  ;;  %v1895_v48 = vadd.f32 %v6323_v10, %v6209_v36  ;;  %v7328_v50 = vld [vmem:[#allocation44_spill] sm:$0xff] }
 0x24f   : > { %v6396_v3 = vpop.f32.mrb[106].mxu0  ;;  %v6403_v47 = vpop.f32.mrb[106].mxu1  ;;  %3135 = vst.msk [vmem:[%s6037_s24 + $0x5c] sm:$0xf] %vm3111_vm1, %v3586_v42  ;;  %v2184_v61 = vadd.f32 %v6331_v37, %v2120_v12  ;;  %v2626_v44 = vmul.f32 %v6344_v25, %v2562_v24  ;;  %v2118_v7 = vmul.f32 %v6344_v25, %v2054_v40  ;;  %v7329_v14 = vmax.f32 %v7327_v34, %v7328_v50  ;;  %v7330_v40 = vld [vmem:[#allocation45_spill] sm:$0xff] }
 0x250   : > { %v6405_v5 = vpop.f32.mrb[107].mxu0  ;;  %v6409_v11 = vpop.f32.mrb[107].mxu1  ;;  %v3584_v8 = vpack.c.bf16 %v2812_v35, %v2812_v35  ;;  %v2751_v36 = vmax.f32 %v2181_v15, %v2687_v53  ;;  %v2560_v2 = vmax.f32 %v2380_v33, 0.0  ;;  %v2059_v21 = vmax.f32 %v1895_v48, 0.0  ;;  %v7331_v15 = vld [vmem:[#allocation46_spill] sm:$0xff] }
 0x251   : > { %v2817_v42 = vmax.f32 %v7329_v14, %v2753_v58  ;;  %v2690_v52 = vadd.f32 %v6331_v37, %v2626_v44  ;;  %v2182_v49 = vadd.f32 %v6331_v37, %v2118_v7  ;;  %v2401_v35 = vadd.f32 %v6323_v10, %v6216_v38 }
 0x252   : > { %3133 = vst.msk [vmem:[%s6037_s24 + $0x54] sm:$0xf] %vm3111_vm1, %v3584_v8  ;;  %v1887_v12 = vadd.f32 %v6323_v10, %v6218_v23  ;;  %v7332_v58 = vmax.f32 %v7330_v40, %v7331_v15  ;;  %v2624_v33 = vmul.f32 %v6344_v25, %v2560_v2  ;;  %v2123_v48 = vmul.f32 %v6344_v25, %v2059_v21 }
 0x253   : > { %v3589_v24 = vpack.c.bf16 %v2817_v42, %v2817_v42  ;;  %v2754_v8 = vmax.f32 %v2184_v61, %v2690_v52  ;;  %v2565_v44 = vmax.f32 %v2401_v35, 0.0  ;;  %v2393_v7 = vadd.f32 %v6323_v10, %v6227_v41  ;;  %v7334_v61 = vld [vmem:[#allocation48_spill] sm:$0xff] }
 0x254   : > { %v2815_v53 = vmax.f32 %v7332_v58, %v2751_v36  ;;  %v2057_v34 = vmax.f32 %v1887_v12, 0.0  ;;  %v2688_v23 = vadd.f32 %v6331_v37, %v2624_v33  ;;  %v2187_v50 = vadd.f32 %v6331_v37, %v2123_v48  ;;  %v7333_v36 = vld [vmem:[#allocation47_spill] sm:$0xff] }
 0x255   : > { %v6431_v18 = vpop.f32.mrb[108].mxu0  ;;  %v6437_v17 = vpop.f32.mrb[108].mxu1  ;;  %3138 = vst.msk [vmem:[%s6037_s24 + $0x68] sm:$0xf] %vm3111_vm1, %v3589_v24  ;;  %v1898_v14 = vadd.f32 %v6323_v10, %v6229_v0  ;;  %v7335_v2 = vmax.f32 %v7333_v36, %v7334_v61  ;;  %v2629_v52 = vmul.f32 %v6344_v25, %v2565_v44  ;;  %v2563_v35 = vmax.f32 %v2393_v7, 0.0 }
 0x256   : > { %v6439_v63 = vpop.f32.mrb[109].mxu0  ;;  %v6448_v6 = vpop.f32.mrb[109].mxu1  ;;  %v3587_v38 = vpack.c.bf16 %v2815_v53, %v2815_v53  ;;  %v2121_v41 = vmul.f32 %v6344_v25, %v2057_v34  ;;  %v2752_v40 = vmax.f32 %v2182_v49, %v2688_v23  ;;  %v2404_v0 = vadd.f32 %v6323_v10, %v6236_v57  ;;  %v7337_v57 = vld [vmem:[#allocation50_spill] sm:$0xff] }
 0x257   : > { %v6450_v26 = vpop.f32.mrb[110].mxu0  ;;  %v6455_v60 = vpop.f32.mrb[110].mxu1  ;;  %v2818_v21 = vmax.f32 %v7335_v2, %v2754_v8  ;;  %v2060_v15 = vmax.f32 %v1898_v14, 0.0  ;;  %v1890_v58 = vadd.f32 %v6323_v10, %v6238_v30  ;;  %v2693_v8 = vadd.f32 %v6331_v37, %v2629_v52 }
 0x258   : > { %v6457_v16 = vpop.f32.mrb[111].mxu0  ;;  %v6462_v19 = vpop.f32.mrb[111].mxu1  ;;  %3136 = vst.msk [vmem:[%s6037_s24 + $0x60] sm:$0xf] %vm3111_vm1, %v3587_v38  ;;  %v2185_v44 = vadd.f32 %v6331_v37, %v2121_v41  ;;  %v2627_v34 = vmul.f32 %v6344_v25, %v2563_v35  ;;  %v7336_v38 = vld [vmem:[#allocation49_spill] sm:$0xff]  ;;  %v2566_v36 = vmax.f32 %v2404_v0, 0.0  ;;  %v2396_v41 = vadd.f32 %v6323_v10, %v6243_v20 }
 0x259   : > { %v3590_v48 = vpack.c.bf16 %v2818_v21, %v2818_v21  ;;  %v7338_v23 = vmax.f32 %v7336_v38, %v7337_v57  ;;  %v2124_v30 = vmul.f32 %v6344_v25, %v2060_v15  ;;  %v2058_v61 = vmax.f32 %v1890_v58, 0.0  ;;  %v7339_v58 = vld [vmem:[#allocation51_spill] sm:$0xff]  ;;  %v7340_v57 = vld [vmem:[#allocation52_spill] sm:$0xff] }
 0x25a   : > { %v2757_v21 = vmax.f32 %v2187_v50, %v2693_v8  ;;  %v2691_v52 = vadd.f32 %v6331_v37, %v2627_v34  ;;  %v1911_v35 = vadd.f32 %v6323_v10, %v6264_v51  ;;  %v2630_v15 = vmul.f32 %v6344_v25, %v2566_v36 }
 0x25b   : > { %v2816_v14 = vmax.f32 %v7338_v23, %v2752_v40  ;;  %3139 = vst.msk [vmem:[%s6037_s24 + $0x6c] sm:$0xf] %vm3111_vm1, %v3590_v48  ;;  %v2188_v40 = vadd.f32 %v6331_v37, %v2124_v30  ;;  %v2122_v0 = vmul.f32 %v6344_v25, %v2058_v61  ;;  %v7341_v23 = vmax.f32 %v7339_v58, %v7340_v57 }
 0x25c   : > { %v2755_v50 = vmax.f32 %v2185_v44, %v2691_v52  ;;  %v2564_v8 = vmax.f32 %v2396_v41, 0.0  ;;  %v2063_v34 = vmax.f32 %v1911_v35, 0.0  ;;  %v2694_v20 = vadd.f32 %v6331_v37, %v2630_v15  ;;  %v7343_v44 = vld [vmem:[#allocation54_spill] sm:$0xff] }
 0x25d   : > { %v6485_v42 = vpop.f32.mrb[112].mxu0  ;;  %v6492_v12 = vpop.f32.mrb[112].mxu1  ;;  %v3588_v38 = vpack.c.bf16 %v2816_v14, %v2816_v14  ;;  %v2821_v48 = vmax.f32 %v7341_v23, %v2757_v21  ;;  %v2186_v51 = vadd.f32 %v6331_v37, %v2122_v0  ;;  %v2417_v14 = vadd.f32 %v6323_v10, %v6271_v29  ;;  %v7342_v21 = vld [vmem:[#allocation53_spill] sm:$0xff] }
 0x25e   : > { %v6494_v24 = vpop.f32.mrb[113].mxu0  ;;  %v6502_v53 = vpop.f32.mrb[113].mxu1  ;;  %v1903_v30 = vadd.f32 %v6323_v10, %v6273_v45  ;;  %v7344_v52 = vmax.f32 %v7342_v21, %v7343_v44  ;;  %v2628_v35 = vmul.f32 %v6344_v25, %v2564_v8  ;;  %v2758_v58 = vmax.f32 %v2188_v40, %v2694_v20 }
 0x25f   : > { %v6504_v33 = vpop.f32.mrb[114].mxu0  ;;  %v6509_v49 = vpop.f32.mrb[114].mxu1  ;;  %3137 = vst.msk [vmem:[%s6037_s24 + $0x64] sm:$0xf] %vm3111_vm1, %v3588_v38  ;;  %v3593_v61 = vpack.c.bf16 %v2821_v48, %v2821_v48  ;;  %v2127_v38 = vmul.f32 %v6344_v25, %v2063_v34  ;;  %v2569_v29 = vmax.f32 %v2417_v14, 0.0  ;;  %v2409_v45 = vadd.f32 %v6323_v10, %v6279_v28  ;;  %v7348_v28 = vld [vmem:[#allocation56_spill] sm:$0xff] }
 0x260   : > { %v6511_v7 = vpop.f32.mrb[115].mxu0  ;;  %v6517_v2 = vpop.f32.mrb[115].mxu1  ;;  %v2819_v41 = vmax.f32 %v7344_v52, %v2755_v50  ;;  %v2061_v57 = vmax.f32 %v1903_v30, 0.0  ;;  %v2692_v8 = vadd.f32 %v6331_v37, %v2628_v35  ;;  %v1914_v40 = vadd.f32 %v6323_v10, %v6281_v43  ;;  %v7347_v30 = vld [vmem:[#allocation55_spill] sm:$0xff] }
 0x261   : > { %3142 = vst.msk [vmem:[%s6037_s24 + $0x78] sm:$0xf] %vm3111_vm1, %v3593_v61  ;;  %v2191_v34 = vadd.f32 %v6331_v37, %v2127_v38  ;;  %v7349_v21 = vmax.f32 %v7347_v30, %v7348_v28  ;;  %v2633_v52 = vmul.f32 %v6344_v25, %v2569_v29  ;;  %v7352_v28 = vld [vmem:[#allocation58_spill] sm:$0xff] }
 0x262   : > { %v3591_v50 = vpack.c.bf16 %v2819_v41, %v2819_v41  ;;  %v2125_v61 = vmul.f32 %v6344_v25, %v2061_v57  ;;  %v2567_v41 = vmax.f32 %v2409_v45, 0.0  ;;  %v2756_v38 = vmax.f32 %v2186_v51, %v2692_v8  ;;  %v7351_v45 = vld [vmem:[#allocation57_spill] sm:$0xff] }
 0x263   : > { %v2822_v44 = vmax.f32 %v7349_v21, %v2758_v58  ;;  %v2064_v43 = vmax.f32 %v1914_v40, 0.0  ;;  %v2697_v58 = vadd.f32 %v6331_v37, %v2633_v52  ;;  %v7353_v21 = vmax.f32 %v7351_v45, %v7352_v28 }
 0x264   : > { %3140 = vst.msk [vmem:[%s6037_s24 + $0x70] sm:$0xf] %vm3111_vm1, %v3591_v50  ;;  %v2189_v29 = vadd.f32 %v6331_v37, %v2125_v61  ;;  %v2631_v57 = vmul.f32 %v6344_v25, %v2567_v41  ;;  %v2412_v40 = vadd.f32 %v6323_v10, %v6298_v54 }
 0x265   : > { %v6540_v36 = vpop.f32.mrb[116].mxu0  ;;  %v6547_v15 = vpop.f32.mrb[116].mxu1  ;;  %v3594_v30 = vpack.c.bf16 %v2822_v44, %v2822_v44  ;;  %v2128_v51 = vmul.f32 %v6344_v25, %v2064_v43  ;;  %v1927_v44 = vadd.f32 %v6323_v10, %v6319_v56  ;;  %v7354_v43 = vld [vmem:[#allocation59_spill] sm:$0xff] }
 0x266   : > { %v6549_v0 = vpop.f32.mrb[117].mxu0  ;;  %v6553_v23 = vpop.f32.mrb[117].mxu1  ;;  %v2568_v45 = vmax.f32 %v2412_v40, 0.0  ;;  %v7359_v40 = vld [vmem:[#allocation61_spill] sm:$0xff] }
 0x267   : > { %v6555_v48 = vpop.f32.mrb[118].mxu0  ;;  %v6563_v20 = vpop.f32.mrb[118].mxu1  ;;  %3143 = vst.msk [vmem:[%s6037_s24 + $0x7c] sm:$0xf] %vm3111_vm1, %v3594_v30  ;;  %v2192_v41 = vadd.f32 %v6331_v37, %v2128_v51  ;;  %v7355_v30 = vld [vmem:[#allocation60_spill] sm:$0xff]  ;;  %v2067_v56 = vmax.f32 %v1927_v44, 0.0 }
 0x268   : > { %7345 = vst [vmem:[#allocation16_spill] sm:$0xff] %v6563_v20  ;;  %v6565_v14 = vpop.f32.mrb[119].mxu0  ;;  %v6572_v35 = vpop.f32.mrb[119].mxu1  ;;  %v2420_v20 = vadd.f32 %v6323_v10, %v6287_v31  ;;  %v2761_v31 = vmax.f32 %v2191_v34, %v2697_v58  ;;  %v7356_v58 = vmax.f32 %v7354_v43, %v7355_v30  ;;  %v7360_v44 = vld [vmem:[#allocation62_spill] sm:$0xff]  ;;  %v2632_v30 = vmul.f32 %v6344_v25, %v2568_v45 }
 0x269   : > { %7346 = vst [vmem:[#allocation17_spill] sm:$0xff] %v6565_v14  ;;  %7350 = vst [vmem:[#allocation18_spill] sm:$0xff] %v6572_v35  ;;  %v1906_v14 = vadd.f32 %v6323_v10, %v6289_v55  ;;  %v2820_v35 = vmax.f32 %v7353_v21, %v2756_v38  ;;  %v2695_v55 = vadd.f32 %v6331_v37, %v2631_v57 }
 0x26a   : > { %v2570_v50 = vmax.f32 %v2420_v20, 0.0  ;;  %v2825_v54 = vmax.f32 %v7356_v58, %v2761_v31  ;;  %v7361_v43 = vmax.f32 %v7359_v40, %v7360_v44  ;;  %v1930_v45 = vadd.f32 %v6323_v10, %v6339_v4  ;;  %v7362_v40 = vld [vmem:[#allocation63_spill] sm:$0xff] }
 0x26b   : > { %v2062_v8 = vmax.f32 %v1906_v14, 0.0  ;;  %v3592_v61 = vpack.c.bf16 %v2820_v35, %v2820_v35  ;;  %v2759_v57 = vmax.f32 %v2189_v29, %v2695_v55  ;;  %v1922_v4 = vadd.f32 %v6323_v10, %v6350_v22 }
 0x26c   : > { %v2634_v20 = vmul.f32 %v6344_v25, %v2570_v50  ;;  %v2433_v50 = vadd.f32 %v6323_v10, %v6327_v27  ;;  %v3597_v55 = vpack.c.bf16 %v2825_v54, %v2825_v54 }
 0x26d   : > { %v6594_v52 = vpop.f32.mrb[120].mxu0  ;;  %v2126_v14 = vmul.f32 %v6344_v25, %v2062_v8  ;;  %v6599_v38 = vpop.f32.mrb[120].mxu1  ;;  %3141 = vst.msk [vmem:[%s6037_s24 + $0x74] sm:$0xf] %vm3111_vm1, %v3592_v61  ;;  %v1919_v8 = vadd.f32 %v6323_v10, %v6329_v32  ;;  %v2823_v61 = vmax.f32 %v7361_v43, %v2759_v57  ;;  %v2425_v32 = vadd.f32 %v6323_v10, %v6337_v1 }
 0x26e   : > { %v6601_v34 = vpop.f32.mrb[121].mxu0  ;;  %v6606_v28 = vpop.f32.mrb[121].mxu1  ;;  %v2698_v21 = vadd.f32 %v6331_v37, %v2634_v20  ;;  %v2131_v20 = vmul.f32 %v6344_v25, %v2067_v56  ;;  %v2573_v58 = vmax.f32 %v2433_v50, 0.0  ;;  %3146 = vst.msk [vmem:[%s6037_s24 + $0x88] sm:$0xf] %vm3111_vm1, %v3597_v55  ;;  %v7363_v56 = vld [vmem:[#allocation64_spill] sm:$0xff]  ;;  %v2436_v55 = vadd.f32 %v6323_v10, %v6348_v9 }
 0x26f   : > { %v6608_v35 = vpop.f32.mrb[122].mxu0  ;;  %v2190_v51 = vadd.f32 %v6331_v37, %v2126_v14  ;;  %v6618_v29 = vpop.f32.mrb[122].mxu1  ;;  %v3595_v54 = vpack.c.bf16 %v2823_v61, %v2823_v61  ;;  %v7364_v44 = vmax.f32 %v7362_v40, %v7363_v56  ;;  %v2571_v50 = vmax.f32 %v2425_v32, 0.0  ;;  %v7366_v32 = vld [vmem:[#allocation66_spill] sm:$0xff] }
 0x270   : > { %7357 = vst [vmem:[#allocation19_spill] sm:$0xff] %v6608_v35  ;;  %v6620_v31 = vpop.f32.mrb[123].mxu0  ;;  %v6627_v14 = vpop.f32.mrb[123].mxu1  ;;  %v2762_v27 = vmax.f32 %v2192_v41, %v2698_v21  ;;  %v2065_v35 = vmax.f32 %v1919_v8, 0.0  ;;  %v2195_v57 = vadd.f32 %v6331_v37, %v2131_v20  ;;  %v2637_v41 = vmul.f32 %v6344_v25, %v2573_v58 }
 0x271   : > { %7358 = vst [vmem:[#allocation20_spill] sm:$0xff] %v6620_v31  ;;  %v2696_v31 = vadd.f32 %v6331_v37, %v2632_v30  ;;  %3144 = vst.msk [vmem:[%s6037_s24 + $0x80] sm:$0xf] %vm3111_vm1, %v3595_v54  ;;  %v2068_v8 = vmax.f32 %v1930_v45, 0.0  ;;  %v2574_v22 = vmax.f32 %v2436_v55, 0.0  ;;  %v2066_v40 = vmax.f32 %v1922_v4, 0.0 }
 0x272   : > { %v2826_v43 = vmax.f32 %v7364_v44, %v2762_v27  ;;  %v2129_v21 = vmul.f32 %v6344_v25, %v2065_v35  ;;  %v2701_v20 = vadd.f32 %v6331_v37, %v2637_v41  ;;  %v2635_v35 = vmul.f32 %v6344_v25, %v2571_v50 }
 0x273   : > { %v2760_v1 = vmax.f32 %v2190_v51, %v2696_v31  ;;  %v7365_v31 = vld [vmem:[#allocation65_spill] sm:$0xff]  ;;  %v2132_v45 = vmul.f32 %v6344_v25, %v2068_v8  ;;  %v1943_v50 = vadd.f32 %v6323_v10, %v6377_v59 }
 0x274   : > { %v3598_v30 = vpack.c.bf16 %v2826_v43, %v2826_v43  ;;  %v2193_v27 = vadd.f32 %v6331_v37, %v2129_v21  ;;  %v7367_v54 = vmax.f32 %v7365_v31, %v7366_v32  ;;  %v2765_v43 = vmax.f32 %v2195_v57, %v2701_v20  ;;  %v7371_v20 = vld [vmem:[#allocation67_spill] sm:$0xff] }
 0x275   : > { %v6648_v61 = vpop.f32.mrb[124].mxu0  ;;  %v6653_v58 = vpop.f32.mrb[124].mxu1  ;;  %v2699_v41 = vadd.f32 %v6331_v37, %v2635_v35  ;;  %v2428_v21 = vadd.f32 %v6323_v10, %v6358_v13  ;;  %v2196_v4 = vadd.f32 %v6331_v37, %v2132_v45  ;;  %v2638_v31 = vmul.f32 %v6344_v25, %v2574_v22  ;;  %v7372_v35 = vld [vmem:[#allocation68_spill] sm:$0xff] }
 0x276   : > { %v6655_v51 = vpop.f32.mrb[125].mxu0  ;;  %v2824_v9 = vmax.f32 %v7367_v54, %v2760_v1  ;;  %v6661_v56 = vpop.f32.mrb[125].mxu1  ;;  %3147 = vst.msk [vmem:[%s6037_s24 + $0x8c] sm:$0xf] %vm3111_vm1, %v3598_v30  ;;  %v2130_v30 = vmul.f32 %v6344_v25, %v2066_v40  ;;  %v7373_v32 = vmax.f32 %v7371_v20, %v7372_v35  ;;  %v2449_v22 = vadd.f32 %v6323_v10, %v6382_v62  ;;  %v7375_v20 = vld [vmem:[#allocation70_spill] sm:$0xff] }
 0x277   : > { %v6663_v44 = vpop.f32.mrb[126].mxu0  ;;  %v6672_v1 = vpop.f32.mrb[126].mxu1  ;;  %v2763_v54 = vmax.f32 %v2193_v27, %v2699_v41  ;;  %v2572_v59 = vmax.f32 %v2428_v21, 0.0  ;;  %v1935_v40 = vadd.f32 %v6323_v10, %v6384_v46 }
 0x278   : > { %7368 = vst [vmem:[#allocation21_spill] sm:$0xff] %v6663_v44  ;;  %v6674_v8 = vpop.f32.mrb[127].mxu0  ;;  %v3596_v55 = vpack.c.bf16 %v2824_v9, %v2824_v9  ;;  %v6679_v57 = vpop.f32.mrb[127].mxu1  ;;  %v2829_v13 = vmax.f32 %v7373_v32, %v2765_v43  ;;  %v2071_v44 = vmax.f32 %v1943_v50, 0.0  ;;  %v2702_v9 = vadd.f32 %v6331_v37, %v2638_v31  ;;  %v7377_v32 = vld [vmem:[#allocation71_spill] sm:$0xff] }
 0x279   : > { %7369 = vst [vmem:[#allocation22_spill] sm:$0xff] %v6674_v8  ;;  %7370 = vst [vmem:[#allocation23_spill] sm:$0xff] %v6679_v57  ;;  %v2194_v45 = vadd.f32 %v6331_v37, %v2130_v30  ;;  %v7374_v8 = vld [vmem:[#allocation69_spill] sm:$0xff]  ;;  %v2636_v41 = vmul.f32 %v6344_v25, %v2572_v59  ;;  %v2069_v31 = vmax.f32 %v1935_v40, 0.0  ;;  %v2441_v30 = vadd.f32 %v6323_v10, %v6394_v39 }
 0x27a   : > { %3145 = vst.msk [vmem:[%s6037_s24 + $0x84] sm:$0xf] %vm3111_vm1, %v3596_v55  ;;  %v3601_v57 = vpack.c.bf16 %v2829_v13, %v2829_v13  ;;  %v7376_v43 = vmax.f32 %v7374_v8, %v7375_v20  ;;  %v2135_v21 = vmul.f32 %v6344_v25, %v2071_v44  ;;  %v2766_v50 = vmax.f32 %v2196_v4, %v2702_v9  ;;  %v7378_v13 = vld [vmem:[#allocation72_spill] sm:$0xff] }
 0x27b   : > { %v2577_v55 = vmax.f32 %v2449_v22, 0.0  ;;  %v2700_v46 = vadd.f32 %v6331_v37, %v2636_v41  ;;  %v1946_v8 = vadd.f32 %v6323_v10, %v6396_v3  ;;  %v2133_v59 = vmul.f32 %v6344_v25, %v2069_v31  ;;  %v7380_v41 = vld [vmem:[#allocation73_spill] sm:$0xff] }
 0x27c   : > { %v2827_v27 = vmax.f32 %v7376_v43, %v2763_v54  ;;  %3150 = vst.msk [vmem:[%s6037_s24 + $0x98] sm:$0xf] %vm3111_vm1, %v3601_v57  ;;  %v2199_v35 = vadd.f32 %v6331_v37, %v2135_v21  ;;  %v7379_v54 = vmax.f32 %v7377_v32, %v7378_v13  ;;  %v2575_v39 = vmax.f32 %v2441_v30, 0.0  ;;  %v7381_v21 = vld [vmem:[#allocation74_spill] sm:$0xff] }
 0x27d   : > { %v2641_v4 = vmul.f32 %v6344_v25, %v2577_v55  ;;  %v2764_v57 = vmax.f32 %v2194_v45, %v2700_v46  ;;  %v2072_v9 = vmax.f32 %v1946_v8, 0.0  ;;  %v2452_v22 = vadd.f32 %v6323_v10, %v6403_v47 }
 0x27e   : > { %v3599_v62 = vpack.c.bf16 %v2827_v27, %v2827_v27  ;;  %v2830_v44 = vmax.f32 %v7379_v54, %v2766_v50  ;;  %v1938_v3 = vadd.f32 %v6323_v10, %v6405_v5  ;;  %v2197_v43 = vadd.f32 %v6331_v37, %v2133_v59 }
 0x27f   : > { %v2705_v20 = vadd.f32 %v6331_v37, %v2641_v4  ;;  %v2639_v27 = vmul.f32 %v6344_v25, %v2575_v39  ;;  %v7382_v50 = vmax.f32 %v7380_v41, %v7381_v21  ;;  %v2136_v45 = vmul.f32 %v6344_v25, %v2072_v9  ;;  %v7384_v4 = vld [vmem:[#allocation76_spill] sm:$0xff] }
 0x280   : > { %3148 = vst.msk [vmem:[%s6037_s24 + $0x90] sm:$0xf] %vm3111_vm1, %v3599_v62  ;;  %v3602_v40 = vpack.c.bf16 %v2830_v44, %v2830_v44  ;;  %v2578_v31 = vmax.f32 %v2452_v22, 0.0  ;;  %v2070_v30 = vmax.f32 %v1938_v3, 0.0  ;;  %v2444_v62 = vadd.f32 %v6323_v10, %v6409_v11  ;;  %v7383_v44 = vld [vmem:[#allocation75_spill] sm:$0xff] }
 0x281   : > { %v2828_v55 = vmax.f32 %v7382_v50, %v2764_v57  ;;  %v2769_v47 = vmax.f32 %v2199_v35, %v2705_v20  ;;  %v2703_v5 = vadd.f32 %v6331_v37, %v2639_v27  ;;  %v1959_v46 = vadd.f32 %v6323_v10, %v6431_v18  ;;  %v7386_v20 = vld [vmem:[#allocation77_spill] sm:$0xff]  ;;  %v7387_v27 = vld [vmem:[#allocation78_spill] sm:$0xff] }
 0x282   : > { %3151 = vst.msk [vmem:[%s6037_s24 + $0x9c] sm:$0xf] %vm3111_vm1, %v3602_v40  ;;  %v2200_v32 = vadd.f32 %v6331_v37, %v2136_v45  ;;  %v2642_v13 = vmul.f32 %v6344_v25, %v2578_v31  ;;  %v2134_v54 = vmul.f32 %v6344_v25, %v2070_v30  ;;  %v7385_v59 = vmax.f32 %v7383_v44, %v7384_v4 }
 0x283   : > { %v3600_v8 = vpack.c.bf16 %v2828_v55, %v2828_v55  ;;  %v2767_v35 = vmax.f32 %v2197_v43, %v2703_v5  ;;  %v2576_v57 = vmax.f32 %v2444_v62, 0.0  ;;  %v2075_v9 = vmax.f32 %v1959_v46, 0.0  ;;  %v7389_v62 = vld [vmem:[#allocation79_spill] sm:$0xff]  ;;  %v7390_v46 = vld [vmem:[#allocation80_spill] sm:$0xff] }
 0x284   : > { %v2833_v39 = vmax.f32 %v7385_v59, %v2769_v47  ;;  %v2706_v11 = vadd.f32 %v6331_v37, %v2642_v13  ;;  %v2198_v18 = vadd.f32 %v6331_v37, %v2134_v54  ;;  %v2465_v22 = vadd.f32 %v6323_v10, %v6437_v17 }
 0x285   : > { %3149 = vst.msk [vmem:[%s6037_s24 + $0x94] sm:$0xf] %vm3111_vm1, %v3600_v8  ;;  %v1951_v3 = vadd.f32 %v6323_v10, %v6439_v63  ;;  %v7388_v41 = vmax.f32 %v7386_v20, %v7387_v27  ;;  %v2640_v21 = vmul.f32 %v6344_v25, %v2576_v57  ;;  %v2139_v50 = vmul.f32 %v6344_v25, %v2075_v9 }
 0x286   : > { %v3605_v40 = vpack.c.bf16 %v2833_v39, %v2833_v39  ;;  %v2770_v55 = vmax.f32 %v2200_v32, %v2706_v11  ;;  %v2581_v45 = vmax.f32 %v2465_v22, 0.0  ;;  %v2457_v30 = vadd.f32 %v6323_v10, %v6448_v6  ;;  %v7392_v11 = vld [vmem:[#allocation81_spill] sm:$0xff]  ;;  %v7393_v22 = vld [vmem:[#allocation82_spill] sm:$0xff] }
 0x287   : > { %v2831_v43 = vmax.f32 %v7388_v41, %v2767_v35  ;;  %v2073_v31 = vmax.f32 %v1951_v3, 0.0  ;;  %v2704_v63 = vadd.f32 %v6331_v37, %v2640_v21  ;;  %v2203_v47 = vadd.f32 %v6331_v37, %v2139_v50 }
 0x288   : > { %3154 = vst.msk [vmem:[%s6037_s24 + $0xa8] sm:$0xf] %vm3111_vm1, %v3605_v40  ;;  %v1962_v5 = vadd.f32 %v6323_v10, %v6450_v26  ;;  %v7391_v8 = vmax.f32 %v7389_v62, %v7390_v46  ;;  %v2645_v32 = vmul.f32 %v6344_v25, %v2581_v45  ;;  %v2579_v6 = vmax.f32 %v2457_v30, 0.0  ;;  %v7396_v30 = vld [vmem:[#allocation84_spill] sm:$0xff] }
 0x289   : > { %v3603_v17 = vpack.c.bf16 %v2831_v43, %v2831_v43  ;;  %v2137_v54 = vmul.f32 %v6344_v25, %v2073_v31  ;;  %v2768_v44 = vmax.f32 %v2198_v18, %v2704_v63  ;;  %v2468_v59 = vadd.f32 %v6323_v10, %v6455_v60  ;;  %v7395_v31 = vld [vmem:[#allocation83_spill] sm:$0xff] }
 0x28a   : > { %v2834_v13 = vmax.f32 %v7391_v8, %v2770_v55  ;;  %v2076_v4 = vmax.f32 %v1962_v5, 0.0  ;;  %v1954_v26 = vadd.f32 %v6323_v10, %v6457_v16  ;;  %v2709_v35 = vadd.f32 %v6331_v37, %v2645_v32  ;;  %v7398_v32 = vld [vmem:[#allocation85_spill] sm:$0xff] }
 0x28b   : > { %3152 = vst.msk [vmem:[%s6037_s24 + $0xa0] sm:$0xf] %vm3111_vm1, %v3603_v17  ;;  %v2201_v57 = vadd.f32 %v6331_v37, %v2137_v54  ;;  %v2643_v9 = vmul.f32 %v6344_v25, %v2579_v6  ;;  %v7394_v3 = vmax.f32 %v7392_v11, %v7393_v22  ;;  %v2582_v20 = vmax.f32 %v2468_v59, 0.0  ;;  %v7399_v54 = vld [vmem:[#allocation86_spill] sm:$0xff]  ;;  %v7401_v22 = vld [vmem:[#allocation87_spill] sm:$0xff] }
 0x28c   : > { %v3606_v39 = vpack.c.bf16 %v2834_v13, %v2834_v13  ;;  %v2140_v18 = vmul.f32 %v6344_v25, %v2076_v4  ;;  %v2074_v27 = vmax.f32 %v1954_v26, 0.0  ;;  %v2773_v60 = vmax.f32 %v2203_v47, %v2709_v35 }
 0x28d   : > { %v2832_v40 = vmax.f32 %v7394_v3, %v2768_v44  ;;  %v2707_v16 = vadd.f32 %v6331_v37, %v2643_v9  ;;  %v2460_v41 = vadd.f32 %v6323_v10, %v6462_v19  ;;  %v1975_v43 = vadd.f32 %v6323_v10, %v6485_v42  ;;  %v7402_v3 = vld [vmem:[#allocation88_spill] sm:$0xff] }
 0x28e   : > { %3155 = vst.msk [vmem:[%s6037_s24 + $0xac] sm:$0xf] %vm3111_vm1, %v3606_v39  ;;  %v2204_v50 = vadd.f32 %v6331_v37, %v2140_v18  ;;  %v2646_v55 = vmul.f32 %v6344_v25, %v2582_v20  ;;  %v2138_v45 = vmul.f32 %v6344_v25, %v2074_v27  ;;  %v7397_v17 = vmax.f32 %v7395_v31, %v7396_v30  ;;  %v7405_v31 = vld [vmem:[#allocation90_spill] sm:$0xff] }
 0x28f   : > { %v3604_v21 = vpack.c.bf16 %v2832_v40, %v2832_v40  ;;  %v2771_v47 = vmax.f32 %v2201_v57, %v2707_v16  ;;  %v2580_v5 = vmax.f32 %v2460_v41, 0.0  ;;  %v2079_v62 = vmax.f32 %v1975_v43, 0.0 }
 0x290   : > { %v2837_v63 = vmax.f32 %v7397_v17, %v2773_v60  ;;  %v2710_v19 = vadd.f32 %v6331_v37, %v2646_v55  ;;  %v2202_v42 = vadd.f32 %v6331_v37, %v2138_v45  ;;  %v2481_v46 = vadd.f32 %v6323_v10, %v6492_v12  ;;  %v7404_v45 = vld [vmem:[#allocation89_spill] sm:$0xff] }
 0x291   : > { %3153 = vst.msk [vmem:[%s6037_s24 + $0xa4] sm:$0xf] %vm3111_vm1, %v3604_v21  ;;  %v1967_v8 = vadd.f32 %v6323_v10, %v6494_v24  ;;  %v7400_v6 = vmax.f32 %v7398_v32, %v7399_v54  ;;  %v2644_v4 = vmul.f32 %v6344_v25, %v2580_v5  ;;  %v2143_v59 = vmul.f32 %v6344_v25, %v2079_v62  ;;  %v7407_v32 = vld [vmem:[#allocation91_spill] sm:$0xff]  ;;  %v7408_v54 = vld [vmem:[#allocation92_spill] sm:$0xff] }
 0x292   : > { %v3609_v13 = vpack.c.bf16 %v2837_v63, %v2837_v63  ;;  %v2774_v26 = vmax.f32 %v2204_v50, %v2710_v19  ;;  %v2585_v39 = vmax.f32 %v2481_v46, 0.0  ;;  %v2473_v57 = vadd.f32 %v6323_v10, %v6502_v53 }
 0x293   : > { %v2835_v44 = vmax.f32 %v7400_v6, %v2771_v47  ;;  %v2077_v35 = vmax.f32 %v1967_v8, 0.0  ;;  %v2708_v24 = vadd.f32 %v6331_v37, %v2644_v4  ;;  %v2207_v9 = vadd.f32 %v6331_v37, %v2143_v59 }
 0x294   : > { %3158 = vst.msk [vmem:[%s6037_s24 + $0xb8] sm:$0xf] %vm3111_vm1, %v3609_v13  ;;  %v1978_v11 = vadd.f32 %v6323_v10, %v6504_v33  ;;  %v7403_v40 = vmax.f32 %v7401_v22, %v7402_v3  ;;  %v2649_v20 = vmul.f32 %v6344_v25, %v2585_v39  ;;  %v2583_v53 = vmax.f32 %v2473_v57, 0.0 }
 0x295   : > { %v3607_v12 = vpack.c.bf16 %v2835_v44, %v2835_v44  ;;  %v2141_v27 = vmul.f32 %v6344_v25, %v2077_v35  ;;  %v2772_v60 = vmax.f32 %v2202_v42, %v2708_v24  ;;  %v2484_v41 = vadd.f32 %v6323_v10, %v6509_v49  ;;  %v7411_v24 = vld [vmem:[#allocation94_spill] sm:$0xff] }
 0x296   : > { %v2838_v18 = vmax.f32 %v7403_v40, %v2774_v26  ;;  %v2080_v16 = vmax.f32 %v1978_v11, 0.0  ;;  %v1970_v33 = vadd.f32 %v6323_v10, %v6511_v7  ;;  %v2713_v21 = vadd.f32 %v6331_v37, %v2649_v20 }
 0x297   : > { %3156 = vst.msk [vmem:[%s6037_s24 + $0xb0] sm:$0xf] %vm3111_vm1, %v3607_v12  ;;  %v2205_v50 = vadd.f32 %v6331_v37, %v2141_v27  ;;  %v2647_v55 = vmul.f32 %v6344_v25, %v2583_v53  ;;  %v7406_v30 = vmax.f32 %v7404_v45, %v7405_v31  ;;  %v2586_v47 = vmax.f32 %v2484_v41, 0.0  ;;  %v7410_v12 = vld [vmem:[#allocation93_spill] sm:$0xff]  ;;  %v7414_v41 = vld [vmem:[#allocation96_spill] sm:$0xff] }
 0x298   : > { %v3610_v43 = vpack.c.bf16 %v2838_v18, %v2838_v18  ;;  %v2144_v63 = vmul.f32 %v6344_v25, %v2080_v16  ;;  %v2078_v5 = vmax.f32 %v1970_v33, 0.0  ;;  %v2777_v49 = vmax.f32 %v2207_v9, %v2713_v21  ;;  %v7413_v16 = vld [vmem:[#allocation95_spill] sm:$0xff]  ;;  %v7416_v31 = vld [vmem:[#allocation16_spill] sm:$0xff] }
 0x299   : > { %v2836_v17 = vmax.f32 %v7406_v30, %v2772_v60  ;;  %v2711_v7 = vadd.f32 %v6331_v37, %v2647_v55  ;;  %v2476_v62 = vadd.f32 %v6323_v10, %v6517_v2  ;;  %v1991_v19 = vadd.f32 %v6323_v10, %v6540_v36 }
 0x29a   : > { %3159 = vst.msk [vmem:[%s6037_s24 + $0xbc] sm:$0xf] %vm3111_vm1, %v3610_v43  ;;  %v2208_v46 = vadd.f32 %v6331_v37, %v2144_v63  ;;  %v2650_v8 = vmul.f32 %v6344_v25, %v2586_v47  ;;  %v2142_v13 = vmul.f32 %v6344_v25, %v2078_v5  ;;  %v7409_v6 = vmax.f32 %v7407_v32, %v7408_v54 }
 0x29b   : > { %v3608_v42 = vpack.c.bf16 %v2836_v17, %v2836_v17  ;;  %v2775_v4 = vmax.f32 %v2205_v50, %v2711_v7  ;;  %v2584_v59 = vmax.f32 %v2476_v62, 0.0  ;;  %v2083_v26 = vmax.f32 %v1991_v19, 0.0  ;;  %v7417_v17 = vld [vmem:[#allocation17_spill] sm:$0xff]  ;;  %v7419_v62 = vld [vmem:[#allocation98_spill] sm:$0xff] }
 0x29c   : > { %v2841_v44 = vmax.f32 %v7409_v6, %v2777_v49  ;;  %v2714_v2 = vadd.f32 %v6331_v37, %v2650_v8  ;;  %v2206_v36 = vadd.f32 %v6331_v37, %v2142_v13  ;;  %v2497_v39 = vadd.f32 %v6323_v10, %v6547_v15  ;;  %v7418_v7 = vld [vmem:[#allocation97_spill] sm:$0xff]  ;;  %v7421_v6 = vld [vmem:[#allocation18_spill] sm:$0xff] }
 0x29d   : > { %3157 = vst.msk [vmem:[%s6037_s24 + $0xb4] sm:$0xf] %vm3111_vm1, %v3608_v42  ;;  %v1983_v35 = vadd.f32 %v6323_v10, %v6549_v0  ;;  %v7412_v9 = vmax.f32 %v7410_v12, %v7411_v24  ;;  %v2648_v22 = vmul.f32 %v6344_v25, %v2584_v59  ;;  %v2147_v3 = vmul.f32 %v6344_v25, %v2083_v26 }
 0x29e   : > { %v3613_v57 = vpack.c.bf16 %v2841_v44, %v2841_v44  ;;  %v2778_v40 = vmax.f32 %v2208_v46, %v2714_v2  ;;  %v2589_v18 = vmax.f32 %v2497_v39, 0.0  ;;  %v2489_v27 = vadd.f32 %v6323_v10, %v6553_v23  ;;  %v7422_v39 = vld [vmem:[#allocation99_spill] sm:$0xff] }
 0x29f   : > { %v2839_v11 = vmax.f32 %v7412_v9, %v2775_v4  ;;  %v2081_v20 = vmax.f32 %v1983_v35, 0.0  ;;  %v2712_v0 = vadd.f32 %v6331_v37, %v2648_v22  ;;  %v2211_v53 = vadd.f32 %v6331_v37, %v2147_v3  ;;  %v7423_v35 = vld [vmem:[#allocation100_spill] sm:$0xff] }
 0x2a0   : > { %3162 = vst.msk [vmem:[%s6037_s24 + $0xc8] sm:$0xf] %vm3111_vm1, %v3613_v57  ;;  %v1994_v60 = vadd.f32 %v6323_v10, %v6555_v48  ;;  %v7415_v33 = vmax.f32 %v7413_v16, %v7414_v41  ;;  %v2653_v21 = vmul.f32 %v6344_v25, %v2589_v18  ;;  %v2587_v23 = vmax.f32 %v2489_v27, 0.0  ;;  %v7426_v27 = vld [vmem:[#allocation102_spill] sm:$0xff] }
 0x2a1   : > { %v3611_v15 = vpack.c.bf16 %v2839_v11, %v2839_v11  ;;  %v2145_v50 = vmul.f32 %v6344_v25, %v2081_v20  ;;  %v2776_v55 = vmax.f32 %v2206_v36, %v2712_v0  ;;  %v2500_v30 = vadd.f32 %v6323_v10, %v7416_v31  ;;  %v7425_v20 = vld [vmem:[#allocation101_spill] sm:$0xff] }
 0x2a2   : > { %v2842_v43 = vmax.f32 %v7415_v33, %v2778_v40  ;;  %v2084_v45 = vmax.f32 %v1994_v60, 0.0  ;;  %v1986_v48 = vadd.f32 %v6323_v10, %v7417_v17  ;;  %v2717_v47 = vadd.f32 %v6331_v37, %v2653_v21 }
 0x2a3   : > { %3160 = vst.msk [vmem:[%s6037_s24 + $0xc0] sm:$0xf] %vm3111_vm1, %v3611_v15  ;;  %v2209_v5 = vadd.f32 %v6331_v37, %v2145_v50  ;;  %v2651_v49 = vmul.f32 %v6344_v25, %v2587_v23  ;;  %v7420_v19 = vmax.f32 %v7418_v7, %v7419_v62  ;;  %v2590_v8 = vmax.f32 %v2500_v30, 0.0  ;;  %v7428_v50 = vld [vmem:[#allocation19_spill] sm:$0xff] }
 0x2a4   : > { %v3614_v63 = vpack.c.bf16 %v2842_v43, %v2842_v43  ;;  %v2148_v46 = vmul.f32 %v6344_v25, %v2084_v45  ;;  %v2082_v13 = vmax.f32 %v1986_v48, 0.0  ;;  %v2781_v32 = vmax.f32 %v2211_v53, %v2717_v47  ;;  %v7430_v45 = vld [vmem:[#allocation104_spill] sm:$0xff] }
 0x2a5   : > { %v2840_v42 = vmax.f32 %v7420_v19, %v2776_v55  ;;  %v2715_v54 = vadd.f32 %v6331_v37, %v2651_v49  ;;  %v2492_v44 = vadd.f32 %v6323_v10, %v7421_v6  ;;  %v2007_v4 = vadd.f32 %v6323_v10, %v6594_v52  ;;  %v7429_v55 = vld [vmem:[#allocation103_spill] sm:$0xff]  ;;  %v7432_v49 = vld [vmem:[#allocation20_spill] sm:$0xff] }
 0x2a6   : > { %3163 = vst.msk [vmem:[%s6037_s24 + $0xcc] sm:$0xf] %vm3111_vm1, %v3614_v63  ;;  %v2212_v26 = vadd.f32 %v6331_v37, %v2148_v46  ;;  %v2654_v2 = vmul.f32 %v6344_v25, %v2590_v8  ;;  %v2146_v36 = vmul.f32 %v6344_v25, %v2082_v13  ;;  %v7424_v57 = vmax.f32 %v7422_v39, %v7423_v35  ;;  %v7433_v8 = vld [vmem:[#allocation105_spill] sm:$0xff]  ;;  %v7434_v13 = vld [vmem:[#allocation106_spill] sm:$0xff] }
 0x2a7   : > { %v3612_v59 = vpack.c.bf16 %v2840_v42, %v2840_v42  ;;  %v2779_v24 = vmax.f32 %v2209_v5, %v2715_v54  ;;  %v2588_v9 = vmax.f32 %v2492_v44, 0.0  ;;  %v2087_v11 = vmax.f32 %v2007_v4, 0.0 }
 0x2a8   : > { %v2845_v12 = vmax.f32 %v7424_v57, %v2781_v32  ;;  %v2718_v22 = vadd.f32 %v6331_v37, %v2654_v2  ;;  %v2210_v52 = vadd.f32 %v6331_v37, %v2146_v36  ;;  %v2513_v3 = vadd.f32 %v6323_v10, %v6599_v38 }
 0x2a9   : > { %3161 = vst.msk [vmem:[%s6037_s24 + $0xc4] sm:$0xf] %vm3111_vm1, %v3612_v59  ;;  %v1999_v40 = vadd.f32 %v6323_v10, %v6601_v34  ;;  %v7427_v15 = vmax.f32 %v7425_v20, %v7426_v27  ;;  %v2652_v53 = vmul.f32 %v6344_v25, %v2588_v9  ;;  %v2151_v60 = vmul.f32 %v6344_v25, %v2087_v11  ;;  %v4189_v59 = vld [vmem:[#allocation7] ss:$0 sm:$0xff]  ;;  %v7439_v27 = vld [vmem:[#allocation109_spill] sm:$0xff] }
 0x2aa   : > { %v3617_v18 = vpack.c.bf16 %v2845_v12, %v2845_v12  ;;  %v2782_v16 = vmax.f32 %v2212_v26, %v2718_v22  ;;  %v2593_v41 = vmax.f32 %v2513_v3, 0.0  ;;  %v2505_v43 = vadd.f32 %v6323_v10, %v6606_v28  ;;  %v7436_v12 = vld [vmem:[#allocation107_spill] sm:$0xff] }
 0x2ab   : > { %v2843_v0 = vmax.f32 %v7427_v15, %v2779_v24  ;;  %v2085_v33 = vmax.f32 %v1999_v40, 0.0  ;;  %v2716_v34 = vadd.f32 %v6331_v37, %v2652_v53  ;;  %v2215_v21 = vadd.f32 %v6331_v37, %v2151_v60  ;;  %v7437_v24 = vld [vmem:[#allocation108_spill] sm:$0xff]  ;;  %v4191_v53 = vld [vmem:[#allocation8] ss:$0 sm:$0xff] }
 0x2ac   : > { %3166 = vst.msk [vmem:[%s6037_s24 + $0xd8] sm:$0xf] %vm3111_vm1, %v3617_v18  ;;  %v2010_v23 = vadd.f32 %v6323_v10, %v7428_v50  ;;  %v7431_v31 = vmax.f32 %v7429_v55, %v7430_v45  ;;  %v2657_v17 = vmul.f32 %v6344_v25, %v2593_v41  ;;  %v2591_v28 = vmax.f32 %v2505_v43, 0.0  ;;  %v7444_v55 = vld [vmem:[#allocation112_spill] sm:$0xff] }
 0x2ad   : > { %v3615_v38 = vpack.c.bf16 %v2843_v0, %v2843_v0  ;;  %v2149_v48 = vmul.f32 %v6344_v25, %v2085_v33  ;;  %v2780_v63 = vmax.f32 %v2210_v52, %v2716_v34  ;;  %v2516_v5 = vadd.f32 %v6323_v10, %v6618_v29 }
 0x2ae   : > { %v2846_v30 = vmax.f32 %v7431_v31, %v2782_v16  ;;  %v2088_v47 = vmax.f32 %v2010_v23, 0.0  ;;  %v2002_v7 = vadd.f32 %v6323_v10, %v7432_v49  ;;  %v2721_v19 = vadd.f32 %v6331_v37, %v2657_v17  ;;  %v7443_v23 = vld [vmem:[#allocation111_spill] sm:$0xff] }
 0x2af   : > { %3164 = vst.msk [vmem:[%s6037_s24 + $0xd0] sm:$0xf] %vm3111_vm1, %v3615_v38  ;;  %v2213_v42 = vadd.f32 %v6331_v37, %v2149_v48  ;;  %v2655_v46 = vmul.f32 %v6344_v25, %v2591_v28  ;;  %v7435_v32 = vmax.f32 %v7433_v8, %v7434_v13  ;;  %v2594_v44 = vmax.f32 %v2516_v5, 0.0 }
 0x2b0   : > { %v3618_v62 = vpack.c.bf16 %v2846_v30, %v2846_v30  ;;  %v2152_v6 = vmul.f32 %v6344_v25, %v2088_v47  ;;  %v2086_v4 = vmax.f32 %v2002_v7, 0.0  ;;  %v2785_v29 = vmax.f32 %v2215_v21, %v2721_v19  ;;  %v7446_v47 = vld [vmem:[#allocation22_spill] sm:$0xff] }
 0x2b1   : > { %v2844_v54 = vmax.f32 %v7435_v32, %v2780_v63  ;;  %v2719_v10 = vadd.f32 %v6331_v37, %v2655_v46  ;;  %v2508_v26 = vadd.f32 %v4189_v59, %v6627_v14  ;;  %v2023_v2 = vadd.f32 %v4189_v59, %v6648_v61  ;;  %v4190_v14 = vld [vmem:[#allocation10] ss:$0 sm:$0xff]  ;;  %v7448_v46 = vld [vmem:[#allocation114_spill] sm:$0xff] }
 0x2b2   : > { %3167 = vst.msk [vmem:[%s6037_s24 + $0xdc] sm:$0xf] %vm3111_vm1, %v3618_v62  ;;  %v2216_v39 = vadd.f32 %v6331_v37, %v2152_v6  ;;  %v2658_v35 = vmul.f32 %v6344_v25, %v2594_v44  ;;  %v2150_v57 = vmul.f32 %v6344_v25, %v2086_v4  ;;  %v7438_v9 = vmax.f32 %v7436_v12, %v7437_v24  ;;  %v7440_v25 = vld [vmem:[#allocation110_spill] sm:$0xff] }
 0x2b3   : > { %v3616_v36 = vpack.c.bf16 %v2844_v54, %v2844_v54  ;;  %v2783_v22 = vmax.f32 %v2213_v42, %v2719_v10  ;;  %v2592_v52 = vmax.f32 %v2508_v26, 0.0  ;;  %v2091_v3 = vmax.f32 %v2023_v2, 0.0  ;;  %v7447_v42 = vld [vmem:[#allocation113_spill] sm:$0xff] }
 0x2b4   : > { %v2849_v11 = vmax.f32 %v7438_v9, %v2785_v29  ;;  %v2722_v40 = vadd.f32 %v4190_v14, %v2658_v35  ;;  %v2214_v61 = vadd.f32 %v4190_v14, %v2150_v57  ;;  %v2529_v18 = vadd.f32 %v4189_v59, %v6653_v58  ;;  %v7450_v29 = vld [vmem:[#allocation23_spill] sm:$0xff]  ;;  %v7452_v35 = vld [vmem:[#allocation116_spill] sm:$0xff] }
 0x2b5   : > { %3165 = vst.msk [vmem:[%s6037_s24 + $0xd4] sm:$0xf] %vm3111_vm1, %v3616_v36  ;;  %v2015_v37 = vadd.f32 %v4189_v59, %v6655_v51  ;;  %v7441_v15 = vmax.f32 %v7439_v27, %v7440_v25  ;;  %v2656_v60 = vmul.f32 %v4191_v53, %v2592_v52  ;;  %v2155_v16 = vmul.f32 %v4191_v53, %v2091_v3  ;;  %v7442_v51 = vld [vmem:[#allocation21_spill] sm:$0xff]  ;;  %v7457_v25 = vld [vmem:[#allocation119_spill] sm:$0xff] }
 0x2b6   : > { %v3621_v20 = vpack.c.bf16 %v2849_v11, %v2849_v11  ;;  %v2786_v41 = vmax.f32 %v2216_v39, %v2722_v40  ;;  %v2597_v33 = vmax.f32 %v2529_v18, 0.0  ;;  %v2521_v38 = vadd.f32 %v4189_v59, %v6661_v56  ;;  %v7451_v39 = vld [vmem:[#allocation115_spill] sm:$0xff]  ;;  %v7454_v52 = vld [vmem:[#allocation117_spill] sm:$0xff] }
 0x2b7   : > { %v2847_v0 = vmax.f32 %v7441_v15, %v2783_v22  ;;  %v2089_v43 = vmax.f32 %v2015_v37, 0.0  ;;  %v2720_v58 = vadd.f32 %v4190_v14, %v2656_v60  ;;  %v2219_v21 = vadd.f32 %v4190_v14, %v2155_v16  ;;  %v7458_v15 = vld [vmem:[#allocation120_spill] sm:$0xff] }
 0x2b8   : > { %3170 = vst.msk [vmem:[%s6037_s24 + $0xe8] sm:$0xf] %vm3111_vm1, %v3621_v20  ;;  %v2026_v50 = vadd.f32 %v4189_v59, %v7442_v51  ;;  %v7445_v45 = vmax.f32 %v7443_v23, %v7444_v55  ;;  %v2661_v30 = vmul.f32 %v4191_v53, %v2597_v33  ;;  %v2595_v48 = vmax.f32 %v2521_v38, 0.0  ;;  %v7460_v33 = vld [vmem:[#allocation121_spill] sm:$0xff] }
 0x2b9   : > { %v3619_v34 = vpack.c.bf16 %v2847_v0, %v2847_v0  ;;  %v2153_v17 = vmul.f32 %v4191_v53, %v2089_v43  ;;  %v2784_v28 = vmax.f32 %v2214_v61, %v2720_v58  ;;  %v2532_v56 = vadd.f32 %v4189_v59, %v6672_v1 }
 0x2ba   : > { %v2850_v31 = vmax.f32 %v7445_v45, %v2786_v41  ;;  %v2092_v63 = vmax.f32 %v2026_v50, 0.0  ;;  %v2018_v5 = vadd.f32 %v4189_v59, %v7446_v47  ;;  %v2725_v7 = vadd.f32 %v4190_v14, %v2661_v30 }
 0x2bb   : > { %3168 = vst.msk [vmem:[%s6037_s24 + $0xe0] sm:$0xf] %vm3111_vm1, %v3619_v34  ;;  %v2217_v62 = vadd.f32 %v4190_v14, %v2153_v17  ;;  %v2659_v19 = vmul.f32 %v4191_v53, %v2595_v48  ;;  %v7449_v8 = vmax.f32 %v7447_v42, %v7448_v46  ;;  %v2598_v54 = vmax.f32 %v2532_v56, 0.0 }
 0x2bc   : > { %v3622_v49 = vpack.c.bf16 %v2850_v31, %v2850_v31  ;;  %v2156_v32 = vmul.f32 %v4191_v53, %v2092_v63  ;;  %v2090_v6 = vmax.f32 %v2018_v5, 0.0  ;;  %v2789_v44 = vmax.f32 %v2219_v21, %v2725_v7 }
 0x2bd   : > { %v2848_v13 = vmax.f32 %v7449_v8, %v2784_v28  ;;  %v2723_v4 = vadd.f32 %v4190_v14, %v2659_v19  ;;  %v2524_v1 = vadd.f32 %v4189_v59, %v7450_v29  ;;  %v2662_v2 = vmul.f32 %v4191_v53, %v2598_v54  ;;  %v7455_v59 = vld [vmem:[#allocation118_spill] sm:$0xff] }
 0x2be   : > { %3171 = vst.msk [vmem:[%s6037_s24 + $0xec] sm:$0xf] %vm3111_vm1, %v3622_v49  ;;  %v2220_v26 = vadd.f32 %v4190_v14, %v2156_v32  ;;  %v2154_v36 = vmul.f32 %v4191_v53, %v2090_v6  ;;  %v7453_v57 = vmax.f32 %v7451_v39, %v7452_v35  ;;  %v7456_v3 = vmax.f32 %v7454_v52, %v7455_v59 }
 0x2bf   : > { %v3620_v10 = vpack.c.bf16 %v2848_v13, %v2848_v13  ;;  %v2787_v24 = vmax.f32 %v2217_v62, %v2723_v4  ;;  %v2596_v9 = vmax.f32 %v2524_v1, 0.0  ;;  %v2726_v11 = vadd.f32 %v4190_v14, %v2662_v2 }
 0x2c0   : > { %v2853_v12 = vmax.f32 %v7453_v57, %v2789_v44  ;;  %v2218_v61 = vadd.f32 %v4190_v14, %v2154_v36  ;;  %v7459_v0 = vmax.f32 %v7457_v25, %v7458_v15 }
 0x2c1   : > { %3169 = vst.msk [vmem:[%s6037_s24 + $0xe4] sm:$0xf] %vm3111_vm1, %v3620_v10  ;;  %v2851_v40 = vmax.f32 %v7456_v3, %v2787_v24  ;;  %v2660_v18 = vmul.f32 %v4191_v53, %v2596_v9  ;;  %v2790_v37 = vmax.f32 %v2220_v26, %v2726_v11  ;;  %v7461_v53 = vld [vmem:[#allocation122_spill] sm:$0xff] }
 0x2c2   : > { %v3625_v22 = vpack.c.bf16 %v2853_v12, %v2853_v12  ;;  %v7462_v43 = vmax.f32 %v7460_v33, %v7461_v53 }
 0x2c3   : > { %v3623_v20 = vpack.c.bf16 %v2851_v40, %v2851_v40  ;;  %v2724_v27 = vadd.f32 %v4190_v14, %v2660_v18  ;;  %v2854_v60 = vmax.f32 %v7459_v0, %v2790_v37 }
 0x2c4   : > { %3174 = vst.msk [vmem:[%s6037_s24 + $0xf8] sm:$0xf] %vm3111_vm1, %v3625_v22 }
 0x2c5   : > { %3172 = vst.msk [vmem:[%s6037_s24 + $0xf0] sm:$0xf] %vm3111_vm1, %v3623_v20  ;;  %v2788_v16 = vmax.f32 %v2218_v61, %v2724_v27  ;;  %v3626_v41 = vpack.c.bf16 %v2854_v60, %v2854_v60 }
 0x2c7   : > { %v2852_v38 = vmax.f32 %v7462_v43, %v2788_v16  ;;  %3175 = vst.msk [vmem:[%s6037_s24 + $0xfc] sm:$0xf] %vm3111_vm1, %v3626_v41 }
 0x2c9   : > { %v3624_v14 = vpack.c.bf16 %v2852_v38, %v2852_v38 }
 0x2cb   : > { %3173 = vst.msk [vmem:[%s6037_s24 + $0xf4] sm:$0xf] %vm3111_vm1, %v3624_v14 }
 0x2cc   : > { %4347 = shalt.err (!%p4344_p13)
}
 0x2cd   : > { %s4348_s29 = scalar_lea.hbm %s6991_s6, 4096  ;;  %s4352_s15 = scalar_lea.hbm %s7044_s5, 8192 }
 0x2ce   : > { %p4349_p9 = scmp.ne.s32.totalorder %s6991_s6, %s4348_s29  ;;  %p4353_p6 = scmp.lt.u32.totalorder %s6991_s6, %s7044_s5 }
 0x2cf   : > { %p4354_p4 = scmp.lt.u32.totalorder %s4352_s15, %s4348_s29  ;;  %p4356_p3 = scmp.lt.u32.totalorder %s4348_s29, %s6991_s6 }
 0x2d0   : > { %p4350_p0 = pnand %p4349_p9, %p4613_p10 }
 0x2d1   : > { %p4355_p8 = por %p4354_p4, %p4353_p6 }
 0x2d2   : > { %p4351_p11 = pneg %p4350_p0 }
 0x2d3   : > { %p4357_p5 = por %p4356_p3, %p4355_p8 }
 0x2d5   : > { %p4358_p7 = pnand %p4357_p5, %p4351_p11 }
 0x2d7   : > { %4361 = shalt.err (!%p4358_p7)
}
 0x2d8   : > { %s4418_s26 = smov 64   ;;  %s4419_s27 = smov 4  }
 0x2d9   : > { %4066 = dma.vmem_to_hbm [thread:$0]  (%p4613_p10), %s6993_s23, 4096, %s6991_s6, %s3177_s22, %s4418_s26, %s4418_s26, %s4419_s27  }
 0x2da PF: > { %s3205_s28 = sand.u32 1, %s4396_s18   ;;  %p7463_p12 = scmp.ne.s32.totalorder %s7156_s25, 0 }
 0x2db   : > { %p7464_p1 = scmp.ge.s32.totalorder %s4408_s21, 2  ;;  %s3206_s30 = scalar_lea.sflag [#allocation4], %s3205_s28 }
 0x2dd   : > { %p4086_p2 = pnand %p7464_p1, %p7463_p12 }
 0x2df   : > { %4391 = dma.done.wait (!%p4086_p2), %s3206_s30, 4096  }
 0x2e0   : > { %4393 = vsyncadd (!%p4086_p2), %s3206_s30, 4294963200  ;;  %p20_p13 = scmp.ge.s32.totalorder %s4603_s14, 4   ;;  %s7465_s18 = smov %s4400_s19 }
 0x2e1   : > { %s7466_s19 = smov %s4404_s20  ;;  %s7467_s20 = smov %s4619_s11 }
 0x2e2   : > { %s7468_s21 = smov %s4603_s14  ;;  %22 = sbr.rel (!%p20_p13) target bundleno = 7 (0x7), region = 104 }
 0x2e9   :  { %3211 = vsyncpa [#allocation3], 1 }
 0x2ea   :  { %3213 = vsyncpa [#allocation3 + $0x1], 1 }
 0x2eb   :  { %3214 = vsyncpa [#allocation6], 1 }
 0x2ec   :  { %3215 = vsyncpa [#allocation9], 1 }
 0x2ed   :  { %3216 = vsyncpa [#allocation4], 1 }
 0x2ee   :  { %3218 = vsyncpa [#allocation4 + $0x1], 1 }

// kernel: cnn_lstm_forward.7
= control target key start
LH: loop header
LB: loop body
LE: loop exit
PB: predicated region body
PF: predicated region fallthrough
CT: control target
= control target key end

     0   :  { %10 = vsyncpa [#allocation3], 0  ;;  %s5018_s0 = inlined_call_operand.hbm [shape: bf16[256,512], index: 0, kind: input, shape index: {}]   ;;  %s5019_s1 = inlined_call_operand.hbm [shape: bf16[4,512,64], index: 1, kind: input, shape index: {}]   ;;  %s5020_s2 = inlined_call_operand.hbm [shape: f32[1,64], index: 2, kind: input, shape index: {}]   ;;  %s5021_s3 = inlined_call_operand.hbm [shape: f32[1,64], index: 3, kind: input, shape index: {}]   ;;  %s5022_s4 = inlined_call_operand.hbm [shape: f32[1,64], index: 4, kind: input, shape index: {}]   ;;  %s5023_s5 = inlined_call_operand.hbm [shape: bf16[256,64], index: 5, kind: output, shape index: {}]  }
   0x1   :  { %12 = vsyncpa [#allocation3 + $0x1], 0 }
   0x2   :  { %13 = vsyncpa [#allocation6], 0 }
   0x3   :  { %14 = vsyncpa [#allocation9], 0 }
   0x4   :  { %15 = vsyncpa [#allocation4], 0 }
   0x5   :  { %17 = vsyncpa [#allocation4 + $0x1], 0  ;;  %s4034_s18 = smov 0   ;;  %s4036_s19 = smov 0  }
   0x6   :  { %s4038_s20 = smov 0   ;;  %s4040_s21 = smov 0  }
   0x7 LB: > { %s4055_s22 = sadd.s32 4294967295, %s3990_s21   ;;  %s2761_s23 = sadd.s32 4294967294, %s3990_s21   ;;  %s3990_s21 = sphi %s4040_s21, %s5086_s21   ;;  %s3986_s20 = sphi %s4038_s20, %s5085_s20   ;;  %s3982_s19 = sphi %s4036_s19, %s5084_s19   ;;  %s3978_s18 = sphi %s4034_s18, %s5083_s18  }
   0x8   : > { %p43_p0 = scmp.ne.s32.totalorder %s3982_s19, %s3978_s18  ;;  %p5024_p1 = scmp.eq.s32.totalorder %s4055_s22, 0 }
   0x9   : > { %p157_p3 = scmp.eq.s32.totalorder %s2761_s23, 1  ;;  %p2762_p5 = scmp.ge.s32.totalorder %s3990_s21, 1 }
   0xa   : > { %p4064_p4 = por %p5024_p1, %p43_p0  ;;  %p164_p7 = scmp.lt.s32.totalorder %s3990_s21, 3 }
   0xb   : > { %p4069_p6 = por %p157_p3, %p43_p0  ;;  %s3992_s27 = smov [#allocation5]  }
   0xc   : > { %s5035_s24 = scalar_select %p4064_p4, 1, 0 }
   0xd   : > { %s5036_s25 = scalar_select %p4069_p6, 1, 0 }
   0xe   : > { %p4074_p8 = pnand %p2762_p5, %p164_p7  ;;  %s176_s28 = sshll.u32 %s3992_s27, 4  ;;  %s4078_s28 = int_to_ptr.vmem [resolvable:$true] %s176_s28 }
   0xf   : > { %s3993_s30 = smov [#allocation8]   ;;  %s3994_s7 = smov [#allocation7]  }
  0x10   : > { %s5037_s26 = scalar_select %p4074_p8, 1, 0 }
  0x11   : > { %p3514_p9 = pneg %p4074_p8  ;;  %s201_s6 = sshll.u32 %s3993_s30, 4  ;;  %s4089_s6 = int_to_ptr.vmem [resolvable:$true] %s201_s6 }
  0x12   : > { %s4091_s8 = sshll.u32 %s3994_s7, 4  ;;  %s3774_s11 = scalar_lea.hbm %s5019_s1, 16384  ;;  %s191_s8 = int_to_ptr.vmem [resolvable:$true] %s4091_s8 }
  0x13   : > { %p4085_p11 = pnand %p3514_p9, %p5024_p1  ;;  %p3775_p12 = scmp.ne.s32.totalorder %s5019_s1, %s3774_s11 }
  0x14   : > { %p3781_p5 = scmp.lt.u32.totalorder %s3774_s11, %s5019_s1 }
  0x15   : > { %p4101_p13 = pneg %p4085_p11 }
  0x17   : > { %p3777_p0 = pnand %p4101_p13, %p3775_p12 }
  0x19   : > { %p3778_p3 = pneg %p3777_p0 }
  0x1b   : > { %p3783_p7 = pnand %p3781_p5, %p3778_p3 }
  0x1d   : > { %3786 = shalt.err (!%p3783_p7)
}
  0x1e   : > { %s3787_s17 = scalar_lea.vmem %s4078_s28, 16384  ;;  %p3795_p2 = scmp.lt.s32.totalorder %s4078_s28, %s4078_s28 }
  0x1f   : > { %p3788_p9 = scmp.ne.s32.totalorder %s4078_s28, %s3787_s17  ;;  %p3796_p6 = scmp.lt.s32.totalorder %s3787_s17, %s3787_s17 }
  0x21   : > { %p3790_p10 = pnand %p3788_p9, %p4101_p13  ;;  %p3797_p12 = por %p3796_p6, %p3795_p2 }
  0x23   : > { %p3791_p1 = pneg %p3790_p10 }
  0x25   : > { %p3798_p0 = pnand %p3797_p12, %p3791_p1 }
  0x27   : > { %3801 = shalt.err (!%p3798_p0)
}
  0x28   : > { %s3995_s23 = smov 64   ;;  %s3996_s27 = smov 4  }
  0x29   : > { %3517 = dma.hbm_to_vmem [thread:$0]  (!%p4085_p11), %s5019_s1, 16384, %s4078_s28, [#allocation6], %s3995_s23, %s3995_s23, %s3996_s27  }
  0x2a   : > { %s3802_s11 = scalar_lea.hbm %s5021_s3, 16 }
  0x2b   : > { %p3803_p2 = scmp.ne.s32.totalorder %s5021_s3, %s3802_s11  ;;  %p3809_p10 = scmp.lt.u32.totalorder %s3802_s11, %s5021_s3 }
  0x2d   : > { %p3805_p1 = pnand %p3803_p2, %p4101_p13 }
  0x2f   : > { %p3806_p6 = pneg %p3805_p1 }
  0x31   : > { %p3811_p3 = pnand %p3809_p10, %p3806_p6 }
  0x33   : > { %3814 = shalt.err (!%p3811_p3)
}
  0x34   : > { %s3815_s28 = scalar_lea.vmem %s4089_s6, 16  ;;  %s3822_s17 = scalar_lea.vmem %s4089_s6, 32 }
  0x35   : > { %p3816_p5 = scmp.ne.s32.totalorder %s4089_s6, %s3815_s28  ;;  %p3823_p12 = scmp.lt.s32.totalorder %s4089_s6, %s4089_s6 }
  0x36   : > { %p3824_p0 = scmp.lt.s32.totalorder %s3822_s17, %s3815_s28 }
  0x37   : > { %p3818_p7 = pnand %p3816_p5, %p4101_p13 }
  0x38   : > { %p3825_p2 = por %p3824_p0, %p3823_p12 }
  0x39   : > { %p3819_p9 = pneg %p3818_p7 }
  0x3b   : > { %p3826_p1 = pnand %p3825_p2, %p3819_p9 }
  0x3d   : > { %3829 = shalt.err (!%p3826_p1)
}
  0x3e   : > { %3523 = dma.hbm_to_vmem [thread:$0]  (!%p4085_p11), %s5021_s3, 16, %s4089_s6, [#allocation9]  }
  0x3f   : > { %s3830_s9 = scalar_lea.hbm %s5020_s2, 16 }
  0x40   : > { %p3831_p6 = scmp.ne.s32.totalorder %s5020_s2, %s3830_s9  ;;  %p3837_p5 = scmp.lt.u32.totalorder %s3830_s9, %s5020_s2 }
  0x42   : > { %p3833_p10 = pnand %p3831_p6, %p4101_p13 }
  0x44   : > { %p3834_p3 = pneg %p3833_p10 }
  0x46   : > { %p3839_p7 = pnand %p3837_p5, %p3834_p3 }
  0x48   : > { %3842 = shalt.err (!%p3839_p7)
}
  0x49   : > { %s3843_s15 = scalar_lea.vmem %s191_s8, 16  ;;  %s3850_s6 = scalar_lea.vmem %s191_s8, 32 }
  0x4a   : > { %p3844_p9 = scmp.ne.s32.totalorder %s191_s8, %s3843_s15  ;;  %p3851_p2 = scmp.lt.s32.totalorder %s191_s8, %s191_s8 }
  0x4b   : > { %p3852_p1 = scmp.lt.s32.totalorder %s3850_s6, %s3843_s15 }
  0x4c   : > { %p3846_p12 = pnand %p3844_p9, %p4101_p13 }
  0x4d   : > { %p3853_p4 = por %p3852_p1, %p3851_p2 }
  0x4e   : > { %p3847_p0 = pneg %p3846_p12 }
  0x50   : > { %p3854_p8 = pnand %p3853_p4, %p3847_p0 }
  0x52   : > { %3857 = shalt.err (!%p3854_p8)
}
  0x53   : > { %3520 = dma.hbm_to_vmem [thread:$0]  (!%p4085_p11), %s5020_s2, 16, %s191_s8, [#allocation6]  }
  0x54   : > { %s3997_s17 = smov [#allocation10]   ;;  %s3858_s7 = scalar_lea.hbm %s5022_s4, 16 }
  0x55   : > { %s212_s23 = sshll.u32 %s3997_s17, 4  ;;  %p3859_p6 = scmp.ne.s32.totalorder %s5022_s4, %s3858_s7  ;;  %s213_s23 = int_to_ptr.vmem [resolvable:$true] %s212_s23 }
  0x56   : > { %p3865_p10 = scmp.lt.u32.totalorder %s3858_s7, %s5022_s4 }
  0x57   : > { %p3861_p4 = pnand %p3859_p6, %p4101_p13 }
  0x59   : > { %p3862_p8 = pneg %p3861_p4 }
  0x5b   : > { %p3867_p3 = pnand %p3865_p10, %p3862_p8 }
  0x5d   : > { %3870 = shalt.err (!%p3867_p3)
}
  0x5e   : > { %s3871_s8 = scalar_lea.vmem %s213_s23, 16  ;;  %s3878_s13 = scalar_lea.vmem %s213_s23, 32 }
  0x5f   : > { %p3872_p5 = scmp.ne.s32.totalorder %s213_s23, %s3871_s8  ;;  %p3879_p12 = scmp.lt.s32.totalorder %s213_s23, %s213_s23 }
  0x60   : > { %p3880_p0 = scmp.lt.s32.totalorder %s3878_s13, %s3871_s8 }
  0x61   : > { %p3874_p7 = pnand %p3872_p5, %p4101_p13 }
  0x62   : > { %p3881_p2 = por %p3880_p0, %p3879_p12 }
  0x63   : > { %p3875_p9 = pneg %p3874_p7 }
  0x65   : > { %p3882_p1 = pnand %p3881_p2, %p3875_p9 }
  0x67   : > { %3885 = shalt.err (!%p3882_p1)
}
  0x68   : > { %3526 = dma.hbm_to_vmem [thread:$0]  (!%p4085_p11), %s5022_s4, 16, %s213_s23, [#allocation9]  }
  0x69   : > { %s4184_s14 = sadd.s32 1, %s3990_s21   ;;  %s30_s16 = sadd.s32 1, %s3986_s20 }
  0x6a   : > { %s27_s29 = ssub.s32 %s3990_s21, %s4184_s14  ;;  %p37_p13 = scmp.ne.s32.totalorder %s3986_s20, %s3982_s19 }
  0x6b   : > { %p28_p6 = scmp.eq.s32.totalorder %s27_s29, 0  ;;  %p38_p4 = scmp.eq.s32.totalorder %s3990_s21, 0 }
  0x6c   : > { %p5040_p8 = scmp.eq.s32.totalorder %s4055_s22, 1  ;;  %p3539_p3 = scmp.lt.s32.totalorder %s3990_s21, 2 }
  0x6d   : > { %s4200_s17 = scalar_select %p28_p6, %s3986_s20, %s30_s16  }
  0x6e   : > { %p4194_p10 = por %p5040_p8, %p37_p13  ;;  %p39_p5 = por %p38_p4, %p37_p13 }
  0x6f   : > { %s223_s27 = sand.u32 1, %s3986_s20   ;;  %s2964_s23 = sshll.u32 %s3990_s21, 12 }
  0x70   : > { %s2768_s30 = sshll.u32 %s223_s27, 8  ;;  %s4207_s10 = scalar_lea.hbm %s5018_s0, %s2964_s23 }
  0x71   : > { %s227_s11 = scalar_lea.vmem [#allocation2], %s2768_s30  ;;  %p4211_p11 = pnand %p3539_p3, %p39_p5 }
  0x72   : > { %s235_s12 = sshll.u32 %s227_s11, 4  ;;  %s4215_s13 = scalar_lea.sflag [#allocation3], %s223_s27  ;;  %s4209_s12 = int_to_ptr.vmem [resolvable:$true] %s235_s12 }
  0x73   : > { %s3886_s15 = scalar_lea.hbm %s4207_s10, 4096  ;;  %p3888_p9 = pneg %p4211_p11 }
  0x74   : > { %p3887_p7 = scmp.ne.s32.totalorder %s4207_s10, %s3886_s15  ;;  %s3891_s29 = scalar_lea.hbm %s5018_s0, 8192 }
  0x75   : > { %p3892_p2 = scmp.lt.u32.totalorder %s4207_s10, %s5018_s0  ;;  %p3893_p1 = scmp.lt.u32.totalorder %s3891_s29, %s3886_s15 }
  0x76   : > { %p3889_p12 = pnand %p3888_p9, %p3887_p7  ;;  %p3895_p6 = scmp.lt.u32.totalorder %s3886_s15, %s4207_s10 }
  0x77   : > { %p3894_p13 = por %p3893_p1, %p3892_p2 }
  0x78   : > { %p3890_p0 = pneg %p3889_p12 }
  0x79   : > { %p3896_p4 = por %p3895_p6, %p3894_p13 }
  0x7b   : > { %p3897_p8 = pnand %p3896_p4, %p3890_p0 }
  0x7d   : > { %3900 = shalt.err (!%p3897_p8)
}
  0x7e   : > { %s3901_s27 = scalar_lea.vmem %s4209_s12, 4096  ;;  %s3998_s7 = smov [#allocation2]  }
  0x7f   : > { %p3902_p3 = scmp.ne.s32.totalorder %s4209_s12, %s3901_s27  ;;  %s3906_s9 = sshll.u32 %s3998_s7, 4  ;;  %s3907_s9 = int_to_ptr.vmem [resolvable:$false] %s3906_s9 }
  0x80   : > { %s3908_s11 = scalar_lea.vmem %s3907_s9, 8192  ;;  %p3909_p12 = scmp.lt.s32.totalorder %s4209_s12, %s3907_s9 }
  0x81   : > { %p3904_p5 = pnand %p3902_p3, %p3888_p9  ;;  %p3910_p2 = scmp.lt.s32.totalorder %s3908_s11, %s3901_s27 }
  0x83   : > { %p3905_p7 = pneg %p3904_p5  ;;  %p3911_p1 = por %p3910_p2, %p3909_p12 }
  0x85   : > { %p3912_p13 = pnand %p3911_p1, %p3905_p7 }
  0x87   : > { %3915 = shalt.err (!%p3912_p13)
}
  0x88   : > { %s3999_s15 = smov 256   ;;  %s4000_s6 = smov 16  }
  0x89   : > { %3530 = dma.hbm_to_vmem [thread:$0]  (!%p4211_p11), %s4207_s10, 4096, %s4209_s12, %s4215_s13, %s3999_s15, %s3999_s15, %s4000_s6  }
  0x8a   : > { %p5043_p9 = scmp.ne.s32.totalorder %s5037_s26, 0 }
  0x8c   : > { %247 = sbr.rel (%p5043_p9) target bundleno = 688 (0x2b0), region = 40 }
  0x93   : > { %s4246_s16 = sand.u32 1, %s3982_s19   ;;  %p5044_p0 = scmp.ne.s32.totalorder %s5035_s24, 0 }
  0x94   : > { %s2773_s29 = sshll.u32 %s4246_s16, 8  ;;  %s250_s30 = scalar_lea.sflag [#allocation3], %s4246_s16 }
  0x95   : > { %s4250_s23 = scalar_lea.vmem [#allocation2], %s2773_s29 }
  0x96   : > { %3961 = dma.done.wait (%p5044_p0), %s250_s30, 4096  }
  0x97   : > { %3963 = vsyncadd (%p5044_p0), %s250_s30, 4294963200  ;;  %p5045_p11 = scmp.eq.s32.totalorder %s4055_s22, 0 }
  0x99   : > { %3965 = dma.done.wait (%p5045_p11), [#allocation6], 16400   ;;  %p5046_p6 = pmov %p5045_p11 }
  0x9b   : > { %3967 = vsyncadd (%p5046_p6), [#allocation6], 4294950896  ;;  %p5047_p4 = pmov %p5046_p6 }
  0x9d   : > { %3969 = dma.done.wait (%p5047_p4), [#allocation9], 32   ;;  %p5048_p8 = pmov %p5047_p4 }
  0x9e   : > { %v3587_v0 = vld [vmem:[#allocation5 + $0x40] sm:$0xff]   ;;  %v3591_v4 = vld [vmem:[#allocation5 + $0x48] sm:$0xff]   ;;  %v3595_v8 = vld [vmem:[#allocation5 + $0x50] sm:$0xff]   ;;  %s2778_s24 = sshll.u32 %s4246_s16, 6  ;;  %vm2619_vm0 = vcmask 519168   ;;  %s2981_s10 = sshll.u32 %s4055_s22, 10 }
  0x9f   : > { %3971 = vsyncadd (%p5048_p8), [#allocation9], 4294967264  ;;  %v3588_v1 = vld [vmem:[#allocation5 + $0xc0] sm:$0xff]   ;;  %2982 = vmatprep.subr.bf16.mxu0 %v3587_v0  ;;  %v3592_v5 = vld [vmem:[#allocation5 + $0xc8] sm:$0xff]   ;;  %s4811_s26 = scalar_lea.vmem [#allocation11], %s2778_s24  ;;  %s4968_s27 = scalar_lea.hbm %s5023_s5, %s2981_s10 }
  0xa0   : > { %v3589_v2 = vld [vmem:[#allocation5] sm:$0xff]   ;;  %3046 = vmatprep.subr.bf16.mxu1 %v3588_v1  ;;  %v3593_v6 = vld [vmem:[#allocation5 + $0x8] sm:$0xff]   ;;  %v3596_v9 = vld [vmem:[#allocation5 + $0xd0] sm:$0xff]   ;;  %s2650_s12 = sshll.u32 %s4811_s26, 4  ;;  %s2637_s22 = scalar_lea.sflag [#allocation4], %s4246_s16  ;;  %s4970_s12 = int_to_ptr.vmem [resolvable:$true] %s2650_s12 }
  0xa1   : > { %v3590_v3 = vld [vmem:[#allocation5 + $0x80] sm:$0xff]   ;;  %2983 = vmatpush3.bf16.msra.mxu0 %v3589_v2  ;;  %v3594_v7 = vld [vmem:[#allocation5 + $0x88] sm:$0xff]   ;;  %v3597_v10 = vld [vmem:[#allocation5 + $0x10] sm:$0xff]   ;;  %s3916_s7 = scalar_lea.vmem %s4970_s12, 1024  ;;  %s4001_s9 = smov [#allocation11]  }
  0xa2   : > { %3047 = vmatpush3.bf16.msra.mxu1 %v3590_v3  ;;  %2984 = vmatprep.subr.bf16.mxu0 %v3591_v4  ;;  %v3598_v11 = vld [vmem:[#allocation5 + $0x90] sm:$0xff]   ;;  %v3599_v12 = vld [vmem:[#allocation5 + $0x58] sm:$0xff]   ;;  %v3603_v16 = vld [vmem:[#allocation5 + $0x60] sm:$0xff]   ;;  %p3917_p3 = scmp.ne.s32.totalorder %s4970_s12, %s3916_s7  ;;  %s3920_s11 = sshll.u32 %s4001_s9, 4  ;;  %s3921_s11 = int_to_ptr.vmem [resolvable:$false] %s3920_s11 }
  0xa3   : > { %3048 = vmatprep.subr.bf16.mxu1 %v3592_v5  ;;  %v3600_v13 = vld [vmem:[#allocation5 + $0xd8] sm:$0xff]   ;;  %v3604_v17 = vld [vmem:[#allocation5 + $0xe0] sm:$0xff]   ;;  %v3607_v20 = vld [vmem:[#allocation5 + $0x68] sm:$0xff]   ;;  %s3922_s15 = scalar_lea.vmem %s3921_s11, 2048  ;;  %p3923_p12 = scmp.lt.s32.totalorder %s4970_s12, %s3921_s11 }
  0xa4   : > { %v3601_v14 = vld [vmem:[#allocation5 + $0x18] sm:$0xff]   ;;  %v3605_v18 = vld [vmem:[#allocation5 + $0x20] sm:$0xff]   ;;  %v3608_v21 = vld [vmem:[#allocation5 + $0xe8] sm:$0xff]   ;;  %p3918_p5 = pnand %p3917_p3, %p4194_p10  ;;  %p3924_p2 = scmp.lt.s32.totalorder %s3922_s15, %s3916_s7 }
  0xa5   : > { %2985 = vmatpush3.bf16.msra.mxu0 %v3593_v6  ;;  %v3602_v15 = vld [vmem:[#allocation5 + $0x98] sm:$0xff]   ;;  %v3606_v19 = vld [vmem:[#allocation5 + $0xa0] sm:$0xff]   ;;  %v3609_v22 = vld [vmem:[#allocation5 + $0x28] sm:$0xff]  }
  0xa6   : > { %3049 = vmatpush3.bf16.msra.mxu1 %v3594_v7  ;;  %2986 = vmatprep.subr.bf16.mxu0 %v3595_v8  ;;  %v3610_v23 = vld [vmem:[#allocation5 + $0xa8] sm:$0xff]   ;;  %v3611_v24 = vld [vmem:[#allocation5 + $0x70] sm:$0xff]   ;;  %v3615_v28 = vld [vmem:[#allocation5 + $0x78] sm:$0xff]   ;;  %p3919_p7 = pneg %p3918_p5  ;;  %p3925_p1 = por %p3924_p2, %p3923_p12 }
  0xa7   : > { %3050 = vmatprep.subr.bf16.mxu1 %v3596_v9  ;;  %v3612_v25 = vld [vmem:[#allocation5 + $0xf0] sm:$0xff]   ;;  %v3616_v29 = vld [vmem:[#allocation5 + $0xf8] sm:$0xff]   ;;  %v3625_v36 = vld [vmem:[#allocation5 + $0x140] sm:$0xff]  }
  0xa8   : > { %v3613_v26 = vld [vmem:[#allocation5 + $0x30] sm:$0xff]   ;;  %v3617_v30 = vld [vmem:[#allocation5 + $0x38] sm:$0xff]   ;;  %v3626_v37 = vld [vmem:[#allocation5 + $0x100] sm:$0xff]   ;;  %p3926_p13 = pnand %p3925_p1, %p3919_p7 }
  0xa9   : > { %2987 = vmatpush3.bf16.msra.mxu0 %v3597_v10  ;;  %v3614_v27 = vld [vmem:[#allocation5 + $0xb0] sm:$0xff]   ;;  %v3618_v31 = vld [vmem:[#allocation5 + $0xb8] sm:$0xff]   ;;  %v3627_v38 = vld [vmem:[#allocation5 + $0x1c0] sm:$0xff]  }
  0xaa   : > { %3051 = vmatpush3.bf16.msra.mxu1 %v3598_v11  ;;  %2988 = vmatprep.subr.bf16.mxu0 %v3599_v12  ;;  %v4265_v32 = vld [vmem:[%s4250_s23 + $0x4] ss:$16 sps:$4 sm:$0xff]   ;;  %v4268_v33 = vld [vmem:[%s4250_s23 + $0xc] ss:$16 sps:$4 sm:$0xff]   ;;  %v4272_v34 = vld [vmem:[%s4250_s23] ss:$16 sps:$4 sm:$0xff]  }
  0xab   : > { %3052 = vmatprep.subr.bf16.mxu1 %v3600_v13  ;;  %788 = vmatprep.mubr.bf16.mxu0 %v4265_v32  ;;  %v4275_v35 = vld [vmem:[%s4250_s23 + $0x8] ss:$16 sps:$4 sm:$0xff]   ;;  %v3628_v39 = vld [vmem:[#allocation5 + $0x180] sm:$0xff]   ;;  %v4284_v41 = vld [vmem:[%s4250_s23 + $0x2c] ss:$16 sps:$4 sm:$0xff]  }
  0xac   : > { %885 = vmatprep.mubr.bf16.mxu1 %v4268_v33  ;;  %v4281_v40 = vld [vmem:[%s4250_s23 + $0x24] ss:$16 sps:$4 sm:$0xff]   ;;  %v4287_v42 = vld [vmem:[%s4250_s23 + $0x20] ss:$16 sps:$4 sm:$0xff]   ;;  %v4291_v43 = vld [vmem:[%s4250_s23 + $0x28] ss:$16 sps:$4 sm:$0xff]  }
  0xad   : > { %2989 = vmatpush3.bf16.msra.mxu0 %v3601_v14  ;;  %v3635_v44 = vld [vmem:[#allocation5 + $0x148] sm:$0xff]   ;;  %v4297_v48 = vld [vmem:[%s4250_s23 + $0x44] ss:$16 sps:$4 sm:$0xff]   ;;  %v4303_v50 = vld [vmem:[%s4250_s23 + $0x40] ss:$16 sps:$4 sm:$0xff]  }
  0xae   : > { %3053 = vmatpush3.bf16.msra.mxu1 %v3602_v15  ;;  %2990 = vmatprep.subr.bf16.mxu0 %v3603_v16  ;;  %v3636_v45 = vld [vmem:[#allocation5 + $0x108] sm:$0xff]   ;;  %v3645_v52 = vld [vmem:[#allocation5 + $0x150] sm:$0xff]   ;;  %v3655_v60 = vld [vmem:[#allocation5 + $0x158] sm:$0xff]  }
  0xaf   : > { %3054 = vmatprep.subr.bf16.mxu1 %v3604_v17  ;;  %v3637_v46 = vld [vmem:[#allocation5 + $0x1c8] sm:$0xff]   ;;  %v3646_v53 = vld [vmem:[#allocation5 + $0x110] sm:$0xff]   ;;  %v3656_v61 = vld [vmem:[#allocation5 + $0x118] sm:$0xff]  }
  0xb0   : > { %v3638_v47 = vld [vmem:[#allocation5 + $0x188] sm:$0xff]   ;;  %v3647_v54 = vld [vmem:[#allocation5 + $0x1d0] sm:$0xff]   ;;  %v3657_v62 = vld [vmem:[#allocation5 + $0x1d8] sm:$0xff]  }
  0xb1   : > { %2991 = vmatpush3.bf16.msra.mxu0 %v3605_v18  ;;  %v4300_v49 = vld [vmem:[%s4250_s23 + $0x4c] ss:$16 sps:$4 sm:$0xff]   ;;  %v4306_v51 = vld [vmem:[%s4250_s23 + $0x48] ss:$16 sps:$4 sm:$0xff]   ;;  %v3648_v55 = vld [vmem:[#allocation5 + $0x190] sm:$0xff]  }
  0xb2   : > { %3055 = vmatpush3.bf16.msra.mxu1 %v3606_v19  ;;  %2992 = vmatprep.subr.bf16.mxu0 %v3607_v20  ;;  %v4313_v56 = vld [vmem:[%s4250_s23 + $0x64] ss:$16 sps:$4 sm:$0xff]   ;;  %v4316_v57 = vld [vmem:[%s4250_s23 + $0x6c] ss:$16 sps:$4 sm:$0xff]   ;;  %v4320_v58 = vld [vmem:[%s4250_s23 + $0x60] ss:$16 sps:$4 sm:$0xff]  }
  0xb3   : > { %3056 = vmatprep.subr.bf16.mxu1 %v3608_v21  ;;  %v4323_v59 = vld [vmem:[%s4250_s23 + $0x68] ss:$16 sps:$4 sm:$0xff]   ;;  %v4327_v0 = vld [vmem:[%s4250_s23 + $0x84] ss:$16 sps:$4 sm:$0xff]   ;;  %v4332_v1 = vld [vmem:[%s4250_s23 + $0x8c] ss:$16 sps:$4 sm:$0xff]  }
  0xb4   : > { %v3658_v63 = vld [vmem:[#allocation5 + $0x198] sm:$0xff]   ;;  %v4337_v2 = vld [vmem:[%s4250_s23 + $0x80] ss:$16 sps:$4 sm:$0xff]   ;;  %v4343_v8 = vld [vmem:[%s4250_s23 + $0xa4] ss:$16 sps:$4 sm:$0xff]  }
  0xb5   : > { %2993 = vmatpush3.bf16.msra.mxu0 %v3609_v22  ;;  %v4340_v3 = vld [vmem:[%s4250_s23 + $0x88] ss:$16 sps:$4 sm:$0xff]   ;;  %v3665_v4 = vld [vmem:[#allocation5 + $0x160] sm:$0xff]   ;;  %v4346_v9 = vld [vmem:[%s4250_s23 + $0xac] ss:$16 sps:$4 sm:$0xff]  }
  0xb6   : > { %3057 = vmatpush3.bf16.msra.mxu1 %v3610_v23  ;;  %2994 = vmatprep.subr.bf16.mxu0 %v3611_v24  ;;  %v3666_v5 = vld [vmem:[#allocation5 + $0x120] sm:$0xff]   ;;  %v3675_v10 = vld [vmem:[#allocation5 + $0x168] sm:$0xff]   ;;  %v3685_v18 = vld [vmem:[#allocation5 + $0x170] sm:$0xff]  }
  0xb7   : > { %3058 = vmatprep.subr.bf16.mxu1 %v3612_v25  ;;  %v3667_v6 = vld [vmem:[#allocation5 + $0x1e0] sm:$0xff]   ;;  %v3676_v11 = vld [vmem:[#allocation5 + $0x128] sm:$0xff]   ;;  %v3686_v19 = vld [vmem:[#allocation5 + $0x130] sm:$0xff]  }
  0xb8   : > { %v3668_v7 = vld [vmem:[#allocation5 + $0x1a0] sm:$0xff]   ;;  %v4356_v13 = vld [vmem:[%s4250_s23 + $0xa8] ss:$16 sps:$4 sm:$0xff]   ;;  %v4362_v17 = vld [vmem:[%s4250_s23 + $0xcc] ss:$16 sps:$4 sm:$0xff]  }
  0xb9   : > { %2995 = vmatpush3.bf16.msra.mxu0 %v3613_v26  ;;  %v4353_v12 = vld [vmem:[%s4250_s23 + $0xa0] ss:$16 sps:$4 sm:$0xff]   ;;  %v3677_v14 = vld [vmem:[#allocation5 + $0x1e8] sm:$0xff]   ;;  %v4359_v16 = vld [vmem:[%s4250_s23 + $0xc4] ss:$16 sps:$4 sm:$0xff]  }
  0xba   : > { %3059 = vmatpush3.bf16.msra.mxu1 %v3614_v27  ;;  %2996 = vmatprep.subr.bf16.mxu0 %v3615_v28  ;;  %v3678_v15 = vld [vmem:[#allocation5 + $0x1a8] sm:$0xff]   ;;  %v3687_v20 = vld [vmem:[#allocation5 + $0x1f0] sm:$0xff]   ;;  %v3695_v26 = vld [vmem:[#allocation5 + $0x178] sm:$0xff]  }
  0xbb   : > { %3060 = vmatprep.subr.bf16.mxu1 %v3616_v29  ;;  %v3688_v21 = vld [vmem:[#allocation5 + $0x1b0] sm:$0xff]   ;;  %v4372_v23 = vld [vmem:[%s4250_s23 + $0xc8] ss:$16 sps:$4 sm:$0xff]   ;;  %v4378_v25 = vld [vmem:[%s4250_s23 + $0xec] ss:$16 sps:$4 sm:$0xff]  }
  0xbc   : > { %v4369_v22 = vld [vmem:[%s4250_s23 + $0xc0] ss:$16 sps:$4 sm:$0xff]   ;;  %v4375_v24 = vld [vmem:[%s4250_s23 + $0xe4] ss:$16 sps:$4 sm:$0xff]   ;;  %v3696_v27 = vld [vmem:[#allocation5 + $0x138] sm:$0xff]  }
  0xbd   : > { %2997 = vmatpush3.bf16.msra.mxu0 %v3617_v30  ;;  %v3697_v28 = vld [vmem:[#allocation5 + $0x1f8] sm:$0xff]   ;;  %v4385_v30 = vld [vmem:[%s4250_s23 + $0xe0] ss:$16 sps:$4 sm:$0xff]  }
  0xbe   : > { %3061 = vmatpush3.bf16.msra.mxu1 %v3618_v31  ;;  %3110 = vmatprep.subr.bf16.mxu0 %v3625_v36  ;;  %v3698_v29 = vld [vmem:[#allocation5 + $0x1b8] sm:$0xff]   ;;  %v3699_v31 = vld [vmem:[#allocation5 + $0x240] sm:$0xff]  }
  0xbf   : > { %3174 = vmatprep.subr.bf16.mxu1 %v3627_v38  ;;  %v4388_v36 = vld [vmem:[%s4250_s23 + $0xe8] ss:$16 sps:$4 sm:$0xff]   ;;  %v3700_v38 = vld [vmem:[#allocation5 + $0x200] sm:$0xff]  }
  0xc0   : > { %789 = vmatmul.mubr.bf16.vlgmr.msra.gmra.mrb[0].mxu0 %v4272_v34 }
  0xc1   : > { %886 = vmatmul.mubr.bf16.vlgmr.msra.gmra.mrb[0].mxu1 %v4275_v35  ;;  %3111 = vmatpush3.bf16.msra.mxu0 %v3626_v37  ;;  %v3701_v37 = vld [vmem:[#allocation5 + $0x2c0] sm:$0xff]  }
  0xc2   : > { %3175 = vmatpush3.bf16.msra.mxu1 %v3628_v39  ;;  %796 = vmatprep.mubr.bf16.mxu0 %v4281_v40  ;;  %v3702_v39 = vld [vmem:[#allocation5 + $0x280] sm:$0xff]  }
  0xc3   : > { %893 = vmatprep.mubr.bf16.mxu1 %v4284_v41  ;;  %3112 = vmatprep.subr.bf16.mxu0 %v3635_v44  ;;  %v3703_v44 = vld [vmem:[#allocation5 + $0x248] sm:$0xff]  }
  0xc4   : > { %3176 = vmatprep.subr.bf16.mxu1 %v3637_v46  ;;  %v3705_v46 = vld [vmem:[#allocation5 + $0x2c8] sm:$0xff]  }
  0xc5   : > { %3113 = vmatpush3.bf16.msra.mxu0 %v3636_v45  ;;  %v3704_v45 = vld [vmem:[#allocation5 + $0x208] sm:$0xff]  }
  0xc6   : > { %3177 = vmatpush3.bf16.msra.mxu1 %v3638_v47  ;;  %3114 = vmatprep.subr.bf16.mxu0 %v3645_v52  ;;  %v3706_v47 = vld [vmem:[#allocation5 + $0x288] sm:$0xff]   ;;  %v3707_v52 = vld [vmem:[#allocation5 + $0x250] sm:$0xff]  }
  0xc7   : > { %3178 = vmatprep.subr.bf16.mxu1 %v3647_v54  ;;  %v3708_v54 = vld [vmem:[#allocation5 + $0x210] sm:$0xff]  }
  0xc8   : > { %797 = vmatmul.mubr.bf16.gmra.mrb[4].mxu0 %v4287_v42 }
  0xc9   : > { %894 = vmatmul.mubr.bf16.gmra.mrb[4].mxu1 %v4291_v43  ;;  %804 = vmatprep.mubr.bf16.mxu0 %v4297_v48 }
  0xca   : > { %901 = vmatprep.mubr.bf16.mxu1 %v4300_v49  ;;  %3115 = vmatpush3.bf16.msra.mxu0 %v3646_v53  ;;  %v3709_v53 = vld [vmem:[#allocation5 + $0x2d0] sm:$0xff]  }
  0xcb   : > { %3179 = vmatpush3.bf16.msra.mxu1 %v3648_v55  ;;  %3116 = vmatprep.subr.bf16.mxu0 %v3655_v60  ;;  %v3710_v55 = vld [vmem:[#allocation5 + $0x290] sm:$0xff]   ;;  %v3711_v60 = vld [vmem:[#allocation5 + $0x258] sm:$0xff]  }
  0xcc   : > { %3180 = vmatprep.subr.bf16.mxu1 %v3657_v62  ;;  %v3712_v62 = vld [vmem:[#allocation5 + $0x218] sm:$0xff]  }
  0xce   : > { %3117 = vmatpush3.bf16.msra.mxu0 %v3656_v61  ;;  %v3713_v61 = vld [vmem:[#allocation5 + $0x2d8] sm:$0xff]  }
  0xcf   : > { %3181 = vmatpush3.bf16.msra.mxu1 %v3658_v63  ;;  %3118 = vmatprep.subr.bf16.mxu0 %v3665_v4  ;;  %v3714_v63 = vld [vmem:[#allocation5 + $0x298] sm:$0xff]   ;;  %v3715_v4 = vld [vmem:[#allocation5 + $0x260] sm:$0xff]  }
  0xd0   : > { %805 = vmatmul.mubr.bf16.gmra.mrb[8].mxu0 %v4303_v50  ;;  %3182 = vmatprep.subr.bf16.mxu1 %v3667_v6  ;;  %v3716_v6 = vld [vmem:[#allocation5 + $0x220] sm:$0xff]  }
  0xd1   : > { %902 = vmatmul.mubr.bf16.gmra.mrb[8].mxu1 %v4306_v51  ;;  %812 = vmatprep.mubr.bf16.mxu0 %v4313_v56 }
  0xd2   : > { %909 = vmatprep.mubr.bf16.mxu1 %v4316_v57  ;;  %3119 = vmatpush3.bf16.msra.mxu0 %v3666_v5  ;;  %v3717_v5 = vld [vmem:[#allocation5 + $0x2e0] sm:$0xff]  }
  0xd3   : > { %3183 = vmatpush3.bf16.msra.mxu1 %v3668_v7  ;;  %3120 = vmatprep.subr.bf16.mxu0 %v3675_v10  ;;  %v3718_v7 = vld [vmem:[#allocation5 + $0x2a0] sm:$0xff]   ;;  %v3719_v10 = vld [vmem:[#allocation5 + $0x268] sm:$0xff]  }
  0xd4   : > { %3184 = vmatprep.subr.bf16.mxu1 %v3677_v14  ;;  %v3720_v14 = vld [vmem:[#allocation5 + $0x228] sm:$0xff]  }
  0xd6   : > { %3121 = vmatpush3.bf16.msra.mxu0 %v3676_v11  ;;  %v3721_v11 = vld [vmem:[#allocation5 + $0x2e8] sm:$0xff]  }
  0xd7   : > { %3185 = vmatpush3.bf16.msra.mxu1 %v3678_v15  ;;  %3122 = vmatprep.subr.bf16.mxu0 %v3685_v18  ;;  %v3722_v15 = vld [vmem:[#allocation5 + $0x2a8] sm:$0xff]   ;;  %v3723_v18 = vld [vmem:[#allocation5 + $0x270] sm:$0xff]  }
  0xd8   : > { %813 = vmatmul.mubr.bf16.gmra.mrb[12].mxu0 %v4320_v58  ;;  %3186 = vmatprep.subr.bf16.mxu1 %v3687_v20  ;;  %v3724_v20 = vld [vmem:[#allocation5 + $0x230] sm:$0xff]  }
  0xd9   : > { %910 = vmatmul.mubr.bf16.gmra.mrb[12].mxu1 %v4323_v59  ;;  %820 = vmatprep.mubr.bf16.mxu0 %v4327_v0 }
  0xda   : > { %917 = vmatprep.mubr.bf16.mxu1 %v4332_v1  ;;  %3123 = vmatpush3.bf16.msra.mxu0 %v3686_v19  ;;  %v3725_v19 = vld [vmem:[#allocation5 + $0x2f0] sm:$0xff]  }
  0xdb   : > { %3187 = vmatpush3.bf16.msra.mxu1 %v3688_v21  ;;  %3124 = vmatprep.subr.bf16.mxu0 %v3695_v26  ;;  %v3726_v21 = vld [vmem:[#allocation5 + $0x2b0] sm:$0xff]   ;;  %v3727_v26 = vld [vmem:[#allocation5 + $0x278] sm:$0xff]  }
  0xdc   : > { %3188 = vmatprep.subr.bf16.mxu1 %v3697_v28  ;;  %v3728_v28 = vld [vmem:[#allocation5 + $0x238] sm:$0xff]  }
  0xde   : > { %3125 = vmatpush3.bf16.msra.mxu0 %v3696_v27  ;;  %v3729_v27 = vld [vmem:[#allocation5 + $0x2f8] sm:$0xff]  }
  0xdf   : > { %3189 = vmatpush3.bf16.msra.mxu1 %v3698_v29  ;;  %3238 = vmatprep.subr.bf16.mxu0 %v3699_v31  ;;  %v3730_v29 = vld [vmem:[#allocation5 + $0x2b8] sm:$0xff]   ;;  %v3731_v31 = vld [vmem:[#allocation5 + $0x340] sm:$0xff]  }
  0xe0   : > { %821 = vmatmul.mubr.bf16.gmra.mrb[16].mxu0 %v4337_v2  ;;  %3302 = vmatprep.subr.bf16.mxu1 %v3701_v37  ;;  %v3733_v37 = vld [vmem:[#allocation5 + $0x3c0] sm:$0xff]  }
  0xe1   : > { %918 = vmatmul.mubr.bf16.gmra.mrb[16].mxu1 %v4340_v3  ;;  %828 = vmatprep.mubr.bf16.mxu0 %v4343_v8 }
  0xe2   : > { %925 = vmatprep.mubr.bf16.mxu1 %v4346_v9 }
  0xe8   : > { %829 = vmatmul.mubr.bf16.gmra.mrb[20].mxu0 %v4353_v12 }
  0xe9   : > { %926 = vmatmul.mubr.bf16.gmra.mrb[20].mxu1 %v4356_v13  ;;  %836 = vmatprep.mubr.bf16.mxu0 %v4359_v16 }
  0xea   : > { %933 = vmatprep.mubr.bf16.mxu1 %v4362_v17 }
  0xf0   : > { %837 = vmatmul.mubr.bf16.gmra.mrb[24].mxu0 %v4369_v22 }
  0xf1   : > { %934 = vmatmul.mubr.bf16.gmra.mrb[24].mxu1 %v4372_v23  ;;  %844 = vmatprep.mubr.bf16.mxu0 %v4375_v24 }
  0xf2   : > { %941 = vmatprep.mubr.bf16.mxu1 %v4378_v25 }
  0xf8   : > { %845 = vmatmul.mubr.bf16.gmra.mrb[28].mxu0 %v4385_v30 }
  0xf9   : > { %942 = vmatmul.mubr.bf16.gmra.mrb[28].mxu1 %v4388_v36  ;;  %1299 = vmatprep.mubr.bf16.mxu0 %v4265_v32 }
  0xfa   : > { %1396 = vmatprep.mubr.bf16.mxu1 %v4268_v33 }
 0x100   : > { %1300 = vmatmul.mubr.bf16.vlgmr.msra.gmra.mrb[32].mxu0 %v4272_v34 }
 0x101   : > { %1397 = vmatmul.mubr.bf16.vlgmr.msra.gmra.mrb[32].mxu1 %v4275_v35  ;;  %3239 = vmatpush3.bf16.msra.mxu0 %v3700_v38  ;;  %v3732_v38 = vld [vmem:[#allocation5 + $0x300] sm:$0xff]  }
 0x102   : > { %3303 = vmatpush3.bf16.msra.mxu1 %v3702_v39  ;;  %1307 = vmatprep.mubr.bf16.mxu0 %v4281_v40  ;;  %v3734_v39 = vld [vmem:[#allocation5 + $0x380] sm:$0xff]  }
 0x103   : > { %1404 = vmatprep.mubr.bf16.mxu1 %v4284_v41  ;;  %3240 = vmatprep.subr.bf16.mxu0 %v3703_v44  ;;  %v3735_v44 = vld [vmem:[#allocation5 + $0x348] sm:$0xff]  }
 0x104   : > { %3304 = vmatprep.subr.bf16.mxu1 %v3705_v46  ;;  %v3736_v46 = vld [vmem:[#allocation5 + $0x308] sm:$0xff]  }
 0x105   : > { %3241 = vmatpush3.bf16.msra.mxu0 %v3704_v45  ;;  %v3737_v45 = vld [vmem:[#allocation5 + $0x3c8] sm:$0xff]  }
 0x106   : > { %3305 = vmatpush3.bf16.msra.mxu1 %v3706_v47  ;;  %3242 = vmatprep.subr.bf16.mxu0 %v3707_v52  ;;  %v3738_v47 = vld [vmem:[#allocation5 + $0x388] sm:$0xff]   ;;  %v3739_v52 = vld [vmem:[#allocation5 + $0x350] sm:$0xff]  }
 0x107   : > { %3306 = vmatprep.subr.bf16.mxu1 %v3709_v53  ;;  %v3743_v53 = vld [vmem:[#allocation5 + $0x358] sm:$0xff]  }
 0x108   : > { %1308 = vmatmul.mubr.bf16.gmra.mrb[36].mxu0 %v4287_v42 }
 0x109   : > { %1405 = vmatmul.mubr.bf16.gmra.mrb[36].mxu1 %v4291_v43  ;;  %1315 = vmatprep.mubr.bf16.mxu0 %v4297_v48 }
 0x10a   : > { %1412 = vmatprep.mubr.bf16.mxu1 %v4300_v49  ;;  %3243 = vmatpush3.bf16.msra.mxu0 %v3708_v54  ;;  %v3747_v54 = vld [vmem:[#allocation5 + $0x360] sm:$0xff]  }
 0x10b   : > { %3307 = vmatpush3.bf16.msra.mxu1 %v3710_v55  ;;  %3244 = vmatprep.subr.bf16.mxu0 %v3711_v60  ;;  %v3749_v55 = vld [vmem:[#allocation5 + $0x3e0] sm:$0xff]  }
 0x10c   : > { %3308 = vmatprep.subr.bf16.mxu1 %v3713_v61  ;;  %v3748_v60 = vld [vmem:[#allocation5 + $0x320] sm:$0xff]  }
 0x10d   : > { %v3750_v61 = vld [vmem:[#allocation5 + $0x3a0] sm:$0xff]  }
 0x10e   : > { %3245 = vmatpush3.bf16.msra.mxu0 %v3712_v62  ;;  %v3752_v62 = vld [vmem:[#allocation5 + $0x328] sm:$0xff]  }
 0x10f   : > { %3309 = vmatpush3.bf16.msra.mxu1 %v3714_v63  ;;  %3246 = vmatprep.subr.bf16.mxu0 %v3715_v4  ;;  %v3754_v63 = vld [vmem:[#allocation5 + $0x3a8] sm:$0xff]   ;;  %v3755_v4 = vld [vmem:[#allocation5 + $0x370] sm:$0xff]  }
 0x110   : > { %3310 = vmatprep.subr.bf16.mxu1 %v3717_v5  ;;  %1316 = vmatmul.mubr.bf16.gmra.mrb[40].mxu0 %v4303_v50  ;;  %v3757_v5 = vld [vmem:[#allocation5 + $0x3f0] sm:$0xff]  }
 0x111   : > { %1413 = vmatmul.mubr.bf16.gmra.mrb[40].mxu1 %v4306_v51  ;;  %1323 = vmatprep.mubr.bf16.mxu0 %v4313_v56 }
 0x112   : > { %1420 = vmatprep.mubr.bf16.mxu1 %v4316_v57  ;;  %3247 = vmatpush3.bf16.msra.mxu0 %v3716_v6  ;;  %v3756_v6 = vld [vmem:[#allocation5 + $0x330] sm:$0xff]  }
 0x113   : > { %3311 = vmatpush3.bf16.msra.mxu1 %v3718_v7  ;;  %3248 = vmatprep.subr.bf16.mxu0 %v3719_v10  ;;  %v3758_v7 = vld [vmem:[#allocation5 + $0x3b0] sm:$0xff]   ;;  %v3759_v10 = vld [vmem:[#allocation5 + $0x378] sm:$0xff]  }
 0x114   : > { %3312 = vmatprep.subr.bf16.mxu1 %v3721_v11  ;;  %v3761_v11 = vld [vmem:[#allocation5 + $0x3f8] sm:$0xff]  }
 0x116   : > { %3249 = vmatpush3.bf16.msra.mxu0 %v3720_v14  ;;  %v3760_v14 = vld [vmem:[#allocation5 + $0x338] sm:$0xff]  }
 0x117   : > { %3313 = vmatpush3.bf16.msra.mxu1 %v3722_v15  ;;  %3250 = vmatprep.subr.bf16.mxu0 %v3723_v18  ;;  %v3762_v15 = vld [vmem:[#allocation5 + $0x3b8] sm:$0xff]   ;;  %v3763_v18 = vld [vmem:[%s4250_s23 + $0x4] ss:$16 sps:$4 sm:$0xff]  }
 0x118   : > { %3314 = vmatprep.subr.bf16.mxu1 %v3725_v19  ;;  %1324 = vmatmul.mubr.bf16.gmra.mrb[44].mxu0 %v4320_v58  ;;  %v3764_v19 = vld [vmem:[%s4250_s23 + $0xc] ss:$16 sps:$4 sm:$0xff]  }
 0x119   : > { %1421 = vmatmul.mubr.bf16.gmra.mrb[44].mxu1 %v4323_v59  ;;  %1331 = vmatprep.mubr.bf16.mxu0 %v4327_v0 }
 0x11a   : > { %1428 = vmatprep.mubr.bf16.mxu1 %v4332_v1  ;;  %3251 = vmatpush3.bf16.msra.mxu0 %v3724_v20  ;;  %v3765_v20 = vld [vmem:[%s4250_s23] ss:$16 sps:$4 sm:$0xff]  }
 0x11b   : > { %3315 = vmatpush3.bf16.msra.mxu1 %v3726_v21  ;;  %3252 = vmatprep.subr.bf16.mxu0 %v3727_v26  ;;  %v3766_v21 = vld [vmem:[%s4250_s23 + $0x8] ss:$16 sps:$4 sm:$0xff]   ;;  %v3767_v26 = vld [vmem:[%s4250_s23 + $0x24] ss:$16 sps:$4 sm:$0xff]  }
 0x11c   : > { %3316 = vmatprep.subr.bf16.mxu1 %v3729_v27  ;;  %v3768_v27 = vld [vmem:[%s4250_s23 + $0x2c] ss:$16 sps:$4 sm:$0xff]  }
 0x11e   : > { %3253 = vmatpush3.bf16.msra.mxu0 %v3728_v28  ;;  %v3769_v28 = vld [vmem:[%s4250_s23 + $0x20] ss:$16 sps:$4 sm:$0xff]  }
 0x11f   : > { %3317 = vmatpush3.bf16.msra.mxu1 %v3730_v29  ;;  %3366 = vmatprep.subr.bf16.mxu0 %v3731_v31  ;;  %v3770_v29 = vld [vmem:[%s4250_s23 + $0x28] ss:$16 sps:$4 sm:$0xff]  }
 0x120   : > { %3430 = vmatprep.subr.bf16.mxu1 %v3733_v37  ;;  %1332 = vmatmul.mubr.bf16.gmra.mrb[48].mxu0 %v4337_v2 }
 0x121   : > { %1429 = vmatmul.mubr.bf16.gmra.mrb[48].mxu1 %v4340_v3  ;;  %1339 = vmatprep.mubr.bf16.mxu0 %v4343_v8 }
 0x122   : > { %1436 = vmatprep.mubr.bf16.mxu1 %v4346_v9 }
 0x128   : > { %1340 = vmatmul.mubr.bf16.gmra.mrb[52].mxu0 %v4353_v12 }
 0x129   : > { %1437 = vmatmul.mubr.bf16.gmra.mrb[52].mxu1 %v4356_v13  ;;  %1347 = vmatprep.mubr.bf16.mxu0 %v4359_v16 }
 0x12a   : > { %1444 = vmatprep.mubr.bf16.mxu1 %v4362_v17 }
 0x130   : > { %1348 = vmatmul.mubr.bf16.gmra.mrb[56].mxu0 %v4369_v22 }
 0x131   : > { %1445 = vmatmul.mubr.bf16.gmra.mrb[56].mxu1 %v4372_v23  ;;  %1355 = vmatprep.mubr.bf16.mxu0 %v4375_v24 }
 0x132   : > { %1452 = vmatprep.mubr.bf16.mxu1 %v4378_v25 }
 0x138   : > { %1356 = vmatmul.mubr.bf16.gmra.mrb[60].mxu0 %v4385_v30 }
 0x139   : > { %1453 = vmatmul.mubr.bf16.gmra.mrb[60].mxu1 %v4388_v36  ;;  %1814 = vmatprep.mubr.bf16.mxu0 %v4265_v32  ;;  %v3741_v32 = vld [vmem:[#allocation5 + $0x3d0] sm:$0xff]  }
 0x13a   : > { %1911 = vmatprep.mubr.bf16.mxu1 %v4268_v33  ;;  %v3740_v33 = vld [vmem:[#allocation5 + $0x310] sm:$0xff]  }
 0x140   : > { %1815 = vmatmul.mubr.bf16.vlgmr.msra.gmra.mrb[64].mxu0 %v4272_v34  ;;  %v3742_v34 = vld [vmem:[#allocation5 + $0x390] sm:$0xff]  }
 0x141   : > { %1912 = vmatmul.mubr.bf16.vlgmr.msra.gmra.mrb[64].mxu1 %v4275_v35  ;;  %3367 = vmatpush3.bf16.msra.mxu0 %v3732_v38  ;;  %v3745_v35 = vld [vmem:[#allocation5 + $0x3d8] sm:$0xff]   ;;  %v4470_v38 = vld [vmem:[#allocation7] ss:$0 sm:$0xff] }
 0x142   : > { %3431 = vmatpush3.bf16.msra.mxu1 %v3734_v39  ;;  %1822 = vmatprep.mubr.bf16.mxu0 %v4281_v40  ;;  %v3744_v40 = vld [vmem:[#allocation5 + $0x318] sm:$0xff]  }
 0x143   : > { %1919 = vmatprep.mubr.bf16.mxu1 %v4284_v41  ;;  %3368 = vmatprep.subr.bf16.mxu0 %v3735_v44  ;;  %v3746_v41 = vld [vmem:[#allocation5 + $0x398] sm:$0xff]  }
 0x144   : > { %3432 = vmatprep.subr.bf16.mxu1 %v3737_v45 }
 0x145   : > { %3369 = vmatpush3.bf16.msra.mxu0 %v3736_v46 }
 0x146   : > { %3433 = vmatpush3.bf16.msra.mxu1 %v3738_v47  ;;  %3370 = vmatprep.subr.bf16.mxu0 %v3739_v52 }
 0x147   : > { %3434 = vmatprep.subr.bf16.mxu1 %v3741_v32 }
 0x148   : > { %1823 = vmatmul.mubr.bf16.gmra.mrb[68].mxu0 %v4287_v42  ;;  %v3751_v42 = vld [vmem:[#allocation5 + $0x368] sm:$0xff]  }
 0x149   : > { %1920 = vmatmul.mubr.bf16.gmra.mrb[68].mxu1 %v4291_v43  ;;  %1830 = vmatprep.mubr.bf16.mxu0 %v4297_v48  ;;  %v3753_v43 = vld [vmem:[#allocation5 + $0x3e8] sm:$0xff]  }
 0x14a   : > { %1927 = vmatprep.mubr.bf16.mxu1 %v4300_v49  ;;  %3371 = vmatpush3.bf16.msra.mxu0 %v3740_v33 }
 0x14b   : > { %3435 = vmatpush3.bf16.msra.mxu1 %v3742_v34  ;;  %3372 = vmatprep.subr.bf16.mxu0 %v3743_v53 }
 0x14c   : > { %3436 = vmatprep.subr.bf16.mxu1 %v3745_v35 }
 0x14e   : > { %3373 = vmatpush3.bf16.msra.mxu0 %v3744_v40 }
 0x14f   : > { %3437 = vmatpush3.bf16.msra.mxu1 %v3746_v41  ;;  %3374 = vmatprep.subr.bf16.mxu0 %v3747_v54 }
 0x150   : > { %3438 = vmatprep.subr.bf16.mxu1 %v3749_v55  ;;  %1831 = vmatmul.mubr.bf16.gmra.mrb[72].mxu0 %v4303_v50 }
 0x151   : > { %1928 = vmatmul.mubr.bf16.gmra.mrb[72].mxu1 %v4306_v51  ;;  %1838 = vmatprep.mubr.bf16.mxu0 %v4313_v56 }
 0x152   : > { %1935 = vmatprep.mubr.bf16.mxu1 %v4316_v57  ;;  %3375 = vmatpush3.bf16.msra.mxu0 %v3748_v60 }
 0x153   : > { %3439 = vmatpush3.bf16.msra.mxu1 %v3750_v61  ;;  %3376 = vmatprep.subr.bf16.mxu0 %v3751_v42 }
 0x154   : > { %3440 = vmatprep.subr.bf16.mxu1 %v3753_v43 }
 0x156   : > { %3377 = vmatpush3.bf16.msra.mxu0 %v3752_v62 }
 0x157   : > { %3441 = vmatpush3.bf16.msra.mxu1 %v3754_v63  ;;  %3378 = vmatprep.subr.bf16.mxu0 %v3755_v4 }
 0x158   : > { %3442 = vmatprep.subr.bf16.mxu1 %v3757_v5  ;;  %1839 = vmatmul.mubr.bf16.gmra.mrb[76].mxu0 %v4320_v58 }
 0x159   : > { %1936 = vmatmul.mubr.bf16.gmra.mrb[76].mxu1 %v4323_v59  ;;  %1846 = vmatprep.mubr.bf16.mxu0 %v4327_v0 }
 0x15a   : > { %1943 = vmatprep.mubr.bf16.mxu1 %v4332_v1  ;;  %3379 = vmatpush3.bf16.msra.mxu0 %v3756_v6 }
 0x15b   : > { %3443 = vmatpush3.bf16.msra.mxu1 %v3758_v7  ;;  %3380 = vmatprep.subr.bf16.mxu0 %v3759_v10 }
 0x15c   : > { %3444 = vmatprep.subr.bf16.mxu1 %v3761_v11 }
 0x15e   : > { %3381 = vmatpush3.bf16.msra.mxu0 %v3760_v14 }
 0x15f   : > { %3445 = vmatpush3.bf16.msra.mxu1 %v3762_v15 }
 0x160   : > { %1847 = vmatmul.mubr.bf16.gmra.mrb[80].mxu0 %v4337_v2 }
 0x161   : > { %1944 = vmatmul.mubr.bf16.gmra.mrb[80].mxu1 %v4340_v3  ;;  %1854 = vmatprep.mubr.bf16.mxu0 %v4343_v8 }
 0x162   : > { %1951 = vmatprep.mubr.bf16.mxu1 %v4346_v9 }
 0x168   : > { %1855 = vmatmul.mubr.bf16.gmra.mrb[84].mxu0 %v4353_v12 }
 0x169   : > { %1952 = vmatmul.mubr.bf16.gmra.mrb[84].mxu1 %v4356_v13  ;;  %1862 = vmatprep.mubr.bf16.mxu0 %v4359_v16 }
 0x16a   : > { %1959 = vmatprep.mubr.bf16.mxu1 %v4362_v17 }
 0x170   : > { %1863 = vmatmul.mubr.bf16.gmra.mrb[88].mxu0 %v4369_v22 }
 0x171   : > { %1960 = vmatmul.mubr.bf16.gmra.mrb[88].mxu1 %v4372_v23  ;;  %1870 = vmatprep.mubr.bf16.mxu0 %v4375_v24 }
 0x172   : > { %1967 = vmatprep.mubr.bf16.mxu1 %v4378_v25 }
 0x178   : > { %1871 = vmatmul.mubr.bf16.gmra.mrb[92].mxu0 %v4385_v30 }
 0x179   : > { %1968 = vmatmul.mubr.bf16.gmra.mrb[92].mxu1 %v4388_v36  ;;  %2313 = vmatprep.mubr.bf16.mxu0 %v3763_v18 }
 0x17a   : > { %2410 = vmatprep.mubr.bf16.mxu1 %v3764_v19 }
 0x180   : > { %2314 = vmatmul.mubr.bf16.vlgmr.msra.gmra.mrb[96].mxu0 %v3765_v20 }
 0x181   : > { %2411 = vmatmul.mubr.bf16.vlgmr.msra.gmra.mrb[96].mxu1 %v3766_v21  ;;  %2321 = vmatprep.mubr.bf16.mxu0 %v3767_v26 }
 0x182   : > { %2418 = vmatprep.mubr.bf16.mxu1 %v3768_v27 }
 0x188   : > { %2322 = vmatmul.mubr.bf16.gmra.mrb[100].mxu0 %v3769_v28 }
 0x189   : > { %2419 = vmatmul.mubr.bf16.gmra.mrb[100].mxu1 %v3770_v29  ;;  %2329 = vmatprep.mubr.bf16.mxu0 %v4297_v48 }
 0x18a   : > { %2426 = vmatprep.mubr.bf16.mxu1 %v4300_v49 }
 0x190   : > { %2330 = vmatmul.mubr.bf16.gmra.mrb[104].mxu0 %v4303_v50 }
 0x191   : > { %2427 = vmatmul.mubr.bf16.gmra.mrb[104].mxu1 %v4306_v51  ;;  %2337 = vmatprep.mubr.bf16.mxu0 %v4313_v56 }
 0x192   : > { %2434 = vmatprep.mubr.bf16.mxu1 %v4316_v57 }
 0x193   : > { %v2998_v31 = vpop.f32.mrb[0].mxu0 }
 0x194   : > { %v3062_v37 = vpop.f32.mrb[0].mxu1  ;;  %v2999_v39 = vpop.f32.mrb[1].mxu0 }
 0x195   : > { %v3063_v44 = vpop.f32.mrb[1].mxu1  ;;  %v3000_v45 = vadd.f32 %v2999_v39, %v2998_v31  ;;  %v3001_v47 = vpop.f32.mrb[2].mxu0 }
 0x196   : > { %v3064_v46 = vadd.f32 %v3063_v44, %v3062_v37  ;;  %v3065_v48 = vpop.f32.mrb[2].mxu1  ;;  %v3002_v52 = vpop.f32.mrb[3].mxu0 }
 0x197   : > { %v3066_v49 = vpop.f32.mrb[3].mxu1  ;;  %v791_v50 = vadd.f32 %v3000_v45, %v4470_v38  ;;  %v3003_v32 = vadd.f32 %v3002_v52, %v3001_v47 }
 0x198   : > { %v3067_v51 = vadd.f32 %v3066_v49, %v3065_v48  ;;  %2338 = vmatmul.mubr.bf16.gmra.mrb[108].mxu0 %v4320_v58 }
 0x199   : > { %2435 = vmatmul.mubr.bf16.gmra.mrb[108].mxu1 %v4323_v59  ;;  %v4475_v56 = vadd.f32 %v3064_v46, %v791_v50  ;;  %v794_v57 = vadd.f32 %v3003_v32, %v4470_v38  ;;  %2345 = vmatprep.mubr.bf16.mxu0 %v4327_v0 }
 0x19a   : > { %2442 = vmatprep.mubr.bf16.mxu1 %v4332_v1 }
 0x19b   : > { %v4480_v33 = vadd.f32 %v3067_v51, %v794_v57  ;;  %v3004_v34 = vpop.f32.mrb[4].mxu0 }
 0x19c   : > { %v3068_v53 = vpop.f32.mrb[4].mxu1  ;;  %v3005_v35 = vpop.f32.mrb[5].mxu0 }
 0x19d   : > { %v3069_v40 = vpop.f32.mrb[5].mxu1  ;;  %v3006_v41 = vadd.f32 %v3005_v35, %v3004_v34  ;;  %v3007_v55 = vpop.f32.mrb[6].mxu0 }
 0x19e   : > { %v3070_v54 = vadd.f32 %v3069_v40, %v3068_v53  ;;  %v3071_v58 = vpop.f32.mrb[6].mxu1  ;;  %v3008_v60 = vpop.f32.mrb[7].mxu0 }
 0x19f   : > { %v3072_v59 = vpop.f32.mrb[7].mxu1  ;;  %v799_v61 = vadd.f32 %v3006_v41, %v4470_v38  ;;  %v3009_v42 = vadd.f32 %v3008_v60, %v3007_v55 }
 0x1a0   : > { %v3073_v43 = vadd.f32 %v3072_v59, %v3071_v58  ;;  %2346 = vmatmul.mubr.bf16.gmra.mrb[112].mxu0 %v4337_v2 }
 0x1a1   : > { %2443 = vmatmul.mubr.bf16.gmra.mrb[112].mxu1 %v4340_v3  ;;  %v4485_v0 = vadd.f32 %v3070_v54, %v799_v61  ;;  %v802_v1 = vadd.f32 %v3009_v42, %v4470_v38  ;;  %2353 = vmatprep.mubr.bf16.mxu0 %v4343_v8 }
 0x1a2   : > { %2450 = vmatprep.mubr.bf16.mxu1 %v4346_v9 }
 0x1a3   : > { %v4490_v62 = vadd.f32 %v3073_v43, %v802_v1  ;;  %v3010_v63 = vpop.f32.mrb[8].mxu0 }
 0x1a4   : > { %v3074_v4 = vpop.f32.mrb[8].mxu1  ;;  %v3011_v5 = vpop.f32.mrb[9].mxu0 }
 0x1a5   : > { %v3075_v6 = vpop.f32.mrb[9].mxu1  ;;  %v3012_v7 = vadd.f32 %v3011_v5, %v3010_v63  ;;  %v3013_v11 = vpop.f32.mrb[10].mxu0 }
 0x1a6   : > { %v3076_v10 = vadd.f32 %v3075_v6, %v3074_v4  ;;  %v3077_v2 = vpop.f32.mrb[10].mxu1  ;;  %v3014_v14 = vpop.f32.mrb[11].mxu0 }
 0x1a7   : > { %v3078_v3 = vpop.f32.mrb[11].mxu1  ;;  %v807_v15 = vadd.f32 %v3012_v7, %v4470_v38  ;;  %v3015_v18 = vadd.f32 %v3014_v14, %v3013_v11 }
 0x1a8   : > { %v3079_v19 = vadd.f32 %v3078_v3, %v3077_v2  ;;  %2354 = vmatmul.mubr.bf16.gmra.mrb[116].mxu0 %v4353_v12 }
 0x1a9   : > { %2451 = vmatmul.mubr.bf16.gmra.mrb[116].mxu1 %v4356_v13  ;;  %v4495_v8 = vadd.f32 %v3076_v10, %v807_v15  ;;  %v810_v9 = vadd.f32 %v3015_v18, %v4470_v38  ;;  %2361 = vmatprep.mubr.bf16.mxu0 %v4359_v16 }
 0x1aa   : > { %2458 = vmatprep.mubr.bf16.mxu1 %v4362_v17 }
 0x1ab   : > { %v4500_v20 = vadd.f32 %v3079_v19, %v810_v9  ;;  %v3016_v21 = vpop.f32.mrb[12].mxu0 }
 0x1ac   : > { %v3080_v26 = vpop.f32.mrb[12].mxu1  ;;  %v3017_v27 = vpop.f32.mrb[13].mxu0 }
 0x1ad   : > { %v3081_v28 = vpop.f32.mrb[13].mxu1  ;;  %v3018_v29 = vadd.f32 %v3017_v27, %v3016_v21  ;;  %v3019_v37 = vpop.f32.mrb[14].mxu0 }
 0x1ae   : > { %v3082_v31 = vadd.f32 %v3081_v28, %v3080_v26  ;;  %v3083_v12 = vpop.f32.mrb[14].mxu1  ;;  %v3020_v39 = vpop.f32.mrb[15].mxu0 }
 0x1af   : > { %v3084_v13 = vpop.f32.mrb[15].mxu1  ;;  %v815_v44 = vadd.f32 %v3018_v29, %v4470_v38  ;;  %v3021_v45 = vadd.f32 %v3020_v39, %v3019_v37 }
 0x1b0   : > { %v3085_v46 = vadd.f32 %v3084_v13, %v3083_v12  ;;  %2362 = vmatmul.mubr.bf16.gmra.mrb[120].mxu0 %v4369_v22 }
 0x1b1   : > { %2459 = vmatmul.mubr.bf16.gmra.mrb[120].mxu1 %v4372_v23  ;;  %v4505_v16 = vadd.f32 %v3082_v31, %v815_v44  ;;  %v818_v17 = vadd.f32 %v3021_v45, %v4470_v38  ;;  %2369 = vmatprep.mubr.bf16.mxu0 %v4375_v24 }
 0x1b2   : > { %2466 = vmatprep.mubr.bf16.mxu1 %v4378_v25 }
 0x1b3   : > { %v4510_v47 = vadd.f32 %v3085_v46, %v818_v17  ;;  %v3022_v48 = vpop.f32.mrb[16].mxu0 }
 0x1b4   : > { %v3086_v52 = vpop.f32.mrb[16].mxu1  ;;  %v3023_v49 = vpop.f32.mrb[17].mxu0 }
 0x1b5   : > { %v3087_v50 = vpop.f32.mrb[17].mxu1  ;;  %v3024_v32 = vadd.f32 %v3023_v49, %v3022_v48  ;;  %v3025_v57 = vpop.f32.mrb[18].mxu0 }
 0x1b6   : > { %v3088_v51 = vadd.f32 %v3087_v50, %v3086_v52  ;;  %v3089_v22 = vpop.f32.mrb[18].mxu1  ;;  %v3026_v34 = vpop.f32.mrb[19].mxu0 }
 0x1b7   : > { %v3090_v23 = vpop.f32.mrb[19].mxu1  ;;  %v823_v53 = vadd.f32 %v3024_v32, %v4470_v38  ;;  %v3027_v35 = vadd.f32 %v3026_v34, %v3025_v57 }
 0x1b8   : > { %v3091_v40 = vadd.f32 %v3090_v23, %v3089_v22  ;;  %2370 = vmatmul.mubr.bf16.gmra.mrb[124].mxu0 %v4385_v30 }
 0x1b9   : > { %2467 = vmatmul.mubr.bf16.gmra.mrb[124].mxu1 %v4388_v36  ;;  %v4515_v24 = vadd.f32 %v3088_v51, %v823_v53  ;;  %v826_v25 = vadd.f32 %v3027_v35, %v4470_v38 }
 0x1bb   : > { %v4518_v41 = vadd.f32 %v3091_v40, %v826_v25  ;;  %v3028_v54 = vpop.f32.mrb[20].mxu0 }
 0x1bc   : > { %v3092_v55 = vpop.f32.mrb[20].mxu1  ;;  %v3029_v58 = vpop.f32.mrb[21].mxu0 }
 0x1bd   : > { %v3093_v60 = vpop.f32.mrb[21].mxu1  ;;  %v3030_v59 = vadd.f32 %v3029_v58, %v3028_v54  ;;  %v3031_v42 = vpop.f32.mrb[22].mxu0 }
 0x1be   : > { %v3094_v61 = vadd.f32 %v3093_v60, %v3092_v55  ;;  %v3095_v43 = vpop.f32.mrb[22].mxu1  ;;  %v3032_v1 = vpop.f32.mrb[23].mxu0  ;;  %v950_v60 = vmax.f32 %v4475_v56, 0.0 }
 0x1bf   : > { %v3096_v63 = vpop.f32.mrb[23].mxu1  ;;  %v831_v30 = vadd.f32 %v3030_v59, %v4470_v38  ;;  %v3033_v4 = vadd.f32 %v3032_v1, %v3031_v42  ;;  %v4539_v42 = vld [vmem:[#allocation8] ss:$0 sm:$0xff] }
 0x1c0   : > { %v3097_v36 = vadd.f32 %v3096_v63, %v3095_v43  ;;  %v951_v63 = vmax.f32 %v4480_v33, 0.0 }
 0x1c1   : > { %v4521_v5 = vadd.f32 %v3094_v61, %v831_v30  ;;  %v834_v6 = vadd.f32 %v3033_v4, %v4470_v38 }
 0x1c3   : > { %v4524_v7 = vadd.f32 %v3097_v36, %v834_v6  ;;  %v3034_v10 = vpop.f32.mrb[24].mxu0  ;;  %v972_v6 = vmul.f32 %v4539_v42, %v950_v60 }
 0x1c4   : > { %v3098_v11 = vpop.f32.mrb[24].mxu1  ;;  %v3035_v2 = vpop.f32.mrb[25].mxu0 }
 0x1c5   : > { %v3099_v14 = vpop.f32.mrb[25].mxu1  ;;  %v3036_v3 = vadd.f32 %v3035_v2, %v3034_v10  ;;  %v3037_v18 = vpop.f32.mrb[26].mxu0  ;;  %v4545_v10 = vld [vmem:[#allocation10] ss:$0 sm:$0xff] }
 0x1c6   : > { %v3100_v15 = vadd.f32 %v3099_v14, %v3098_v11  ;;  %v3101_v19 = vpop.f32.mrb[26].mxu1  ;;  %v3038_v9 = vpop.f32.mrb[27].mxu0 }
 0x1c7   : > { %v3102_v21 = vpop.f32.mrb[27].mxu1  ;;  %v839_v26 = vadd.f32 %v3036_v3, %v4470_v38  ;;  %v3039_v27 = vadd.f32 %v3038_v9, %v3037_v18  ;;  %v973_v3 = vmul.f32 %v4539_v42, %v951_v63  ;;  %v954_v63 = vmax.f32 %v4495_v8, 0.0 }
 0x1c8   : > { %v3103_v28 = vadd.f32 %v3102_v21, %v3101_v19 }
 0x1c9   : > { %v4527_v29 = vadd.f32 %v3100_v15, %v839_v26  ;;  %v842_v31 = vadd.f32 %v3039_v27, %v4470_v38 }
 0x1cb   : > { %v4530_v37 = vadd.f32 %v3103_v28, %v842_v31  ;;  %v3040_v12 = vpop.f32.mrb[28].mxu0  ;;  %v4550_v28 = vadd.f32 %v4545_v10, %v972_v6  ;;  %v952_v31 = vmax.f32 %v4485_v0, 0.0 }
 0x1cc   : > { %v3104_v39 = vpop.f32.mrb[28].mxu1  ;;  %v3041_v13 = vpop.f32.mrb[29].mxu0 }
 0x1cd   : > { %v3105_v44 = vpop.f32.mrb[29].mxu1  ;;  %v3042_v45 = vadd.f32 %v3041_v13, %v3040_v12  ;;  %v3043_v17 = vpop.f32.mrb[30].mxu0 }
 0x1ce   : > { %v3106_v46 = vadd.f32 %v3105_v44, %v3104_v39  ;;  %v3107_v48 = vpop.f32.mrb[30].mxu1  ;;  %v3044_v52 = vpop.f32.mrb[31].mxu0 }
 0x1cf   : > { %v3108_v49 = vpop.f32.mrb[31].mxu1  ;;  %v847_v50 = vadd.f32 %v3042_v45, %v4470_v38  ;;  %v3045_v32 = vadd.f32 %v3044_v52, %v3043_v17  ;;  %v4559_v17 = vadd.f32 %v4545_v10, %v973_v3 }
 0x1d0   : > { %v3109_v51 = vadd.f32 %v3108_v49, %v3107_v48  ;;  %v953_v48 = vmax.f32 %v4490_v62, 0.0 }
 0x1d1   : > { %v4533_v57 = vadd.f32 %v3106_v46, %v847_v50  ;;  %v850_v22 = vadd.f32 %v3045_v32, %v4470_v38 }
 0x1d2   : > { %v975_v62 = vmul.f32 %v4539_v42, %v953_v48 }
 0x1d3   : > { %v4536_v34 = vadd.f32 %v3109_v51, %v850_v22  ;;  %v3126_v23 = vpop.f32.mrb[32].mxu0  ;;  %v974_v51 = vmul.f32 %v4539_v42, %v952_v31 }
 0x1d4   : > { %v3190_v53 = vpop.f32.mrb[32].mxu1  ;;  %v3127_v35 = vpop.f32.mrb[33].mxu0 }
 0x1d5   : > { %v3191_v40 = vpop.f32.mrb[33].mxu1  ;;  %v3128_v25 = vadd.f32 %v3127_v35, %v3126_v23  ;;  %v3129_v55 = vpop.f32.mrb[34].mxu0 }
 0x1d6   : > { %v3192_v54 = vadd.f32 %v3191_v40, %v3190_v53  ;;  %v3193_v58 = vpop.f32.mrb[34].mxu1  ;;  %v3130_v59 = vpop.f32.mrb[35].mxu0 }
 0x1d7   : > { %v3194_v61 = vpop.f32.mrb[35].mxu1  ;;  %v1302_v43 = vadd.f32 %v3128_v25, %v4470_v38  ;;  %v3131_v1 = vadd.f32 %v3130_v59, %v3129_v55 }
 0x1d8   : > { %v3195_v30 = vadd.f32 %v3194_v61, %v3193_v58 }
 0x1d9   : > { %v1399_v4 = vadd.f32 %v3192_v54, %v1302_v43  ;;  %v1305_v36 = vadd.f32 %v3131_v1, %v4470_v38  ;;  %v4574_v1 = vadd.f32 %v4545_v10, %v974_v51  ;;  %v956_v51 = vmax.f32 %v4505_v16, 0.0 }
 0x1db   : > { %v1461_v11 = vmax.f32 %v1399_v4, 0.0  ;;  %v1402_v2 = vadd.f32 %v3195_v30, %v1305_v36  ;;  %v3132_v56 = vpop.f32.mrb[36].mxu0 }
 0x1dc   : > { %v3196_v14 = vpop.f32.mrb[36].mxu1  ;;  %v3133_v15 = vpop.f32.mrb[37].mxu0 }
 0x1dd   : > { %v3197_v18 = vpop.f32.mrb[37].mxu1  ;;  %v1477_v19 = vmul.f32 %v4539_v42, %v1461_v11  ;;  %v1462_v9 = vmax.f32 %v1402_v2, 0.0  ;;  %v3134_v33 = vadd.f32 %v3133_v15, %v3132_v56  ;;  %v3135_v26 = vpop.f32.mrb[38].mxu0  ;;  %v4583_v56 = vadd.f32 %v4545_v10, %v975_v62 }
 0x1de   : > { %v3198_v21 = vadd.f32 %v3197_v18, %v3196_v14  ;;  %v3199_v27 = vpop.f32.mrb[38].mxu1  ;;  %v3136_v12 = vpop.f32.mrb[39].mxu0  ;;  %v955_v14 = vmax.f32 %v4500_v20, 0.0 }
 0x1df   : > { %v3200_v39 = vpop.f32.mrb[39].mxu1  ;;  %v4554_v13 = vadd.f32 %v4545_v10, %v1477_v19  ;;  %v1478_v44 = vmul.f32 %v4539_v42, %v1462_v9  ;;  %v1310_v45 = vadd.f32 %v3134_v33, %v4470_v38  ;;  %v3137_v46 = vadd.f32 %v3136_v12, %v3135_v26 }
 0x1e0   : > { %v3201_v52 = vadd.f32 %v3200_v39, %v3199_v27  ;;  %v976_v9 = vmul.f32 %v4539_v42, %v954_v63  ;;  %v977_v20 = vmul.f32 %v4539_v42, %v955_v14 }
 0x1e1   : > { %v4565_v0 = vadd.f32 %v4545_v10, %v1478_v44  ;;  %v1407_v50 = vadd.f32 %v3198_v21, %v1310_v45  ;;  %v1313_v32 = vadd.f32 %v3137_v46, %v4470_v38 }
 0x1e3   : > { %v1463_v23 = vmax.f32 %v1407_v50, 0.0  ;;  %v1410_v53 = vadd.f32 %v3201_v52, %v1313_v32  ;;  %v3138_v35 = vpop.f32.mrb[40].mxu0  ;;  %v4598_v32 = vadd.f32 %v4545_v10, %v976_v9 }
 0x1e4   : > { %v3202_v40 = vpop.f32.mrb[40].mxu1  ;;  %v3139_v25 = vpop.f32.mrb[41].mxu0 }
 0x1e5   : > { %v3203_v54 = vpop.f32.mrb[41].mxu1  ;;  %v1479_v55 = vmul.f32 %v4539_v42, %v1463_v23  ;;  %v1464_v58 = vmax.f32 %v1410_v53, 0.0  ;;  %v3140_v60 = vadd.f32 %v3139_v25, %v3138_v35  ;;  %v3141_v61 = vpop.f32.mrb[42].mxu0 }
 0x1e6   : > { %v3204_v59 = vadd.f32 %v3203_v54, %v3202_v40  ;;  %v3205_v43 = vpop.f32.mrb[42].mxu1  ;;  %v3142_v30 = vpop.f32.mrb[43].mxu0  ;;  %v4607_v54 = vadd.f32 %v4545_v10, %v977_v20 }
 0x1e7   : > { %v3206_v4 = vpop.f32.mrb[43].mxu1  ;;  %v4578_v36 = vadd.f32 %v4545_v10, %v1479_v55  ;;  %v1480_v6 = vmul.f32 %v4539_v42, %v1464_v58  ;;  %v1318_v11 = vadd.f32 %v3140_v60, %v4470_v38  ;;  %v3143_v2 = vadd.f32 %v3142_v30, %v3141_v61 }
 0x1e8   : > { %v3207_v3 = vadd.f32 %v3206_v4, %v3205_v43  ;;  %v957_v55 = vmax.f32 %v4510_v47, 0.0  ;;  %v978_v43 = vmul.f32 %v4539_v42, %v956_v51 }
 0x1e9   : > { %v4589_v8 = vadd.f32 %v4545_v10, %v1480_v6  ;;  %v1415_v18 = vadd.f32 %v3204_v59, %v1318_v11  ;;  %v1321_v19 = vadd.f32 %v3143_v2, %v4470_v38 }
 0x1ea   : > { %v979_v47 = vmul.f32 %v4539_v42, %v957_v55 }
 0x1eb   : > { %v1465_v21 = vmax.f32 %v1415_v18, 0.0  ;;  %v1418_v26 = vadd.f32 %v3207_v3, %v1321_v19  ;;  %v3144_v27 = vpop.f32.mrb[44].mxu0 }
 0x1ec   : > { %v3208_v31 = vpop.f32.mrb[44].mxu1  ;;  %v3145_v12 = vpop.f32.mrb[45].mxu0 }
 0x1ed   : > { %v3209_v39 = vpop.f32.mrb[45].mxu1  ;;  %v1481_v44 = vmul.f32 %v4539_v42, %v1465_v21  ;;  %v1466_v45 = vmax.f32 %v1418_v26, 0.0  ;;  %v3146_v46 = vadd.f32 %v3145_v12, %v3144_v27  ;;  %v3147_v52 = vpop.f32.mrb[46].mxu0  ;;  %v4622_v27 = vadd.f32 %v4545_v10, %v978_v43 }
 0x1ee   : > { %v3210_v48 = vadd.f32 %v3209_v39, %v3208_v31  ;;  %v3211_v50 = vpop.f32.mrb[46].mxu1  ;;  %v3148_v23 = vpop.f32.mrb[47].mxu0  ;;  %v958_v31 = vmax.f32 %v4515_v24, 0.0 }
 0x1ef   : > { %v3212_v53 = vpop.f32.mrb[47].mxu1  ;;  %v4602_v35 = vadd.f32 %v4545_v10, %v1481_v44  ;;  %v1482_v40 = vmul.f32 %v4539_v42, %v1466_v45  ;;  %v1326_v62 = vadd.f32 %v3146_v46, %v4470_v38  ;;  %v3149_v25 = vadd.f32 %v3148_v23, %v3147_v52 }
 0x1f0   : > { %v3213_v58 = vadd.f32 %v3212_v53, %v3211_v50  ;;  %v959_v52 = vmax.f32 %v4518_v41, 0.0 }
 0x1f1   : > { %v4613_v16 = vadd.f32 %v4545_v10, %v1482_v40  ;;  %v1423_v59 = vadd.f32 %v3210_v48, %v1326_v62  ;;  %v1329_v61 = vadd.f32 %v3149_v25, %v4470_v38  ;;  %v4631_v48 = vadd.f32 %v4545_v10, %v979_v47 }
 0x1f2   : > { %v980_v40 = vmul.f32 %v4539_v42, %v958_v31  ;;  %v981_v41 = vmul.f32 %v4539_v42, %v959_v52 }
 0x1f3   : > { %v1467_v30 = vmax.f32 %v1423_v59, 0.0  ;;  %v1426_v4 = vadd.f32 %v3213_v58, %v1329_v61  ;;  %v3150_v6 = vpop.f32.mrb[48].mxu0 }
 0x1f4   : > { %v3214_v11 = vpop.f32.mrb[48].mxu1  ;;  %v3151_v2 = vpop.f32.mrb[49].mxu0 }
 0x1f5   : > { %v3215_v14 = vpop.f32.mrb[49].mxu1  ;;  %v1483_v3 = vmul.f32 %v4539_v42, %v1467_v30  ;;  %v1468_v18 = vmax.f32 %v1426_v4, 0.0  ;;  %v3152_v19 = vadd.f32 %v3151_v2, %v3150_v6  ;;  %v3153_v21 = vpop.f32.mrb[50].mxu0 }
 0x1f6   : > { %v3216_v9 = vadd.f32 %v3215_v14, %v3214_v11  ;;  %v3217_v26 = vpop.f32.mrb[50].mxu1  ;;  %v3154_v20 = vpop.f32.mrb[51].mxu0  ;;  %v4646_v14 = vadd.f32 %v4545_v10, %v980_v40 }
 0x1f7   : > { %v3218_v12 = vpop.f32.mrb[51].mxu1  ;;  %v4626_v39 = vadd.f32 %v4545_v10, %v1483_v3  ;;  %v1484_v44 = vmul.f32 %v4539_v42, %v1468_v18  ;;  %v1334_v45 = vadd.f32 %v3152_v19, %v4470_v38  ;;  %v3155_v46 = vadd.f32 %v3154_v20, %v3153_v21 }
 0x1f8   : > { %v3219_v50 = vadd.f32 %v3218_v12, %v3217_v26  ;;  %v960_v3 = vmax.f32 %v4521_v5, 0.0  ;;  %v4655_v20 = vadd.f32 %v4545_v10, %v981_v41  ;;  %v961_v12 = vmax.f32 %v4524_v7, 0.0 }
 0x1f9   : > { %v4637_v24 = vadd.f32 %v4545_v10, %v1484_v44  ;;  %v1431_v23 = vadd.f32 %v3216_v9, %v1334_v45  ;;  %v1337_v53 = vadd.f32 %v3155_v46, %v4470_v38 }
 0x1fa   : > { %v983_v7 = vmul.f32 %v4539_v42, %v961_v12  ;;  %v963_v12 = vmax.f32 %v4530_v37, 0.0 }
 0x1fb   : > { %v1469_v25 = vmax.f32 %v1431_v23, 0.0  ;;  %v1434_v55 = vadd.f32 %v3219_v50, %v1337_v53  ;;  %v3156_v58 = vpop.f32.mrb[52].mxu0  ;;  %v982_v50 = vmul.f32 %v4539_v42, %v960_v3 }
 0x1fc   : > { %v3220_v59 = vpop.f32.mrb[52].mxu1  ;;  %v3157_v61 = vpop.f32.mrb[53].mxu0  ;;  %v985_v37 = vmul.f32 %v4539_v42, %v963_v12 }
 0x1fd   : > { %v3221_v43 = vpop.f32.mrb[53].mxu1  ;;  %v1485_v30 = vmul.f32 %v4539_v42, %v1469_v25  ;;  %v1470_v4 = vmax.f32 %v1434_v55, 0.0  ;;  %v3158_v6 = vadd.f32 %v3157_v61, %v3156_v58  ;;  %v3159_v47 = vpop.f32.mrb[54].mxu0 }
 0x1fe   : > { %v3222_v11 = vadd.f32 %v3221_v43, %v3220_v59  ;;  %v3223_v2 = vpop.f32.mrb[54].mxu1  ;;  %v3160_v18 = vpop.f32.mrb[55].mxu0 }
 0x1ff   : > { %v3224_v19 = vpop.f32.mrb[55].mxu1  ;;  %v4650_v9 = vadd.f32 %v4545_v10, %v1485_v30  ;;  %v1486_v21 = vmul.f32 %v4539_v42, %v1470_v4  ;;  %v1342_v26 = vadd.f32 %v3158_v6, %v4470_v38  ;;  %v3161_v31 = vadd.f32 %v3160_v18, %v3159_v47 }
 0x200   : > { %v3225_v44 = vadd.f32 %v3224_v19, %v3223_v2  ;;  %v962_v47 = vmax.f32 %v4527_v29, 0.0 }
 0x201   : > { %v4661_v5 = vadd.f32 %v4545_v10, %v1486_v21  ;;  %v1439_v46 = vadd.f32 %v3222_v11, %v1342_v26  ;;  %v1345_v52 = vadd.f32 %v3161_v31, %v4470_v38  ;;  %v4670_v11 = vadd.f32 %v4545_v10, %v982_v50 }
 0x202   : > { %v4679_v31 = vadd.f32 %v4545_v10, %v983_v7 }
 0x203   : > { %v1471_v53 = vmax.f32 %v1439_v46, 0.0  ;;  %v1442_v40 = vadd.f32 %v3225_v44, %v1345_v52  ;;  %v3162_v25 = vpop.f32.mrb[56].mxu0 }
 0x204   : > { %v3226_v55 = vpop.f32.mrb[56].mxu1  ;;  %v3163_v58 = vpop.f32.mrb[57].mxu0 }
 0x205   : > { %v3227_v59 = vpop.f32.mrb[57].mxu1  ;;  %v1487_v41 = vmul.f32 %v4539_v42, %v1471_v53  ;;  %v1472_v61 = vmax.f32 %v1442_v40, 0.0  ;;  %v3164_v43 = vadd.f32 %v3163_v58, %v3162_v25  ;;  %v3165_v4 = vpop.f32.mrb[58].mxu0  ;;  %v984_v53 = vmul.f32 %v4539_v42, %v962_v47 }
 0x206   : > { %v3228_v30 = vadd.f32 %v3227_v59, %v3226_v55  ;;  %v3229_v6 = vpop.f32.mrb[58].mxu1  ;;  %v3166_v2 = vpop.f32.mrb[59].mxu0 }
 0x207   : > { %v3230_v3 = vpop.f32.mrb[59].mxu1  ;;  %v4674_v18 = vadd.f32 %v4545_v10, %v1487_v41  ;;  %v1488_v19 = vmul.f32 %v4539_v42, %v1472_v61  ;;  %v1350_v21 = vadd.f32 %v3164_v43, %v4470_v38  ;;  %v3167_v26 = vadd.f32 %v3166_v2, %v3165_v4 }
 0x208   : > { %v3231_v44 = vadd.f32 %v3230_v3, %v3229_v6  ;;  %v4694_v47 = vadd.f32 %v4545_v10, %v984_v53  ;;  %v964_v3 = vmax.f32 %v4533_v57, 0.0 }
 0x209   : > { %v4685_v29 = vadd.f32 %v4545_v10, %v1488_v19  ;;  %v1447_v52 = vadd.f32 %v3228_v30, %v1350_v21  ;;  %v1353_v50 = vadd.f32 %v3167_v26, %v4470_v38 }
 0x20a   : > { %5049 = vst [vmem:[#allocation16_spill] sm:$0xff] %v4694_v47 }
 0x20b   : > { %v1473_v25 = vmax.f32 %v1447_v52, 0.0  ;;  %v1450_v55 = vadd.f32 %v3231_v44, %v1353_v50  ;;  %v3168_v7 = vpop.f32.mrb[60].mxu0  ;;  %v4703_v50 = vadd.f32 %v4545_v10, %v985_v37 }
 0x20c   : > { %v3232_v58 = vpop.f32.mrb[60].mxu1  ;;  %v3169_v59 = vpop.f32.mrb[61].mxu0 }
 0x20d   : > { %v3233_v41 = vpop.f32.mrb[61].mxu1  ;;  %v1489_v61 = vmul.f32 %v4539_v42, %v1473_v25  ;;  %v1474_v43 = vmax.f32 %v1450_v55, 0.0  ;;  %v3170_v4 = vadd.f32 %v3169_v59, %v3168_v7  ;;  %v3171_v6 = vpop.f32.mrb[62].mxu0  ;;  %5051 = vst [vmem:[#allocation18_spill] sm:$0xff] %v4703_v50  ;;  %v965_v25 = vmax.f32 %v4536_v34, 0.0 }
 0x20e   : > { %v3234_v30 = vadd.f32 %v3233_v41, %v3232_v58  ;;  %v3235_v2 = vpop.f32.mrb[62].mxu1  ;;  %v3172_v19 = vpop.f32.mrb[63].mxu0  ;;  %v986_v59 = vmul.f32 %v4539_v42, %v964_v3 }
 0x20f   : > { %v3236_v21 = vpop.f32.mrb[63].mxu1  ;;  %v4698_v26 = vadd.f32 %v4545_v10, %v1489_v61  ;;  %v1490_v12 = vmul.f32 %v4539_v42, %v1474_v43  ;;  %v1358_v44 = vadd.f32 %v3170_v4, %v4470_v38  ;;  %v3173_v52 = vadd.f32 %v3172_v19, %v3171_v6 }
 0x210   : > { %v3237_v55 = vadd.f32 %v3236_v21, %v3235_v2  ;;  %v987_v34 = vmul.f32 %v4539_v42, %v965_v25  ;;  %v4718_v3 = vadd.f32 %v4545_v10, %v986_v59 }
 0x211   : > { %5050 = vst [vmem:[#allocation17_spill] sm:$0xff] %v4698_v26  ;;  %v4709_v57 = vadd.f32 %v4545_v10, %v1490_v12  ;;  %v1455_v7 = vadd.f32 %v3234_v30, %v1358_v44  ;;  %v1361_v58 = vadd.f32 %v3173_v52, %v4470_v38 }
 0x212   : > { %5053 = vst [vmem:[#allocation20_spill] sm:$0xff] %v4718_v3 }
 0x213   : > { %5052 = vst [vmem:[#allocation19_spill] sm:$0xff] %v4709_v57  ;;  %v1475_v61 = vmax.f32 %v1455_v7, 0.0  ;;  %v1458_v37 = vadd.f32 %v3237_v55, %v1361_v58  ;;  %v3254_v43 = vpop.f32.mrb[64].mxu0 }
 0x214   : > { %v3318_v4 = vpop.f32.mrb[64].mxu1  ;;  %v3255_v6 = vpop.f32.mrb[65].mxu0 }
 0x215   : > { %v3319_v2 = vpop.f32.mrb[65].mxu1  ;;  %v1491_v19 = vmul.f32 %v4539_v42, %v1475_v61  ;;  %v1476_v21 = vmax.f32 %v1458_v37, 0.0  ;;  %v3256_v12 = vadd.f32 %v3255_v6, %v3254_v43  ;;  %v3257_v44 = vpop.f32.mrb[66].mxu0  ;;  %v4726_v61 = vadd.f32 %v4545_v10, %v987_v34 }
 0x216   : > { %v3320_v30 = vadd.f32 %v3319_v2, %v3318_v4  ;;  %v3321_v52 = vpop.f32.mrb[66].mxu1  ;;  %v3258_v53 = vpop.f32.mrb[67].mxu0 }
 0x217   : > { %v3322_v41 = vpop.f32.mrb[67].mxu1  ;;  %v4721_v55 = vadd.f32 %v4545_v10, %v1491_v19  ;;  %v1492_v7 = vmul.f32 %v4539_v42, %v1476_v21  ;;  %v1817_v25 = vadd.f32 %v3256_v12, %v4470_v38  ;;  %v3259_v58 = vadd.f32 %v3258_v53, %v3257_v44  ;;  %5055 = vst [vmem:[#allocation22_spill] sm:$0xff] %v4726_v61 }
 0x218   : > { %v3323_v37 = vadd.f32 %v3322_v41, %v3321_v52 }
 0x219   : > { %5054 = vst [vmem:[#allocation21_spill] sm:$0xff] %v4721_v55  ;;  %v4731_v59 = vadd.f32 %v4545_v10, %v1492_v7  ;;  %v4733_v4 = vadd.f32 %v3320_v30, %v1817_v25  ;;  %v1820_v6 = vadd.f32 %v3259_v58, %v4470_v38 }
 0x21b   : > { %5056 = vst [vmem:[#allocation23_spill] sm:$0xff] %v4731_v59  ;;  %v4738_v19 = vadd.f32 %v3323_v37, %v1820_v6  ;;  %v3260_v53 = vpop.f32.mrb[68].mxu0 }
 0x21c   : > { %v3324_v21 = vpop.f32.mrb[68].mxu1  ;;  %v3261_v34 = vpop.f32.mrb[69].mxu0 }
 0x21d   : > { %v3325_v12 = vpop.f32.mrb[69].mxu1  ;;  %v3262_v41 = vadd.f32 %v3261_v34, %v3260_v53  ;;  %v3263_v52 = vpop.f32.mrb[70].mxu0 }
 0x21e   : > { %v3326_v44 = vadd.f32 %v3325_v12, %v3324_v21  ;;  %v3327_v43 = vpop.f32.mrb[70].mxu1  ;;  %v3264_v40 = vpop.f32.mrb[71].mxu0 }
 0x21f   : > { %v3328_v7 = vpop.f32.mrb[71].mxu1  ;;  %v1825_v30 = vadd.f32 %v3262_v41, %v4470_v38  ;;  %v3265_v25 = vadd.f32 %v3264_v40, %v3263_v52 }
 0x220   : > { %v3329_v46 = vadd.f32 %v3328_v7, %v3327_v43 }
 0x221   : > { %v4741_v58 = vadd.f32 %v3326_v44, %v1825_v30  ;;  %v1828_v2 = vadd.f32 %v3265_v25, %v4470_v38 }
 0x223   : > { %v4744_v37 = vadd.f32 %v3329_v46, %v1828_v2  ;;  %v3266_v6 = vpop.f32.mrb[72].mxu0 }
 0x224   : > { %v3330_v23 = vpop.f32.mrb[72].mxu1  ;;  %v3267_v45 = vpop.f32.mrb[73].mxu0 }
 0x225   : > { %v3331_v62 = vpop.f32.mrb[73].mxu1  ;;  %v3268_v53 = vadd.f32 %v3267_v45, %v3266_v6  ;;  %v3269_v34 = vpop.f32.mrb[74].mxu0 }
 0x226   : > { %v3332_v21 = vadd.f32 %v3331_v62, %v3330_v23  ;;  %v3333_v12 = vpop.f32.mrb[74].mxu1  ;;  %v3270_v51 = vpop.f32.mrb[75].mxu0 }
 0x227   : > { %v3334_v63 = vpop.f32.mrb[75].mxu1  ;;  %v1833_v41 = vadd.f32 %v3268_v53, %v4470_v38  ;;  %v3271_v40 = vadd.f32 %v3270_v51, %v3269_v34 }
 0x228   : > { %v3335_v43 = vadd.f32 %v3334_v63, %v3333_v12 }
 0x229   : > { %v4747_v44 = vadd.f32 %v3332_v21, %v1833_v41  ;;  %v1836_v52 = vadd.f32 %v3271_v40, %v4470_v38 }
 0x22b   : > { %v4750_v46 = vadd.f32 %v3335_v43, %v1836_v52  ;;  %v3272_v2 = vpop.f32.mrb[76].mxu0 }
 0x22c   : > { %v3336_v7 = vpop.f32.mrb[76].mxu1  ;;  %v3273_v30 = vpop.f32.mrb[77].mxu0 }
 0x22d   : > { %v3337_v25 = vpop.f32.mrb[77].mxu1  ;;  %v3274_v45 = vadd.f32 %v3273_v30, %v3272_v2  ;;  %v3275_v23 = vpop.f32.mrb[78].mxu0 }
 0x22e   : > { %v3338_v62 = vadd.f32 %v3337_v25, %v3336_v7  ;;  %v3339_v6 = vpop.f32.mrb[78].mxu1  ;;  %v3276_v60 = vpop.f32.mrb[79].mxu0 }
 0x22f   : > { %v3340_v33 = vpop.f32.mrb[79].mxu1  ;;  %v1841_v53 = vadd.f32 %v3274_v45, %v4470_v38  ;;  %v3277_v51 = vadd.f32 %v3276_v60, %v3275_v23 }
 0x230   : > { %v3341_v63 = vadd.f32 %v3340_v33, %v3339_v6 }
 0x231   : > { %v4753_v21 = vadd.f32 %v3338_v62, %v1841_v53  ;;  %v1844_v34 = vadd.f32 %v3277_v51, %v4470_v38 }
 0x233   : > { %v4756_v12 = vadd.f32 %v3341_v63, %v1844_v34  ;;  %v3278_v41 = vpop.f32.mrb[80].mxu0 }
 0x234   : > { %v3342_v40 = vpop.f32.mrb[80].mxu1  ;;  %v3279_v43 = vpop.f32.mrb[81].mxu0 }
 0x235   : > { %v3343_v52 = vpop.f32.mrb[81].mxu1  ;;  %v3280_v2 = vadd.f32 %v3279_v43, %v3278_v41  ;;  %v3281_v30 = vpop.f32.mrb[82].mxu0 }
 0x236   : > { %v3344_v7 = vadd.f32 %v3343_v52, %v3342_v40  ;;  %v3345_v25 = vpop.f32.mrb[82].mxu1  ;;  %v3282_v15 = vpop.f32.mrb[83].mxu0 }
 0x237   : > { %v3346_v22 = vpop.f32.mrb[83].mxu1  ;;  %v1849_v45 = vadd.f32 %v3280_v2, %v4470_v38  ;;  %v3283_v60 = vadd.f32 %v3282_v15, %v3281_v30 }
 0x238   : > { %v3347_v33 = vadd.f32 %v3346_v22, %v3345_v25 }
 0x239   : > { %v4759_v62 = vadd.f32 %v3344_v7, %v1849_v45  ;;  %v1852_v23 = vadd.f32 %v3283_v60, %v4470_v38 }
 0x23b   : > { %v4762_v6 = vadd.f32 %v3347_v33, %v1852_v23  ;;  %v3284_v53 = vpop.f32.mrb[84].mxu0 }
 0x23c   : > { %v3348_v51 = vpop.f32.mrb[84].mxu1  ;;  %v3285_v63 = vpop.f32.mrb[85].mxu0 }
 0x23d   : > { %v3349_v34 = vpop.f32.mrb[85].mxu1  ;;  %v3286_v41 = vadd.f32 %v3285_v63, %v3284_v53  ;;  %v3287_v43 = vpop.f32.mrb[86].mxu0 }
 0x23e   : > { %v3350_v40 = vadd.f32 %v3349_v34, %v3348_v51  ;;  %v3351_v52 = vpop.f32.mrb[86].mxu1  ;;  %v3288_v49 = vpop.f32.mrb[87].mxu0 }
 0x23f   : > { %v3352_v59 = vpop.f32.mrb[87].mxu1  ;;  %v1857_v2 = vadd.f32 %v3286_v41, %v4470_v38  ;;  %v3289_v15 = vadd.f32 %v3288_v49, %v3287_v43 }
 0x240   : > { %v3353_v22 = vadd.f32 %v3352_v59, %v3351_v52 }
 0x241   : > { %v4765_v7 = vadd.f32 %v3350_v40, %v1857_v2  ;;  %v1860_v30 = vadd.f32 %v3289_v15, %v4470_v38 }
 0x243   : > { %v4768_v25 = vadd.f32 %v3353_v22, %v1860_v30  ;;  %v3290_v45 = vpop.f32.mrb[88].mxu0 }
 0x244   : > { %v3354_v60 = vpop.f32.mrb[88].mxu1  ;;  %v3291_v33 = vpop.f32.mrb[89].mxu0 }
 0x245   : > { %v3355_v23 = vpop.f32.mrb[89].mxu1  ;;  %v3292_v53 = vadd.f32 %v3291_v33, %v3290_v45  ;;  %v3293_v63 = vpop.f32.mrb[90].mxu0 }
 0x246   : > { %v3356_v51 = vadd.f32 %v3355_v23, %v3354_v60  ;;  %v3357_v34 = vpop.f32.mrb[90].mxu1  ;;  %v3294_v61 = vpop.f32.mrb[91].mxu0 }
 0x247   : > { %v3358_v55 = vpop.f32.mrb[91].mxu1  ;;  %v1865_v41 = vadd.f32 %v3292_v53, %v4470_v38  ;;  %v3295_v49 = vadd.f32 %v3294_v61, %v3293_v63  ;;  %v4779_v63 = vld [vmem:[#allocation7] ss:$0 sm:$0xff] }
 0x248   : > { %v3359_v59 = vadd.f32 %v3358_v55, %v3357_v34 }
 0x249   : > { %v4771_v40 = vadd.f32 %v3356_v51, %v1865_v41  ;;  %v1868_v43 = vadd.f32 %v3295_v49, %v4470_v38 }
 0x24b   : > { %v4774_v52 = vadd.f32 %v3359_v59, %v1868_v43  ;;  %v3296_v2 = vpop.f32.mrb[92].mxu0 }
 0x24c   : > { %v3360_v15 = vpop.f32.mrb[92].mxu1  ;;  %v3297_v22 = vpop.f32.mrb[93].mxu0 }
 0x24d   : > { %v3361_v30 = vpop.f32.mrb[93].mxu1  ;;  %v3298_v45 = vadd.f32 %v3297_v22, %v3296_v2  ;;  %v3299_v33 = vpop.f32.mrb[94].mxu0 }
 0x24e   : > { %v3362_v60 = vadd.f32 %v3361_v30, %v3360_v15  ;;  %v3363_v23 = vpop.f32.mrb[94].mxu1  ;;  %v3300_v3 = vpop.f32.mrb[95].mxu0 }
 0x24f   : > { %v3364_v57 = vpop.f32.mrb[95].mxu1  ;;  %v1873_v53 = vadd.f32 %v3298_v45, %v4470_v38  ;;  %v3301_v61 = vadd.f32 %v3300_v3, %v3299_v33  ;;  %v1976_v38 = vmax.f32 %v4733_v4, 0.0  ;;  %v1977_v33 = vmax.f32 %v4738_v19, 0.0 }
 0x250   : > { %v3365_v55 = vadd.f32 %v3364_v57, %v3363_v23 }
 0x251   : > { %v4777_v51 = vadd.f32 %v3362_v60, %v1873_v53  ;;  %v1876_v34 = vadd.f32 %v4779_v63, %v3301_v61 }
 0x253   : > { %v4782_v41 = vadd.f32 %v3365_v55, %v1876_v34  ;;  %v3382_v49 = vpop.f32.mrb[96].mxu0  ;;  %v1992_v55 = vmul.f32 %v4539_v42, %v1976_v38  ;;  %v1978_v38 = vmax.f32 %v4741_v58, 0.0 }
 0x254   : > { %v3446_v59 = vpop.f32.mrb[96].mxu1  ;;  %v3383_v43 = vpop.f32.mrb[97].mxu0 }
 0x255   : > { %v3447_v2 = vpop.f32.mrb[97].mxu1  ;;  %v3384_v15 = vadd.f32 %v3383_v43, %v3382_v49  ;;  %v3385_v30 = vpop.f32.mrb[98].mxu0 }
 0x256   : > { %v3448_v22 = vadd.f32 %v3447_v2, %v3446_v59  ;;  %v3449_v50 = vpop.f32.mrb[98].mxu1  ;;  %v3386_v3 = vpop.f32.mrb[99].mxu0  ;;  %v1993_v2 = vmul.f32 %v4539_v42, %v1977_v33 }
 0x257   : > { %v3450_v57 = vpop.f32.mrb[99].mxu1  ;;  %v2316_v45 = vadd.f32 %v4779_v63, %v3384_v15  ;;  %v3387_v60 = vadd.f32 %v3386_v3, %v3385_v30  ;;  %v2008_v3 = vadd.f32 %v4545_v10, %v1992_v55 }
 0x258   : > { %v3451_v23 = vadd.f32 %v3450_v57, %v3449_v50 }
 0x259   : > { %v2413_v53 = vadd.f32 %v3448_v22, %v2316_v45  ;;  %v2319_v61 = vadd.f32 %v4779_v63, %v3387_v60 }
 0x25b   : > { %v2475_v34 = vmax.f32 %v2413_v53, 0.0  ;;  %v2416_v49 = vadd.f32 %v3451_v23, %v2319_v61  ;;  %v3388_v59 = vpop.f32.mrb[100].mxu0  ;;  %v2009_v61 = vadd.f32 %v4545_v10, %v1993_v2 }
 0x25c   : > { %v3452_v43 = vpop.f32.mrb[100].mxu1  ;;  %v3389_v4 = vpop.f32.mrb[101].mxu0 }
 0x25d   : > { %v3453_v26 = vpop.f32.mrb[101].mxu1  ;;  %v2491_v47 = vmul.f32 %v4539_v42, %v2475_v34  ;;  %v2476_v15 = vmax.f32 %v2416_v49, 0.0  ;;  %v3390_v30 = vadd.f32 %v3389_v4, %v3388_v59  ;;  %v3391_v50 = vpop.f32.mrb[102].mxu0  ;;  %v1979_v34 = vmax.f32 %v4744_v37, 0.0 }
 0x25e   : > { %v3454_v19 = vadd.f32 %v3453_v26, %v3452_v43  ;;  %v3455_v22 = vpop.f32.mrb[102].mxu1  ;;  %v3392_v57 = vpop.f32.mrb[103].mxu0  ;;  %v1994_v43 = vmul.f32 %v4539_v42, %v1978_v38 }
 0x25f   : > { %v3456_v45 = vpop.f32.mrb[103].mxu1  ;;  %v2507_v60 = vadd.f32 %v4545_v10, %v2491_v47  ;;  %v2492_v33 = vmul.f32 %v4539_v42, %v2476_v15  ;;  %v2324_v23 = vadd.f32 %v4779_v63, %v3390_v30  ;;  %v3393_v53 = vadd.f32 %v3392_v57, %v3391_v50 }
 0x260   : > { %v3457_v26 = vadd.f32 %v3456_v45, %v3455_v22  ;;  %v5057_v47 = vmax.f32 %v4550_v28, %v4554_v13  ;;  %v1995_v37 = vmul.f32 %v4539_v42, %v1979_v34 }
 0x261   : > { %v2523_v49 = vmax.f32 %v2008_v3, %v2507_v60  ;;  %v2508_v55 = vadd.f32 %v4545_v10, %v2492_v33  ;;  %v2421_v59 = vadd.f32 %v3454_v19, %v2324_v23  ;;  %v2327_v58 = vadd.f32 %v4779_v63, %v3393_v53 }
 0x262   : > { %v5058_v19 = vmax.f32 %v4559_v17, %v4565_v0  ;;  %v2010_v23 = vadd.f32 %v4545_v10, %v1994_v43 }
 0x263   : > { %v2539_v4 = vmax.f32 %v5057_v47, %v2523_v49  ;;  %v2524_v15 = vmax.f32 %v2009_v61, %v2508_v55  ;;  %v2477_v30 = vmax.f32 %v2421_v59, 0.0  ;;  %v2424_v50 = vadd.f32 %v3457_v26, %v2327_v58  ;;  %v3394_v2 = vpop.f32.mrb[104].mxu0 }
 0x264   : > { %v3458_v57 = vpop.f32.mrb[104].mxu1  ;;  %v3395_v22 = vpop.f32.mrb[105].mxu0  ;;  %v1980_v59 = vmax.f32 %v4747_v44, 0.0  ;;  %v1981_v58 = vmax.f32 %v4750_v46, 0.0 }
 0x265   : > { %v3459_v3 = vpop.f32.mrb[105].mxu1  ;;  %v2965_v45 = vpack.c.bf16 %v2539_v4, %v2539_v4  ;;  %v2540_v60 = vmax.f32 %v5058_v19, %v2524_v15  ;;  %v2493_v38 = vmul.f32 %v4539_v42, %v2477_v30  ;;  %v2478_v33 = vmax.f32 %v2424_v50, 0.0  ;;  %v3397_v28 = vpop.f32.mrb[106].mxu0 }
 0x266   : > { %v3461_v13 = vpop.f32.mrb[106].mxu1  ;;  %v3396_v53 = vadd.f32 %v3395_v22, %v3394_v2  ;;  %v3460_v61 = vadd.f32 %v3459_v3, %v3458_v57  ;;  %v3398_v26 = vpop.f32.mrb[107].mxu0  ;;  %v2011_v4 = vadd.f32 %v4545_v10, %v1995_v37  ;;  %v5059_v57 = vmax.f32 %v4574_v1, %v4578_v36 }
 0x267   : > { %v3462_v49 = vpop.f32.mrb[107].mxu1  ;;  %2620 = vst.msk [vmem:[%s4811_s26] sm:$0xf] %vm2619_vm0, %v2965_v45  ;;  %v2966_v34 = vpack.c.bf16 %v2540_v60, %v2540_v60  ;;  %v2509_v17 = vadd.f32 %v4545_v10, %v2493_v38  ;;  %v2494_v0 = vmul.f32 %v4539_v42, %v2478_v33  ;;  %v3399_v55 = vadd.f32 %v3398_v26, %v3397_v28 }
 0x268   : > { %v2332_v43 = vadd.f32 %v4779_v63, %v3396_v53  ;;  %v3463_v47 = vadd.f32 %v3462_v49, %v3461_v13  ;;  %v1996_v19 = vmul.f32 %v4539_v42, %v1980_v59  ;;  %v1997_v37 = vmul.f32 %v4539_v42, %v1981_v58 }
 0x269   : > { %2621 = vst.msk [vmem:[%s4811_s26 + $0x4] sm:$0xf] %vm2619_vm0, %v2966_v34  ;;  %v2525_v15 = vmax.f32 %v2010_v23, %v2509_v17  ;;  %v2510_v30 = vadd.f32 %v4545_v10, %v2494_v0  ;;  %v2335_v50 = vadd.f32 %v4779_v63, %v3399_v55  ;;  %v5060_v13 = vmax.f32 %v4583_v56, %v4589_v8 }
 0x26a   : > { %v2429_v2 = vadd.f32 %v3460_v61, %v2332_v43  ;;  %v1982_v26 = vmax.f32 %v4753_v21, 0.0  ;;  %v2012_v58 = vadd.f32 %v4545_v10, %v1996_v19  ;;  %v1983_v43 = vmax.f32 %v4756_v12, 0.0 }
 0x26b   : > { %v2541_v22 = vmax.f32 %v5059_v57, %v2525_v15  ;;  %v2526_v44 = vmax.f32 %v2011_v4, %v2510_v30  ;;  %v2432_v3 = vadd.f32 %v3463_v47, %v2335_v50  ;;  %v3400_v46 = vpop.f32.mrb[108].mxu0  ;;  %v2013_v4 = vadd.f32 %v4545_v10, %v1997_v37 }
 0x26c   : > { %v3464_v45 = vpop.f32.mrb[108].mxu1  ;;  %v2479_v60 = vmax.f32 %v2429_v2, 0.0  ;;  %v3401_v38 = vpop.f32.mrb[109].mxu0  ;;  %v1998_v2 = vmul.f32 %v4539_v42, %v1982_v26  ;;  %v1984_v19 = vmax.f32 %v4759_v62, 0.0  ;;  %v5061_v37 = vmax.f32 %v4598_v32, %v4602_v35 }
 0x26d   : > { %v3465_v33 = vpop.f32.mrb[109].mxu1  ;;  %v2967_v28 = vpack.c.bf16 %v2541_v22, %v2541_v22  ;;  %v2542_v23 = vmax.f32 %v5060_v13, %v2526_v44  ;;  %v2480_v53 = vmax.f32 %v2432_v3, 0.0  ;;  %v3402_v1 = vadd.f32 %v3401_v38, %v3400_v46  ;;  %v3403_v36 = vpop.f32.mrb[110].mxu0 }
 0x26e   : > { %v3467_v61 = vpop.f32.mrb[110].mxu1  ;;  %v2495_v49 = vmul.f32 %v4539_v42, %v2479_v60  ;;  %v3466_v34 = vadd.f32 %v3465_v33, %v3464_v45  ;;  %v3404_v17 = vpop.f32.mrb[111].mxu0  ;;  %v1999_v45 = vmul.f32 %v4539_v42, %v1983_v43  ;;  %v2014_v62 = vadd.f32 %v4545_v10, %v1998_v2 }
 0x26f   : > { %v3468_v0 = vpop.f32.mrb[111].mxu1  ;;  %2622 = vst.msk [vmem:[%s4811_s26 + $0x8] sm:$0xf] %vm2619_vm0, %v2967_v28  ;;  %v2968_v55 = vpack.c.bf16 %v2542_v23, %v2542_v23  ;;  %v2496_v59 = vmul.f32 %v4539_v42, %v2480_v53  ;;  %v2340_v56 = vadd.f32 %v4779_v63, %v3402_v1  ;;  %v3405_v8 = vadd.f32 %v3404_v17, %v3403_v36 }
 0x270   : > { %v2511_v47 = vadd.f32 %v4545_v10, %v2495_v49  ;;  %v3469_v21 = vadd.f32 %v3468_v0, %v3467_v61  ;;  %v5062_v28 = vmax.f32 %v4607_v54, %v4613_v16  ;;  %v2000_v0 = vmul.f32 %v4539_v42, %v1984_v19 }
 0x271   : > { %2623 = vst.msk [vmem:[%s4811_s26 + $0xc] sm:$0xf] %vm2619_vm0, %v2968_v55  ;;  %v2512_v15 = vadd.f32 %v4545_v10, %v2496_v59  ;;  %v2437_v30 = vadd.f32 %v3466_v34, %v2340_v56  ;;  %v2343_v50 = vadd.f32 %v4779_v63, %v3405_v8  ;;  %v2015_v56 = vadd.f32 %v4545_v10, %v1999_v45  ;;  %v4879_v45 = vld [vmem:[#allocation8] ss:$0 sm:$0xff] }
 0x272   : > { %v2527_v57 = vmax.f32 %v2012_v58, %v2511_v47  ;;  %v1985_v47 = vmax.f32 %v4762_v6, 0.0  ;;  %v5064_v6 = vmax.f32 %v4631_v48, %v4637_v24 }
 0x273   : > { %v2528_v22 = vmax.f32 %v2013_v4, %v2512_v15  ;;  %v2481_v44 = vmax.f32 %v2437_v30, 0.0  ;;  %v2440_v3 = vadd.f32 %v3469_v21, %v2343_v50  ;;  %v3406_v46 = vpop.f32.mrb[112].mxu0  ;;  %v5063_v4 = vmax.f32 %v4622_v27, %v4626_v39 }
 0x274   : > { %v3470_v12 = vpop.f32.mrb[112].mxu1  ;;  %v2543_v60 = vmax.f32 %v5061_v37, %v2527_v57  ;;  %v3407_v38 = vpop.f32.mrb[113].mxu0  ;;  %v4873_v57 = vld [vmem:[#allocation10] ss:$0 sm:$0xff] }
 0x275   : > { %v3471_v33 = vpop.f32.mrb[113].mxu1  ;;  %v2544_v13 = vmax.f32 %v5062_v28, %v2528_v22  ;;  %v2497_v23 = vmul.f32 %v4539_v42, %v2481_v44  ;;  %v2482_v53 = vmax.f32 %v2440_v3, 0.0  ;;  %v3408_v1 = vadd.f32 %v3407_v38, %v3406_v46  ;;  %v3409_v36 = vpop.f32.mrb[114].mxu0 }
 0x276   : > { %v3473_v61 = vpop.f32.mrb[114].mxu1  ;;  %v2969_v26 = vpack.c.bf16 %v2543_v60, %v2543_v60  ;;  %v3472_v49 = vadd.f32 %v3471_v33, %v3470_v12  ;;  %v3410_v32 = vpop.f32.mrb[115].mxu0  ;;  %v2016_v22 = vadd.f32 %v4873_v57, %v2000_v0  ;;  %v2001_v60 = vmul.f32 %v4879_v45, %v1985_v47 }
 0x277   : > { %v3474_v35 = vpop.f32.mrb[115].mxu1  ;;  %v2970_v34 = vpack.c.bf16 %v2544_v13, %v2544_v13  ;;  %v2513_v17 = vadd.f32 %v4545_v10, %v2497_v23  ;;  %v2498_v54 = vmul.f32 %v4539_v42, %v2482_v53  ;;  %v2348_v16 = vadd.f32 %v4779_v63, %v3408_v1 }
 0x278   : > { %2624 = vst.msk [vmem:[%s4811_s26 + $0x10] sm:$0xf] %vm2619_vm0, %v2969_v26  ;;  %v3411_v55 = vadd.f32 %v3410_v32, %v3409_v36  ;;  %v3475_v59 = vadd.f32 %v3474_v35, %v3473_v61  ;;  %v1986_v38 = vmax.f32 %v4765_v7, 0.0  ;;  %v1987_v36 = vmax.f32 %v4768_v25, 0.0 }
 0x279   : > { %2625 = vst.msk [vmem:[%s4811_s26 + $0x14] sm:$0xf] %vm2619_vm0, %v2970_v34  ;;  %v2529_v8 = vmax.f32 %v2014_v62, %v2513_v17  ;;  %v2514_v58 = vadd.f32 %v4545_v10, %v2498_v54  ;;  %v2445_v43 = vadd.f32 %v3472_v49, %v2348_v16  ;;  %v2017_v32 = vadd.f32 %v4873_v57, %v2001_v60 }
 0x27a   : > { %v2351_v21 = vadd.f32 %v4779_v63, %v3411_v55  ;;  %v2002_v35 = vmul.f32 %v4879_v45, %v1986_v38  ;;  %v5065_v17 = vmax.f32 %v4646_v14, %v4650_v9  ;;  %v1988_v9 = vmax.f32 %v4771_v40, 0.0 }
 0x27b   : > { %v2545_v42 = vmax.f32 %v5063_v4, %v2529_v8  ;;  %v2530_v15 = vmax.f32 %v2015_v56, %v2514_v58  ;;  %v2483_v30 = vmax.f32 %v2445_v43, 0.0  ;;  %v3412_v50 = vpop.f32.mrb[116].mxu0  ;;  %v1989_v40 = vmax.f32 %v4774_v52, 0.0 }
 0x27c   : > { %v3476_v2 = vpop.f32.mrb[116].mxu1  ;;  %v2448_v44 = vadd.f32 %v3475_v59, %v2351_v21  ;;  %v3413_v10 = vpop.f32.mrb[117].mxu0  ;;  %v2003_v59 = vmul.f32 %v4879_v45, %v1987_v36  ;;  %v2018_v14 = vadd.f32 %v4873_v57, %v2002_v35  ;;  %v2004_v60 = vmul.f32 %v4879_v45, %v1988_v9 }
 0x27d   : > { %v3477_v3 = vpop.f32.mrb[117].mxu1  ;;  %v2971_v46 = vpack.c.bf16 %v2545_v42, %v2545_v42  ;;  %v2546_v12 = vmax.f32 %v5064_v6, %v2530_v15  ;;  %v2499_v27 = vmul.f32 %v4879_v45, %v2483_v30  ;;  %v3414_v39 = vadd.f32 %v3413_v10, %v3412_v50  ;;  %v3415_v19 = vpop.f32.mrb[118].mxu0 }
 0x27e   : > { %v3479_v37 = vpop.f32.mrb[118].mxu1  ;;  %v2484_v33 = vmax.f32 %v2448_v44, 0.0  ;;  %v3478_v28 = vadd.f32 %v3477_v3, %v3476_v2  ;;  %v3416_v13 = vpop.f32.mrb[119].mxu0  ;;  %v5066_v30 = vmax.f32 %v4655_v20, %v4661_v5  ;;  %v5067_v38 = vmax.f32 %v4670_v11, %v4674_v18 }
 0x27f   : > { %v3480_v23 = vpop.f32.mrb[119].mxu1  ;;  %2626 = vst.msk [vmem:[%s4811_s26 + $0x18] sm:$0xf] %vm2619_vm0, %v2971_v46  ;;  %v2972_v48 = vpack.c.bf16 %v2546_v12, %v2546_v12  ;;  %v2515_v24 = vadd.f32 %v4873_v57, %v2499_v27  ;;  %v2356_v53 = vadd.f32 %v4779_v63, %v3414_v39  ;;  %v3417_v1 = vadd.f32 %v3416_v13, %v3415_v19 }
 0x280   : > { %v2500_v61 = vmul.f32 %v4879_v45, %v2484_v33  ;;  %v3481_v62 = vadd.f32 %v3480_v23, %v3479_v37  ;;  %v2019_v12 = vadd.f32 %v4873_v57, %v2003_v59 }
 0x281   : > { %2627 = vst.msk [vmem:[%s4811_s26 + $0x1c] sm:$0xf] %vm2619_vm0, %v2972_v48  ;;  %v2531_v7 = vmax.f32 %v2016_v22, %v2515_v24  ;;  %v2453_v26 = vadd.f32 %v3478_v28, %v2356_v53  ;;  %v2359_v49 = vadd.f32 %v4779_v63, %v3417_v1  ;;  %v2005_v24 = vmul.f32 %v4879_v45, %v1989_v40 }
 0x282   : > { %v2516_v34 = vadd.f32 %v4873_v57, %v2500_v61  ;;  %v5068_v61 = vmax.f32 %v4679_v31, %v4685_v29 }
 0x283   : > { %v2547_v54 = vmax.f32 %v5065_v17, %v2531_v7  ;;  %v2485_v25 = vmax.f32 %v2453_v26, 0.0  ;;  %v2456_v16 = vadd.f32 %v3481_v62, %v2359_v49  ;;  %v3418_v0 = vpop.f32.mrb[120].mxu0  ;;  %v2020_v49 = vadd.f32 %v4873_v57, %v2004_v60 }
 0x284   : > { %v3482_v55 = vpop.f32.mrb[120].mxu1  ;;  %v2532_v56 = vmax.f32 %v2017_v32, %v2516_v34  ;;  %v3419_v8 = vpop.f32.mrb[121].mxu0 }
 0x285   : > { %v3483_v58 = vpop.f32.mrb[121].mxu1  ;;  %v2973_v43 = vpack.c.bf16 %v2547_v54, %v2547_v54  ;;  %v2501_v47 = vmul.f32 %v4879_v45, %v2485_v25  ;;  %v2486_v21 = vmax.f32 %v2456_v16, 0.0  ;;  %v3420_v4 = vadd.f32 %v3419_v8, %v3418_v0  ;;  %v3421_v42 = vpop.f32.mrb[122].mxu0 }
 0x286   : > { %v3485_v15 = vpop.f32.mrb[122].mxu1  ;;  %v2548_v50 = vmax.f32 %v5066_v30, %v2532_v56  ;;  %v3484_v2 = vadd.f32 %v3483_v58, %v3482_v55  ;;  %v3422_v22 = vpop.f32.mrb[123].mxu0  ;;  %v2021_v16 = vadd.f32 %v4873_v57, %v2005_v24  ;;  %v1990_v0 = vmax.f32 %v4777_v51, 0.0 }
 0x287   : > { %v3486_v44 = vpop.f32.mrb[123].mxu1  ;;  %2628 = vst.msk [vmem:[%s4811_s26 + $0x20] sm:$0xf] %vm2619_vm0, %v2973_v43  ;;  %v2517_v10 = vadd.f32 %v4873_v57, %v2501_v47  ;;  %v2502_v3 = vmul.f32 %v4879_v45, %v2486_v21  ;;  %v2364_v46 = vadd.f32 %v4779_v63, %v3420_v4  ;;  %v3423_v6 = vadd.f32 %v3422_v22, %v3421_v42  ;;  %v5069_v21 = vld [vmem:[#allocation16_spill] sm:$0xff]  ;;  %v5070_v4 = vld [vmem:[#allocation17_spill] sm:$0xff]  ;;  %v5073_v22 = vld [vmem:[#allocation19_spill] sm:$0xff] }
 0x288   : > { %v2974_v27 = vpack.c.bf16 %v2548_v50, %v2548_v50  ;;  %v3487_v20 = vadd.f32 %v3486_v44, %v3485_v15  ;;  %v1991_v56 = vmax.f32 %v4782_v41, 0.0  ;;  %v5071_v42 = vmax.f32 %v5069_v21, %v5070_v4 }
 0x289   : > { %v2533_v5 = vmax.f32 %v2018_v14, %v2517_v10  ;;  %v2518_v39 = vadd.f32 %v4873_v57, %v2502_v3  ;;  %v2461_v19 = vadd.f32 %v3484_v2, %v2364_v46  ;;  %v2367_v37 = vadd.f32 %v4779_v63, %v3423_v6  ;;  %v5072_v2 = vld [vmem:[#allocation18_spill] sm:$0xff] }
 0x28a   : > { %2629 = vst.msk [vmem:[%s4811_s26 + $0x24] sm:$0xf] %vm2619_vm0, %v2974_v27  ;;  %v2006_v9 = vmul.f32 %v4879_v45, %v1990_v0  ;;  %v2007_v41 = vmul.f32 %v4879_v45, %v1991_v56  ;;  %v5074_v44 = vmax.f32 %v5072_v2, %v5073_v22 }
 0x28b   : > { %v2549_v33 = vmax.f32 %v5067_v38, %v2533_v5  ;;  %v2534_v28 = vmax.f32 %v2019_v12, %v2518_v39  ;;  %v2487_v13 = vmax.f32 %v2461_v19, 0.0  ;;  %v2464_v23 = vadd.f32 %v3487_v20, %v2367_v37  ;;  %v3424_v52 = vpop.f32.mrb[124].mxu0  ;;  %v5075_v19 = vld [vmem:[#allocation20_spill] sm:$0xff]  ;;  %v5078_v38 = vld [vmem:[#allocation22_spill] sm:$0xff] }
 0x28c   : > { %v3488_v48 = vpop.f32.mrb[124].mxu1  ;;  %v3425_v53 = vpop.f32.mrb[125].mxu0  ;;  %v2022_v12 = vadd.f32 %v4873_v57, %v2006_v9  ;;  %v2023_v27 = vadd.f32 %v4873_v57, %v2007_v41 }
 0x28d   : > { %v3489_v1 = vpop.f32.mrb[125].mxu1  ;;  %v2975_v36 = vpack.c.bf16 %v2549_v33, %v2549_v33  ;;  %v2550_v62 = vmax.f32 %v5068_v61, %v2534_v28  ;;  %v2503_v7 = vmul.f32 %v4879_v45, %v2487_v13  ;;  %v2488_v26 = vmax.f32 %v2464_v23, 0.0  ;;  %v3427_v11 = vpop.f32.mrb[126].mxu0  ;;  %v5079_v33 = vld [vmem:[#allocation23_spill] sm:$0xff] }
 0x28e   : > { %v3491_v18 = vpop.f32.mrb[126].mxu1  ;;  %v3426_v32 = vadd.f32 %v3425_v53, %v3424_v52  ;;  %v3490_v35 = vadd.f32 %v3489_v1, %v3488_v48  ;;  %v3428_v34 = vpop.f32.mrb[127].mxu0  ;;  %v5080_v28 = vmax.f32 %v5078_v38, %v5079_v33 }
 0x28f   : > { %v3492_v17 = vpop.f32.mrb[127].mxu1  ;;  %2630 = vst.msk [vmem:[%s4811_s26 + $0x28] sm:$0xf] %vm2619_vm0, %v2975_v36  ;;  %v2976_v54 = vpack.c.bf16 %v2550_v62, %v2550_v62  ;;  %v2519_v25 = vadd.f32 %v4873_v57, %v2503_v7  ;;  %v2504_v31 = vmul.f32 %v4879_v45, %v2488_v26  ;;  %v3429_v29 = vadd.f32 %v3428_v34, %v3427_v11 }
 0x290   : > { %v2372_v55 = vadd.f32 %v4779_v63, %v3426_v32  ;;  %v3493_v59 = vadd.f32 %v3492_v17, %v3491_v18 }
 0x291   : > { %2631 = vst.msk [vmem:[%s4811_s26 + $0x2c] sm:$0xf] %vm2619_vm0, %v2976_v54  ;;  %v2535_v8 = vmax.f32 %v2020_v49, %v2519_v25  ;;  %v2520_v58 = vadd.f32 %v4873_v57, %v2504_v31  ;;  %v2375_v43 = vadd.f32 %v4779_v63, %v3429_v29 }
 0x292   : > { %v2469_v47 = vadd.f32 %v3490_v35, %v2372_v55 }
 0x293   : > { %v2551_v15 = vmax.f32 %v5071_v42, %v2535_v8  ;;  %v2536_v51 = vmax.f32 %v2021_v16, %v2520_v58  ;;  %v2472_v14 = vadd.f32 %v3493_v59, %v2375_v43 }
 0x294   : > { %v2489_v30 = vmax.f32 %v2469_v47, 0.0 }
 0x295   : > { %v2977_v50 = vpack.c.bf16 %v2551_v15, %v2551_v15  ;;  %v2552_v63 = vmax.f32 %v5074_v44, %v2536_v51  ;;  %v2490_v10 = vmax.f32 %v2472_v14, 0.0 }
 0x296   : > { %v2505_v3 = vmul.f32 %v4879_v45, %v2489_v30 }
 0x297   : > { %2632 = vst.msk [vmem:[%s4811_s26 + $0x30] sm:$0xf] %vm2619_vm0, %v2977_v50  ;;  %v2978_v46 = vpack.c.bf16 %v2552_v63, %v2552_v63  ;;  %v2506_v6 = vmul.f32 %v4879_v45, %v2490_v10  ;;  %v5076_v45 = vld [vmem:[#allocation21_spill] sm:$0xff] }
 0x298   : > { %v2521_v40 = vadd.f32 %v4873_v57, %v2505_v3  ;;  %v5077_v37 = vmax.f32 %v5075_v19, %v5076_v45 }
 0x299   : > { %2633 = vst.msk [vmem:[%s4811_s26 + $0x34] sm:$0xf] %vm2619_vm0, %v2978_v46  ;;  %v2522_v20 = vadd.f32 %v4873_v57, %v2506_v6 }
 0x29a   : > { %v2537_v5 = vmax.f32 %v2022_v12, %v2521_v40 }
 0x29b   : > { %v2538_v39 = vmax.f32 %v2023_v27, %v2522_v20 }
 0x29c   : > { %v2553_v60 = vmax.f32 %v5077_v37, %v2537_v5 }
 0x29d   : > { %v2554_v13 = vmax.f32 %v5080_v28, %v2538_v39 }
 0x29e   : > { %v2979_v23 = vpack.c.bf16 %v2553_v60, %v2553_v60 }
 0x29f   : > { %v2980_v57 = vpack.c.bf16 %v2554_v13, %v2554_v13 }
 0x2a0   : > { %2634 = vst.msk [vmem:[%s4811_s26 + $0x38] sm:$0xf] %vm2619_vm0, %v2979_v23 }
 0x2a1   : > { %2635 = vst.msk [vmem:[%s4811_s26 + $0x3c] sm:$0xf] %vm2619_vm0, %v2980_v57 }
 0x2a2   : > { %3929 = shalt.err (!%p3926_p13)
}
 0x2a3   : > { %s3930_s6 = scalar_lea.hbm %s4968_s27, 1024  ;;  %s3934_s23 = scalar_lea.hbm %s5023_s5, 2048 }
 0x2a4   : > { %p3931_p9 = scmp.ne.s32.totalorder %s4968_s27, %s3930_s6  ;;  %p3935_p6 = scmp.lt.u32.totalorder %s4968_s27, %s5023_s5 }
 0x2a5   : > { %p3936_p4 = scmp.lt.u32.totalorder %s3934_s23, %s3930_s6  ;;  %p3938_p3 = scmp.lt.u32.totalorder %s3930_s6, %s4968_s27 }
 0x2a6   : > { %p3932_p0 = pnand %p3931_p9, %p4194_p10 }
 0x2a7   : > { %p3937_p8 = por %p3936_p4, %p3935_p6 }
 0x2a8   : > { %p3933_p11 = pneg %p3932_p0 }
 0x2a9   : > { %p3939_p5 = por %p3938_p3, %p3937_p8 }
 0x2ab   : > { %p3940_p7 = pnand %p3939_p5, %p3933_p11 }
 0x2ad   : > { %3943 = shalt.err (!%p3940_p7)
}
 0x2ae   : > { %s4002_s10 = smov 64   ;;  %s4003_s8 = smov 4  }
 0x2af   : > { %3512 = dma.vmem_to_hbm [thread:$0]  (%p4194_p10), %s4970_s12, 1024, %s4968_s27, %s2637_s22, %s4002_s10, %s4002_s10, %s4003_s8  }
 0x2b0 PF: > { %s2665_s13 = sand.u32 1, %s3978_s18   ;;  %p5081_p12 = scmp.ne.s32.totalorder %s5036_s25, 0 }
 0x2b1   : > { %p5082_p2 = scmp.ge.s32.totalorder %s3990_s21, 2  ;;  %s2666_s7 = scalar_lea.sflag [#allocation4], %s2665_s13 }
 0x2b3   : > { %p3532_p1 = pnand %p5082_p2, %p5081_p12 }
 0x2b5   : > { %3973 = dma.done.wait (!%p3532_p1), %s2666_s7, 1024  }
 0x2b6   : > { %3975 = vsyncadd (!%p3532_p1), %s2666_s7, 4294966272  ;;  %p20_p13 = scmp.ge.s32.totalorder %s4184_s14, 4   ;;  %s5083_s18 = smov %s3982_s19 }
 0x2b7   : > { %s5084_s19 = smov %s3986_s20  ;;  %s5085_s20 = smov %s4200_s17 }
 0x2b8   : > { %s5086_s21 = smov %s4184_s14  ;;  %22 = sbr.rel (!%p20_p13) target bundleno = 7 (0x7), region = 104 }
 0x2bf   :  { %2671 = vsyncpa [#allocation3], 1 }
 0x2c0   :  { %2673 = vsyncpa [#allocation3 + $0x1], 1 }
 0x2c1   :  { %2674 = vsyncpa [#allocation6], 1 }
 0x2c2   :  { %2675 = vsyncpa [#allocation9], 1 }
 0x2c3   :  { %2676 = vsyncpa [#allocation4], 1 }
 0x2c4   :  { %2678 = vsyncpa [#allocation4 + $0x1], 1 }

// kernel: cnn_lstm_forward.8
= control target key start
LH: loop header
LB: loop body
LE: loop exit
PB: predicated region body
PF: predicated region fallthrough
CT: control target
= control target key end

     0   :  { %10 = vsyncpa [#allocation3], 0  ;;  %s5340_s0 = inlined_call_operand.hbm [shape: bf16[64,1024], index: 0, kind: input, shape index: {}]   ;;  %s5341_s1 = inlined_call_operand.hbm [shape: bf16[4,1024,128], index: 1, kind: input, shape index: {}]   ;;  %s5342_s2 = inlined_call_operand.hbm [shape: f32[1,128], index: 2, kind: input, shape index: {}]   ;;  %s5343_s3 = inlined_call_operand.hbm [shape: f32[1,128], index: 3, kind: input, shape index: {}]   ;;  %s5344_s4 = inlined_call_operand.hbm [shape: f32[1,128], index: 4, kind: input, shape index: {}]   ;;  %s5345_s5 = inlined_call_operand.hbm [shape: bf16[64,128], index: 5, kind: output, shape index: {}]  }
   0x1   :  { %12 = vsyncpa [#allocation3 + $0x1], 0 }
   0x2   :  { %13 = vsyncpa [#allocation6], 0 }
   0x3   :  { %14 = vsyncpa [#allocation9], 0 }
   0x4   :  { %15 = vsyncpa [#allocation4], 0 }
   0x5   :  { %17 = vsyncpa [#allocation4 + $0x1], 0  ;;  %s4833_s18 = smov 0   ;;  %s4835_s19 = smov 0  }
   0x6   :  { %s4837_s20 = smov 0   ;;  %s4839_s21 = smov 0  }
   0x7 LB: > { %s4854_s22 = sadd.s32 4294967295, %s4789_s21   ;;  %s3456_s23 = sadd.s32 4294967294, %s4789_s21   ;;  %s4789_s21 = sphi %s4839_s21, %s5368_s21   ;;  %s4785_s20 = sphi %s4837_s20, %s5367_s20   ;;  %s4781_s19 = sphi %s4835_s19, %s5366_s19   ;;  %s4777_s18 = sphi %s4833_s18, %s5365_s18  }
   0x8   : > { %p43_p0 = scmp.ne.s32.totalorder %s4781_s19, %s4777_s18  ;;  %p5346_p1 = scmp.eq.s32.totalorder %s4854_s22, 0 }
   0x9   : > { %p157_p3 = scmp.eq.s32.totalorder %s3456_s23, 1  ;;  %p3457_p5 = scmp.ge.s32.totalorder %s4789_s21, 1 }
   0xa   : > { %p4863_p4 = por %p5346_p1, %p43_p0  ;;  %p164_p7 = scmp.lt.s32.totalorder %s4789_s21, 3 }
   0xb   : > { %p4868_p6 = por %p157_p3, %p43_p0  ;;  %s4791_s27 = smov [#allocation5]  }
   0xc   : > { %s5349_s24 = scalar_select %p4863_p4, 1, 0 }
   0xd   : > { %s5350_s25 = scalar_select %p4868_p6, 1, 0 }
   0xe   : > { %p4873_p8 = pnand %p3457_p5, %p164_p7  ;;  %s176_s28 = sshll.u32 %s4791_s27, 4  ;;  %s4877_s28 = int_to_ptr.vmem [resolvable:$true] %s176_s28 }
   0xf   : > { %s4792_s30 = smov [#allocation8]   ;;  %s4793_s7 = smov [#allocation7]  }
  0x10   : > { %s5351_s26 = scalar_select %p4873_p8, 1, 0 }
  0x11   : > { %p4244_p9 = pneg %p4873_p8  ;;  %s201_s6 = sshll.u32 %s4792_s30, 4  ;;  %s4888_s6 = int_to_ptr.vmem [resolvable:$true] %s201_s6 }
  0x12   : > { %s4890_s8 = sshll.u32 %s4793_s7, 4  ;;  %s4573_s11 = scalar_lea.hbm %s5341_s1, 32768  ;;  %s191_s8 = int_to_ptr.vmem [resolvable:$true] %s4890_s8 }
  0x13   : > { %p4884_p11 = pnand %p4244_p9, %p5346_p1  ;;  %p4574_p12 = scmp.ne.s32.totalorder %s5341_s1, %s4573_s11 }
  0x14   : > { %p4580_p5 = scmp.lt.u32.totalorder %s4573_s11, %s5341_s1 }
  0x15   : > { %p4900_p13 = pneg %p4884_p11 }
  0x17   : > { %p4576_p0 = pnand %p4900_p13, %p4574_p12 }
  0x19   : > { %p4577_p3 = pneg %p4576_p0 }
  0x1b   : > { %p4582_p7 = pnand %p4580_p5, %p4577_p3 }
  0x1d   : > { %4585 = shalt.err (!%p4582_p7)
}
  0x1e   : > { %s4586_s17 = scalar_lea.vmem %s4877_s28, 32768  ;;  %p4594_p2 = scmp.lt.s32.totalorder %s4877_s28, %s4877_s28 }
  0x1f   : > { %p4587_p9 = scmp.ne.s32.totalorder %s4877_s28, %s4586_s17  ;;  %p4595_p6 = scmp.lt.s32.totalorder %s4586_s17, %s4586_s17 }
  0x21   : > { %p4589_p10 = pnand %p4587_p9, %p4900_p13  ;;  %p4596_p12 = por %p4595_p6, %p4594_p2 }
  0x23   : > { %p4590_p1 = pneg %p4589_p10 }
  0x25   : > { %p4597_p0 = pnand %p4596_p12, %p4590_p1 }
  0x27   : > { %4600 = shalt.err (!%p4597_p0)
}
  0x28   : > { %s4794_s23 = smov 64   ;;  %s4795_s27 = smov 4  }
  0x29   : > { %4247 = dma.hbm_to_vmem [thread:$0]  (!%p4884_p11), %s5341_s1, 32768, %s4877_s28, [#allocation6], %s4794_s23, %s4794_s23, %s4795_s27  }
  0x2a   : > { %s4601_s11 = scalar_lea.hbm %s5343_s3, 16 }
  0x2b   : > { %p4602_p2 = scmp.ne.s32.totalorder %s5343_s3, %s4601_s11  ;;  %p4608_p10 = scmp.lt.u32.totalorder %s4601_s11, %s5343_s3 }
  0x2d   : > { %p4604_p1 = pnand %p4602_p2, %p4900_p13 }
  0x2f   : > { %p4605_p6 = pneg %p4604_p1 }
  0x31   : > { %p4610_p3 = pnand %p4608_p10, %p4605_p6 }
  0x33   : > { %4613 = shalt.err (!%p4610_p3)
}
  0x34   : > { %s4614_s28 = scalar_lea.vmem %s4888_s6, 16  ;;  %s4621_s17 = scalar_lea.vmem %s4888_s6, 32 }
  0x35   : > { %p4615_p5 = scmp.ne.s32.totalorder %s4888_s6, %s4614_s28  ;;  %p4622_p12 = scmp.lt.s32.totalorder %s4888_s6, %s4888_s6 }
  0x36   : > { %p4623_p0 = scmp.lt.s32.totalorder %s4621_s17, %s4614_s28 }
  0x37   : > { %p4617_p7 = pnand %p4615_p5, %p4900_p13 }
  0x38   : > { %p4624_p2 = por %p4623_p0, %p4622_p12 }
  0x39   : > { %p4618_p9 = pneg %p4617_p7 }
  0x3b   : > { %p4625_p1 = pnand %p4624_p2, %p4618_p9 }
  0x3d   : > { %4628 = shalt.err (!%p4625_p1)
}
  0x3e   : > { %4253 = dma.hbm_to_vmem [thread:$0]  (!%p4884_p11), %s5343_s3, 16, %s4888_s6, [#allocation9]  }
  0x3f   : > { %s4629_s9 = scalar_lea.hbm %s5342_s2, 16 }
  0x40   : > { %p4630_p6 = scmp.ne.s32.totalorder %s5342_s2, %s4629_s9  ;;  %p4636_p5 = scmp.lt.u32.totalorder %s4629_s9, %s5342_s2 }
  0x42   : > { %p4632_p10 = pnand %p4630_p6, %p4900_p13 }
  0x44   : > { %p4633_p3 = pneg %p4632_p10 }
  0x46   : > { %p4638_p7 = pnand %p4636_p5, %p4633_p3 }
  0x48   : > { %4641 = shalt.err (!%p4638_p7)
}
  0x49   : > { %s4642_s15 = scalar_lea.vmem %s191_s8, 16  ;;  %s4649_s6 = scalar_lea.vmem %s191_s8, 32 }
  0x4a   : > { %p4643_p9 = scmp.ne.s32.totalorder %s191_s8, %s4642_s15  ;;  %p4650_p2 = scmp.lt.s32.totalorder %s191_s8, %s191_s8 }
  0x4b   : > { %p4651_p1 = scmp.lt.s32.totalorder %s4649_s6, %s4642_s15 }
  0x4c   : > { %p4645_p12 = pnand %p4643_p9, %p4900_p13 }
  0x4d   : > { %p4652_p4 = por %p4651_p1, %p4650_p2 }
  0x4e   : > { %p4646_p0 = pneg %p4645_p12 }
  0x50   : > { %p4653_p8 = pnand %p4652_p4, %p4646_p0 }
  0x52   : > { %4656 = shalt.err (!%p4653_p8)
}
  0x53   : > { %4250 = dma.hbm_to_vmem [thread:$0]  (!%p4884_p11), %s5342_s2, 16, %s191_s8, [#allocation6]  }
  0x54   : > { %s4796_s17 = smov [#allocation10]   ;;  %s4657_s7 = scalar_lea.hbm %s5344_s4, 16 }
  0x55   : > { %s212_s23 = sshll.u32 %s4796_s17, 4  ;;  %p4658_p6 = scmp.ne.s32.totalorder %s5344_s4, %s4657_s7  ;;  %s213_s23 = int_to_ptr.vmem [resolvable:$true] %s212_s23 }
  0x56   : > { %p4664_p10 = scmp.lt.u32.totalorder %s4657_s7, %s5344_s4 }
  0x57   : > { %p4660_p4 = pnand %p4658_p6, %p4900_p13 }
  0x59   : > { %p4661_p8 = pneg %p4660_p4 }
  0x5b   : > { %p4666_p3 = pnand %p4664_p10, %p4661_p8 }
  0x5d   : > { %4669 = shalt.err (!%p4666_p3)
}
  0x5e   : > { %s4670_s8 = scalar_lea.vmem %s213_s23, 16  ;;  %s4677_s13 = scalar_lea.vmem %s213_s23, 32 }
  0x5f   : > { %p4671_p5 = scmp.ne.s32.totalorder %s213_s23, %s4670_s8  ;;  %p4678_p12 = scmp.lt.s32.totalorder %s213_s23, %s213_s23 }
  0x60   : > { %p4679_p0 = scmp.lt.s32.totalorder %s4677_s13, %s4670_s8 }
  0x61   : > { %p4673_p7 = pnand %p4671_p5, %p4900_p13 }
  0x62   : > { %p4680_p2 = por %p4679_p0, %p4678_p12 }
  0x63   : > { %p4674_p9 = pneg %p4673_p7 }
  0x65   : > { %p4681_p1 = pnand %p4680_p2, %p4674_p9 }
  0x67   : > { %4684 = shalt.err (!%p4681_p1)
}
  0x68   : > { %4256 = dma.hbm_to_vmem [thread:$0]  (!%p4884_p11), %s5344_s4, 16, %s213_s23, [#allocation9]  }
  0x69   : > { %s4983_s14 = sadd.s32 1, %s4789_s21   ;;  %s30_s16 = sadd.s32 1, %s4785_s20 }
  0x6a   : > { %s27_s29 = ssub.s32 %s4789_s21, %s4983_s14  ;;  %p37_p13 = scmp.ne.s32.totalorder %s4785_s20, %s4781_s19 }
  0x6b   : > { %p28_p6 = scmp.eq.s32.totalorder %s27_s29, 0  ;;  %p38_p4 = scmp.eq.s32.totalorder %s4789_s21, 0 }
  0x6c   : > { %p5354_p8 = scmp.eq.s32.totalorder %s4854_s22, 1  ;;  %p4269_p3 = scmp.lt.s32.totalorder %s4789_s21, 2 }
  0x6d   : > { %s4999_s17 = scalar_select %p28_p6, %s4785_s20, %s30_s16  }
  0x6e   : > { %p4993_p10 = por %p5354_p8, %p37_p13  ;;  %p39_p5 = por %p38_p4, %p37_p13 }
  0x6f   : > { %s223_s27 = sand.u32 1, %s4785_s20   ;;  %s3759_s23 = sshll.u32 %s4789_s21, 11 }
  0x70   : > { %s3463_s30 = sshll.u32 %s223_s27, 7  ;;  %s5006_s10 = scalar_lea.hbm %s5340_s0, %s3759_s23 }
  0x71   : > { %s227_s11 = scalar_lea.vmem [#allocation2], %s3463_s30  ;;  %p5010_p11 = pnand %p4269_p3, %p39_p5 }
  0x72   : > { %s235_s12 = sshll.u32 %s227_s11, 4  ;;  %s5014_s13 = scalar_lea.sflag [#allocation3], %s223_s27  ;;  %s5008_s12 = int_to_ptr.vmem [resolvable:$true] %s235_s12 }
  0x73   : > { %s4685_s15 = scalar_lea.hbm %s5006_s10, 2048  ;;  %p4687_p9 = pneg %p5010_p11 }
  0x74   : > { %p4686_p7 = scmp.ne.s32.totalorder %s5006_s10, %s4685_s15  ;;  %s4690_s29 = scalar_lea.hbm %s5340_s0, 4096 }
  0x75   : > { %p4691_p2 = scmp.lt.u32.totalorder %s5006_s10, %s5340_s0  ;;  %p4692_p1 = scmp.lt.u32.totalorder %s4690_s29, %s4685_s15 }
  0x76   : > { %p4688_p12 = pnand %p4687_p9, %p4686_p7  ;;  %p4694_p6 = scmp.lt.u32.totalorder %s4685_s15, %s5006_s10 }
  0x77   : > { %p4693_p13 = por %p4692_p1, %p4691_p2 }
  0x78   : > { %p4689_p0 = pneg %p4688_p12 }
  0x79   : > { %p4695_p4 = por %p4694_p6, %p4693_p13 }
  0x7b   : > { %p4696_p8 = pnand %p4695_p4, %p4689_p0 }
  0x7d   : > { %4699 = shalt.err (!%p4696_p8)
}
  0x7e   : > { %s4700_s27 = scalar_lea.vmem %s5008_s12, 2048  ;;  %s4797_s7 = smov [#allocation2]  }
  0x7f   : > { %p4701_p3 = scmp.ne.s32.totalorder %s5008_s12, %s4700_s27  ;;  %s4705_s9 = sshll.u32 %s4797_s7, 4  ;;  %s4706_s9 = int_to_ptr.vmem [resolvable:$false] %s4705_s9 }
  0x80   : > { %s4707_s11 = scalar_lea.vmem %s4706_s9, 4096  ;;  %p4708_p12 = scmp.lt.s32.totalorder %s5008_s12, %s4706_s9 }
  0x81   : > { %p4703_p5 = pnand %p4701_p3, %p4687_p9  ;;  %p4709_p2 = scmp.lt.s32.totalorder %s4707_s11, %s4700_s27 }
  0x83   : > { %p4704_p7 = pneg %p4703_p5  ;;  %p4710_p1 = por %p4709_p2, %p4708_p12 }
  0x85   : > { %p4711_p13 = pnand %p4710_p1, %p4704_p7 }
  0x87   : > { %4714 = shalt.err (!%p4711_p13)
}
  0x88   : > { %s4798_s15 = smov 512   ;;  %s4799_s6 = smov 32  }
  0x89   : > { %4260 = dma.hbm_to_vmem [thread:$0]  (!%p5010_p11), %s5006_s10, 2048, %s5008_s12, %s5014_s13, %s4798_s15, %s4798_s15, %s4799_s6  }
  0x8a   : > { %p5357_p9 = scmp.ne.s32.totalorder %s5351_s26, 0 }
  0x8b   : > { %s5045_s16 = sand.u32 (!%p5357_p9), 1, %s4781_s19   ;;  %p5358_p0 = scmp.ne.s32.totalorder (!%p5357_p9), %s5349_s24, 0 }
  0x8c   : > { %247 = sbr.rel (%p5357_p9) target bundleno = 669 (0x29d), region = 40  ;;  %s3468_s29 = sshll.u32 (!%p5357_p9), %s5045_s16, 7 }
  0x8d   : > { %s250_s30 = scalar_lea.sflag (!%p5357_p9), [#allocation3], %s5045_s16  ;;  %s5049_s23 = scalar_lea.vmem (!%p5357_p9), [#allocation2], %s3468_s29 }
  0x93   : > { %4760 = dma.done.wait (%p5358_p0), %s250_s30, 2048  }
  0x94   : > { %4762 = vsyncadd (%p5358_p0), %s250_s30, 4294965248  ;;  %p5359_p11 = scmp.eq.s32.totalorder %s4854_s22, 0 }
  0x96   : > { %4764 = dma.done.wait (%p5359_p11), [#allocation6], 32784   ;;  %p5360_p6 = pmov %p5359_p11 }
  0x98   : > { %4766 = vsyncadd (%p5360_p6), [#allocation6], 4294934512  ;;  %p5361_p4 = pmov %p5360_p6 }
  0x9a   : > { %4768 = dma.done.wait (%p5361_p4), [#allocation9], 32   ;;  %p5362_p8 = pmov %p5361_p4 }
  0x9b   : > { %v4317_v0 = vld [vmem:[#allocation5 + $0x40] sm:$0xff]   ;;  %v4321_v4 = vld [vmem:[#allocation5 + $0x48] sm:$0xff]   ;;  %v4325_v8 = vld [vmem:[#allocation5 + $0x50] sm:$0xff]   ;;  %s3473_s24 = sshll.u32 %s5045_s16, 4  ;;  %s3764_s10 = sshll.u32 %s4854_s22, 8 }
  0x9c   : > { %4770 = vsyncadd (%p5362_p8), [#allocation9], 4294967264  ;;  %v4318_v1 = vld [vmem:[#allocation5 + $0xc0] sm:$0xff]   ;;  %3776 = vmatprep.subr.bf16.mxu0 %v4317_v0  ;;  %v4322_v5 = vld [vmem:[#allocation5 + $0xc8] sm:$0xff]   ;;  %s295_s26 = scalar_lea.vmem [#allocation11], %s3473_s24  ;;  %s5294_s27 = scalar_lea.hbm %s5345_s5, %s3764_s10 }
  0x9d   : > { %v4319_v2 = vld [vmem:[#allocation5] sm:$0xff]   ;;  %3804 = vmatprep.subr.bf16.mxu1 %v4318_v1  ;;  %v4323_v6 = vld [vmem:[#allocation5 + $0x8] sm:$0xff]   ;;  %v4326_v9 = vld [vmem:[#allocation5 + $0xd0] sm:$0xff]   ;;  %s3345_s12 = sshll.u32 %s295_s26, 4  ;;  %s3332_s7 = scalar_lea.sflag [#allocation4], %s5045_s16  ;;  %s5296_s12 = int_to_ptr.vmem [resolvable:$true] %s3345_s12 }
  0x9e   : > { %v4320_v3 = vld [vmem:[#allocation5 + $0x80] sm:$0xff]   ;;  %3777 = vmatpush3.bf16.msra.mxu0 %v4319_v2  ;;  %v4324_v7 = vld [vmem:[#allocation5 + $0x88] sm:$0xff]   ;;  %v4327_v10 = vld [vmem:[#allocation5 + $0x10] sm:$0xff]   ;;  %s4715_s9 = scalar_lea.vmem %s5296_s12, 256  ;;  %s4800_s22 = smov [#allocation11]  }
  0x9f   : > { %3805 = vmatpush3.bf16.msra.mxu1 %v4320_v3  ;;  %3778 = vmatprep.subr.bf16.mxu0 %v4321_v4  ;;  %v4328_v11 = vld [vmem:[#allocation5 + $0x90] sm:$0xff]   ;;  %v4329_v12 = vld [vmem:[#allocation5 + $0x58] sm:$0xff]   ;;  %v4333_v16 = vld [vmem:[#allocation5 + $0x60] sm:$0xff]   ;;  %p4716_p3 = scmp.ne.s32.totalorder %s5296_s12, %s4715_s9  ;;  %s4719_s11 = sshll.u32 %s4800_s22, 4  ;;  %s4720_s11 = int_to_ptr.vmem [resolvable:$false] %s4719_s11 }
  0xa0   : > { %3806 = vmatprep.subr.bf16.mxu1 %v4322_v5  ;;  %v4330_v13 = vld [vmem:[#allocation5 + $0xd8] sm:$0xff]   ;;  %v4334_v17 = vld [vmem:[#allocation5 + $0xe0] sm:$0xff]   ;;  %v4337_v20 = vld [vmem:[#allocation5 + $0x68] sm:$0xff]   ;;  %s4721_s15 = scalar_lea.vmem %s4720_s11, 512  ;;  %p4722_p12 = scmp.lt.s32.totalorder %s5296_s12, %s4720_s11 }
  0xa1   : > { %v4331_v14 = vld [vmem:[#allocation5 + $0x18] sm:$0xff]   ;;  %v4335_v18 = vld [vmem:[#allocation5 + $0x20] sm:$0xff]   ;;  %v4338_v21 = vld [vmem:[#allocation5 + $0xe8] sm:$0xff]   ;;  %p4717_p5 = pnand %p4716_p3, %p4993_p10  ;;  %p4723_p2 = scmp.lt.s32.totalorder %s4721_s15, %s4715_s9 }
  0xa2   : > { %3779 = vmatpush3.bf16.msra.mxu0 %v4323_v6  ;;  %v4332_v15 = vld [vmem:[#allocation5 + $0x98] sm:$0xff]   ;;  %v4336_v19 = vld [vmem:[#allocation5 + $0xa0] sm:$0xff]   ;;  %v4339_v22 = vld [vmem:[#allocation5 + $0x28] sm:$0xff]  }
  0xa3   : > { %3807 = vmatpush3.bf16.msra.mxu1 %v4324_v7  ;;  %3780 = vmatprep.subr.bf16.mxu0 %v4325_v8  ;;  %v4340_v23 = vld [vmem:[#allocation5 + $0xa8] sm:$0xff]   ;;  %v4341_v24 = vld [vmem:[#allocation5 + $0x70] sm:$0xff]   ;;  %v4345_v28 = vld [vmem:[#allocation5 + $0x78] sm:$0xff]   ;;  %p4718_p7 = pneg %p4717_p5  ;;  %p4724_p1 = por %p4723_p2, %p4722_p12 }
  0xa4   : > { %3808 = vmatprep.subr.bf16.mxu1 %v4326_v9  ;;  %v4342_v25 = vld [vmem:[#allocation5 + $0xf0] sm:$0xff]   ;;  %v4346_v29 = vld [vmem:[#allocation5 + $0xf8] sm:$0xff]   ;;  %v299_v32 = vld [vmem:[%s5049_s23] sm:$0xff] }
  0xa5   : > { %v4343_v26 = vld [vmem:[#allocation5 + $0x30] sm:$0xff]   ;;  %v4347_v30 = vld [vmem:[#allocation5 + $0x38] sm:$0xff]   ;;  %v303_v33 = vld [vmem:[%s5049_s23 + $0x20] sm:$0xff]  ;;  %p4725_p13 = pnand %p4724_p1, %p4718_p7 }
  0xa6   : > { %3781 = vmatpush3.bf16.msra.mxu0 %v4327_v10  ;;  %v4344_v27 = vld [vmem:[#allocation5 + $0xb0] sm:$0xff]   ;;  %v4348_v31 = vld [vmem:[#allocation5 + $0xb8] sm:$0xff]   ;;  %v300_v34 = vld [vmem:[%s5049_s23 + $0x8] sm:$0xff]  ;;  %v5066_v35 = vcombine.high %v299_v32, %v303_v33  ;;  %v5069_v37 = vcombine.low %v299_v32, %v303_v33 }
  0xa7   : > { %3809 = vmatpush3.bf16.msra.mxu1 %v4328_v11  ;;  %3782 = vmatprep.subr.bf16.mxu0 %v4329_v12  ;;  %v304_v36 = vld [vmem:[%s5049_s23 + $0x28] sm:$0xff]  ;;  %v4349_v40 = vld [vmem:[#allocation5 + $0x140] sm:$0xff]   ;;  %v4357_v48 = vld [vmem:[#allocation5 + $0x150] sm:$0xff]  }
  0xa8   : > { %3810 = vmatprep.subr.bf16.mxu1 %v4330_v13  ;;  %v5071_v38 = vcombine.high %v300_v34, %v304_v36  ;;  %v5073_v39 = vcombine.low %v300_v34, %v304_v36  ;;  %948 = vmatprep.mubr.bf16.mxu0 %v5066_v35  ;;  %v4350_v41 = vld [vmem:[#allocation5 + $0x1c0] sm:$0xff]   ;;  %v4353_v44 = vld [vmem:[#allocation5 + $0x148] sm:$0xff]   ;;  %v4358_v49 = vld [vmem:[#allocation5 + $0x1d0] sm:$0xff]  }
  0xa9   : > { %v4351_v42 = vld [vmem:[#allocation5 + $0x100] sm:$0xff]   ;;  %v4354_v45 = vld [vmem:[#allocation5 + $0x1c8] sm:$0xff]   ;;  %v4359_v50 = vld [vmem:[#allocation5 + $0x110] sm:$0xff]  }
  0xaa   : > { %3783 = vmatpush3.bf16.msra.mxu0 %v4331_v14  ;;  %997 = vmatprep.mubr.bf16.mxu1 %v5071_v38  ;;  %v4352_v43 = vld [vmem:[#allocation5 + $0x180] sm:$0xff]   ;;  %v4355_v46 = vld [vmem:[#allocation5 + $0x108] sm:$0xff]   ;;  %v4360_v51 = vld [vmem:[#allocation5 + $0x190] sm:$0xff]  }
  0xab   : > { %3811 = vmatpush3.bf16.msra.mxu1 %v4332_v15  ;;  %3784 = vmatprep.subr.bf16.mxu0 %v4333_v16  ;;  %v4356_v47 = vld [vmem:[#allocation5 + $0x188] sm:$0xff]   ;;  %v4361_v52 = vld [vmem:[#allocation5 + $0x158] sm:$0xff]   ;;  %v4365_v56 = vld [vmem:[#allocation5 + $0x160] sm:$0xff]  }
  0xac   : > { %3812 = vmatprep.subr.bf16.mxu1 %v4334_v17  ;;  %v4362_v53 = vld [vmem:[#allocation5 + $0x1d8] sm:$0xff]   ;;  %v4366_v57 = vld [vmem:[#allocation5 + $0x1e0] sm:$0xff]   ;;  %v4369_v60 = vld [vmem:[#allocation5 + $0x168] sm:$0xff]  }
  0xad   : > { %v4363_v54 = vld [vmem:[#allocation5 + $0x118] sm:$0xff]   ;;  %v4367_v58 = vld [vmem:[#allocation5 + $0x120] sm:$0xff]   ;;  %v4370_v61 = vld [vmem:[#allocation5 + $0x1e8] sm:$0xff]  }
  0xae   : > { %3785 = vmatpush3.bf16.msra.mxu0 %v4335_v18  ;;  %v4364_v55 = vld [vmem:[#allocation5 + $0x198] sm:$0xff]   ;;  %v4368_v59 = vld [vmem:[#allocation5 + $0x1a0] sm:$0xff]   ;;  %v4371_v1 = vld [vmem:[#allocation5 + $0x128] sm:$0xff]  }
  0xaf   : > { %3813 = vmatpush3.bf16.msra.mxu1 %v4336_v19  ;;  %3786 = vmatprep.subr.bf16.mxu0 %v4337_v20  ;;  %v307_v62 = vld [vmem:[%s5049_s23 + $0x40] sm:$0xff]  ;;  %v4372_v3 = vld [vmem:[#allocation5 + $0x1a8] sm:$0xff]   ;;  %v4373_v8 = vld [vmem:[#allocation5 + $0x170] sm:$0xff]  }
  0xb0   : > { %3814 = vmatprep.subr.bf16.mxu1 %v4338_v21  ;;  %v311_v63 = vld [vmem:[%s5049_s23 + $0x60] sm:$0xff]  ;;  %v308_v4 = vld [vmem:[%s5049_s23 + $0x48] sm:$0xff]  ;;  %v4374_v9 = vld [vmem:[#allocation5 + $0x1f0] sm:$0xff]  }
  0xb1   : > { %v5081_v0 = vcombine.high %v307_v62, %v311_v63  ;;  %v5083_v2 = vcombine.low %v307_v62, %v311_v63  ;;  %v312_v5 = vld [vmem:[%s5049_s23 + $0x68] sm:$0xff]  ;;  %v4375_v10 = vld [vmem:[#allocation5 + $0x130] sm:$0xff]   ;;  %v4377_v12 = vld [vmem:[#allocation5 + $0x178] sm:$0xff]  }
  0xb2   : > { %3787 = vmatpush3.bf16.msra.mxu0 %v4339_v22  ;;  %v5089_v6 = vcombine.high %v308_v4, %v312_v5  ;;  %v5091_v7 = vcombine.low %v308_v4, %v312_v5  ;;  %v4376_v11 = vld [vmem:[#allocation5 + $0x1b0] sm:$0xff]   ;;  %v4378_v13 = vld [vmem:[#allocation5 + $0x1f8] sm:$0xff]  }
  0xb3   : > { %3815 = vmatpush3.bf16.msra.mxu1 %v4340_v23  ;;  %3788 = vmatprep.subr.bf16.mxu0 %v4341_v24  ;;  %v4379_v14 = vld [vmem:[#allocation5 + $0x138] sm:$0xff]   ;;  %v301_v16 = vld [vmem:[%s5049_s23 + $0x10] sm:$0xff]  ;;  %v4381_v24 = vld [vmem:[#allocation5 + $0x240] sm:$0xff]  }
  0xb4   : > { %3816 = vmatprep.subr.bf16.mxu1 %v4342_v25  ;;  %v4380_v15 = vld [vmem:[#allocation5 + $0x1b8] sm:$0xff]   ;;  %v305_v17 = vld [vmem:[%s5049_s23 + $0x30] sm:$0xff]  ;;  %v4382_v25 = vld [vmem:[#allocation5 + $0x2c0] sm:$0xff]  }
  0xb5   : > { %v302_v18 = vld [vmem:[%s5049_s23 + $0x18] sm:$0xff]  ;;  %v5099_v20 = vcombine.low %v301_v16, %v305_v17  ;;  %v5101_v21 = vcombine.high %v301_v16, %v305_v17  ;;  %v309_v32 = vld [vmem:[%s5049_s23 + $0x50] sm:$0xff] }
  0xb6   : > { %3789 = vmatpush3.bf16.msra.mxu0 %v4343_v26  ;;  %v306_v19 = vld [vmem:[%s5049_s23 + $0x38] sm:$0xff]  ;;  %v4383_v26 = vld [vmem:[#allocation5 + $0x200] sm:$0xff]   ;;  %v313_v33 = vld [vmem:[%s5049_s23 + $0x70] sm:$0xff] }
  0xb7   : > { %3817 = vmatpush3.bf16.msra.mxu1 %v4344_v27  ;;  %3790 = vmatprep.subr.bf16.mxu0 %v4345_v28  ;;  %v5103_v22 = vcombine.low %v302_v18, %v306_v19  ;;  %v5105_v23 = vcombine.high %v302_v18, %v306_v19  ;;  %v4384_v27 = vld [vmem:[#allocation5 + $0x280] sm:$0xff]   ;;  %v4385_v28 = vld [vmem:[#allocation5 + $0x248] sm:$0xff]   ;;  %v5113_v34 = vcombine.high %v309_v32, %v313_v33  ;;  %v4407_v62 = vld [vmem:[#allocation5 + $0x230] sm:$0xff]  }
  0xb8   : > { %3818 = vmatprep.subr.bf16.mxu1 %v4346_v29  ;;  %v4386_v29 = vld [vmem:[#allocation5 + $0x2c8] sm:$0xff]   ;;  %v5115_v36 = vcombine.low %v309_v32, %v313_v33  ;;  %v4408_v63 = vld [vmem:[#allocation5 + $0x2b0] sm:$0xff]   ;;  %v4411_v4 = vld [vmem:[#allocation5 + $0x238] sm:$0xff]  }
  0xb9   : > { %v4412_v5 = vld [vmem:[#allocation5 + $0x2b8] sm:$0xff]   ;;  %v4421_v16 = vld [vmem:[#allocation5 + $0x350] sm:$0xff]   ;;  %v4433_v32 = vld [vmem:[#allocation5 + $0x368] sm:$0xff]  }
  0xba   : > { %3791 = vmatpush3.bf16.msra.mxu0 %v4347_v30  ;;  %v4387_v30 = vld [vmem:[#allocation5 + $0x208] sm:$0xff]   ;;  %v4422_v17 = vld [vmem:[#allocation5 + $0x3d0] sm:$0xff]  }
  0xbb   : > { %3819 = vmatpush3.bf16.msra.mxu1 %v4348_v31  ;;  %3832 = vmatprep.subr.bf16.mxu0 %v4349_v40  ;;  %v4388_v31 = vld [vmem:[#allocation5 + $0x288] sm:$0xff]   ;;  %v4389_v40 = vld [vmem:[#allocation5 + $0x250] sm:$0xff]  }
  0xbc   : > { %3860 = vmatprep.subr.bf16.mxu1 %v4350_v41  ;;  %v4390_v41 = vld [vmem:[#allocation5 + $0x2d0] sm:$0xff]   ;;  %v4434_v33 = vld [vmem:[#allocation5 + $0x3e8] sm:$0xff]  }
  0xbd   : > { %949 = vmatmul.mubr.bf16.vlgmr.msra.gmra.mrb[0].mxu0 %v5069_v37  ;;  %v4423_v18 = vld [vmem:[#allocation5 + $0x310] sm:$0xff]  }
  0xbe   : > { %998 = vmatmul.mubr.bf16.vlgmr.msra.gmra.mrb[0].mxu1 %v5073_v39  ;;  %3833 = vmatpush3.bf16.msra.mxu0 %v4351_v42  ;;  %v310_v42 = vld [vmem:[%s5049_s23 + $0x58] sm:$0xff]  ;;  %v4424_v19 = vld [vmem:[#allocation5 + $0x390] sm:$0xff]  }
  0xbf   : > { %3861 = vmatpush3.bf16.msra.mxu1 %v4352_v43  ;;  %3834 = vmatprep.subr.bf16.mxu0 %v4353_v44  ;;  %v314_v43 = vld [vmem:[%s5049_s23 + $0x78] sm:$0xff] }
  0xc0   : > { %3862 = vmatprep.subr.bf16.mxu1 %v4354_v45  ;;  %956 = vmatprep.mubr.bf16.mxu0 %v5081_v0  ;;  %v5121_v44 = vcombine.high %v310_v42, %v314_v43  ;;  %v4391_v45 = vld [vmem:[#allocation5 + $0x210] sm:$0xff]  }
  0xc1   : > { %1005 = vmatprep.mubr.bf16.mxu1 %v5089_v6 }
  0xc2   : > { %3835 = vmatpush3.bf16.msra.mxu0 %v4355_v46  ;;  %v5123_v46 = vcombine.low %v310_v42, %v314_v43  ;;  %v4437_v42 = vld [vmem:[#allocation5 + $0x370] sm:$0xff]  }
  0xc3   : > { %3863 = vmatpush3.bf16.msra.mxu1 %v4356_v47  ;;  %3836 = vmatprep.subr.bf16.mxu0 %v4357_v48  ;;  %v4392_v47 = vld [vmem:[#allocation5 + $0x290] sm:$0xff]   ;;  %v4393_v48 = vld [vmem:[#allocation5 + $0x258] sm:$0xff]  }
  0xc4   : > { %3864 = vmatprep.subr.bf16.mxu1 %v4358_v49  ;;  %v4394_v49 = vld [vmem:[#allocation5 + $0x2d8] sm:$0xff]   ;;  %v4438_v43 = vld [vmem:[#allocation5 + $0x3f0] sm:$0xff]  }
  0xc5   : > { %957 = vmatmul.mubr.bf16.gmra.mrb[4].mxu0 %v5083_v2 }
  0xc6   : > { %3837 = vmatpush3.bf16.msra.mxu0 %v4359_v50  ;;  %1006 = vmatmul.mubr.bf16.gmra.mrb[4].mxu1 %v5091_v7  ;;  %v4395_v50 = vld [vmem:[#allocation5 + $0x218] sm:$0xff]  }
  0xc7   : > { %3865 = vmatpush3.bf16.msra.mxu1 %v4360_v51  ;;  %3838 = vmatprep.subr.bf16.mxu0 %v4361_v52  ;;  %v4396_v51 = vld [vmem:[#allocation5 + $0x298] sm:$0xff]   ;;  %v4397_v52 = vld [vmem:[#allocation5 + $0x260] sm:$0xff]  }
  0xc8   : > { %3866 = vmatprep.subr.bf16.mxu1 %v4362_v53  ;;  %1046 = vmatprep.mubr.bf16.mxu0 %v5101_v21  ;;  %v4398_v53 = vld [vmem:[#allocation5 + $0x2e0] sm:$0xff]  }
  0xc9   : > { %1095 = vmatprep.mubr.bf16.mxu1 %v5105_v23 }
  0xca   : > { %3839 = vmatpush3.bf16.msra.mxu0 %v4363_v54  ;;  %v4399_v54 = vld [vmem:[#allocation5 + $0x220] sm:$0xff]  }
  0xcb   : > { %3867 = vmatpush3.bf16.msra.mxu1 %v4364_v55  ;;  %3840 = vmatprep.subr.bf16.mxu0 %v4365_v56  ;;  %v4400_v55 = vld [vmem:[#allocation5 + $0x2a0] sm:$0xff]   ;;  %v4401_v56 = vld [vmem:[#allocation5 + $0x268] sm:$0xff]  }
  0xcc   : > { %3868 = vmatprep.subr.bf16.mxu1 %v4366_v57  ;;  %v4402_v57 = vld [vmem:[#allocation5 + $0x2e8] sm:$0xff]  }
  0xce   : > { %3841 = vmatpush3.bf16.msra.mxu0 %v4367_v58  ;;  %v4403_v58 = vld [vmem:[#allocation5 + $0x228] sm:$0xff]  }
  0xcf   : > { %3869 = vmatpush3.bf16.msra.mxu1 %v4368_v59  ;;  %3842 = vmatprep.subr.bf16.mxu0 %v4369_v60  ;;  %v4404_v59 = vld [vmem:[#allocation5 + $0x2a8] sm:$0xff]   ;;  %v4405_v60 = vld [vmem:[#allocation5 + $0x270] sm:$0xff]  }
  0xd0   : > { %3870 = vmatprep.subr.bf16.mxu1 %v4370_v61  ;;  %v4406_v61 = vld [vmem:[#allocation5 + $0x2f0] sm:$0xff]  }
  0xd2   : > { %3843 = vmatpush3.bf16.msra.mxu0 %v4371_v1  ;;  %v4409_v1 = vld [vmem:[#allocation5 + $0x278] sm:$0xff]  }
  0xd3   : > { %3871 = vmatpush3.bf16.msra.mxu1 %v4372_v3  ;;  %3844 = vmatprep.subr.bf16.mxu0 %v4373_v8  ;;  %v4410_v3 = vld [vmem:[#allocation5 + $0x2f8] sm:$0xff]   ;;  %v4413_v8 = vld [vmem:[#allocation5 + $0x340] sm:$0xff]  }
  0xd4   : > { %3872 = vmatprep.subr.bf16.mxu1 %v4374_v9  ;;  %v4414_v9 = vld [vmem:[#allocation5 + $0x3c0] sm:$0xff]  }
  0xd6   : > { %3845 = vmatpush3.bf16.msra.mxu0 %v4375_v10  ;;  %v4415_v10 = vld [vmem:[#allocation5 + $0x300] sm:$0xff]  }
  0xd7   : > { %3873 = vmatpush3.bf16.msra.mxu1 %v4376_v11  ;;  %3846 = vmatprep.subr.bf16.mxu0 %v4377_v12  ;;  %v4416_v11 = vld [vmem:[#allocation5 + $0x380] sm:$0xff]   ;;  %v4417_v12 = vld [vmem:[#allocation5 + $0x348] sm:$0xff]  }
  0xd8   : > { %3874 = vmatprep.subr.bf16.mxu1 %v4378_v13  ;;  %v4418_v13 = vld [vmem:[#allocation5 + $0x3c8] sm:$0xff]  }
  0xda   : > { %3847 = vmatpush3.bf16.msra.mxu0 %v4379_v14  ;;  %v4419_v14 = vld [vmem:[#allocation5 + $0x308] sm:$0xff]  }
  0xdb   : > { %3875 = vmatpush3.bf16.msra.mxu1 %v4380_v15  ;;  %3888 = vmatprep.subr.bf16.mxu0 %v4381_v24  ;;  %v4420_v15 = vld [vmem:[#allocation5 + $0x388] sm:$0xff]   ;;  %v4425_v24 = vld [vmem:[#allocation5 + $0x358] sm:$0xff]  }
  0xdc   : > { %3916 = vmatprep.subr.bf16.mxu1 %v4382_v25  ;;  %v4426_v25 = vld [vmem:[#allocation5 + $0x3d8] sm:$0xff]  }
  0xdd   : > { %1047 = vmatmul.mubr.bf16.vlgmr.msra.gmra.mrb[8].mxu0 %v5099_v20 }
  0xde   : > { %1096 = vmatmul.mubr.bf16.vlgmr.msra.gmra.mrb[8].mxu1 %v5103_v22  ;;  %3889 = vmatpush3.bf16.msra.mxu0 %v4383_v26  ;;  %v4427_v26 = vld [vmem:[#allocation5 + $0x318] sm:$0xff]  }
  0xdf   : > { %3917 = vmatpush3.bf16.msra.mxu1 %v4384_v27  ;;  %3890 = vmatprep.subr.bf16.mxu0 %v4385_v28  ;;  %v4428_v27 = vld [vmem:[#allocation5 + $0x398] sm:$0xff]   ;;  %v4429_v28 = vld [vmem:[#allocation5 + $0x360] sm:$0xff]  }
  0xe0   : > { %3918 = vmatprep.subr.bf16.mxu1 %v4386_v29  ;;  %1054 = vmatprep.mubr.bf16.mxu0 %v5113_v34  ;;  %v4430_v29 = vld [vmem:[#allocation5 + $0x3e0] sm:$0xff]  }
  0xe1   : > { %1103 = vmatprep.mubr.bf16.mxu1 %v5121_v44 }
  0xe2   : > { %3891 = vmatpush3.bf16.msra.mxu0 %v4387_v30  ;;  %v4431_v30 = vld [vmem:[#allocation5 + $0x320] sm:$0xff]  }
  0xe3   : > { %3919 = vmatpush3.bf16.msra.mxu1 %v4388_v31  ;;  %3892 = vmatprep.subr.bf16.mxu0 %v4389_v40  ;;  %v4432_v31 = vld [vmem:[#allocation5 + $0x3a0] sm:$0xff]   ;;  %v4435_v40 = vld [vmem:[#allocation5 + $0x328] sm:$0xff]  }
  0xe4   : > { %3920 = vmatprep.subr.bf16.mxu1 %v4390_v41  ;;  %v4436_v41 = vld [vmem:[#allocation5 + $0x3a8] sm:$0xff]  }
  0xe5   : > { %1055 = vmatmul.mubr.bf16.gmra.mrb[12].mxu0 %v5115_v36 }
  0xe6   : > { %1681 = vmatprep.mubr.bf16.mxu0 %v5066_v35  ;;  %3893 = vmatpush3.bf16.msra.mxu0 %v4391_v45  ;;  %v4439_v45 = vld [vmem:[#allocation5 + $0x330] sm:$0xff]  }
  0xe7   : > { %3921 = vmatpush3.bf16.msra.mxu1 %v4392_v47  ;;  %3894 = vmatprep.subr.bf16.mxu0 %v4393_v48  ;;  %v4440_v47 = vld [vmem:[#allocation5 + $0x3b0] sm:$0xff]   ;;  %v4441_v48 = vld [vmem:[#allocation5 + $0x378] sm:$0xff]  }
  0xe8   : > { %1104 = vmatmul.mubr.bf16.gmra.mrb[12].mxu1 %v5123_v46  ;;  %3922 = vmatprep.subr.bf16.mxu1 %v4394_v49  ;;  %v4442_v49 = vld [vmem:[#allocation5 + $0x3f8] sm:$0xff]  }
  0xe9   : > { %1730 = vmatprep.mubr.bf16.mxu1 %v5071_v38 }
  0xea   : > { %3895 = vmatpush3.bf16.msra.mxu0 %v4395_v50  ;;  %v4443_v50 = vld [vmem:[#allocation5 + $0x338] sm:$0xff]  }
  0xeb   : > { %3923 = vmatpush3.bf16.msra.mxu1 %v4396_v51  ;;  %3896 = vmatprep.subr.bf16.mxu0 %v4397_v52  ;;  %v4444_v51 = vld [vmem:[#allocation5 + $0x3b8] sm:$0xff]   ;;  %v4445_v52 = vld [vmem:[#allocation5 + $0x440] sm:$0xff]  }
  0xec   : > { %3924 = vmatprep.subr.bf16.mxu1 %v4398_v53  ;;  %v4446_v53 = vld [vmem:[#allocation5 + $0x4c0] sm:$0xff]  }
  0xee   : > { %3897 = vmatpush3.bf16.msra.mxu0 %v4399_v54  ;;  %v4447_v54 = vld [vmem:[#allocation5 + $0x400] sm:$0xff]  }
  0xef   : > { %3925 = vmatpush3.bf16.msra.mxu1 %v4400_v55  ;;  %3898 = vmatprep.subr.bf16.mxu0 %v4401_v56  ;;  %v4448_v55 = vld [vmem:[#allocation5 + $0x480] sm:$0xff]   ;;  %v4449_v56 = vld [vmem:[#allocation5 + $0x448] sm:$0xff]  }
  0xf0   : > { %3926 = vmatprep.subr.bf16.mxu1 %v4402_v57  ;;  %v4450_v57 = vld [vmem:[#allocation5 + $0x4c8] sm:$0xff]  }
  0xf2   : > { %3899 = vmatpush3.bf16.msra.mxu0 %v4403_v58  ;;  %v4451_v58 = vld [vmem:[#allocation5 + $0x408] sm:$0xff]  }
  0xf3   : > { %3927 = vmatpush3.bf16.msra.mxu1 %v4404_v59  ;;  %3900 = vmatprep.subr.bf16.mxu0 %v4405_v60  ;;  %v4452_v59 = vld [vmem:[#allocation5 + $0x488] sm:$0xff]   ;;  %v4453_v60 = vld [vmem:[#allocation5 + $0x450] sm:$0xff]  }
  0xf4   : > { %3928 = vmatprep.subr.bf16.mxu1 %v4406_v61  ;;  %v4454_v61 = vld [vmem:[#allocation5 + $0x4d0] sm:$0xff]  }
  0xf6   : > { %3901 = vmatpush3.bf16.msra.mxu0 %v4407_v62  ;;  %v4455_v62 = vld [vmem:[#allocation5 + $0x410] sm:$0xff]  }
  0xf7   : > { %3929 = vmatpush3.bf16.msra.mxu1 %v4408_v63  ;;  %3902 = vmatprep.subr.bf16.mxu0 %v4409_v1  ;;  %v4456_v63 = vld [vmem:[#allocation5 + $0x490] sm:$0xff]   ;;  %v4457_v1 = vld [vmem:[#allocation5 + $0x458] sm:$0xff]  }
  0xf8   : > { %3930 = vmatprep.subr.bf16.mxu1 %v4410_v3  ;;  %v4458_v3 = vld [vmem:[#allocation5 + $0x4d8] sm:$0xff]  }
  0xfa   : > { %3903 = vmatpush3.bf16.msra.mxu0 %v4411_v4  ;;  %v4459_v4 = vld [vmem:[#allocation5 + $0x418] sm:$0xff]  }
  0xfb   : > { %3931 = vmatpush3.bf16.msra.mxu1 %v4412_v5  ;;  %3944 = vmatprep.subr.bf16.mxu0 %v4413_v8  ;;  %v4460_v5 = vld [vmem:[#allocation5 + $0x498] sm:$0xff]   ;;  %v4461_v8 = vld [vmem:[#allocation5 + $0x460] sm:$0xff]  }
  0xfc   : > { %3972 = vmatprep.subr.bf16.mxu1 %v4414_v9  ;;  %v4462_v9 = vld [vmem:[#allocation5 + $0x4e0] sm:$0xff]  }
  0xfd   : > { %1682 = vmatmul.mubr.bf16.vlgmr.msra.gmra.mrb[16].mxu0 %v5069_v37 }
  0xfe   : > { %1731 = vmatmul.mubr.bf16.vlgmr.msra.gmra.mrb[16].mxu1 %v5073_v39  ;;  %3945 = vmatpush3.bf16.msra.mxu0 %v4415_v10  ;;  %v4463_v10 = vld [vmem:[#allocation5 + $0x420] sm:$0xff]  }
  0xff   : > { %3973 = vmatpush3.bf16.msra.mxu1 %v4416_v11  ;;  %1689 = vmatprep.mubr.bf16.mxu0 %v5081_v0  ;;  %v4464_v11 = vld [vmem:[#allocation5 + $0x4a0] sm:$0xff]  }
 0x100   : > { %3946 = vmatprep.subr.bf16.mxu0 %v4417_v12  ;;  %1738 = vmatprep.mubr.bf16.mxu1 %v5089_v6  ;;  %v4465_v12 = vld [vmem:[#allocation5 + $0x468] sm:$0xff]  }
 0x101   : > { %3974 = vmatprep.subr.bf16.mxu1 %v4418_v13  ;;  %v4466_v13 = vld [vmem:[#allocation5 + $0x4e8] sm:$0xff]  }
 0x102   : > { %3947 = vmatpush3.bf16.msra.mxu0 %v4419_v14  ;;  %v4467_v14 = vld [vmem:[#allocation5 + $0x428] sm:$0xff]  }
 0x103   : > { %3975 = vmatpush3.bf16.msra.mxu1 %v4420_v15  ;;  %3948 = vmatprep.subr.bf16.mxu0 %v4421_v16  ;;  %v4468_v15 = vld [vmem:[#allocation5 + $0x4a8] sm:$0xff]   ;;  %v4469_v16 = vld [vmem:[#allocation5 + $0x470] sm:$0xff]  }
 0x104   : > { %3976 = vmatprep.subr.bf16.mxu1 %v4422_v17  ;;  %v4470_v17 = vld [vmem:[#allocation5 + $0x4f0] sm:$0xff]  }
 0x105   : > { %1690 = vmatmul.mubr.bf16.gmra.mrb[20].mxu0 %v5083_v2 }
 0x106   : > { %3949 = vmatpush3.bf16.msra.mxu0 %v4423_v18  ;;  %1739 = vmatmul.mubr.bf16.gmra.mrb[20].mxu1 %v5091_v7  ;;  %v4471_v18 = vld [vmem:[#allocation5 + $0x430] sm:$0xff]  }
 0x107   : > { %3977 = vmatpush3.bf16.msra.mxu1 %v4424_v19  ;;  %1779 = vmatprep.mubr.bf16.mxu0 %v5101_v21  ;;  %v4472_v19 = vld [vmem:[#allocation5 + $0x4b0] sm:$0xff]  }
 0x108   : > { %3950 = vmatprep.subr.bf16.mxu0 %v4425_v24  ;;  %1828 = vmatprep.mubr.bf16.mxu1 %v5105_v23  ;;  %v4473_v24 = vld [vmem:[#allocation5 + $0x478] sm:$0xff]  }
 0x109   : > { %3978 = vmatprep.subr.bf16.mxu1 %v4426_v25  ;;  %v4474_v25 = vld [vmem:[#allocation5 + $0x4f8] sm:$0xff]  }
 0x10a   : > { %3951 = vmatpush3.bf16.msra.mxu0 %v4427_v26  ;;  %v4475_v26 = vld [vmem:[#allocation5 + $0x438] sm:$0xff]  }
 0x10b   : > { %3979 = vmatpush3.bf16.msra.mxu1 %v4428_v27  ;;  %3952 = vmatprep.subr.bf16.mxu0 %v4429_v28  ;;  %v4476_v27 = vld [vmem:[#allocation5 + $0x4b8] sm:$0xff]   ;;  %v4477_v28 = vld [vmem:[#allocation5 + $0x540] sm:$0xff]  }
 0x10c   : > { %3980 = vmatprep.subr.bf16.mxu1 %v4430_v29  ;;  %v4478_v29 = vld [vmem:[#allocation5 + $0x5c0] sm:$0xff]  }
 0x10e   : > { %3953 = vmatpush3.bf16.msra.mxu0 %v4431_v30  ;;  %v4479_v30 = vld [vmem:[#allocation5 + $0x500] sm:$0xff]  }
 0x10f   : > { %3981 = vmatpush3.bf16.msra.mxu1 %v4432_v31  ;;  %3954 = vmatprep.subr.bf16.mxu0 %v4433_v32  ;;  %v4480_v31 = vld [vmem:[#allocation5 + $0x580] sm:$0xff]   ;;  %v4481_v32 = vld [vmem:[#allocation5 + $0x548] sm:$0xff]  }
 0x110   : > { %3982 = vmatprep.subr.bf16.mxu1 %v4434_v33  ;;  %v4482_v33 = vld [vmem:[#allocation5 + $0x5c8] sm:$0xff]  }
 0x112   : > { %3955 = vmatpush3.bf16.msra.mxu0 %v4435_v40  ;;  %v4483_v40 = vld [vmem:[#allocation5 + $0x508] sm:$0xff]  }
 0x113   : > { %3983 = vmatpush3.bf16.msra.mxu1 %v4436_v41  ;;  %3956 = vmatprep.subr.bf16.mxu0 %v4437_v42  ;;  %v4484_v41 = vld [vmem:[#allocation5 + $0x588] sm:$0xff]   ;;  %v4485_v42 = vld [vmem:[#allocation5 + $0x550] sm:$0xff]  }
 0x114   : > { %3984 = vmatprep.subr.bf16.mxu1 %v4438_v43  ;;  %v4486_v43 = vld [vmem:[#allocation5 + $0x5d0] sm:$0xff]  }
 0x116   : > { %3957 = vmatpush3.bf16.msra.mxu0 %v4439_v45  ;;  %v4487_v45 = vld [vmem:[#allocation5 + $0x510] sm:$0xff]  }
 0x117   : > { %3985 = vmatpush3.bf16.msra.mxu1 %v4440_v47  ;;  %3958 = vmatprep.subr.bf16.mxu0 %v4441_v48  ;;  %v4488_v47 = vld [vmem:[#allocation5 + $0x590] sm:$0xff]   ;;  %v4489_v48 = vld [vmem:[#allocation5 + $0x558] sm:$0xff]  }
 0x118   : > { %3986 = vmatprep.subr.bf16.mxu1 %v4442_v49  ;;  %v4490_v49 = vld [vmem:[#allocation5 + $0x5d8] sm:$0xff]  }
 0x11a   : > { %3959 = vmatpush3.bf16.msra.mxu0 %v4443_v50  ;;  %v4491_v50 = vld [vmem:[#allocation5 + $0x518] sm:$0xff]  }
 0x11b   : > { %3987 = vmatpush3.bf16.msra.mxu1 %v4444_v51  ;;  %4000 = vmatprep.subr.bf16.mxu0 %v4445_v52  ;;  %v4492_v51 = vld [vmem:[#allocation5 + $0x598] sm:$0xff]   ;;  %v4493_v52 = vld [vmem:[#allocation5 + $0x560] sm:$0xff]  }
 0x11c   : > { %4028 = vmatprep.subr.bf16.mxu1 %v4446_v53  ;;  %v4494_v53 = vld [vmem:[#allocation5 + $0x5e0] sm:$0xff]  }
 0x11d   : > { %1780 = vmatmul.mubr.bf16.vlgmr.msra.gmra.mrb[24].mxu0 %v5099_v20 }
 0x11e   : > { %1829 = vmatmul.mubr.bf16.vlgmr.msra.gmra.mrb[24].mxu1 %v5103_v22  ;;  %4001 = vmatpush3.bf16.msra.mxu0 %v4447_v54  ;;  %v4495_v54 = vld [vmem:[#allocation5 + $0x520] sm:$0xff]  }
 0x11f   : > { %4029 = vmatpush3.bf16.msra.mxu1 %v4448_v55  ;;  %1787 = vmatprep.mubr.bf16.mxu0 %v5113_v34  ;;  %v4496_v55 = vld [vmem:[#allocation5 + $0x5a0] sm:$0xff]  }
 0x120   : > { %4002 = vmatprep.subr.bf16.mxu0 %v4449_v56  ;;  %1836 = vmatprep.mubr.bf16.mxu1 %v5121_v44  ;;  %v4497_v56 = vld [vmem:[#allocation5 + $0x568] sm:$0xff]  }
 0x121   : > { %4030 = vmatprep.subr.bf16.mxu1 %v4450_v57  ;;  %v4498_v57 = vld [vmem:[#allocation5 + $0x5e8] sm:$0xff]  }
 0x122   : > { %4003 = vmatpush3.bf16.msra.mxu0 %v4451_v58  ;;  %v4499_v58 = vld [vmem:[#allocation5 + $0x528] sm:$0xff]  }
 0x123   : > { %4031 = vmatpush3.bf16.msra.mxu1 %v4452_v59  ;;  %4004 = vmatprep.subr.bf16.mxu0 %v4453_v60  ;;  %v4500_v59 = vld [vmem:[#allocation5 + $0x5a8] sm:$0xff]   ;;  %v4501_v60 = vld [vmem:[#allocation5 + $0x570] sm:$0xff]  }
 0x124   : > { %4032 = vmatprep.subr.bf16.mxu1 %v4454_v61  ;;  %v4502_v61 = vld [vmem:[#allocation5 + $0x5f0] sm:$0xff]  }
 0x125   : > { %1788 = vmatmul.mubr.bf16.gmra.mrb[28].mxu0 %v5115_v36 }
 0x126   : > { %4005 = vmatpush3.bf16.msra.mxu0 %v4455_v62  ;;  %1837 = vmatmul.mubr.bf16.gmra.mrb[28].mxu1 %v5123_v46  ;;  %v4503_v62 = vld [vmem:[#allocation5 + $0x530] sm:$0xff]  }
 0x127   : > { %4033 = vmatpush3.bf16.msra.mxu1 %v4456_v63  ;;  %2406 = vmatprep.mubr.bf16.mxu0 %v5066_v35  ;;  %v4504_v63 = vld [vmem:[#allocation5 + $0x5b0] sm:$0xff]  }
 0x128   : > { %4006 = vmatprep.subr.bf16.mxu0 %v4457_v1  ;;  %2455 = vmatprep.mubr.bf16.mxu1 %v5071_v38  ;;  %v4505_v1 = vld [vmem:[#allocation5 + $0x578] sm:$0xff]  }
 0x129   : > { %4034 = vmatprep.subr.bf16.mxu1 %v4458_v3  ;;  %v4506_v3 = vld [vmem:[#allocation5 + $0x5f8] sm:$0xff]  }
 0x12a   : > { %4007 = vmatpush3.bf16.msra.mxu0 %v4459_v4  ;;  %v4507_v4 = vld [vmem:[#allocation5 + $0x538] sm:$0xff]  }
 0x12b   : > { %4035 = vmatpush3.bf16.msra.mxu1 %v4460_v5  ;;  %4008 = vmatprep.subr.bf16.mxu0 %v4461_v8  ;;  %v4508_v5 = vld [vmem:[#allocation5 + $0x5b8] sm:$0xff]   ;;  %v4509_v8 = vld [vmem:[#allocation5 + $0x640] sm:$0xff]  }
 0x12c   : > { %4036 = vmatprep.subr.bf16.mxu1 %v4462_v9  ;;  %v4510_v9 = vld [vmem:[#allocation5 + $0x6c0] sm:$0xff]  }
 0x12e   : > { %4009 = vmatpush3.bf16.msra.mxu0 %v4463_v10  ;;  %v4511_v10 = vld [vmem:[#allocation5 + $0x600] sm:$0xff]  }
 0x12f   : > { %4037 = vmatpush3.bf16.msra.mxu1 %v4464_v11  ;;  %4010 = vmatprep.subr.bf16.mxu0 %v4465_v12  ;;  %v4512_v11 = vld [vmem:[#allocation5 + $0x680] sm:$0xff]   ;;  %v4513_v12 = vld [vmem:[#allocation5 + $0x648] sm:$0xff]  }
 0x130   : > { %4038 = vmatprep.subr.bf16.mxu1 %v4466_v13  ;;  %v4514_v13 = vld [vmem:[#allocation5 + $0x6c8] sm:$0xff]  }
 0x132   : > { %4011 = vmatpush3.bf16.msra.mxu0 %v4467_v14  ;;  %v4515_v14 = vld [vmem:[#allocation5 + $0x608] sm:$0xff]  }
 0x133   : > { %4039 = vmatpush3.bf16.msra.mxu1 %v4468_v15  ;;  %4012 = vmatprep.subr.bf16.mxu0 %v4469_v16  ;;  %v4516_v15 = vld [vmem:[#allocation5 + $0x688] sm:$0xff]   ;;  %v4517_v16 = vld [vmem:[#allocation5 + $0x650] sm:$0xff]  }
 0x134   : > { %4040 = vmatprep.subr.bf16.mxu1 %v4470_v17  ;;  %v4518_v17 = vld [vmem:[#allocation5 + $0x6d0] sm:$0xff]  }
 0x136   : > { %4013 = vmatpush3.bf16.msra.mxu0 %v4471_v18  ;;  %v4519_v18 = vld [vmem:[#allocation5 + $0x610] sm:$0xff]  }
 0x137   : > { %4041 = vmatpush3.bf16.msra.mxu1 %v4472_v19  ;;  %4014 = vmatprep.subr.bf16.mxu0 %v4473_v24  ;;  %v4520_v19 = vld [vmem:[#allocation5 + $0x690] sm:$0xff]   ;;  %v4521_v24 = vld [vmem:[#allocation5 + $0x658] sm:$0xff]  }
 0x138   : > { %4042 = vmatprep.subr.bf16.mxu1 %v4474_v25  ;;  %v4522_v25 = vld [vmem:[#allocation5 + $0x6d8] sm:$0xff]  }
 0x13a   : > { %4015 = vmatpush3.bf16.msra.mxu0 %v4475_v26  ;;  %v4523_v26 = vld [vmem:[#allocation5 + $0x618] sm:$0xff]  }
 0x13b   : > { %4043 = vmatpush3.bf16.msra.mxu1 %v4476_v27  ;;  %4056 = vmatprep.subr.bf16.mxu0 %v4477_v28  ;;  %v4524_v27 = vld [vmem:[#allocation5 + $0x698] sm:$0xff]   ;;  %v4525_v28 = vld [vmem:[#allocation5 + $0x660] sm:$0xff]  }
 0x13c   : > { %4084 = vmatprep.subr.bf16.mxu1 %v4478_v29  ;;  %v4526_v29 = vld [vmem:[#allocation5 + $0x6e0] sm:$0xff]  }
 0x13d   : > { %2407 = vmatmul.mubr.bf16.vlgmr.msra.gmra.mrb[32].mxu0 %v5069_v37 }
 0x13e   : > { %2456 = vmatmul.mubr.bf16.vlgmr.msra.gmra.mrb[32].mxu1 %v5073_v39  ;;  %4057 = vmatpush3.bf16.msra.mxu0 %v4479_v30  ;;  %v4527_v30 = vld [vmem:[#allocation5 + $0x620] sm:$0xff]  }
 0x13f   : > { %4085 = vmatpush3.bf16.msra.mxu1 %v4480_v31  ;;  %2414 = vmatprep.mubr.bf16.mxu0 %v5081_v0  ;;  %v4528_v31 = vld [vmem:[#allocation5 + $0x6a0] sm:$0xff]  }
 0x140   : > { %4058 = vmatprep.subr.bf16.mxu0 %v4481_v32  ;;  %2463 = vmatprep.mubr.bf16.mxu1 %v5089_v6  ;;  %v4529_v32 = vld [vmem:[#allocation5 + $0x668] sm:$0xff]  }
 0x141   : > { %4086 = vmatprep.subr.bf16.mxu1 %v4482_v33  ;;  %v4530_v33 = vld [vmem:[#allocation5 + $0x6e8] sm:$0xff]  }
 0x142   : > { %4059 = vmatpush3.bf16.msra.mxu0 %v4483_v40  ;;  %v4532_v40 = vld [vmem:[#allocation5 + $0x6a8] sm:$0xff]  }
 0x143   : > { %4087 = vmatpush3.bf16.msra.mxu1 %v4484_v41  ;;  %4060 = vmatprep.subr.bf16.mxu0 %v4485_v42  ;;  %v4534_v41 = vld [vmem:[#allocation5 + $0x6f0] sm:$0xff]  }
 0x144   : > { %4088 = vmatprep.subr.bf16.mxu1 %v4486_v43  ;;  %v4535_v42 = vld [vmem:[#allocation5 + $0x630] sm:$0xff]  }
 0x145   : > { %2415 = vmatmul.mubr.bf16.gmra.mrb[36].mxu0 %v5083_v2  ;;  %v4536_v43 = vld [vmem:[#allocation5 + $0x6b0] sm:$0xff]  }
 0x146   : > { %4061 = vmatpush3.bf16.msra.mxu0 %v4487_v45  ;;  %2464 = vmatmul.mubr.bf16.gmra.mrb[36].mxu1 %v5091_v7  ;;  %v4537_v45 = vld [vmem:[#allocation5 + $0x678] sm:$0xff]  }
 0x147   : > { %4089 = vmatpush3.bf16.msra.mxu1 %v4488_v47  ;;  %2504 = vmatprep.mubr.bf16.mxu0 %v5101_v21  ;;  %v4538_v47 = vld [vmem:[#allocation5 + $0x6f8] sm:$0xff]  }
 0x148   : > { %4062 = vmatprep.subr.bf16.mxu0 %v4489_v48  ;;  %2553 = vmatprep.mubr.bf16.mxu1 %v5105_v23  ;;  %v4539_v48 = vld [vmem:[#allocation5 + $0x638] sm:$0xff]  }
 0x149   : > { %4090 = vmatprep.subr.bf16.mxu1 %v4490_v49  ;;  %v4540_v49 = vld [vmem:[#allocation5 + $0x6b8] sm:$0xff]  }
 0x14a   : > { %4063 = vmatpush3.bf16.msra.mxu0 %v4491_v50  ;;  %v4541_v50 = vld [vmem:[#allocation5 + $0x740] sm:$0xff]  }
 0x14b   : > { %4091 = vmatpush3.bf16.msra.mxu1 %v4492_v51  ;;  %4064 = vmatprep.subr.bf16.mxu0 %v4493_v52  ;;  %v4542_v51 = vld [vmem:[#allocation5 + $0x7c0] sm:$0xff]  }
 0x14c   : > { %4092 = vmatprep.subr.bf16.mxu1 %v4494_v53  ;;  %v4543_v52 = vld [vmem:[#allocation5 + $0x700] sm:$0xff]  }
 0x14d   : > { %v4544_v53 = vld [vmem:[#allocation5 + $0x780] sm:$0xff]  }
 0x14e   : > { %4065 = vmatpush3.bf16.msra.mxu0 %v4495_v54  ;;  %v4545_v54 = vld [vmem:[#allocation5 + $0x748] sm:$0xff]  }
 0x14f   : > { %4093 = vmatpush3.bf16.msra.mxu1 %v4496_v55  ;;  %4066 = vmatprep.subr.bf16.mxu0 %v4497_v56  ;;  %v4546_v55 = vld [vmem:[#allocation5 + $0x7c8] sm:$0xff]  }
 0x150   : > { %4094 = vmatprep.subr.bf16.mxu1 %v4498_v57  ;;  %v4547_v56 = vld [vmem:[#allocation5 + $0x708] sm:$0xff]  }
 0x151   : > { %v4548_v57 = vld [vmem:[#allocation5 + $0x788] sm:$0xff]  }
 0x152   : > { %4067 = vmatpush3.bf16.msra.mxu0 %v4499_v58  ;;  %v4549_v58 = vld [vmem:[#allocation5 + $0x750] sm:$0xff]  }
 0x153   : > { %4095 = vmatpush3.bf16.msra.mxu1 %v4500_v59  ;;  %4068 = vmatprep.subr.bf16.mxu0 %v4501_v60  ;;  %v4551_v59 = vld [vmem:[#allocation5 + $0x710] sm:$0xff]   ;;  %v4553_v60 = vld [vmem:[#allocation5 + $0x758] sm:$0xff]  }
 0x154   : > { %4096 = vmatprep.subr.bf16.mxu1 %v4502_v61  ;;  %v4556_v61 = vld [vmem:[#allocation5 + $0x798] sm:$0xff]  }
 0x156   : > { %4069 = vmatpush3.bf16.msra.mxu0 %v4503_v62  ;;  %v4557_v62 = vld [vmem:[#allocation5 + $0x760] sm:$0xff]  }
 0x157   : > { %4097 = vmatpush3.bf16.msra.mxu1 %v4504_v63  ;;  %4070 = vmatprep.subr.bf16.mxu0 %v4505_v1  ;;  %v4558_v63 = vld [vmem:[#allocation5 + $0x7e0] sm:$0xff]  }
 0x158   : > { %4098 = vmatprep.subr.bf16.mxu1 %v4506_v3 }
 0x15a   : > { %4071 = vmatpush3.bf16.msra.mxu0 %v4507_v4  ;;  %v5169_v4 = vld [vmem:[#allocation7] ss:$0 sm:$0xff] }
 0x15b   : > { %4099 = vmatpush3.bf16.msra.mxu1 %v4508_v5  ;;  %4112 = vmatprep.subr.bf16.mxu0 %v4509_v8  ;;  %v4561_v8 = vld [vmem:[#allocation5 + $0x768] sm:$0xff]  }
 0x15c   : > { %4140 = vmatprep.subr.bf16.mxu1 %v4510_v9 }
 0x15d   : > { %2505 = vmatmul.mubr.bf16.vlgmr.msra.gmra.mrb[40].mxu0 %v5099_v20 }
 0x15e   : > { %2554 = vmatmul.mubr.bf16.vlgmr.msra.gmra.mrb[40].mxu1 %v5103_v22  ;;  %4113 = vmatpush3.bf16.msra.mxu0 %v4511_v10  ;;  %v4562_v10 = vld [vmem:[#allocation5 + $0x7e8] sm:$0xff]  }
 0x15f   : > { %4141 = vmatpush3.bf16.msra.mxu1 %v4512_v11  ;;  %2512 = vmatprep.mubr.bf16.mxu0 %v5113_v34 }
 0x160   : > { %4114 = vmatprep.subr.bf16.mxu0 %v4513_v12  ;;  %2561 = vmatprep.mubr.bf16.mxu1 %v5121_v44 }
 0x161   : > { %4142 = vmatprep.subr.bf16.mxu1 %v4514_v13  ;;  %v4563_v13 = vld [vmem:[#allocation5 + $0x728] sm:$0xff]  }
 0x162   : > { %4115 = vmatpush3.bf16.msra.mxu0 %v4515_v14 }
 0x163   : > { %4143 = vmatpush3.bf16.msra.mxu1 %v4516_v15  ;;  %4116 = vmatprep.subr.bf16.mxu0 %v4517_v16  ;;  %v4564_v15 = vld [vmem:[#allocation5 + $0x7a8] sm:$0xff]  }
 0x164   : > { %4144 = vmatprep.subr.bf16.mxu1 %v4518_v17 }
 0x165   : > { %2513 = vmatmul.mubr.bf16.gmra.mrb[44].mxu0 %v5115_v36 }
 0x166   : > { %4117 = vmatpush3.bf16.msra.mxu0 %v4519_v18  ;;  %2562 = vmatmul.mubr.bf16.gmra.mrb[44].mxu1 %v5123_v46  ;;  %v4565_v18 = vld [vmem:[#allocation5 + $0x770] sm:$0xff]  }
 0x167   : > { %4145 = vmatpush3.bf16.msra.mxu1 %v4520_v19  ;;  %3127 = vmatprep.mubr.bf16.mxu0 %v5066_v35  ;;  %v4531_v35 = vld [vmem:[#allocation5 + $0x628] sm:$0xff]  }
 0x168   : > { %4118 = vmatprep.subr.bf16.mxu0 %v4521_v24  ;;  %3176 = vmatprep.mubr.bf16.mxu1 %v5071_v38  ;;  %v4533_v38 = vld [vmem:[#allocation5 + $0x670] sm:$0xff]  }
 0x169   : > { %4146 = vmatprep.subr.bf16.mxu1 %v4522_v25 }
 0x16a   : > { %4119 = vmatpush3.bf16.msra.mxu0 %v4523_v26  ;;  %v4566_v26 = vld [vmem:[#allocation5 + $0x7f0] sm:$0xff]  }
 0x16b   : > { %4147 = vmatpush3.bf16.msra.mxu1 %v4524_v27  ;;  %4120 = vmatprep.subr.bf16.mxu0 %v4525_v28  ;;  %v4567_v28 = vld [vmem:[#allocation5 + $0x730] sm:$0xff]  }
 0x16c   : > { %4148 = vmatprep.subr.bf16.mxu1 %v4526_v29  ;;  %v4568_v29 = vld [vmem:[#allocation5 + $0x7b0] sm:$0xff]  }
 0x16e   : > { %4121 = vmatpush3.bf16.msra.mxu0 %v4527_v30 }
 0x16f   : > { %4149 = vmatpush3.bf16.msra.mxu1 %v4528_v31  ;;  %4122 = vmatprep.subr.bf16.mxu0 %v4529_v32  ;;  %v4569_v31 = vld [vmem:[#allocation5 + $0x778] sm:$0xff]  }
 0x170   : > { %4150 = vmatprep.subr.bf16.mxu1 %v4530_v33  ;;  %v4570_v32 = vld [vmem:[#allocation5 + $0x7f8] sm:$0xff]  }
 0x171   : > { %v4571_v33 = vld [vmem:[#allocation5 + $0x738] sm:$0xff]  }
 0x172   : > { %4123 = vmatpush3.bf16.msra.mxu0 %v4531_v35  ;;  %v4572_v35 = vld [vmem:[#allocation5 + $0x7b8] sm:$0xff]  }
 0x173   : > { %4151 = vmatpush3.bf16.msra.mxu1 %v4532_v40  ;;  %4124 = vmatprep.subr.bf16.mxu0 %v4533_v38 }
 0x174   : > { %4152 = vmatprep.subr.bf16.mxu1 %v4534_v41 }
 0x176   : > { %4125 = vmatpush3.bf16.msra.mxu0 %v4535_v42 }
 0x177   : > { %4153 = vmatpush3.bf16.msra.mxu1 %v4536_v43  ;;  %4126 = vmatprep.subr.bf16.mxu0 %v4537_v45 }
 0x178   : > { %4154 = vmatprep.subr.bf16.mxu1 %v4538_v47 }
 0x17a   : > { %4127 = vmatpush3.bf16.msra.mxu0 %v4539_v48 }
 0x17b   : > { %4155 = vmatpush3.bf16.msra.mxu1 %v4540_v49  ;;  %4168 = vmatprep.subr.bf16.mxu0 %v4541_v50 }
 0x17c   : > { %4196 = vmatprep.subr.bf16.mxu1 %v4542_v51 }
 0x17d   : > { %3128 = vmatmul.mubr.bf16.vlgmr.msra.gmra.mrb[48].mxu0 %v5069_v37  ;;  %v4550_v37 = vld [vmem:[#allocation5 + $0x7d0] sm:$0xff]  }
 0x17e   : > { %3177 = vmatmul.mubr.bf16.vlgmr.msra.gmra.mrb[48].mxu1 %v5073_v39  ;;  %4169 = vmatpush3.bf16.msra.mxu0 %v4543_v52  ;;  %v4552_v39 = vld [vmem:[#allocation5 + $0x790] sm:$0xff]  }
 0x17f   : > { %4197 = vmatpush3.bf16.msra.mxu1 %v4544_v53  ;;  %3135 = vmatprep.mubr.bf16.mxu0 %v5081_v0  ;;  %v4554_v0 = vld [vmem:[#allocation5 + $0x7d8] sm:$0xff]  }
 0x180   : > { %4170 = vmatprep.subr.bf16.mxu0 %v4545_v54  ;;  %3184 = vmatprep.mubr.bf16.mxu1 %v5089_v6  ;;  %v4555_v6 = vld [vmem:[#allocation5 + $0x718] sm:$0xff]  }
 0x181   : > { %4198 = vmatprep.subr.bf16.mxu1 %v4546_v55 }
 0x182   : > { %4171 = vmatpush3.bf16.msra.mxu0 %v4547_v56 }
 0x183   : > { %4199 = vmatpush3.bf16.msra.mxu1 %v4548_v57  ;;  %4172 = vmatprep.subr.bf16.mxu0 %v4549_v58 }
 0x184   : > { %4200 = vmatprep.subr.bf16.mxu1 %v4550_v37 }
 0x185   : > { %3136 = vmatmul.mubr.bf16.gmra.mrb[52].mxu0 %v5083_v2  ;;  %v4559_v2 = vld [vmem:[#allocation5 + $0x720] sm:$0xff]  }
 0x186   : > { %4173 = vmatpush3.bf16.msra.mxu0 %v4551_v59  ;;  %3185 = vmatmul.mubr.bf16.gmra.mrb[52].mxu1 %v5091_v7  ;;  %v4560_v7 = vld [vmem:[#allocation5 + $0x7a0] sm:$0xff]  }
 0x187   : > { %4201 = vmatpush3.bf16.msra.mxu1 %v4552_v39  ;;  %3225 = vmatprep.mubr.bf16.mxu0 %v5101_v21 }
 0x188   : > { %4174 = vmatprep.subr.bf16.mxu0 %v4553_v60  ;;  %3274 = vmatprep.mubr.bf16.mxu1 %v5105_v23 }
 0x189   : > { %4202 = vmatprep.subr.bf16.mxu1 %v4554_v0 }
 0x18a   : > { %4175 = vmatpush3.bf16.msra.mxu0 %v4555_v6 }
 0x18b   : > { %4203 = vmatpush3.bf16.msra.mxu1 %v4556_v61  ;;  %4176 = vmatprep.subr.bf16.mxu0 %v4557_v62 }
 0x18c   : > { %4204 = vmatprep.subr.bf16.mxu1 %v4558_v63 }
 0x18e   : > { %4177 = vmatpush3.bf16.msra.mxu0 %v4559_v2 }
 0x18f   : > { %4205 = vmatpush3.bf16.msra.mxu1 %v4560_v7  ;;  %4178 = vmatprep.subr.bf16.mxu0 %v4561_v8 }
 0x190   : > { %v3792_v1 = vpop.f32.mrb[0].mxu0  ;;  %4206 = vmatprep.subr.bf16.mxu1 %v4562_v10 }
 0x191   : > { %v3820_v3 = vpop.f32.mrb[0].mxu1  ;;  %v3793_v5 = vpop.f32.mrb[1].mxu0 }
 0x192   : > { %v3821_v21 = vpop.f32.mrb[1].mxu1  ;;  %v3794_v9 = vadd.f32 %v3793_v5, %v3792_v1  ;;  %v3795_v11 = vpop.f32.mrb[2].mxu0  ;;  %4179 = vmatpush3.bf16.msra.mxu0 %v4563_v13 }
 0x193   : > { %v3822_v23 = vadd.f32 %v3821_v21, %v3820_v3  ;;  %v3823_v12 = vpop.f32.mrb[2].mxu1  ;;  %v3796_v16 = vpop.f32.mrb[3].mxu0  ;;  %4207 = vmatpush3.bf16.msra.mxu1 %v4564_v15  ;;  %4180 = vmatprep.subr.bf16.mxu0 %v4565_v18 }
 0x194   : > { %v951_v14 = vadd.f32 %v3794_v9, %v5169_v4  ;;  %v3824_v17 = vpop.f32.mrb[3].mxu1  ;;  %v3797_v24 = vadd.f32 %v3796_v16, %v3795_v11  ;;  %4208 = vmatprep.subr.bf16.mxu1 %v4566_v26 }
 0x195   : > { %v3825_v25 = vadd.f32 %v3824_v17, %v3823_v12 }
 0x196   : > { %v1000_v19 = vadd.f32 %v3822_v23, %v951_v14  ;;  %v954_v27 = vadd.f32 %v3797_v24, %v5169_v4  ;;  %4181 = vmatpush3.bf16.msra.mxu0 %v4567_v28 }
 0x197   : > { %4209 = vmatpush3.bf16.msra.mxu1 %v4568_v29  ;;  %4182 = vmatprep.subr.bf16.mxu0 %v4569_v31 }
 0x198   : > { %v1003_v30 = vadd.f32 %v3825_v25, %v954_v27  ;;  %4210 = vmatprep.subr.bf16.mxu1 %v4570_v32  ;;  %v3798_v40 = vpop.f32.mrb[4].mxu0 }
 0x199   : > { %v3799_v38 = vpop.f32.mrb[5].mxu0  ;;  %v3826_v43 = vpop.f32.mrb[4].mxu1 }
 0x19a   : > { %4183 = vmatpush3.bf16.msra.mxu0 %v4571_v33  ;;  %v3800_v41 = vadd.f32 %v3799_v38, %v3798_v40  ;;  %v3801_v42 = vpop.f32.mrb[6].mxu0 }
 0x19b   : > { %4211 = vmatpush3.bf16.msra.mxu1 %v4572_v35  ;;  %v3802_v45 = vpop.f32.mrb[7].mxu0 }
 0x19c   : > { %v959_v47 = vadd.f32 %v3800_v41, %v5169_v4  ;;  %v3803_v48 = vadd.f32 %v3802_v45, %v3801_v42 }
 0x19d   : > { %3226 = vmatmul.mubr.bf16.vlgmr.msra.gmra.mrb[56].mxu0 %v5099_v20  ;;  %v3827_v20 = vpop.f32.mrb[5].mxu1 }
 0x19e   : > { %3275 = vmatmul.mubr.bf16.vlgmr.msra.gmra.mrb[56].mxu1 %v5103_v22  ;;  %3233 = vmatprep.mubr.bf16.mxu0 %v5113_v34  ;;  %v3828_v49 = vadd.f32 %v3827_v20, %v3826_v43  ;;  %v3829_v22 = vpop.f32.mrb[6].mxu1  ;;  %v962_v34 = vadd.f32 %v3803_v48, %v5169_v4 }
 0x19f   : > { %3282 = vmatprep.mubr.bf16.mxu1 %v5121_v44  ;;  %v3830_v50 = vpop.f32.mrb[7].mxu1 }
 0x1a0   : > { %v1008_v44 = vadd.f32 %v3828_v49, %v959_v47  ;;  %v3831_v51 = vadd.f32 %v3830_v50, %v3829_v22 }
 0x1a2   : > { %v1011_v52 = vadd.f32 %v3831_v51, %v962_v34 }
 0x1a5   : > { %3234 = vmatmul.mubr.bf16.gmra.mrb[60].mxu0 %v5115_v36 }
 0x1a6   : > { %3283 = vmatmul.mubr.bf16.gmra.mrb[60].mxu1 %v5123_v46 }
 0x1b0   : > { %v3848_v53 = vpop.f32.mrb[8].mxu0 }
 0x1b1   : > { %v3876_v54 = vpop.f32.mrb[8].mxu1  ;;  %v3849_v55 = vpop.f32.mrb[9].mxu0 }
 0x1b2   : > { %v3877_v36 = vpop.f32.mrb[9].mxu1  ;;  %v3850_v56 = vadd.f32 %v3849_v55, %v3848_v53  ;;  %v3851_v58 = vpop.f32.mrb[10].mxu0 }
 0x1b3   : > { %v3878_v57 = vadd.f32 %v3877_v36, %v3876_v54  ;;  %v3879_v46 = vpop.f32.mrb[10].mxu1  ;;  %v3852_v37 = vpop.f32.mrb[11].mxu0 }
 0x1b4   : > { %v3880_v59 = vpop.f32.mrb[11].mxu1  ;;  %v1049_v39 = vadd.f32 %v3850_v56, %v1000_v19  ;;  %v3853_v60 = vadd.f32 %v3852_v37, %v3851_v58 }
 0x1b5   : > { %v3881_v0 = vadd.f32 %v3880_v59, %v3879_v46 }
 0x1b6   : > { %v5181_v6 = vadd.f32 %v3878_v57, %v1049_v39  ;;  %v1052_v61 = vadd.f32 %v3853_v60, %v1003_v30  ;;  %v5194_v60 = vld [vmem:[#allocation8] ss:$0 sm:$0xff] }
 0x1b8   : > { %v5183_v62 = vadd.f32 %v3881_v0, %v1052_v61  ;;  %v3854_v63 = vpop.f32.mrb[12].mxu0  ;;  %v1112_v46 = vmax.f32 %v5181_v6, 0.0 }
 0x1b9   : > { %v3855_v1 = vpop.f32.mrb[13].mxu0 }
 0x1ba   : > { %v3856_v2 = vadd.f32 %v3855_v1, %v3854_v63  ;;  %v3857_v3 = vpop.f32.mrb[14].mxu0  ;;  %v1113_v1 = vmax.f32 %v5183_v62, 0.0 }
 0x1bb   : > { %v3858_v7 = vpop.f32.mrb[15].mxu0  ;;  %v3882_v21 = vpop.f32.mrb[12].mxu1 }
 0x1bc   : > { %v1057_v5 = vadd.f32 %v3856_v2, %v1008_v44  ;;  %v3859_v8 = vadd.f32 %v3858_v7, %v3857_v3  ;;  %v3883_v9 = vpop.f32.mrb[13].mxu1 }
 0x1bd   : > { %v3884_v10 = vadd.f32 %v3883_v9, %v3882_v21  ;;  %v3885_v11 = vpop.f32.mrb[14].mxu1  ;;  %v5198_v21 = vld [vmem:[#allocation10] ss:$0 sm:$0xff] }
 0x1be   : > { %v1060_v23 = vadd.f32 %v3859_v8, %v1011_v52  ;;  %v3886_v12 = vpop.f32.mrb[15].mxu1 }
 0x1bf   : > { %v5185_v13 = vadd.f32 %v3884_v10, %v1057_v5  ;;  %v3887_v14 = vadd.f32 %v3886_v12, %v3885_v11  ;;  %v1122_v5 = vmul.f32 %v5194_v60, %v1112_v46 }
 0x1c1   : > { %v5187_v15 = vadd.f32 %v3887_v14, %v1060_v23  ;;  %v1123_v23 = vmul.f32 %v5194_v60, %v1113_v1 }
 0x1d0   : > { %v3904_v16 = vpop.f32.mrb[16].mxu0 }
 0x1d1   : > { %v3932_v17 = vpop.f32.mrb[16].mxu1  ;;  %v3905_v18 = vpop.f32.mrb[17].mxu0 }
 0x1d2   : > { %v3906_v19 = vadd.f32 %v3905_v18, %v3904_v16  ;;  %v3933_v24 = vpop.f32.mrb[17].mxu1  ;;  %v3907_v25 = vpop.f32.mrb[18].mxu0  ;;  %v5203_v18 = vadd.f32 %v5198_v21, %v1122_v5 }
 0x1d3   : > { %v3934_v26 = vadd.f32 %v3933_v24, %v3932_v17  ;;  %v3935_v27 = vpop.f32.mrb[18].mxu1  ;;  %v3908_v28 = vpop.f32.mrb[19].mxu0 }
 0x1d4   : > { %v1684_v29 = vadd.f32 %v3906_v19, %v5169_v4  ;;  %v3909_v30 = vadd.f32 %v3908_v28, %v3907_v25  ;;  %v3936_v31 = vpop.f32.mrb[19].mxu1  ;;  %v1114_v19 = vmax.f32 %v5185_v13, 0.0 }
 0x1d5   : > { %v3937_v32 = vadd.f32 %v3936_v31, %v3935_v27 }
 0x1d6   : > { %v1733_v33 = vadd.f32 %v3934_v26, %v1684_v29  ;;  %v1687_v35 = vadd.f32 %v3909_v30, %v5169_v4 }
 0x1d8   : > { %v1736_v40 = vadd.f32 %v3937_v32, %v1687_v35  ;;  %v3910_v38 = vpop.f32.mrb[20].mxu0  ;;  %v5211_v32 = vadd.f32 %v5198_v21, %v1123_v23 }
 0x1d9   : > { %v3911_v41 = vpop.f32.mrb[21].mxu0  ;;  %v3938_v42 = vpop.f32.mrb[20].mxu1 }
 0x1da   : > { %v3912_v43 = vadd.f32 %v3911_v41, %v3910_v38  ;;  %v3913_v45 = vpop.f32.mrb[22].mxu0  ;;  %v3939_v47 = vpop.f32.mrb[21].mxu1 }
 0x1db   : > { %v3914_v48 = vpop.f32.mrb[23].mxu0  ;;  %v3940_v20 = vadd.f32 %v3939_v47, %v3938_v42  ;;  %v3941_v49 = vpop.f32.mrb[22].mxu1  ;;  %v1124_v42 = vmul.f32 %v5194_v60, %v1114_v19 }
 0x1dc   : > { %v1692_v22 = vadd.f32 %v3912_v43, %v5169_v4  ;;  %v3915_v34 = vadd.f32 %v3914_v48, %v3913_v45  ;;  %v3942_v50 = vpop.f32.mrb[23].mxu1 }
 0x1dd   : > { %v3943_v44 = vadd.f32 %v3942_v50, %v3941_v49  ;;  %v5225_v49 = vadd.f32 %v5198_v21, %v1124_v42 }
 0x1de   : > { %v1695_v51 = vadd.f32 %v3915_v34, %v5169_v4  ;;  %v1741_v52 = vadd.f32 %v3940_v20, %v1692_v22 }
 0x1e0   : > { %v1744_v53 = vadd.f32 %v3943_v44, %v1695_v51 }
 0x1f0   : > { %v3960_v54 = vpop.f32.mrb[24].mxu0 }
 0x1f1   : > { %v3988_v55 = vpop.f32.mrb[24].mxu1  ;;  %v3961_v36 = vpop.f32.mrb[25].mxu0 }
 0x1f2   : > { %v3962_v56 = vadd.f32 %v3961_v36, %v3960_v54  ;;  %v3989_v57 = vpop.f32.mrb[25].mxu1  ;;  %v3963_v58 = vpop.f32.mrb[26].mxu0 }
 0x1f3   : > { %v3990_v37 = vadd.f32 %v3989_v57, %v3988_v55  ;;  %v3991_v59 = vpop.f32.mrb[26].mxu1  ;;  %v3964_v39 = vpop.f32.mrb[27].mxu0 }
 0x1f4   : > { %v1782_v0 = vadd.f32 %v3962_v56, %v1733_v33  ;;  %v3965_v61 = vadd.f32 %v3964_v39, %v3963_v58  ;;  %v3992_v63 = vpop.f32.mrb[27].mxu1  ;;  %v1115_v33 = vmax.f32 %v5187_v15, 0.0 }
 0x1f5   : > { %v3993_v2 = vadd.f32 %v3992_v63, %v3991_v59 }
 0x1f6   : > { %v1831_v3 = vadd.f32 %v3990_v37, %v1782_v0  ;;  %v1785_v7 = vadd.f32 %v3965_v61, %v1736_v40  ;;  %v1125_v48 = vmul.f32 %v5194_v60, %v1115_v33 }
 0x1f8   : > { %v1845_v8 = vmax.f32 %v1831_v3, 0.0  ;;  %v1834_v9 = vadd.f32 %v3993_v2, %v1785_v7  ;;  %v3966_v6 = vpop.f32.mrb[28].mxu0  ;;  %v5232_v50 = vadd.f32 %v5198_v21, %v1125_v48 }
 0x1f9   : > { %v3967_v10 = vpop.f32.mrb[29].mxu0  ;;  %v3994_v11 = vpop.f32.mrb[28].mxu1 }
 0x1fa   : > { %v1849_v12 = vmul.f32 %v5194_v60, %v1845_v8  ;;  %v1846_v14 = vmax.f32 %v1834_v9, 0.0  ;;  %v3968_v16 = vadd.f32 %v3967_v10, %v3966_v6  ;;  %v3969_v17 = vpop.f32.mrb[30].mxu0  ;;  %v3995_v62 = vpop.f32.mrb[29].mxu1 }
 0x1fb   : > { %v3970_v24 = vpop.f32.mrb[31].mxu0  ;;  %v3996_v25 = vadd.f32 %v3995_v62, %v3994_v11  ;;  %v3997_v26 = vpop.f32.mrb[30].mxu1 }
 0x1fc   : > { %v5207_v27 = vadd.f32 %v5198_v21, %v1849_v12  ;;  %v1850_v28 = vmul.f32 %v5194_v60, %v1846_v14  ;;  %v1790_v29 = vadd.f32 %v3968_v16, %v1741_v52  ;;  %v3971_v30 = vadd.f32 %v3970_v24, %v3969_v17  ;;  %v3998_v31 = vpop.f32.mrb[31].mxu1 }
 0x1fd   : > { %v3999_v35 = vadd.f32 %v3998_v31, %v3997_v26 }
 0x1fe   : > { %v1857_v13 = vmax.f32 %v5203_v18, %v5207_v27  ;;  %v5217_v40 = vadd.f32 %v5198_v21, %v1850_v28  ;;  %v1793_v38 = vadd.f32 %v3971_v30, %v1744_v53  ;;  %v1839_v41 = vadd.f32 %v3996_v25, %v1790_v29 }
 0x200   : > { %v1858_v43 = vmax.f32 %v5211_v32, %v5217_v40  ;;  %v1847_v45 = vmax.f32 %v1839_v41, 0.0  ;;  %v1842_v47 = vadd.f32 %v3999_v35, %v1793_v38 }
 0x202   : > { %v1851_v15 = vmul.f32 %v5194_v60, %v1847_v45  ;;  %v1848_v20 = vmax.f32 %v1842_v47, 0.0 }
 0x204   : > { %v5228_v22 = vadd.f32 %v5198_v21, %v1851_v15  ;;  %v1852_v34 = vmul.f32 %v5194_v60, %v1848_v20 }
 0x206   : > { %v1859_v44 = vmax.f32 %v5225_v49, %v5228_v22  ;;  %v5237_v51 = vadd.f32 %v5198_v21, %v1852_v34 }
 0x208   : > { %v1860_v52 = vmax.f32 %v5232_v50, %v5237_v51 }
 0x210   : > { %v4016_v53 = vpop.f32.mrb[32].mxu0 }
 0x211   : > { %v4044_v54 = vpop.f32.mrb[32].mxu1  ;;  %v4017_v55 = vpop.f32.mrb[33].mxu0 }
 0x212   : > { %v4018_v36 = vadd.f32 %v4017_v55, %v4016_v53  ;;  %v4045_v56 = vpop.f32.mrb[33].mxu1  ;;  %v4019_v57 = vpop.f32.mrb[34].mxu0 }
 0x213   : > { %v4046_v58 = vadd.f32 %v4045_v56, %v4044_v54  ;;  %v4047_v46 = vpop.f32.mrb[34].mxu1  ;;  %v4020_v37 = vpop.f32.mrb[35].mxu0 }
 0x214   : > { %v2409_v59 = vadd.f32 %v4018_v36, %v5169_v4  ;;  %v4021_v39 = vadd.f32 %v4020_v37, %v4019_v57  ;;  %v4048_v0 = vpop.f32.mrb[35].mxu1 }
 0x215   : > { %v4049_v61 = vadd.f32 %v4048_v0, %v4047_v46 }
 0x216   : > { %v2458_v63 = vadd.f32 %v4046_v58, %v2409_v59  ;;  %v2412_v1 = vadd.f32 %v4021_v39, %v5169_v4 }
 0x218   : > { %v2461_v2 = vadd.f32 %v4049_v61, %v2412_v1  ;;  %v4022_v3 = vpop.f32.mrb[36].mxu0 }
 0x219   : > { %v4023_v7 = vpop.f32.mrb[37].mxu0  ;;  %v4050_v5 = vpop.f32.mrb[36].mxu1 }
 0x21a   : > { %v4024_v8 = vadd.f32 %v4023_v7, %v4022_v3  ;;  %v4025_v9 = vpop.f32.mrb[38].mxu0  ;;  %v4051_v6 = vpop.f32.mrb[37].mxu1 }
 0x21b   : > { %v4026_v23 = vpop.f32.mrb[39].mxu0  ;;  %v4052_v10 = vadd.f32 %v4051_v6, %v4050_v5  ;;  %v4053_v11 = vpop.f32.mrb[38].mxu1 }
 0x21c   : > { %v2417_v12 = vadd.f32 %v4024_v8, %v5169_v4  ;;  %v4027_v14 = vadd.f32 %v4026_v23, %v4025_v9  ;;  %v4054_v16 = vpop.f32.mrb[39].mxu1 }
 0x21d   : > { %v4055_v17 = vadd.f32 %v4054_v16, %v4053_v11 }
 0x21e   : > { %v2420_v62 = vadd.f32 %v4027_v14, %v5169_v4  ;;  %v2466_v19 = vadd.f32 %v4052_v10, %v2417_v12 }
 0x220   : > { %v2469_v24 = vadd.f32 %v4055_v17, %v2420_v62 }
 0x230   : > { %v4072_v25 = vpop.f32.mrb[40].mxu0 }
 0x231   : > { %v4100_v26 = vpop.f32.mrb[40].mxu1  ;;  %v4073_v28 = vpop.f32.mrb[41].mxu0 }
 0x232   : > { %v4074_v29 = vadd.f32 %v4073_v28, %v4072_v25  ;;  %v4101_v30 = vpop.f32.mrb[41].mxu1  ;;  %v4075_v31 = vpop.f32.mrb[42].mxu0 }
 0x233   : > { %v4102_v33 = vadd.f32 %v4101_v30, %v4100_v26  ;;  %v4103_v35 = vpop.f32.mrb[42].mxu1  ;;  %v4076_v38 = vpop.f32.mrb[43].mxu0 }
 0x234   : > { %v2507_v41 = vadd.f32 %v4074_v29, %v2458_v63  ;;  %v4077_v42 = vadd.f32 %v4076_v38, %v4075_v31  ;;  %v4104_v45 = vpop.f32.mrb[43].mxu1 }
 0x235   : > { %v4105_v47 = vadd.f32 %v4104_v45, %v4103_v35 }
 0x236   : > { %v5245_v48 = vadd.f32 %v4102_v33, %v2507_v41  ;;  %v2510_v15 = vadd.f32 %v4077_v42, %v2461_v2 }
 0x238   : > { %v5247_v20 = vadd.f32 %v4105_v47, %v2510_v15  ;;  %v4078_v34 = vpop.f32.mrb[44].mxu0 }
 0x239   : > { %v4079_v53 = vpop.f32.mrb[45].mxu0  ;;  %v4106_v54 = vpop.f32.mrb[44].mxu1 }
 0x23a   : > { %v4080_v55 = vadd.f32 %v4079_v53, %v4078_v34  ;;  %v4081_v36 = vpop.f32.mrb[46].mxu0  ;;  %v4107_v56 = vpop.f32.mrb[45].mxu1 }
 0x23b   : > { %v4082_v57 = vpop.f32.mrb[47].mxu0  ;;  %v4108_v58 = vadd.f32 %v4107_v56, %v4106_v54  ;;  %v4109_v46 = vpop.f32.mrb[46].mxu1 }
 0x23c   : > { %v2515_v37 = vadd.f32 %v4080_v55, %v2466_v19  ;;  %v4083_v59 = vadd.f32 %v4082_v57, %v4081_v36  ;;  %v4110_v39 = vpop.f32.mrb[47].mxu1 }
 0x23d   : > { %v4111_v0 = vadd.f32 %v4110_v39, %v4109_v46 }
 0x23e   : > { %v2518_v61 = vadd.f32 %v4083_v59, %v2469_v24  ;;  %v5249_v63 = vadd.f32 %v4108_v58, %v2515_v37  ;;  %v2570_v58 = vmax.f32 %v5245_v48, 0.0 }
 0x240   : > { %v5251_v1 = vadd.f32 %v4111_v0, %v2518_v61 }
 0x250   : > { %v4128_v2 = vpop.f32.mrb[48].mxu0 }
 0x251   : > { %v4156_v3 = vpop.f32.mrb[48].mxu1  ;;  %v4129_v7 = vpop.f32.mrb[49].mxu0 }
 0x252   : > { %v4130_v5 = vadd.f32 %v4129_v7, %v4128_v2  ;;  %v4157_v8 = vpop.f32.mrb[49].mxu1  ;;  %v4131_v9 = vpop.f32.mrb[50].mxu0  ;;  %v2571_v2 = vmax.f32 %v5247_v20, 0.0 }
 0x253   : > { %v4158_v6 = vadd.f32 %v4157_v8, %v4156_v3  ;;  %v4159_v23 = vpop.f32.mrb[50].mxu1  ;;  %v4132_v10 = vpop.f32.mrb[51].mxu0 }
 0x254   : > { %v3130_v11 = vadd.f32 %v4130_v5, %v5169_v4  ;;  %v4133_v12 = vadd.f32 %v4132_v10, %v4131_v9  ;;  %v4160_v14 = vpop.f32.mrb[51].mxu1  ;;  %v2574_v5 = vmul.f32 %v5194_v60, %v2570_v58 }
 0x255   : > { %v4161_v16 = vadd.f32 %v4160_v14, %v4159_v23  ;;  %v2575_v23 = vmul.f32 %v5194_v60, %v2571_v2 }
 0x256   : > { %v3179_v17 = vadd.f32 %v4158_v6, %v3130_v11  ;;  %v3133_v62 = vadd.f32 %v4133_v12, %v5169_v4  ;;  %v2578_v20 = vadd.f32 %v5198_v21, %v2574_v5 }
 0x258   : > { %v3182_v19 = vadd.f32 %v4161_v16, %v3133_v62  ;;  %v4134_v24 = vpop.f32.mrb[52].mxu0  ;;  %v2572_v62 = vmax.f32 %v5249_v63, 0.0 }
 0x259   : > { %v4135_v25 = vpop.f32.mrb[53].mxu0  ;;  %v4162_v26 = vpop.f32.mrb[52].mxu1 }
 0x25a   : > { %v4136_v28 = vadd.f32 %v4135_v25, %v4134_v24  ;;  %v4137_v29 = vpop.f32.mrb[54].mxu0  ;;  %v4163_v30 = vpop.f32.mrb[53].mxu1 }
 0x25b   : > { %v4138_v31 = vpop.f32.mrb[55].mxu0  ;;  %v4164_v33 = vadd.f32 %v4163_v30, %v4162_v26  ;;  %v4165_v35 = vpop.f32.mrb[54].mxu1 }
 0x25c   : > { %v3138_v38 = vadd.f32 %v4136_v28, %v5169_v4  ;;  %v4139_v41 = vadd.f32 %v4138_v31, %v4137_v29  ;;  %v4166_v42 = vpop.f32.mrb[55].mxu1 }
 0x25d   : > { %v4167_v45 = vadd.f32 %v4166_v42, %v4165_v35  ;;  %v2573_v35 = vmax.f32 %v5251_v1, 0.0 }
 0x25e   : > { %v3141_v47 = vadd.f32 %v4139_v41, %v5169_v4  ;;  %v3187_v15 = vadd.f32 %v4164_v33, %v3138_v38  ;;  %v2579_v33 = vadd.f32 %v5198_v21, %v2575_v23 }
 0x260   : > { %v3190_v34 = vadd.f32 %v4167_v45, %v3141_v47  ;;  %v2576_v47 = vmul.f32 %v5194_v60, %v2572_v62 }
 0x270   : > { %v4184_v53 = vpop.f32.mrb[56].mxu0 }
 0x271   : > { %v4212_v54 = vpop.f32.mrb[56].mxu1  ;;  %v4185_v55 = vpop.f32.mrb[57].mxu0 }
 0x272   : > { %v4186_v36 = vadd.f32 %v4185_v55, %v4184_v53  ;;  %v4213_v56 = vpop.f32.mrb[57].mxu1  ;;  %v4187_v57 = vpop.f32.mrb[58].mxu0 }
 0x273   : > { %v4214_v46 = vadd.f32 %v4213_v56, %v4212_v54  ;;  %v4215_v37 = vpop.f32.mrb[58].mxu1  ;;  %v4188_v59 = vpop.f32.mrb[59].mxu0 }
 0x274   : > { %v3228_v39 = vadd.f32 %v4186_v36, %v3179_v17  ;;  %v4189_v0 = vadd.f32 %v4188_v59, %v4187_v57  ;;  %v4216_v61 = vpop.f32.mrb[59].mxu1  ;;  %v2577_v36 = vmul.f32 %v5194_v60, %v2573_v35  ;;  %v2580_v57 = vadd.f32 %v5198_v21, %v2576_v47 }
 0x275   : > { %v4217_v3 = vadd.f32 %v4216_v61, %v4215_v37 }
 0x276   : > { %v3277_v4 = vadd.f32 %v4214_v46, %v3228_v39  ;;  %v3231_v7 = vadd.f32 %v4189_v0, %v3182_v19 }
 0x278   : > { %v3291_v8 = vmax.f32 %v3277_v4, 0.0  ;;  %v3280_v9 = vadd.f32 %v4217_v3, %v3231_v7  ;;  %v4190_v6 = vpop.f32.mrb[60].mxu0 }
 0x279   : > { %v4218_v10 = vpop.f32.mrb[60].mxu1  ;;  %v4191_v48 = vpop.f32.mrb[61].mxu0 }
 0x27a   : > { %v3295_v11 = vmul.f32 %v5194_v60, %v3291_v8  ;;  %v3292_v12 = vmax.f32 %v3280_v9, 0.0  ;;  %v4192_v14 = vadd.f32 %v4191_v48, %v4190_v6  ;;  %v4219_v16 = vpop.f32.mrb[61].mxu1  ;;  %v4193_v17 = vpop.f32.mrb[62].mxu0 }
 0x27b   : > { %v4220_v19 = vadd.f32 %v4219_v16, %v4218_v10  ;;  %v4221_v24 = vpop.f32.mrb[62].mxu1  ;;  %v4194_v25 = vpop.f32.mrb[63].mxu0 }
 0x27c   : > { %v3299_v26 = vadd.f32 %v5198_v21, %v3295_v11  ;;  %v3296_v28 = vmul.f32 %v5194_v60, %v3292_v12  ;;  %v3236_v29 = vadd.f32 %v4192_v14, %v3187_v15  ;;  %v4195_v30 = vadd.f32 %v4194_v25, %v4193_v17  ;;  %v4222_v31 = vpop.f32.mrb[63].mxu1 }
 0x27d   : > { %v4223_v38 = vadd.f32 %v4222_v31, %v4221_v24 }
 0x27e   : > { %v3303_v41 = vmax.f32 %v2578_v20, %v3299_v26  ;;  %v3300_v42 = vadd.f32 %v5198_v21, %v3296_v28  ;;  %v3285_v63 = vadd.f32 %v4220_v19, %v3236_v29  ;;  %v3239_v45 = vadd.f32 %v4195_v30, %v3190_v34 }
 0x280   : > { %v3307_v53 = vmax.f32 %v1857_v13, %v3303_v41  ;;  %v3304_v54 = vmax.f32 %v2579_v33, %v3300_v42  ;;  %v3293_v15 = vmax.f32 %v3285_v63, 0.0  ;;  %v3288_v55 = vadd.f32 %v4223_v38, %v3239_v45 }
 0x281   : > { %v2581_v13 = vadd.f32 %v5198_v21, %v2577_v36 }
 0x282   : > { %v3308_v1 = vmax.f32 %v1858_v43, %v3304_v54  ;;  %v3297_v56 = vmul.f32 %v5194_v60, %v3293_v15  ;;  %v3294_v34 = vmax.f32 %v3288_v55, 0.0 }
 0x284   : > { %v3768_v58 = vpack.c.bf16 %v3308_v1, %v3307_v53  ;;  %v3301_v18 = vadd.f32 %v5198_v21, %v3297_v56  ;;  %v3298_v27 = vmul.f32 %v5194_v60, %v3294_v34 }
 0x286   : > { %v3305_v46 = vmax.f32 %v2580_v57, %v3301_v18  ;;  %v3302_v37 = vadd.f32 %v5198_v21, %v3298_v27  ;;  %3769 = vst [vmem:[%s295_s26] sm:$0xff] %v3768_v58  }
 0x288   : > { %v3309_v32 = vmax.f32 %v1859_v44, %v3305_v46  ;;  %v3306_v40 = vmax.f32 %v2581_v13, %v3302_v37 }
 0x28a   : > { %v3310_v43 = vmax.f32 %v1860_v52, %v3306_v40 }
 0x28c   : > { %v3773_v60 = vpack.c.bf16 %v3310_v43, %v3309_v32 }
 0x28e   : > { %3775 = vst [vmem:[%s295_s26 + $0x8] sm:$0xff] %v3773_v60  }
 0x28f   : > { %4728 = shalt.err (!%p4725_p13)
}
 0x290   : > { %s4729_s6 = scalar_lea.hbm %s5294_s27, 256  ;;  %s4733_s23 = scalar_lea.hbm %s5345_s5, 512 }
 0x291   : > { %p4730_p9 = scmp.ne.s32.totalorder %s5294_s27, %s4729_s6  ;;  %p4734_p6 = scmp.lt.u32.totalorder %s5294_s27, %s5345_s5 }
 0x292   : > { %p4735_p4 = scmp.lt.u32.totalorder %s4733_s23, %s4729_s6  ;;  %p4737_p3 = scmp.lt.u32.totalorder %s4729_s6, %s5294_s27 }
 0x293   : > { %p4731_p0 = pnand %p4730_p9, %p4993_p10 }
 0x294   : > { %p4736_p8 = por %p4735_p4, %p4734_p6 }
 0x295   : > { %p4732_p11 = pneg %p4731_p0 }
 0x296   : > { %p4738_p5 = por %p4737_p3, %p4736_p8 }
 0x298   : > { %p4739_p7 = pnand %p4738_p5, %p4732_p11 }
 0x29a   : > { %4742 = shalt.err (!%p4739_p7)
}
 0x29b   : > { %s4801_s10 = smov 64   ;;  %s4802_s8 = smov 4  }
 0x29c   : > { %4242 = dma.vmem_to_hbm [thread:$0]  (%p4993_p10), %s5296_s12, 256, %s5294_s27, %s3332_s7, %s4801_s10, %s4801_s10, %s4802_s8  }
 0x29d PF: > { %s3360_s13 = sand.u32 1, %s4777_s18   ;;  %p5363_p12 = scmp.ne.s32.totalorder %s5350_s25, 0 }
 0x29e   : > { %p5364_p2 = scmp.ge.s32.totalorder %s4789_s21, 2  ;;  %s3361_s9 = scalar_lea.sflag [#allocation4], %s3360_s13 }
 0x2a0   : > { %p4262_p1 = pnand %p5364_p2, %p5363_p12 }
 0x2a2   : > { %4772 = dma.done.wait (!%p4262_p1), %s3361_s9, 256  }
 0x2a3   : > { %4774 = vsyncadd (!%p4262_p1), %s3361_s9, 4294967040  ;;  %p20_p13 = scmp.ge.s32.totalorder %s4983_s14, 4   ;;  %s5365_s18 = smov %s4781_s19 }
 0x2a4   : > { %s5366_s19 = smov %s4785_s20  ;;  %s5367_s20 = smov %s4999_s17 }
 0x2a5   : > { %s5368_s21 = smov %s4983_s14  ;;  %22 = sbr.rel (!%p20_p13) target bundleno = 7 (0x7), region = 104 }
 0x2ac   :  { %3366 = vsyncpa [#allocation3], 1 }
 0x2ad   :  { %3368 = vsyncpa [#allocation3 + $0x1], 1 }
 0x2ae   :  { %3369 = vsyncpa [#allocation6], 1 }
 0x2af   :  { %3370 = vsyncpa [#allocation9], 1 }
 0x2b0   :  { %3371 = vsyncpa [#allocation4], 1 }
 0x2b1   :  { %3373 = vsyncpa [#allocation4 + $0x1], 1 }

// kernel: cnn_lstm_forward.9
= control target key start
LH: loop header
LB: loop body
LE: loop exit
PB: predicated region body
PF: predicated region fallthrough
CT: control target
= control target key end

     0   :  { %8 = vsyncpa [#allocation4], 0  ;;  %s1644_s0 = inlined_call_operand.hbm [shape: bf16[16,512], index: 0, kind: input, shape index: {}]   ;;  %s1645_s1 = inlined_call_operand.hbm [shape: bf16[512,512], index: 1, kind: input, shape index: {}]   ;;  %s1646_s2 = inlined_call_operand.hbm [shape: f32[1,512], index: 2, kind: input, shape index: {}]   ;;  %s1647_s3 = inlined_call_operand.hbm [shape: f32[16,512], index: 3, kind: output, shape index: {}]  }
   0x1   :  { %9 = vsyncpa [#allocation7], 0 }
   0x2   :  { %10 = vsyncpa [#allocation5], 0  ;;  %s1561_s12 = smov [#allocation6]   ;;  %s1562_s14 = smov [#allocation3]  }
   0x3   :  { %s28_s13 = sshll.u32 %s1561_s12, 4  ;;  %s16_s15 = sshll.u32 %s1562_s14, 4  ;;  %s29_s13 = int_to_ptr.vmem [resolvable:$true] %s28_s13  ;;  %s1589_s15 = int_to_ptr.vmem [resolvable:$true] %s16_s15 }
   0x4   :  { %s1467_s18 = scalar_lea.hbm %s1645_s1, 16384 }
   0x5   :  { %p1468_p0 = scmp.ne.s32.totalorder %s1645_s1, %s1467_s18  ;;  %p1471_p1 = scmp.lt.u32.totalorder %s1467_s18, %s1645_s1 }
   0x7   :  { %p1473_p2 = pnand %p1471_p1, %p1468_p0 }
   0x9   :  { %1476 = shalt.err (!%p1473_p2)
}
   0xa   :  { %s1477_s23 = scalar_lea.vmem %s29_s13, 16384  ;;  %p1482_p4 = scmp.lt.s32.totalorder %s29_s13, %s29_s13 }
   0xb   :  { %p1478_p3 = scmp.ne.s32.totalorder %s29_s13, %s1477_s23  ;;  %p1483_p5 = scmp.lt.s32.totalorder %s1477_s23, %s1477_s23 }
   0xd   :  { %p1484_p6 = por %p1483_p5, %p1482_p4 }
   0xf   :  { %p1485_p7 = pnand %p1484_p6, %p1478_p3 }
  0x11   :  { %1488 = shalt.err (!%p1485_p7)
}
  0x12   :  { %s1563_s24 = smov 256   ;;  %s1564_s25 = smov 16  }
  0x13   :  { %34 = dma.hbm_to_vmem [thread:$0]  %s1645_s1, 16384, %s29_s13, [#allocation7], %s1563_s24, %s1563_s24, %s1564_s25  }
  0x14   :  { %s1489_s30 = scalar_lea.hbm %s1644_s0, 512 }
  0x15   :  { %p1490_p8 = scmp.ne.s32.totalorder %s1644_s0, %s1489_s30  ;;  %p1493_p9 = scmp.lt.u32.totalorder %s1489_s30, %s1644_s0 }
  0x17   :  { %p1495_p10 = pnand %p1493_p9, %p1490_p8 }
  0x19   :  { %1498 = shalt.err (!%p1495_p10)
}
  0x1a   :  { %s1499_s8 = scalar_lea.vmem %s1589_s15, 512  ;;  %p1504_p12 = scmp.lt.s32.totalorder %s1589_s15, %s1589_s15 }
  0x1b   :  { %p1500_p11 = scmp.ne.s32.totalorder %s1589_s15, %s1499_s8  ;;  %p1505_p13 = scmp.lt.s32.totalorder %s1499_s8, %s1499_s8 }
  0x1d   :  { %p1506_p0 = por %p1505_p13, %p1504_p12 }
  0x1f   :  { %p1507_p1 = pnand %p1506_p0, %p1500_p11 }
  0x21   :  { %1510 = shalt.err (!%p1507_p1)
}
  0x22   :  { %22 = dma.hbm_to_vmem [thread:$0]  %s1644_s0, 512, %s1589_s15, [#allocation4], %s1563_s24, %s1563_s24, %s1564_s25  }
  0x23   :  { %s1565_s10 = smov [#allocation8]   ;;  %s1511_s14 = scalar_lea.hbm %s1646_s2, 64 }
  0x24   :  { %s41_s11 = sshll.u32 %s1565_s10, 4  ;;  %p1512_p2 = scmp.ne.s32.totalorder %s1646_s2, %s1511_s14  ;;  %s42_s11 = int_to_ptr.vmem [resolvable:$true] %s41_s11 }
  0x25   :  { %p1515_p3 = scmp.lt.u32.totalorder %s1511_s14, %s1646_s2 }
  0x27   :  { %p1517_p4 = pnand %p1515_p3, %p1512_p2 }
  0x29   :  { %1520 = shalt.err (!%p1517_p4)
}
  0x2a   :  { %s1521_s20 = scalar_lea.vmem %s42_s11, 64  ;;  %p1526_p6 = scmp.lt.s32.totalorder %s42_s11, %s42_s11 }
  0x2b   :  { %p1522_p5 = scmp.ne.s32.totalorder %s42_s11, %s1521_s20  ;;  %p1527_p7 = scmp.lt.s32.totalorder %s1521_s20, %s1521_s20 }
  0x2d   :  { %p1528_p8 = por %p1527_p7, %p1526_p6 }
  0x2f   :  { %p1529_p9 = pnand %p1528_p8, %p1522_p5 }
  0x31   :  { %1532 = shalt.err (!%p1529_p9)
}
  0x32   :  { %44 = dma.hbm_to_vmem [thread:$0]  %s1646_s2, 64, %s42_s11, [#allocation7]  }
  0x33   :  { %1555 = dma.done.wait [#allocation4], 512  }
  0x34   :  { %1556 = vsyncadd [#allocation4], 4294966784 }
  0x35   :  { %1557 = dma.done.wait [#allocation7], 16448  }
  0x36   :  { %1558 = vsyncadd [#allocation7], 4294950848  ;;  %v1269_v0 = vld [vmem:[#allocation6 + $0x4] ss:$16 sps:$4 sm:$0xff]   ;;  %v1271_v1 = vld [vmem:[#allocation6 + $0xc] ss:$16 sps:$4 sm:$0xff]  }
  0x37   :  { %866 = vmatprep.subr.bf16.mxu0 %v1269_v0  ;;  %v1273_v2 = vld [vmem:[#allocation6] ss:$16 sps:$4 sm:$0xff]   ;;  %v1274_v3 = vld [vmem:[#allocation6 + $0x8] ss:$16 sps:$4 sm:$0xff]   ;;  %952 = vmatprep.subr.bf16.mxu1 %v1271_v1  ;;  %v1275_v4 = vld [vmem:[#allocation6 + $0x24] ss:$16 sps:$4 sm:$0xff]  }
  0x38   :  { %867 = vmatpush1.bf16.msra.mxu0 %v1273_v2  ;;  %953 = vmatpush1.bf16.msra.mxu1 %v1274_v3  ;;  %v1277_v5 = vld [vmem:[#allocation6 + $0x2c] ss:$16 sps:$4 sm:$0xff]   ;;  %v1279_v6 = vld [vmem:[#allocation6 + $0x20] ss:$16 sps:$4 sm:$0xff]   ;;  %v1280_v7 = vld [vmem:[#allocation6 + $0x28] ss:$16 sps:$4 sm:$0xff]  }
  0x39   :  { %868 = vmatprep.subr.bf16.mxu0 %v1275_v4  ;;  %954 = vmatprep.subr.bf16.mxu1 %v1277_v5  ;;  %v1281_v8 = vld [vmem:[#allocation6 + $0x44] ss:$16 sps:$4 sm:$0xff]   ;;  %v1283_v9 = vld [vmem:[#allocation6 + $0x4c] ss:$16 sps:$4 sm:$0xff]   ;;  %v1285_v10 = vld [vmem:[#allocation6 + $0x40] ss:$16 sps:$4 sm:$0xff]  }
  0x3a   :  { %v1286_v11 = vld [vmem:[#allocation6 + $0x48] ss:$16 sps:$4 sm:$0xff]   ;;  %v1287_v12 = vld [vmem:[#allocation6 + $0x64] ss:$16 sps:$4 sm:$0xff]   ;;  %v1289_v13 = vld [vmem:[#allocation6 + $0x6c] ss:$16 sps:$4 sm:$0xff]  }
  0x3b   :  { %v1291_v14 = vld [vmem:[#allocation6 + $0x60] ss:$16 sps:$4 sm:$0xff]   ;;  %v1292_v15 = vld [vmem:[#allocation6 + $0x68] ss:$16 sps:$4 sm:$0xff]   ;;  %v1293_v16 = vld [vmem:[#allocation6 + $0x84] ss:$16 sps:$4 sm:$0xff]  }
  0x3c   :  { %869 = vmatpush1.bf16.msra.mxu0 %v1279_v6  ;;  %955 = vmatpush1.bf16.msra.mxu1 %v1280_v7  ;;  %v1295_v17 = vld [vmem:[#allocation6 + $0x8c] ss:$16 sps:$4 sm:$0xff]   ;;  %v1297_v18 = vld [vmem:[#allocation6 + $0x80] ss:$16 sps:$4 sm:$0xff]   ;;  %v1298_v19 = vld [vmem:[#allocation6 + $0x88] ss:$16 sps:$4 sm:$0xff]  }
  0x3d   :  { %870 = vmatprep.subr.bf16.mxu0 %v1281_v8  ;;  %956 = vmatprep.subr.bf16.mxu1 %v1283_v9  ;;  %v1299_v20 = vld [vmem:[#allocation6 + $0xa4] ss:$16 sps:$4 sm:$0xff]   ;;  %v1301_v21 = vld [vmem:[#allocation6 + $0xac] ss:$16 sps:$4 sm:$0xff]   ;;  %v1303_v22 = vld [vmem:[#allocation6 + $0xa0] ss:$16 sps:$4 sm:$0xff]  }
  0x3e   :  { %v1304_v23 = vld [vmem:[#allocation6 + $0xa8] ss:$16 sps:$4 sm:$0xff]   ;;  %v1305_v24 = vld [vmem:[#allocation6 + $0xc4] ss:$16 sps:$4 sm:$0xff]   ;;  %v1307_v25 = vld [vmem:[#allocation6 + $0xcc] ss:$16 sps:$4 sm:$0xff]  }
  0x3f   :  { %v1309_v26 = vld [vmem:[#allocation6 + $0xc0] ss:$16 sps:$4 sm:$0xff]   ;;  %v1310_v27 = vld [vmem:[#allocation6 + $0xc8] ss:$16 sps:$4 sm:$0xff]   ;;  %v1311_v28 = vld [vmem:[#allocation6 + $0xe4] ss:$16 sps:$4 sm:$0xff]  }
  0x40   :  { %871 = vmatpush1.bf16.msra.mxu0 %v1285_v10  ;;  %957 = vmatpush1.bf16.msra.mxu1 %v1286_v11  ;;  %v1313_v29 = vld [vmem:[#allocation6 + $0xec] ss:$16 sps:$4 sm:$0xff]   ;;  %v1315_v30 = vld [vmem:[#allocation6 + $0xe0] ss:$16 sps:$4 sm:$0xff]   ;;  %v1316_v31 = vld [vmem:[#allocation6 + $0xe8] ss:$16 sps:$4 sm:$0xff]  }
  0x41   :  { %872 = vmatprep.subr.bf16.mxu0 %v1287_v12  ;;  %958 = vmatprep.subr.bf16.mxu1 %v1289_v13  ;;  %v1317_v32 = vld [vmem:[#allocation6 + $0x104] ss:$16 sps:$4 sm:$0xff]   ;;  %v1319_v33 = vld [vmem:[#allocation6 + $0x10c] ss:$16 sps:$4 sm:$0xff]   ;;  %v1321_v34 = vld [vmem:[#allocation6 + $0x100] ss:$16 sps:$4 sm:$0xff]  }
  0x42   :  { %v1322_v35 = vld [vmem:[#allocation6 + $0x108] ss:$16 sps:$4 sm:$0xff]   ;;  %v1323_v36 = vld [vmem:[#allocation6 + $0x124] ss:$16 sps:$4 sm:$0xff]   ;;  %v1325_v37 = vld [vmem:[#allocation6 + $0x12c] ss:$16 sps:$4 sm:$0xff]  }
  0x43   :  { %v1327_v38 = vld [vmem:[#allocation6 + $0x120] ss:$16 sps:$4 sm:$0xff]   ;;  %v1328_v39 = vld [vmem:[#allocation6 + $0x128] ss:$16 sps:$4 sm:$0xff]   ;;  %v1329_v40 = vld [vmem:[#allocation6 + $0x144] ss:$16 sps:$4 sm:$0xff]  }
  0x44   :  { %873 = vmatpush1.bf16.msra.mxu0 %v1291_v14  ;;  %959 = vmatpush1.bf16.msra.mxu1 %v1292_v15  ;;  %v1331_v41 = vld [vmem:[#allocation6 + $0x14c] ss:$16 sps:$4 sm:$0xff]   ;;  %v1333_v42 = vld [vmem:[#allocation6 + $0x140] ss:$16 sps:$4 sm:$0xff]   ;;  %v1334_v43 = vld [vmem:[#allocation6 + $0x148] ss:$16 sps:$4 sm:$0xff]  }
  0x45   :  { %874 = vmatprep.subr.bf16.mxu0 %v1293_v16  ;;  %960 = vmatprep.subr.bf16.mxu1 %v1295_v17  ;;  %v1335_v44 = vld [vmem:[#allocation6 + $0x164] ss:$16 sps:$4 sm:$0xff]   ;;  %v1337_v45 = vld [vmem:[#allocation6 + $0x16c] ss:$16 sps:$4 sm:$0xff]   ;;  %v1339_v46 = vld [vmem:[#allocation6 + $0x160] ss:$16 sps:$4 sm:$0xff]  }
  0x46   :  { %v1340_v47 = vld [vmem:[#allocation6 + $0x168] ss:$16 sps:$4 sm:$0xff]   ;;  %v1367_v48 = vld [vmem:[#allocation3 + $0x4] ss:$16 sps:$4 sm:$0xff]   ;;  %v1343_v50 = vld [vmem:[#allocation6 + $0x18c] ss:$16 sps:$4 sm:$0xff]  }
  0x47   :  { %v1341_v49 = vld [vmem:[#allocation6 + $0x184] ss:$16 sps:$4 sm:$0xff]   ;;  %898 = vmatprep.mubr.bf16.mxu0 %v1367_v48  ;;  %984 = vmatprep.mubr.bf16.mxu1 %v1367_v48  ;;  %v1345_v51 = vld [vmem:[#allocation6 + $0x180] ss:$16 sps:$4 sm:$0xff]   ;;  %v1346_v52 = vld [vmem:[#allocation6 + $0x188] ss:$16 sps:$4 sm:$0xff]  }
  0x48   :  { %875 = vmatpush1.bf16.msra.mxu0 %v1297_v18  ;;  %961 = vmatpush1.bf16.msra.mxu1 %v1298_v19  ;;  %v1347_v53 = vld [vmem:[#allocation6 + $0x1a4] ss:$16 sps:$4 sm:$0xff]   ;;  %v1349_v54 = vld [vmem:[#allocation6 + $0x1ac] ss:$16 sps:$4 sm:$0xff]   ;;  %v1351_v55 = vld [vmem:[#allocation6 + $0x1a0] ss:$16 sps:$4 sm:$0xff]  }
  0x49   :  { %876 = vmatprep.subr.bf16.mxu0 %v1299_v20  ;;  %962 = vmatprep.subr.bf16.mxu1 %v1301_v21  ;;  %v1352_v56 = vld [vmem:[#allocation6 + $0x1a8] ss:$16 sps:$4 sm:$0xff]   ;;  %v1353_v57 = vld [vmem:[#allocation6 + $0x1c4] ss:$16 sps:$4 sm:$0xff]   ;;  %v1355_v58 = vld [vmem:[#allocation6 + $0x1cc] ss:$16 sps:$4 sm:$0xff]  }
  0x4a   :  { %v1357_v59 = vld [vmem:[#allocation6 + $0x1c0] ss:$16 sps:$4 sm:$0xff]   ;;  %v1358_v60 = vld [vmem:[#allocation6 + $0x1c8] ss:$16 sps:$4 sm:$0xff]   ;;  %v1359_v61 = vld [vmem:[#allocation6 + $0x1e4] ss:$16 sps:$4 sm:$0xff]  }
  0x4b   :  { %v1361_v62 = vld [vmem:[#allocation6 + $0x1ec] ss:$16 sps:$4 sm:$0xff]   ;;  %v1363_v63 = vld [vmem:[#allocation6 + $0x1e0] ss:$16 sps:$4 sm:$0xff]   ;;  %v1364_v0 = vld [vmem:[#allocation6 + $0x1e8] ss:$16 sps:$4 sm:$0xff]  }
  0x4c   :  { %877 = vmatpush1.bf16.msra.mxu0 %v1303_v22  ;;  %963 = vmatpush1.bf16.msra.mxu1 %v1304_v23  ;;  %v1370_v1 = vld [vmem:[#allocation6 + $0x204] ss:$16 sps:$4 sm:$0xff]   ;;  %v1373_v2 = vld [vmem:[#allocation6 + $0x20c] ss:$16 sps:$4 sm:$0xff]   ;;  %v1365_v3 = vld [vmem:[#allocation3] ss:$16 sps:$4 sm:$0xff]  }
  0x4d   :  { %878 = vmatprep.subr.bf16.mxu0 %v1305_v24  ;;  %964 = vmatprep.subr.bf16.mxu1 %v1307_v25  ;;  %v1368_v4 = vld [vmem:[#allocation6 + $0x200] ss:$16 sps:$4 sm:$0xff]   ;;  %v1371_v5 = vld [vmem:[#allocation6 + $0x208] ss:$16 sps:$4 sm:$0xff]   ;;  %v1376_v6 = vld [vmem:[#allocation6 + $0x224] ss:$16 sps:$4 sm:$0xff]  }
  0x4e   :  { %v1379_v7 = vld [vmem:[#allocation6 + $0x22c] ss:$16 sps:$4 sm:$0xff]   ;;  %v1374_v8 = vld [vmem:[#allocation6 + $0x220] ss:$16 sps:$4 sm:$0xff]   ;;  %v1377_v9 = vld [vmem:[#allocation6 + $0x228] ss:$16 sps:$4 sm:$0xff]  }
  0x4f   :  { %v1382_v10 = vld [vmem:[#allocation6 + $0x244] ss:$16 sps:$4 sm:$0xff]   ;;  %v1385_v11 = vld [vmem:[#allocation6 + $0x24c] ss:$16 sps:$4 sm:$0xff]   ;;  %v1380_v12 = vld [vmem:[#allocation6 + $0x240] ss:$16 sps:$4 sm:$0xff]  }
  0x50   :  { %879 = vmatpush1.bf16.msra.mxu0 %v1309_v26  ;;  %965 = vmatpush1.bf16.msra.mxu1 %v1310_v27  ;;  %v1383_v13 = vld [vmem:[#allocation6 + $0x248] ss:$16 sps:$4 sm:$0xff]   ;;  %v1388_v14 = vld [vmem:[#allocation6 + $0x264] ss:$16 sps:$4 sm:$0xff]   ;;  %v1391_v15 = vld [vmem:[#allocation6 + $0x26c] ss:$16 sps:$4 sm:$0xff]  }
  0x51   :  { %880 = vmatprep.subr.bf16.mxu0 %v1311_v28  ;;  %966 = vmatprep.subr.bf16.mxu1 %v1313_v29  ;;  %v1386_v16 = vld [vmem:[#allocation6 + $0x260] ss:$16 sps:$4 sm:$0xff]   ;;  %v1389_v17 = vld [vmem:[#allocation6 + $0x268] ss:$16 sps:$4 sm:$0xff]   ;;  %v1394_v18 = vld [vmem:[#allocation6 + $0x284] ss:$16 sps:$4 sm:$0xff]  }
  0x52   :  { %v1397_v19 = vld [vmem:[#allocation6 + $0x28c] ss:$16 sps:$4 sm:$0xff]   ;;  %v1392_v20 = vld [vmem:[#allocation6 + $0x280] ss:$16 sps:$4 sm:$0xff]   ;;  %v1395_v21 = vld [vmem:[#allocation6 + $0x288] ss:$16 sps:$4 sm:$0xff]  }
  0x53   :  { %v1400_v22 = vld [vmem:[#allocation6 + $0x2a4] ss:$16 sps:$4 sm:$0xff]   ;;  %v1403_v23 = vld [vmem:[#allocation6 + $0x2ac] ss:$16 sps:$4 sm:$0xff]   ;;  %v1398_v24 = vld [vmem:[#allocation6 + $0x2a0] ss:$16 sps:$4 sm:$0xff]  }
  0x54   :  { %881 = vmatpush1.bf16.msra.mxu0 %v1315_v30  ;;  %967 = vmatpush1.bf16.msra.mxu1 %v1316_v31  ;;  %v1401_v25 = vld [vmem:[#allocation6 + $0x2a8] ss:$16 sps:$4 sm:$0xff]   ;;  %v1406_v26 = vld [vmem:[#allocation6 + $0x2c4] ss:$16 sps:$4 sm:$0xff]   ;;  %v1409_v27 = vld [vmem:[#allocation6 + $0x2cc] ss:$16 sps:$4 sm:$0xff]  }
  0x55   :  { %882 = vmatprep.subr.bf16.mxu0 %v1317_v32  ;;  %968 = vmatprep.subr.bf16.mxu1 %v1319_v33  ;;  %v1466_v28 = vld [vmem:[#allocation3 + $0xc] ss:$16 sps:$4 sm:$0xff]   ;;  %v1404_v29 = vld [vmem:[#allocation6 + $0x2c0] ss:$16 sps:$4 sm:$0xff]   ;;  %v1407_v30 = vld [vmem:[#allocation6 + $0x2c8] ss:$16 sps:$4 sm:$0xff]  }
  0x56   :  { %v1412_v31 = vld [vmem:[#allocation6 + $0x2e4] ss:$16 sps:$4 sm:$0xff]   ;;  %v1415_v32 = vld [vmem:[#allocation6 + $0x2ec] ss:$16 sps:$4 sm:$0xff]   ;;  %v1410_v33 = vld [vmem:[#allocation6 + $0x2e0] ss:$16 sps:$4 sm:$0xff]  }
  0x57   :  { %v1439_v48 = vld [vmem:[#allocation6 + $0x36c] ss:$16 sps:$4 sm:$0xff]   ;;  %s1566_s2 = smov [#allocation9]  }
  0x58   :  { %883 = vmatpush1.bf16.msra.mxu0 %v1321_v34  ;;  %969 = vmatpush1.bf16.msra.mxu1 %v1322_v35  ;;  %v1413_v34 = vld [vmem:[#allocation6 + $0x2e8] ss:$16 sps:$4 sm:$0xff]   ;;  %v1418_v35 = vld [vmem:[#allocation6 + $0x304] ss:$16 sps:$4 sm:$0xff]   ;;  %s1108_s21 = sshll.u32 %s1566_s2, 4  ;;  %s1109_s21 = int_to_ptr.vmem [resolvable:$true] %s1108_s21 }
  0x59   :  { %884 = vmatprep.subr.bf16.mxu0 %v1323_v36  ;;  %970 = vmatprep.subr.bf16.mxu1 %v1325_v37  ;;  %v1421_v36 = vld [vmem:[#allocation6 + $0x30c] ss:$16 sps:$4 sm:$0xff]   ;;  %v1416_v37 = vld [vmem:[#allocation6 + $0x300] ss:$16 sps:$4 sm:$0xff]   ;;  %s1533_s22 = scalar_lea.vmem %s1109_s21, 1024  ;;  %p1538_p11 = scmp.lt.s32.totalorder %s1109_s21, %s1109_s21 }
  0x5a   :  { %p1534_p10 = scmp.ne.s32.totalorder %s1109_s21, %s1533_s22  ;;  %p1539_p12 = scmp.lt.s32.totalorder %s1533_s22, %s1533_s22 }
  0x5c   :  { %885 = vmatpush1.bf16.msra.mxu0 %v1327_v38  ;;  %971 = vmatpush1.bf16.msra.mxu1 %v1328_v39  ;;  %v1419_v38 = vld [vmem:[#allocation6 + $0x308] ss:$16 sps:$4 sm:$0xff]   ;;  %v1424_v39 = vld [vmem:[#allocation6 + $0x324] ss:$16 sps:$4 sm:$0xff]   ;;  %p1540_p13 = por %p1539_p12, %p1538_p11 }
  0x5d   :  { %886 = vmatprep.subr.bf16.mxu0 %v1329_v40  ;;  %972 = vmatprep.subr.bf16.mxu1 %v1331_v41  ;;  %v1427_v40 = vld [vmem:[#allocation6 + $0x32c] ss:$16 sps:$4 sm:$0xff]   ;;  %v1422_v41 = vld [vmem:[#allocation6 + $0x320] ss:$16 sps:$4 sm:$0xff]  }
  0x5e   :  { %p1541_p0 = pnand %p1540_p13, %p1534_p10 }
  0x60   :  { %887 = vmatpush1.bf16.msra.mxu0 %v1333_v42  ;;  %973 = vmatpush1.bf16.msra.mxu1 %v1334_v43  ;;  %v1425_v42 = vld [vmem:[#allocation6 + $0x328] ss:$16 sps:$4 sm:$0xff]   ;;  %v1430_v43 = vld [vmem:[#allocation6 + $0x344] ss:$16 sps:$4 sm:$0xff]  }
  0x61   :  { %888 = vmatprep.subr.bf16.mxu0 %v1335_v44  ;;  %974 = vmatprep.subr.bf16.mxu1 %v1337_v45  ;;  %v1433_v44 = vld [vmem:[#allocation6 + $0x34c] ss:$16 sps:$4 sm:$0xff]   ;;  %v1428_v45 = vld [vmem:[#allocation6 + $0x340] ss:$16 sps:$4 sm:$0xff]  }
  0x64   :  { %889 = vmatpush1.bf16.msra.mxu0 %v1339_v46  ;;  %975 = vmatpush1.bf16.msra.mxu1 %v1340_v47  ;;  %v1431_v46 = vld [vmem:[#allocation6 + $0x348] ss:$16 sps:$4 sm:$0xff]   ;;  %v1436_v47 = vld [vmem:[#allocation6 + $0x364] ss:$16 sps:$4 sm:$0xff]  }
  0x65   :  { %890 = vmatprep.subr.bf16.mxu0 %v1341_v49  ;;  %976 = vmatprep.subr.bf16.mxu1 %v1343_v50  ;;  %v1434_v49 = vld [vmem:[#allocation6 + $0x360] ss:$16 sps:$4 sm:$0xff]   ;;  %v1437_v50 = vld [vmem:[#allocation6 + $0x368] ss:$16 sps:$4 sm:$0xff]  }
  0x68   :  { %891 = vmatpush1.bf16.msra.mxu0 %v1345_v51  ;;  %977 = vmatpush1.bf16.msra.mxu1 %v1346_v52  ;;  %v1442_v51 = vld [vmem:[#allocation6 + $0x384] ss:$16 sps:$4 sm:$0xff]   ;;  %v1445_v52 = vld [vmem:[#allocation6 + $0x38c] ss:$16 sps:$4 sm:$0xff]  }
  0x69   :  { %892 = vmatprep.subr.bf16.mxu0 %v1347_v53  ;;  %978 = vmatprep.subr.bf16.mxu1 %v1349_v54  ;;  %v1440_v53 = vld [vmem:[#allocation6 + $0x380] ss:$16 sps:$4 sm:$0xff]   ;;  %v1443_v54 = vld [vmem:[#allocation6 + $0x388] ss:$16 sps:$4 sm:$0xff]  }
  0x6c   :  { %893 = vmatpush1.bf16.msra.mxu0 %v1351_v55  ;;  %979 = vmatpush1.bf16.msra.mxu1 %v1352_v56  ;;  %v1448_v55 = vld [vmem:[#allocation6 + $0x3a4] ss:$16 sps:$4 sm:$0xff]   ;;  %v1451_v56 = vld [vmem:[#allocation6 + $0x3ac] ss:$16 sps:$4 sm:$0xff]  }
  0x6d   :  { %894 = vmatprep.subr.bf16.mxu0 %v1353_v57  ;;  %980 = vmatprep.subr.bf16.mxu1 %v1355_v58  ;;  %v1446_v57 = vld [vmem:[#allocation6 + $0x3a0] ss:$16 sps:$4 sm:$0xff]   ;;  %v1449_v58 = vld [vmem:[#allocation6 + $0x3a8] ss:$16 sps:$4 sm:$0xff]  }
  0x70   :  { %895 = vmatpush1.bf16.msra.mxu0 %v1357_v59  ;;  %981 = vmatpush1.bf16.msra.mxu1 %v1358_v60  ;;  %v1454_v59 = vld [vmem:[#allocation6 + $0x3c4] ss:$16 sps:$4 sm:$0xff]   ;;  %v1457_v60 = vld [vmem:[#allocation6 + $0x3cc] ss:$16 sps:$4 sm:$0xff]  }
  0x71   :  { %896 = vmatprep.subr.bf16.mxu0 %v1359_v61  ;;  %982 = vmatprep.subr.bf16.mxu1 %v1361_v62  ;;  %v1452_v61 = vld [vmem:[#allocation6 + $0x3c0] ss:$16 sps:$4 sm:$0xff]   ;;  %v1455_v62 = vld [vmem:[#allocation6 + $0x3c8] ss:$16 sps:$4 sm:$0xff]  }
  0x74   :  { %897 = vmatpush1.bf16.msra.mxu0 %v1363_v63  ;;  %983 = vmatpush1.bf16.msra.mxu1 %v1364_v0  ;;  %v1460_v63 = vld [vmem:[#allocation6 + $0x3e4] ss:$16 sps:$4 sm:$0xff]   ;;  %v1463_v0 = vld [vmem:[#allocation6 + $0x3ec] ss:$16 sps:$4 sm:$0xff]  }
  0x75   :  { %909 = vmatprep.subr.bf16.mxu0 %v1370_v1  ;;  %995 = vmatprep.subr.bf16.mxu1 %v1373_v2  ;;  %v1458_v1 = vld [vmem:[#allocation6 + $0x3e0] ss:$16 sps:$4 sm:$0xff]   ;;  %v1461_v2 = vld [vmem:[#allocation6 + $0x3e8] ss:$16 sps:$4 sm:$0xff]  }
  0x77   :  { %899 = vmatmul.mubr.bf16.vlgmr.msra.gmra.mrb[0].mxu0 %v1365_v3  ;;  %985 = vmatmul.mubr.bf16.vlgmr.msra.gmra.mrb[0].mxu1 %v1365_v3  ;;  %v1464_v3 = vld [vmem:[#allocation3 + $0x8] ss:$16 sps:$4 sm:$0xff]  }
  0x78   :  { %910 = vmatpush1.bf16.msra.mxu0 %v1368_v4  ;;  %996 = vmatpush1.bf16.msra.mxu1 %v1371_v5  ;;  %v1067_v4 = vlaneseq }
  0x79   :  { %911 = vmatprep.subr.bf16.mxu0 %v1376_v6  ;;  %997 = vmatprep.subr.bf16.mxu1 %v1379_v7 }
  0x7a   :  { %941 = vmatprep.mubr.bf16.mxu0 %v1466_v28  ;;  %1027 = vmatprep.mubr.bf16.mxu1 %v1466_v28  ;;  %v1068_v5 = vshrl.u32 %v1067_v4, 7 }
  0x7c   :  { %912 = vmatpush1.bf16.msra.mxu0 %v1374_v8  ;;  %998 = vmatpush1.bf16.msra.mxu1 %v1377_v9  ;;  %v1069_v6 = vsub.s32 0, %v1068_v5  ;;  %v1077_v7 = vsub.s32 2, %v1068_v5  ;;  %v1065_v8 = vld [vmem:[#allocation8] sm:$0xf]  ;;  %v1073_v9 = vsub.s32 1, %v1068_v5 }
  0x7d   :  { %913 = vmatprep.subr.bf16.mxu0 %v1382_v10  ;;  %999 = vmatprep.subr.bf16.mxu1 %v1385_v11  ;;  %v1081_v10 = vsub.s32 3, %v1068_v5 }
  0x7e   :  { %v1070_v11 = vrot.slane %v1065_v8, %v1069_v6 }
  0x80   :  { %914 = vmatpush1.bf16.msra.mxu0 %v1380_v12  ;;  %1000 = vmatpush1.bf16.msra.mxu1 %v1383_v13  ;;  %v1078_v12 = vrot.slane %v1065_v8, %v1077_v7  ;;  %v1074_v13 = vrot.slane %v1065_v8, %v1073_v9 }
  0x81   :  { %915 = vmatprep.subr.bf16.mxu0 %v1388_v14  ;;  %1001 = vmatprep.subr.bf16.mxu1 %v1391_v15  ;;  %v1082_v14 = vrot.slane %v1065_v8, %v1081_v10 }
  0x84   :  { %916 = vmatpush1.bf16.msra.mxu0 %v1386_v16  ;;  %1002 = vmatpush1.bf16.msra.mxu1 %v1389_v17 }
  0x85   :  { %917 = vmatprep.subr.bf16.mxu0 %v1394_v18  ;;  %1003 = vmatprep.subr.bf16.mxu1 %v1397_v19 }
  0x88   :  { %918 = vmatpush1.bf16.msra.mxu0 %v1392_v20  ;;  %1004 = vmatpush1.bf16.msra.mxu1 %v1395_v21 }
  0x89   :  { %919 = vmatprep.subr.bf16.mxu0 %v1400_v22  ;;  %1005 = vmatprep.subr.bf16.mxu1 %v1403_v23 }
  0x8c   :  { %920 = vmatpush1.bf16.msra.mxu0 %v1398_v24  ;;  %1006 = vmatpush1.bf16.msra.mxu1 %v1401_v25 }
  0x8d   :  { %921 = vmatprep.subr.bf16.mxu0 %v1406_v26  ;;  %1007 = vmatprep.subr.bf16.mxu1 %v1409_v27 }
  0x90   :  { %922 = vmatpush1.bf16.msra.mxu0 %v1404_v29  ;;  %1008 = vmatpush1.bf16.msra.mxu1 %v1407_v30 }
  0x91   :  { %923 = vmatprep.subr.bf16.mxu0 %v1412_v31  ;;  %1009 = vmatprep.subr.bf16.mxu1 %v1415_v32 }
  0x94   :  { %924 = vmatpush1.bf16.msra.mxu0 %v1410_v33  ;;  %1010 = vmatpush1.bf16.msra.mxu1 %v1413_v34 }
  0x95   :  { %925 = vmatprep.subr.bf16.mxu0 %v1418_v35  ;;  %1011 = vmatprep.subr.bf16.mxu1 %v1421_v36 }
  0x98   :  { %926 = vmatpush1.bf16.msra.mxu0 %v1416_v37  ;;  %1012 = vmatpush1.bf16.msra.mxu1 %v1419_v38 }
  0x99   :  { %927 = vmatprep.subr.bf16.mxu0 %v1424_v39  ;;  %1013 = vmatprep.subr.bf16.mxu1 %v1427_v40 }
  0x9c   :  { %928 = vmatpush1.bf16.msra.mxu0 %v1422_v41  ;;  %1014 = vmatpush1.bf16.msra.mxu1 %v1425_v42 }
  0x9d   :  { %929 = vmatprep.subr.bf16.mxu0 %v1430_v43  ;;  %1015 = vmatprep.subr.bf16.mxu1 %v1433_v44 }
  0xa0   :  { %930 = vmatpush1.bf16.msra.mxu0 %v1428_v45  ;;  %1016 = vmatpush1.bf16.msra.mxu1 %v1431_v46 }
  0xa1   :  { %931 = vmatprep.subr.bf16.mxu0 %v1436_v47  ;;  %1017 = vmatprep.subr.bf16.mxu1 %v1439_v48 }
  0xa4   :  { %932 = vmatpush1.bf16.msra.mxu0 %v1434_v49  ;;  %1018 = vmatpush1.bf16.msra.mxu1 %v1437_v50 }
  0xa5   :  { %933 = vmatprep.subr.bf16.mxu0 %v1442_v51  ;;  %1019 = vmatprep.subr.bf16.mxu1 %v1445_v52 }
  0xa8   :  { %934 = vmatpush1.bf16.msra.mxu0 %v1440_v53  ;;  %1020 = vmatpush1.bf16.msra.mxu1 %v1443_v54 }
  0xa9   :  { %935 = vmatprep.subr.bf16.mxu0 %v1448_v55  ;;  %1021 = vmatprep.subr.bf16.mxu1 %v1451_v56 }
  0xac   :  { %936 = vmatpush1.bf16.msra.mxu0 %v1446_v57  ;;  %1022 = vmatpush1.bf16.msra.mxu1 %v1449_v58 }
  0xad   :  { %937 = vmatprep.subr.bf16.mxu0 %v1454_v59  ;;  %1023 = vmatprep.subr.bf16.mxu1 %v1457_v60 }
  0xb0   :  { %938 = vmatpush1.bf16.msra.mxu0 %v1452_v61  ;;  %1024 = vmatpush1.bf16.msra.mxu1 %v1455_v62 }
  0xb1   :  { %939 = vmatprep.subr.bf16.mxu0 %v1460_v63  ;;  %1025 = vmatprep.subr.bf16.mxu1 %v1463_v0 }
  0xb4   :  { %940 = vmatpush1.bf16.msra.mxu0 %v1458_v1  ;;  %1026 = vmatpush1.bf16.msra.mxu1 %v1461_v2 }
  0xb7   :  { %942 = vmatmul.mubr.bf16.vlgmr.msra.gmra.mrb[0].mxu0 %v1464_v3  ;;  %1028 = vmatmul.mubr.bf16.vlgmr.msra.gmra.mrb[0].mxu1 %v1464_v3 }
 0x18a   :  { %v943_v15 = vpop.f32.mrb[0].mxu0  ;;  %v1029_v16 = vpop.f32.mrb[0].mxu1 }
 0x18b   :  { %v1087_v17 = vadd.f32 %v1070_v11, %v943_v15  ;;  %v1089_v18 = vadd.f32 %v1078_v12, %v1029_v16  ;;  %v945_v19 = vpop.f32.mrb[1].mxu0  ;;  %v1031_v20 = vpop.f32.mrb[1].mxu1 }
 0x18c   :  { %v1088_v21 = vadd.f32 %v1074_v13, %v945_v19  ;;  %v1090_v22 = vadd.f32 %v1082_v14, %v1031_v20  ;;  %v947_v23 = vpop.f32.mrb[2].mxu0  ;;  %v1033_v24 = vpop.f32.mrb[2].mxu1 }
 0x18d   :  { %1095 = vst [vmem:[#allocation9] sm:$0xff] %v1087_v17  ;;  %1097 = vst [vmem:[#allocation9 + $0x10] sm:$0xff] %v1089_v18  ;;  %v1091_v25 = vadd.f32 %v1070_v11, %v947_v23  ;;  %v1093_v26 = vadd.f32 %v1078_v12, %v1033_v24  ;;  %v949_v27 = vpop.f32.mrb[3].mxu0  ;;  %v1035_v28 = vpop.f32.mrb[3].mxu1 }
 0x18e   :  { %1096 = vst [vmem:[#allocation9 + $0x8] sm:$0xff] %v1088_v21  ;;  %1098 = vst [vmem:[#allocation9 + $0x18] sm:$0xff] %v1090_v22  ;;  %v1092_v29 = vadd.f32 %v1074_v13, %v949_v27  ;;  %v1094_v30 = vadd.f32 %v1082_v14, %v1035_v28 }
 0x18f   :  { %1099 = vst [vmem:[#allocation9 + $0x20] sm:$0xff] %v1091_v25  ;;  %1101 = vst [vmem:[#allocation9 + $0x30] sm:$0xff] %v1093_v26 }
 0x190   :  { %1100 = vst [vmem:[#allocation9 + $0x28] sm:$0xff] %v1092_v29  ;;  %1102 = vst [vmem:[#allocation9 + $0x38] sm:$0xff] %v1094_v30 }
 0x191   :  { %1544 = shalt.err (!%p1541_p0)
}
 0x192   :  { %s1545_s25 = scalar_lea.hbm %s1647_s3, 1024 }
 0x193   :  { %p1546_p1 = scmp.ne.s32.totalorder %s1647_s3, %s1545_s25  ;;  %p1549_p2 = scmp.lt.u32.totalorder %s1545_s25, %s1647_s3 }
 0x195   :  { %p1551_p3 = pnand %p1549_p2, %p1546_p1 }
 0x197   :  { %1554 = shalt.err (!%p1551_p3)
}
 0x198   :  { %s1567_s30 = smov 512   ;;  %s1568_s4 = smov 32  }
 0x199   :  { %1114 = dma.vmem_to_hbm [thread:$0]  %s1109_s21, 1024, %s1647_s3, [#allocation5], %s1567_s30, %s1567_s30, %s1568_s4  }
 0x19a   :  { %1559 = dma.done.wait [#allocation5], 1024  }
 0x19b   :  { %1560 = vsyncadd [#allocation5], 4294966272 }
 0x19c   :  { %1118 = vsyncpa [#allocation4], 1 }
 0x19d   :  { %1119 = vsyncpa [#allocation7], 1 }
 0x19e   :  { %1120 = vsyncpa [#allocation5], 1 }

// kernel: cnn_lstm_forward.10
= control target key start
LH: loop header
LB: loop body
LE: loop exit
PB: predicated region body
PF: predicated region fallthrough
CT: control target
= control target key end

     0   :  { %7 = vsyncpa [#allocation3], 0  ;;  %s2113_s0 = inlined_call_operand.hbm [shape: f32[8,2,512], index: 0, kind: input, shape index: {}]   ;;  %s2114_s1 = inlined_call_operand.hbm [shape: bf16[128,512], index: 1, kind: input, shape index: {}]   ;;  %s2115_s2 = inlined_call_operand.hbm [shape: f32[2,128], index: 2, kind: output, shape index: {}]  }
   0x1   :  { %8 = vsyncpa [#allocation6], 0 }
   0x2   :  { %9 = vsyncpa [#allocation4], 0  ;;  %s1705_s9 = smov [#allocation2]   ;;  %s1633_s13 = scalar_lea.hbm %s2113_s0, 1024 }
   0x3   :  { %s15_s10 = sshll.u32 %s1705_s9, 4  ;;  %p1634_p0 = scmp.ne.s32.totalorder %s2113_s0, %s1633_s13  ;;  %s16_s10 = int_to_ptr.vmem [resolvable:$true] %s15_s10 }
   0x4   :  { %p1637_p1 = scmp.lt.u32.totalorder %s1633_s13, %s2113_s0 }
   0x6   :  { %p1639_p2 = pnand %p1637_p1, %p1634_p0 }
   0x8   :  { %1642 = shalt.err (!%p1639_p2)
}
   0x9   :  { %s1643_s18 = scalar_lea.vmem %s16_s10, 1024  ;;  %p1648_p4 = scmp.lt.s32.totalorder %s16_s10, %s16_s10 }
   0xa   :  { %p1644_p3 = scmp.ne.s32.totalorder %s16_s10, %s1643_s18  ;;  %p1649_p5 = scmp.lt.s32.totalorder %s1643_s18, %s1643_s18 }
   0xc   :  { %p1650_p6 = por %p1649_p5, %p1648_p4 }
   0xe   :  { %p1651_p7 = pnand %p1650_p6, %p1644_p3 }
  0x10   :  { %1654 = shalt.err (!%p1651_p7)
}
  0x11   :  { %s1706_s19 = smov 128   ;;  %s1707_s20 = smov 8  }
  0x12   :  { %21 = dma.hbm_to_vmem [thread:$0]  %s2113_s0, 1024, %s16_s10, [#allocation3], %s1706_s19, %s1706_s19, %s1707_s20  }
  0x13   :  { %s1708_s23 = smov [#allocation5]   ;;  %s1655_s27 = scalar_lea.hbm %s2114_s1, 4096 }
  0x14   :  { %s27_s24 = sshll.u32 %s1708_s23, 4  ;;  %p1656_p8 = scmp.ne.s32.totalorder %s2114_s1, %s1655_s27  ;;  %s28_s24 = int_to_ptr.vmem [resolvable:$true] %s27_s24 }
  0x15   :  { %p1659_p9 = scmp.lt.u32.totalorder %s1655_s27, %s2114_s1 }
  0x17   :  { %p1661_p10 = pnand %p1659_p9, %p1656_p8 }
  0x19   :  { %1664 = shalt.err (!%p1661_p10)
}
  0x1a   :  { %s1665_s4 = scalar_lea.vmem %s28_s24, 4096  ;;  %p1670_p12 = scmp.lt.s32.totalorder %s28_s24, %s28_s24 }
  0x1b   :  { %p1666_p11 = scmp.ne.s32.totalorder %s28_s24, %s1665_s4  ;;  %p1671_p13 = scmp.lt.s32.totalorder %s1665_s4, %s1665_s4 }
  0x1d   :  { %p1672_p0 = por %p1671_p13, %p1670_p12 }
  0x1f   :  { %p1673_p1 = pnand %p1672_p0, %p1666_p11 }
  0x21   :  { %1676 = shalt.err (!%p1673_p1)
}
  0x22   :  { %s1709_s0 = smov 256   ;;  %s1710_s5 = smov 16  }
  0x23   :  { %33 = dma.hbm_to_vmem [thread:$0]  %s2114_s1, 4096, %s28_s24, [#allocation6], %s1709_s0, %s1709_s0, %s1710_s5  }
  0x24   :  { %1699 = dma.done.wait [#allocation3], 1024  }
  0x25   :  { %1700 = vsyncadd [#allocation3], 4294966272 }
  0x26   :  { %1701 = dma.done.wait [#allocation6], 4096  }
  0x27   :  { %1702 = vsyncadd [#allocation6], 4294963200  ;;  %v1711_v0 = vmov 0   ;;  %v1755_v1 = vld [vmem:[#allocation5 + $0x4] ss:$16 sps:$4 sm:$0xff]   ;;  %v325_v35 = vlaneseq  ;;  %s1713_s1 = smov [#allocation7]  }
  0x28   :  { %266 = vmatprep.mubr.bf16.mxu0 %v1711_v0  ;;  %307 = vmatprep.mubr.bf16.mxu1 %v1711_v0  ;;  %v1757_v2 = vld [vmem:[#allocation5 + $0xc] ss:$16 sps:$4 sm:$0xff]   ;;  %v1760_v3 = vld [vmem:[#allocation5] ss:$16 sps:$4 sm:$0xff]   ;;  %v1762_v4 = vld [vmem:[#allocation5 + $0x8] ss:$16 sps:$4 sm:$0xff]  }
  0x29   :  { %234 = vmatprep.subr.bf16.mxu0 %v1755_v1  ;;  %275 = vmatprep.subr.bf16.mxu1 %v1757_v2  ;;  %v1765_v5 = vld [vmem:[#allocation5 + $0x24] ss:$16 sps:$4 sm:$0xff]   ;;  %v1769_v6 = vld [vmem:[#allocation5 + $0x2c] ss:$16 sps:$4 sm:$0xff]   ;;  %v1771_v7 = vld [vmem:[#allocation5 + $0x20] ss:$16 sps:$4 sm:$0xff]  }
  0x2a   :  { %235 = vmatpush1.bf16.msra.mxu0 %v1760_v3  ;;  %276 = vmatpush1.bf16.msra.mxu1 %v1762_v4  ;;  %v1774_v8 = vld [vmem:[#allocation5 + $0x28] ss:$16 sps:$4 sm:$0xff]   ;;  %v1777_v9 = vld [vmem:[#allocation5 + $0x44] ss:$16 sps:$4 sm:$0xff]   ;;  %v1779_v10 = vld [vmem:[#allocation5 + $0x4c] ss:$16 sps:$4 sm:$0xff]  }
  0x2b   :  { %236 = vmatprep.subr.bf16.mxu0 %v1765_v5  ;;  %277 = vmatprep.subr.bf16.mxu1 %v1769_v6  ;;  %v1781_v11 = vld [vmem:[#allocation5 + $0x40] ss:$16 sps:$4 sm:$0xff]   ;;  %v1783_v12 = vld [vmem:[#allocation5 + $0x48] ss:$16 sps:$4 sm:$0xff]   ;;  %v1787_v13 = vld [vmem:[#allocation5 + $0x64] ss:$16 sps:$4 sm:$0xff]  }
  0x2c   :  { %v1791_v14 = vld [vmem:[#allocation5 + $0x6c] ss:$16 sps:$4 sm:$0xff]   ;;  %v1793_v15 = vld [vmem:[#allocation5 + $0x60] ss:$16 sps:$4 sm:$0xff]   ;;  %v1797_v16 = vld [vmem:[#allocation5 + $0x68] ss:$16 sps:$4 sm:$0xff]  }
  0x2d   :  { %v1799_v17 = vld [vmem:[#allocation5 + $0x84] ss:$16 sps:$4 sm:$0xff]   ;;  %v1803_v18 = vld [vmem:[#allocation5 + $0x8c] ss:$16 sps:$4 sm:$0xff]   ;;  %v1805_v19 = vld [vmem:[#allocation5 + $0x80] ss:$16 sps:$4 sm:$0xff]  }
  0x2e   :  { %237 = vmatpush1.bf16.msra.mxu0 %v1771_v7  ;;  %278 = vmatpush1.bf16.msra.mxu1 %v1774_v8  ;;  %v1807_v20 = vld [vmem:[#allocation5 + $0x88] ss:$16 sps:$4 sm:$0xff]   ;;  %v1811_v21 = vld [vmem:[#allocation5 + $0xa4] ss:$16 sps:$4 sm:$0xff]   ;;  %v1815_v22 = vld [vmem:[#allocation5 + $0xac] ss:$16 sps:$4 sm:$0xff]  }
  0x2f   :  { %238 = vmatprep.subr.bf16.mxu0 %v1777_v9  ;;  %279 = vmatprep.subr.bf16.mxu1 %v1779_v10  ;;  %v1819_v23 = vld [vmem:[#allocation5 + $0xa0] ss:$16 sps:$4 sm:$0xff]   ;;  %v1821_v24 = vld [vmem:[#allocation5 + $0xa8] ss:$16 sps:$4 sm:$0xff]   ;;  %v1825_v25 = vld [vmem:[#allocation5 + $0xc4] ss:$16 sps:$4 sm:$0xff]  }
  0x30   :  { %v1827_v26 = vld [vmem:[#allocation5 + $0xcc] ss:$16 sps:$4 sm:$0xff]   ;;  %v1831_v27 = vld [vmem:[#allocation5 + $0xc0] ss:$16 sps:$4 sm:$0xff]   ;;  %v1833_v28 = vld [vmem:[#allocation5 + $0xc8] ss:$16 sps:$4 sm:$0xff]  }
  0x31   :  { %v1837_v29 = vld [vmem:[#allocation5 + $0xe4] ss:$16 sps:$4 sm:$0xff]   ;;  %v1839_v30 = vld [vmem:[#allocation5 + $0xec] ss:$16 sps:$4 sm:$0xff]   ;;  %v1843_v31 = vld [vmem:[#allocation5 + $0xe0] ss:$16 sps:$4 sm:$0xff]  }
  0x32   :  { %239 = vmatpush1.bf16.msra.mxu0 %v1781_v11  ;;  %280 = vmatpush1.bf16.msra.mxu1 %v1783_v12  ;;  %v1845_v32 = vld [vmem:[#allocation5 + $0xe8] ss:$16 sps:$4 sm:$0xff]   ;;  %v1712_v33 = vmov 1983009808   ;;  %v326_v37 = vshrl.u32 %v325_v35, 7  ;;  %v73_v51 = vld [vmem:[#allocation2] sm:$0xff] }
  0x33   :  { %240 = vmatprep.subr.bf16.mxu0 %v1787_v13  ;;  %281 = vmatprep.subr.bf16.mxu1 %v1791_v14  ;;  %v323_v34 = vunpack.c.l.s4 %v1712_v33  ;;  %s1350_s8 = sshll.u32 %s1713_s1, 4  ;;  %s1351_s8 = int_to_ptr.vmem [resolvable:$true] %s1350_s8 }
  0x34   :  { %s1677_s9 = scalar_lea.vmem %s1351_s8, 32  ;;  %p1682_p3 = scmp.lt.s32.totalorder %s1351_s8, %s1351_s8 }
  0x35   :  { %v324_v36 = vunpack.c.0.s8 %v323_v34  ;;  %p1678_p2 = scmp.ne.s32.totalorder %s1351_s8, %s1677_s9  ;;  %p1683_p4 = scmp.lt.s32.totalorder %s1677_s9, %s1677_s9 }
  0x36   :  { %241 = vmatpush1.bf16.msra.mxu0 %v1793_v15  ;;  %282 = vmatpush1.bf16.msra.mxu1 %v1797_v16 }
  0x37   :  { %242 = vmatprep.subr.bf16.mxu0 %v1799_v17  ;;  %283 = vmatprep.subr.bf16.mxu1 %v1803_v18  ;;  %v1889_v40 = vsub.s32 %v324_v36, %v326_v37  ;;  %p1684_p5 = por %p1683_p4, %p1682_p3 }
  0x39   :  { %p1685_p6 = pnand %p1684_p5, %p1678_p2 }
  0x3a   :  { %243 = vmatpush1.bf16.msra.mxu0 %v1805_v19  ;;  %284 = vmatpush1.bf16.msra.mxu1 %v1807_v20 }
  0x3b   :  { %244 = vmatprep.subr.bf16.mxu0 %v1811_v21  ;;  %285 = vmatprep.subr.bf16.mxu1 %v1815_v22 }
  0x3e   :  { %245 = vmatpush1.bf16.msra.mxu0 %v1819_v23  ;;  %286 = vmatpush1.bf16.msra.mxu1 %v1821_v24 }
  0x3f   :  { %246 = vmatprep.subr.bf16.mxu0 %v1825_v25  ;;  %287 = vmatprep.subr.bf16.mxu1 %v1827_v26 }
  0x42   :  { %247 = vmatpush1.bf16.msra.mxu0 %v1831_v27  ;;  %288 = vmatpush1.bf16.msra.mxu1 %v1833_v28 }
  0x43   :  { %248 = vmatprep.subr.bf16.mxu0 %v1837_v29  ;;  %289 = vmatprep.subr.bf16.mxu1 %v1839_v30 }
  0x46   :  { %249 = vmatpush1.bf16.msra.mxu0 %v1843_v31  ;;  %290 = vmatpush1.bf16.msra.mxu1 %v1845_v32 }
  0x47   :  { %373 = vmatprep.subr.bf16.mxu0 %v1755_v1  ;;  %414 = vmatprep.subr.bf16.mxu1 %v1757_v2 }
  0x49   :  { %267 = vmatmul.mubr.bf16.vlgmr.msra.gmra.mrb[0].mxu0 %v1711_v0  ;;  %308 = vmatmul.mubr.bf16.vlgmr.msra.gmra.mrb[0].mxu1 %v1711_v0 }
  0x4a   :  { %374 = vmatpush1.bf16.msra.mxu0 %v1760_v3  ;;  %415 = vmatpush1.bf16.msra.mxu1 %v1762_v4 }
  0x4b   :  { %375 = vmatprep.subr.bf16.mxu0 %v1765_v5  ;;  %416 = vmatprep.subr.bf16.mxu1 %v1769_v6 }
  0x4c   :  { %405 = vmatprep.mubr.bf16.mxu0 %v1711_v0  ;;  %446 = vmatprep.mubr.bf16.mxu1 %v1711_v0 }
  0x4e   :  { %376 = vmatpush1.bf16.msra.mxu0 %v1771_v7  ;;  %417 = vmatpush1.bf16.msra.mxu1 %v1774_v8 }
  0x4f   :  { %377 = vmatprep.subr.bf16.mxu0 %v1777_v9  ;;  %418 = vmatprep.subr.bf16.mxu1 %v1779_v10 }
  0x52   :  { %378 = vmatpush1.bf16.msra.mxu0 %v1781_v11  ;;  %419 = vmatpush1.bf16.msra.mxu1 %v1783_v12 }
  0x53   :  { %379 = vmatprep.subr.bf16.mxu0 %v1787_v13  ;;  %420 = vmatprep.subr.bf16.mxu1 %v1791_v14 }
  0x56   :  { %380 = vmatpush1.bf16.msra.mxu0 %v1793_v15  ;;  %421 = vmatpush1.bf16.msra.mxu1 %v1797_v16 }
  0x57   :  { %381 = vmatprep.subr.bf16.mxu0 %v1799_v17  ;;  %422 = vmatprep.subr.bf16.mxu1 %v1803_v18 }
  0x5a   :  { %382 = vmatpush1.bf16.msra.mxu0 %v1805_v19  ;;  %423 = vmatpush1.bf16.msra.mxu1 %v1807_v20 }
  0x5b   :  { %383 = vmatprep.subr.bf16.mxu0 %v1811_v21  ;;  %424 = vmatprep.subr.bf16.mxu1 %v1815_v22 }
  0x5e   :  { %384 = vmatpush1.bf16.msra.mxu0 %v1819_v23  ;;  %425 = vmatpush1.bf16.msra.mxu1 %v1821_v24 }
  0x5f   :  { %385 = vmatprep.subr.bf16.mxu0 %v1825_v25  ;;  %426 = vmatprep.subr.bf16.mxu1 %v1827_v26 }
  0x62   :  { %386 = vmatpush1.bf16.msra.mxu0 %v1831_v27  ;;  %427 = vmatpush1.bf16.msra.mxu1 %v1833_v28 }
  0x63   :  { %387 = vmatprep.subr.bf16.mxu0 %v1837_v29  ;;  %428 = vmatprep.subr.bf16.mxu1 %v1839_v30 }
  0x66   :  { %388 = vmatpush1.bf16.msra.mxu0 %v1843_v31  ;;  %429 = vmatpush1.bf16.msra.mxu1 %v1845_v32 }
  0x67   :  { %512 = vmatprep.subr.bf16.mxu0 %v1755_v1  ;;  %553 = vmatprep.subr.bf16.mxu1 %v1757_v2 }
 0x11c   :  { %v268_v38 = vpop.f32.mrb[0].mxu0  ;;  %v309_v39 = vpop.f32.mrb[0].mxu1 }
 0x11d   :  { %v270_v41 = vpop.f32.mrb[1].mxu0  ;;  %v311_v42 = vpop.f32.mrb[1].mxu1 }
 0x11e   :  { %v320_v43 = vcombine.low %v268_v38, %v270_v41  ;;  %v321_v44 = vcombine.low %v309_v39, %v311_v42  ;;  %v272_v45 = vpop.f32.mrb[2].mxu0  ;;  %v313_v46 = vpop.f32.mrb[2].mxu1 }
 0x11f   :  { %v273_v47 = vpop.f32.mrb[3].mxu0  ;;  %v314_v48 = vpop.f32.mrb[3].mxu1 }
 0x120   :  { %v328_v49 = vrot.slane %v320_v43, %v1889_v40  ;;  %v335_v50 = vrot.slane %v321_v44, %v1889_v40 }
 0x122   :  { %v336_v52 = vcombine.low %v328_v49, %v335_v50 }
 0x124   :  { %v338_v53 = vadd.f32 %v336_v52, %v73_v51 }
 0x126   :  { %v1392_v54 = vmul.f32 -1.442695, %v338_v53  ;;  %v346_v55 = vrot.slane %v338_v53, 2  ;;  %v357_v57 = vrot.slane %v338_v53, 6  ;;  %v354_v60 = vrot.slane %v338_v53, 4 }
 0x128   :  { %1473 = vpow2.f32 %v1392_v54  ;;  %v1393_v56 = vmul.f32 -1.442695, %v346_v55  ;;  %v1394_v58 = vmul.f32 -1.442695, %v357_v57 }
 0x12a   :  { %1475 = vpow2.f32 %v1393_v56 }
 0x12b   :  { %1477 = vpow2.f32 %v1394_v58  ;;  %v371_v58 = vld [vmem:[#allocation2 + $0x8] sm:$0xff] }
 0x132   :  { %v1474_v59 = vpop.eup %1473 }
 0x133   :  { %v342_v61 = vadd.f32 1.0, %v1474_v59 }
 0x134   :  { %v1476_v62 = vpop.eup %1475 }
 0x135   :  { %1479 = vrcp.f32 %v342_v61  ;;  %v351_v63 = vadd.f32 1.0, %v1476_v62  ;;  %v1478_v33 = vpop.eup %1477 }
 0x136   :  { %1481 = vtanh.f32 %v354_v60  ;;  %v362_v37 = vadd.f32 1.0, %v1478_v33 }
 0x137   :  { %1483 = vrcp.f32 %v351_v63 }
 0x138   :  { %1485 = vrcp.f32 %v362_v37 }
 0x13f   :  { %v1480_v34 = vpop.eup %1479 }
 0x140   :  { %v1482_v35 = vpop.eup %1481 }
 0x141   :  { %v1484_v36 = vpop.eup %1483  ;;  %v366_v39 = vmul.f32 %v1482_v35, %v1480_v34 }
 0x142   :  { %v365_v38 = vmul.f32 0.0, %v1484_v36  ;;  %v1486_v42 = vpop.eup %1485 }
 0x144   :  { %v1893_v41 = vadd.f32 %v366_v39, %v365_v38 }
 0x146   :  { %1487 = vtanh.f32 %v1893_v41 }
 0x150   :  { %v1488_v43 = vpop.eup %1487 }
 0x151   :  { %v369_v44 = vmul.f32 %v1488_v43, %v1486_v42 }
 0x153   :  { %v372_v45 = vpack.c.bf16 %v369_v44, %v369_v44 }
 0x155   :  { %406 = vmatmul.mubr.bf16.vlgmr.msra.gmra.mrb[4].mxu0 %v372_v45  ;;  %447 = vmatmul.mubr.bf16.vlgmr.msra.gmra.mrb[4].mxu1 %v372_v45 }
 0x156   :  { %513 = vmatpush1.bf16.msra.mxu0 %v1760_v3  ;;  %554 = vmatpush1.bf16.msra.mxu1 %v1762_v4 }
 0x157   :  { %514 = vmatprep.subr.bf16.mxu0 %v1765_v5  ;;  %555 = vmatprep.subr.bf16.mxu1 %v1769_v6 }
 0x158   :  { %544 = vmatprep.mubr.bf16.mxu0 %v1711_v0  ;;  %585 = vmatprep.mubr.bf16.mxu1 %v1711_v0 }
 0x15a   :  { %515 = vmatpush1.bf16.msra.mxu0 %v1771_v7  ;;  %556 = vmatpush1.bf16.msra.mxu1 %v1774_v8 }
 0x15b   :  { %516 = vmatprep.subr.bf16.mxu0 %v1777_v9  ;;  %557 = vmatprep.subr.bf16.mxu1 %v1779_v10 }
 0x15e   :  { %517 = vmatpush1.bf16.msra.mxu0 %v1781_v11  ;;  %558 = vmatpush1.bf16.msra.mxu1 %v1783_v12 }
 0x15f   :  { %518 = vmatprep.subr.bf16.mxu0 %v1787_v13  ;;  %559 = vmatprep.subr.bf16.mxu1 %v1791_v14 }
 0x162   :  { %519 = vmatpush1.bf16.msra.mxu0 %v1793_v15  ;;  %560 = vmatpush1.bf16.msra.mxu1 %v1797_v16 }
 0x163   :  { %520 = vmatprep.subr.bf16.mxu0 %v1799_v17  ;;  %561 = vmatprep.subr.bf16.mxu1 %v1803_v18 }
 0x166   :  { %521 = vmatpush1.bf16.msra.mxu0 %v1805_v19  ;;  %562 = vmatpush1.bf16.msra.mxu1 %v1807_v20 }
 0x167   :  { %522 = vmatprep.subr.bf16.mxu0 %v1811_v21  ;;  %563 = vmatprep.subr.bf16.mxu1 %v1815_v22 }
 0x16a   :  { %523 = vmatpush1.bf16.msra.mxu0 %v1819_v23  ;;  %564 = vmatpush1.bf16.msra.mxu1 %v1821_v24 }
 0x16b   :  { %524 = vmatprep.subr.bf16.mxu0 %v1825_v25  ;;  %565 = vmatprep.subr.bf16.mxu1 %v1827_v26 }
 0x16e   :  { %525 = vmatpush1.bf16.msra.mxu0 %v1831_v27  ;;  %566 = vmatpush1.bf16.msra.mxu1 %v1833_v28 }
 0x16f   :  { %526 = vmatprep.subr.bf16.mxu0 %v1837_v29  ;;  %567 = vmatprep.subr.bf16.mxu1 %v1839_v30 }
 0x172   :  { %527 = vmatpush1.bf16.msra.mxu0 %v1843_v31  ;;  %568 = vmatpush1.bf16.msra.mxu1 %v1845_v32 }
 0x173   :  { %651 = vmatprep.subr.bf16.mxu0 %v1755_v1  ;;  %692 = vmatprep.subr.bf16.mxu1 %v1757_v2 }
 0x228   :  { %v407_v46 = vpop.f32.mrb[4].mxu0  ;;  %v448_v47 = vpop.f32.mrb[4].mxu1 }
 0x229   :  { %v409_v48 = vpop.f32.mrb[5].mxu0  ;;  %v450_v49 = vpop.f32.mrb[5].mxu1 }
 0x22a   :  { %v459_v50 = vcombine.low %v407_v46, %v409_v48  ;;  %v460_v51 = vcombine.low %v448_v47, %v450_v49  ;;  %v411_v52 = vpop.f32.mrb[6].mxu0  ;;  %v452_v53 = vpop.f32.mrb[6].mxu1 }
 0x22b   :  { %v412_v54 = vpop.f32.mrb[7].mxu0  ;;  %v453_v55 = vpop.f32.mrb[7].mxu1 }
 0x22c   :  { %v467_v56 = vrot.slane %v459_v50, %v1889_v40  ;;  %v474_v57 = vrot.slane %v460_v51, %v1889_v40 }
 0x22e   :  { %v475_v59 = vcombine.low %v467_v56, %v474_v57 }
 0x230   :  { %v477_v60 = vadd.f32 %v475_v59, %v371_v58 }
 0x232   :  { %v1395_v61 = vmul.f32 -1.442695, %v477_v60  ;;  %v485_v62 = vrot.slane %v477_v60, 2  ;;  %v496_v33 = vrot.slane %v477_v60, 6  ;;  %v493_v36 = vrot.slane %v477_v60, 4 }
 0x234   :  { %1489 = vpow2.f32 %v1395_v61  ;;  %v1396_v63 = vmul.f32 -1.442695, %v485_v62  ;;  %v1397_v34 = vmul.f32 -1.442695, %v496_v33 }
 0x236   :  { %1491 = vpow2.f32 %v1396_v63 }
 0x237   :  { %1493 = vpow2.f32 %v1397_v34  ;;  %v510_v34 = vld [vmem:[#allocation2 + $0x10] sm:$0xff] }
 0x23e   :  { %v1490_v35 = vpop.eup %1489 }
 0x23f   :  { %v481_v37 = vadd.f32 1.0, %v1490_v35 }
 0x240   :  { %v1492_v38 = vpop.eup %1491 }
 0x241   :  { %1495 = vrcp.f32 %v481_v37  ;;  %v490_v39 = vadd.f32 1.0, %v1492_v38  ;;  %v1494_v42 = vpop.eup %1493 }
 0x242   :  { %1497 = vtanh.f32 %v493_v36  ;;  %v501_v46 = vadd.f32 1.0, %v1494_v42 }
 0x243   :  { %1499 = vrcp.f32 %v490_v39 }
 0x244   :  { %1501 = vrcp.f32 %v501_v46 }
 0x24b   :  { %v1496_v43 = vpop.eup %1495 }
 0x24c   :  { %v1498_v44 = vpop.eup %1497 }
 0x24d   :  { %v1500_v45 = vpop.eup %1499  ;;  %v505_v48 = vmul.f32 %v1498_v44, %v1496_v43 }
 0x24e   :  { %v504_v47 = vmul.f32 %v1500_v45, %v1893_v41  ;;  %v1502_v50 = vpop.eup %1501 }
 0x250   :  { %v1933_v49 = vadd.f32 %v505_v48, %v504_v47 }
 0x252   :  { %1503 = vtanh.f32 %v1933_v49 }
 0x25c   :  { %v1504_v51 = vpop.eup %1503 }
 0x25d   :  { %v508_v52 = vmul.f32 %v1504_v51, %v1502_v50 }
 0x25f   :  { %v511_v53 = vpack.c.bf16 %v508_v52, %v508_v52 }
 0x261   :  { %545 = vmatmul.mubr.bf16.vlgmr.msra.gmra.mrb[8].mxu0 %v511_v53  ;;  %586 = vmatmul.mubr.bf16.vlgmr.msra.gmra.mrb[8].mxu1 %v511_v53 }
 0x262   :  { %652 = vmatpush1.bf16.msra.mxu0 %v1760_v3  ;;  %693 = vmatpush1.bf16.msra.mxu1 %v1762_v4 }
 0x263   :  { %653 = vmatprep.subr.bf16.mxu0 %v1765_v5  ;;  %694 = vmatprep.subr.bf16.mxu1 %v1769_v6 }
 0x264   :  { %683 = vmatprep.mubr.bf16.mxu0 %v1711_v0  ;;  %724 = vmatprep.mubr.bf16.mxu1 %v1711_v0 }
 0x266   :  { %654 = vmatpush1.bf16.msra.mxu0 %v1771_v7  ;;  %695 = vmatpush1.bf16.msra.mxu1 %v1774_v8 }
 0x267   :  { %655 = vmatprep.subr.bf16.mxu0 %v1777_v9  ;;  %696 = vmatprep.subr.bf16.mxu1 %v1779_v10 }
 0x26a   :  { %656 = vmatpush1.bf16.msra.mxu0 %v1781_v11  ;;  %697 = vmatpush1.bf16.msra.mxu1 %v1783_v12 }
 0x26b   :  { %657 = vmatprep.subr.bf16.mxu0 %v1787_v13  ;;  %698 = vmatprep.subr.bf16.mxu1 %v1791_v14 }
 0x26e   :  { %658 = vmatpush1.bf16.msra.mxu0 %v1793_v15  ;;  %699 = vmatpush1.bf16.msra.mxu1 %v1797_v16 }
 0x26f   :  { %659 = vmatprep.subr.bf16.mxu0 %v1799_v17  ;;  %700 = vmatprep.subr.bf16.mxu1 %v1803_v18 }
 0x272   :  { %660 = vmatpush1.bf16.msra.mxu0 %v1805_v19  ;;  %701 = vmatpush1.bf16.msra.mxu1 %v1807_v20 }
 0x273   :  { %661 = vmatprep.subr.bf16.mxu0 %v1811_v21  ;;  %702 = vmatprep.subr.bf16.mxu1 %v1815_v22 }
 0x276   :  { %662 = vmatpush1.bf16.msra.mxu0 %v1819_v23  ;;  %703 = vmatpush1.bf16.msra.mxu1 %v1821_v24 }
 0x277   :  { %663 = vmatprep.subr.bf16.mxu0 %v1825_v25  ;;  %704 = vmatprep.subr.bf16.mxu1 %v1827_v26 }
 0x27a   :  { %664 = vmatpush1.bf16.msra.mxu0 %v1831_v27  ;;  %705 = vmatpush1.bf16.msra.mxu1 %v1833_v28 }
 0x27b   :  { %665 = vmatprep.subr.bf16.mxu0 %v1837_v29  ;;  %706 = vmatprep.subr.bf16.mxu1 %v1839_v30 }
 0x27e   :  { %666 = vmatpush1.bf16.msra.mxu0 %v1843_v31  ;;  %707 = vmatpush1.bf16.msra.mxu1 %v1845_v32 }
 0x27f   :  { %790 = vmatprep.subr.bf16.mxu0 %v1755_v1  ;;  %831 = vmatprep.subr.bf16.mxu1 %v1757_v2 }
 0x334   :  { %v546_v41 = vpop.f32.mrb[8].mxu0  ;;  %v587_v54 = vpop.f32.mrb[8].mxu1 }
 0x335   :  { %v548_v55 = vpop.f32.mrb[9].mxu0  ;;  %v589_v56 = vpop.f32.mrb[9].mxu1 }
 0x336   :  { %v598_v57 = vcombine.low %v546_v41, %v548_v55  ;;  %v599_v58 = vcombine.low %v587_v54, %v589_v56  ;;  %v550_v59 = vpop.f32.mrb[10].mxu0  ;;  %v591_v60 = vpop.f32.mrb[10].mxu1 }
 0x337   :  { %v551_v61 = vpop.f32.mrb[11].mxu0  ;;  %v592_v62 = vpop.f32.mrb[11].mxu1 }
 0x338   :  { %v606_v63 = vrot.slane %v598_v57, %v1889_v40  ;;  %v613_v33 = vrot.slane %v599_v58, %v1889_v40 }
 0x33a   :  { %v614_v35 = vcombine.low %v606_v63, %v613_v33 }
 0x33c   :  { %v616_v36 = vadd.f32 %v614_v35, %v510_v34 }
 0x33e   :  { %v1398_v37 = vmul.f32 -1.442695, %v616_v36  ;;  %v624_v38 = vrot.slane %v616_v36, 2  ;;  %v635_v42 = vrot.slane %v616_v36, 6  ;;  %v632_v45 = vrot.slane %v616_v36, 4 }
 0x340   :  { %1505 = vpow2.f32 %v1398_v37  ;;  %v1399_v39 = vmul.f32 -1.442695, %v624_v38  ;;  %v1400_v43 = vmul.f32 -1.442695, %v635_v42 }
 0x342   :  { %1507 = vpow2.f32 %v1399_v39 }
 0x343   :  { %1509 = vpow2.f32 %v1400_v43  ;;  %v649_v43 = vld [vmem:[#allocation2 + $0x18] sm:$0xff] }
 0x34a   :  { %v1506_v44 = vpop.eup %1505 }
 0x34b   :  { %v620_v46 = vadd.f32 1.0, %v1506_v44 }
 0x34c   :  { %v1508_v47 = vpop.eup %1507 }
 0x34d   :  { %1511 = vrcp.f32 %v620_v46  ;;  %v629_v48 = vadd.f32 1.0, %v1508_v47  ;;  %v1510_v50 = vpop.eup %1509 }
 0x34e   :  { %1513 = vtanh.f32 %v632_v45  ;;  %v640_v41 = vadd.f32 1.0, %v1510_v50 }
 0x34f   :  { %1515 = vrcp.f32 %v629_v48 }
 0x350   :  { %1517 = vrcp.f32 %v640_v41 }
 0x357   :  { %v1512_v51 = vpop.eup %1511 }
 0x358   :  { %v1514_v52 = vpop.eup %1513 }
 0x359   :  { %v1516_v53 = vpop.eup %1515  ;;  %v644_v55 = vmul.f32 %v1514_v52, %v1512_v51 }
 0x35a   :  { %v643_v54 = vmul.f32 %v1516_v53, %v1933_v49  ;;  %v1518_v57 = vpop.eup %1517 }
 0x35c   :  { %v1973_v56 = vadd.f32 %v644_v55, %v643_v54 }
 0x35e   :  { %1519 = vtanh.f32 %v1973_v56 }
 0x368   :  { %v1520_v58 = vpop.eup %1519 }
 0x369   :  { %v647_v59 = vmul.f32 %v1520_v58, %v1518_v57 }
 0x36b   :  { %v650_v60 = vpack.c.bf16 %v647_v59, %v647_v59 }
 0x36d   :  { %684 = vmatmul.mubr.bf16.vlgmr.msra.gmra.mrb[12].mxu0 %v650_v60  ;;  %725 = vmatmul.mubr.bf16.vlgmr.msra.gmra.mrb[12].mxu1 %v650_v60 }
 0x36e   :  { %791 = vmatpush1.bf16.msra.mxu0 %v1760_v3  ;;  %832 = vmatpush1.bf16.msra.mxu1 %v1762_v4 }
 0x36f   :  { %792 = vmatprep.subr.bf16.mxu0 %v1765_v5  ;;  %833 = vmatprep.subr.bf16.mxu1 %v1769_v6 }
 0x370   :  { %822 = vmatprep.mubr.bf16.mxu0 %v1711_v0  ;;  %863 = vmatprep.mubr.bf16.mxu1 %v1711_v0 }
 0x372   :  { %793 = vmatpush1.bf16.msra.mxu0 %v1771_v7  ;;  %834 = vmatpush1.bf16.msra.mxu1 %v1774_v8 }
 0x373   :  { %794 = vmatprep.subr.bf16.mxu0 %v1777_v9  ;;  %835 = vmatprep.subr.bf16.mxu1 %v1779_v10 }
 0x376   :  { %795 = vmatpush1.bf16.msra.mxu0 %v1781_v11  ;;  %836 = vmatpush1.bf16.msra.mxu1 %v1783_v12 }
 0x377   :  { %796 = vmatprep.subr.bf16.mxu0 %v1787_v13  ;;  %837 = vmatprep.subr.bf16.mxu1 %v1791_v14 }
 0x37a   :  { %797 = vmatpush1.bf16.msra.mxu0 %v1793_v15  ;;  %838 = vmatpush1.bf16.msra.mxu1 %v1797_v16 }
 0x37b   :  { %798 = vmatprep.subr.bf16.mxu0 %v1799_v17  ;;  %839 = vmatprep.subr.bf16.mxu1 %v1803_v18 }
 0x37e   :  { %799 = vmatpush1.bf16.msra.mxu0 %v1805_v19  ;;  %840 = vmatpush1.bf16.msra.mxu1 %v1807_v20 }
 0x37f   :  { %800 = vmatprep.subr.bf16.mxu0 %v1811_v21  ;;  %841 = vmatprep.subr.bf16.mxu1 %v1815_v22 }
 0x382   :  { %801 = vmatpush1.bf16.msra.mxu0 %v1819_v23  ;;  %842 = vmatpush1.bf16.msra.mxu1 %v1821_v24 }
 0x383   :  { %802 = vmatprep.subr.bf16.mxu0 %v1825_v25  ;;  %843 = vmatprep.subr.bf16.mxu1 %v1827_v26 }
 0x386   :  { %803 = vmatpush1.bf16.msra.mxu0 %v1831_v27  ;;  %844 = vmatpush1.bf16.msra.mxu1 %v1833_v28 }
 0x387   :  { %804 = vmatprep.subr.bf16.mxu0 %v1837_v29  ;;  %845 = vmatprep.subr.bf16.mxu1 %v1839_v30 }
 0x38a   :  { %805 = vmatpush1.bf16.msra.mxu0 %v1843_v31  ;;  %846 = vmatpush1.bf16.msra.mxu1 %v1845_v32 }
 0x38b   :  { %929 = vmatprep.subr.bf16.mxu0 %v1755_v1  ;;  %970 = vmatprep.subr.bf16.mxu1 %v1757_v2 }
 0x440   :  { %v685_v49 = vpop.f32.mrb[12].mxu0  ;;  %v726_v61 = vpop.f32.mrb[12].mxu1 }
 0x441   :  { %v687_v62 = vpop.f32.mrb[13].mxu0  ;;  %v728_v63 = vpop.f32.mrb[13].mxu1 }
 0x442   :  { %v737_v33 = vcombine.low %v685_v49, %v687_v62  ;;  %v738_v34 = vcombine.low %v726_v61, %v728_v63  ;;  %v689_v35 = vpop.f32.mrb[14].mxu0  ;;  %v730_v36 = vpop.f32.mrb[14].mxu1 }
 0x443   :  { %v690_v37 = vpop.f32.mrb[15].mxu0  ;;  %v731_v38 = vpop.f32.mrb[15].mxu1 }
 0x444   :  { %v745_v39 = vrot.slane %v737_v33, %v1889_v40  ;;  %v752_v42 = vrot.slane %v738_v34, %v1889_v40 }
 0x446   :  { %v753_v44 = vcombine.low %v745_v39, %v752_v42 }
 0x448   :  { %v755_v45 = vadd.f32 %v753_v44, %v649_v43 }
 0x44a   :  { %v1401_v46 = vmul.f32 -1.442695, %v755_v45  ;;  %v763_v47 = vrot.slane %v755_v45, 2  ;;  %v774_v50 = vrot.slane %v755_v45, 6  ;;  %v771_v53 = vrot.slane %v755_v45, 4 }
 0x44c   :  { %1521 = vpow2.f32 %v1401_v46  ;;  %v1402_v48 = vmul.f32 -1.442695, %v763_v47  ;;  %v1403_v51 = vmul.f32 -1.442695, %v774_v50 }
 0x44e   :  { %1523 = vpow2.f32 %v1402_v48 }
 0x44f   :  { %1525 = vpow2.f32 %v1403_v51  ;;  %v788_v51 = vld [vmem:[#allocation2 + $0x20] sm:$0xff] }
 0x456   :  { %v1522_v52 = vpop.eup %1521 }
 0x457   :  { %v759_v41 = vadd.f32 1.0, %v1522_v52 }
 0x458   :  { %v1524_v54 = vpop.eup %1523 }
 0x459   :  { %1527 = vrcp.f32 %v759_v41  ;;  %v768_v55 = vadd.f32 1.0, %v1524_v54  ;;  %v1526_v57 = vpop.eup %1525 }
 0x45a   :  { %1529 = vtanh.f32 %v771_v53  ;;  %v779_v49 = vadd.f32 1.0, %v1526_v57 }
 0x45b   :  { %1531 = vrcp.f32 %v768_v55 }
 0x45c   :  { %1533 = vrcp.f32 %v779_v49 }
 0x463   :  { %v1528_v58 = vpop.eup %1527 }
 0x464   :  { %v1530_v59 = vpop.eup %1529 }
 0x465   :  { %v1532_v60 = vpop.eup %1531  ;;  %v783_v62 = vmul.f32 %v1530_v59, %v1528_v58 }
 0x466   :  { %v782_v61 = vmul.f32 %v1532_v60, %v1973_v56  ;;  %v1534_v33 = vpop.eup %1533 }
 0x468   :  { %v2013_v63 = vadd.f32 %v783_v62, %v782_v61 }
 0x46a   :  { %1535 = vtanh.f32 %v2013_v63 }
 0x474   :  { %v1536_v34 = vpop.eup %1535 }
 0x475   :  { %v786_v35 = vmul.f32 %v1536_v34, %v1534_v33 }
 0x477   :  { %v789_v36 = vpack.c.bf16 %v786_v35, %v786_v35 }
 0x479   :  { %823 = vmatmul.mubr.bf16.vlgmr.msra.gmra.mrb[16].mxu0 %v789_v36  ;;  %864 = vmatmul.mubr.bf16.vlgmr.msra.gmra.mrb[16].mxu1 %v789_v36 }
 0x47a   :  { %930 = vmatpush1.bf16.msra.mxu0 %v1760_v3  ;;  %971 = vmatpush1.bf16.msra.mxu1 %v1762_v4 }
 0x47b   :  { %931 = vmatprep.subr.bf16.mxu0 %v1765_v5  ;;  %972 = vmatprep.subr.bf16.mxu1 %v1769_v6 }
 0x47c   :  { %961 = vmatprep.mubr.bf16.mxu0 %v1711_v0  ;;  %1002 = vmatprep.mubr.bf16.mxu1 %v1711_v0 }
 0x47e   :  { %932 = vmatpush1.bf16.msra.mxu0 %v1771_v7  ;;  %973 = vmatpush1.bf16.msra.mxu1 %v1774_v8 }
 0x47f   :  { %933 = vmatprep.subr.bf16.mxu0 %v1777_v9  ;;  %974 = vmatprep.subr.bf16.mxu1 %v1779_v10 }
 0x482   :  { %934 = vmatpush1.bf16.msra.mxu0 %v1781_v11  ;;  %975 = vmatpush1.bf16.msra.mxu1 %v1783_v12 }
 0x483   :  { %935 = vmatprep.subr.bf16.mxu0 %v1787_v13  ;;  %976 = vmatprep.subr.bf16.mxu1 %v1791_v14 }
 0x486   :  { %936 = vmatpush1.bf16.msra.mxu0 %v1793_v15  ;;  %977 = vmatpush1.bf16.msra.mxu1 %v1797_v16 }
 0x487   :  { %937 = vmatprep.subr.bf16.mxu0 %v1799_v17  ;;  %978 = vmatprep.subr.bf16.mxu1 %v1803_v18 }
 0x48a   :  { %938 = vmatpush1.bf16.msra.mxu0 %v1805_v19  ;;  %979 = vmatpush1.bf16.msra.mxu1 %v1807_v20 }
 0x48b   :  { %939 = vmatprep.subr.bf16.mxu0 %v1811_v21  ;;  %980 = vmatprep.subr.bf16.mxu1 %v1815_v22 }
 0x48e   :  { %940 = vmatpush1.bf16.msra.mxu0 %v1819_v23  ;;  %981 = vmatpush1.bf16.msra.mxu1 %v1821_v24 }
 0x48f   :  { %941 = vmatprep.subr.bf16.mxu0 %v1825_v25  ;;  %982 = vmatprep.subr.bf16.mxu1 %v1827_v26 }
 0x492   :  { %942 = vmatpush1.bf16.msra.mxu0 %v1831_v27  ;;  %983 = vmatpush1.bf16.msra.mxu1 %v1833_v28 }
 0x493   :  { %943 = vmatprep.subr.bf16.mxu0 %v1837_v29  ;;  %984 = vmatprep.subr.bf16.mxu1 %v1839_v30 }
 0x496   :  { %944 = vmatpush1.bf16.msra.mxu0 %v1843_v31  ;;  %985 = vmatpush1.bf16.msra.mxu1 %v1845_v32 }
 0x497   :  { %1068 = vmatprep.subr.bf16.mxu0 %v1755_v1  ;;  %1109 = vmatprep.subr.bf16.mxu1 %v1757_v2 }
 0x54c   :  { %v824_v56 = vpop.f32.mrb[16].mxu0  ;;  %v865_v37 = vpop.f32.mrb[16].mxu1 }
 0x54d   :  { %v826_v38 = vpop.f32.mrb[17].mxu0  ;;  %v867_v39 = vpop.f32.mrb[17].mxu1 }
 0x54e   :  { %v876_v42 = vcombine.low %v824_v56, %v826_v38  ;;  %v877_v43 = vcombine.low %v865_v37, %v867_v39  ;;  %v828_v44 = vpop.f32.mrb[18].mxu0  ;;  %v869_v45 = vpop.f32.mrb[18].mxu1 }
 0x54f   :  { %v829_v46 = vpop.f32.mrb[19].mxu0  ;;  %v870_v47 = vpop.f32.mrb[19].mxu1 }
 0x550   :  { %v884_v48 = vrot.slane %v876_v42, %v1889_v40  ;;  %v891_v50 = vrot.slane %v877_v43, %v1889_v40 }
 0x552   :  { %v892_v52 = vcombine.low %v884_v48, %v891_v50 }
 0x554   :  { %v894_v53 = vadd.f32 %v892_v52, %v788_v51 }
 0x556   :  { %v1404_v1 = vmul.f32 -1.442695, %v894_v53  ;;  %v902_v41 = vrot.slane %v894_v53, 2  ;;  %v913_v54 = vrot.slane %v894_v53, 6  ;;  %v910_v58 = vrot.slane %v894_v53, 4 }
 0x557   :  { %v1603_v53 = vld [vmem:[#allocation5] ss:$16 sps:$4 sm:$0xff]  }
 0x558   :  { %1537 = vpow2.f32 %v1404_v1  ;;  %v1405_v2 = vmul.f32 -1.442695, %v902_v41  ;;  %v1406_v55 = vmul.f32 -1.442695, %v913_v54  ;;  %v1604_v1 = vld [vmem:[#allocation5 + $0x8] ss:$16 sps:$4 sm:$0xff]  }
 0x559   :  { %v1605_v41 = vld [vmem:[#allocation5 + $0x24] ss:$16 sps:$4 sm:$0xff]   ;;  %v1607_v54 = vld [vmem:[#allocation5 + $0x20] ss:$16 sps:$4 sm:$0xff]  }
 0x55a   :  { %1539 = vpow2.f32 %v1405_v2  ;;  %v1606_v2 = vld [vmem:[#allocation5 + $0x2c] ss:$16 sps:$4 sm:$0xff]  }
 0x55b   :  { %1541 = vpow2.f32 %v1406_v55  ;;  %v1608_v55 = vld [vmem:[#allocation5 + $0x28] ss:$16 sps:$4 sm:$0xff]  }
 0x562   :  { %v1538_v57 = vpop.eup %1537 }
 0x563   :  { %v898_v59 = vadd.f32 1.0, %v1538_v57  ;;  %v1609_v57 = vld [vmem:[#allocation5 + $0x44] ss:$16 sps:$4 sm:$0xff]  }
 0x564   :  { %v1540_v60 = vpop.eup %1539 }
 0x565   :  { %1543 = vrcp.f32 %v898_v59  ;;  %v907_v49 = vadd.f32 1.0, %v1540_v60  ;;  %v1542_v61 = vpop.eup %1541  ;;  %v1611_v59 = vld [vmem:[#allocation5 + $0x40] ss:$16 sps:$4 sm:$0xff]   ;;  %v1612_v60 = vld [vmem:[#allocation5 + $0x48] ss:$16 sps:$4 sm:$0xff]  }
 0x566   :  { %1545 = vtanh.f32 %v910_v58  ;;  %v918_v35 = vadd.f32 1.0, %v1542_v61  ;;  %v1610_v58 = vld [vmem:[#allocation5 + $0x4c] ss:$16 sps:$4 sm:$0xff]  }
 0x567   :  { %1547 = vrcp.f32 %v907_v49  ;;  %v1613_v49 = vld [vmem:[#allocation5 + $0x64] ss:$16 sps:$4 sm:$0xff]   ;;  %v1614_v61 = vld [vmem:[#allocation5 + $0x6c] ss:$16 sps:$4 sm:$0xff]  }
 0x568   :  { %1549 = vrcp.f32 %v918_v35  ;;  %v1619_v35 = vld [vmem:[#allocation5 + $0x80] ss:$16 sps:$4 sm:$0xff]  }
 0x56f   :  { %v1544_v62 = vpop.eup %1543 }
 0x570   :  { %v1546_v33 = vpop.eup %1545 }
 0x571   :  { %v1548_v34 = vpop.eup %1547  ;;  %v922_v56 = vmul.f32 %v1546_v33, %v1544_v62  ;;  %v1615_v62 = vld [vmem:[#allocation5 + $0x60] ss:$16 sps:$4 sm:$0xff]   ;;  %v1616_v33 = vld [vmem:[#allocation5 + $0x68] ss:$16 sps:$4 sm:$0xff]  }
 0x572   :  { %v921_v36 = vmul.f32 %v1548_v34, %v2013_v63  ;;  %v1550_v38 = vpop.eup %1549  ;;  %v1618_v34 = vld [vmem:[#allocation5 + $0x8c] ss:$16 sps:$4 sm:$0xff]  }
 0x574   :  { %v2053_v37 = vadd.f32 %v922_v56, %v921_v36  ;;  %v1620_v36 = vld [vmem:[#allocation5 + $0x88] ss:$16 sps:$4 sm:$0xff]   ;;  %v1621_v56 = vld [vmem:[#allocation5 + $0xa4] ss:$16 sps:$4 sm:$0xff]  }
 0x576   :  { %1551 = vtanh.f32 %v2053_v37 }
 0x580   :  { %v1552_v39 = vpop.eup %1551 }
 0x581   :  { %v925_v42 = vmul.f32 %v1552_v39, %v1550_v38  ;;  %v1623_v38 = vld [vmem:[#allocation5 + $0xa0] ss:$16 sps:$4 sm:$0xff]   ;;  %v1624_v39 = vld [vmem:[#allocation5 + $0xa8] ss:$16 sps:$4 sm:$0xff]  }
 0x583   :  { %v928_v43 = vpack.c.bf16 %v925_v42, %v925_v42  ;;  %v1625_v42 = vld [vmem:[#allocation5 + $0xc4] ss:$16 sps:$4 sm:$0xff]  }
 0x585   :  { %962 = vmatmul.mubr.bf16.vlgmr.msra.gmra.mrb[20].mxu0 %v928_v43  ;;  %1003 = vmatmul.mubr.bf16.vlgmr.msra.gmra.mrb[20].mxu1 %v928_v43  ;;  %v1626_v43 = vld [vmem:[#allocation5 + $0xcc] ss:$16 sps:$4 sm:$0xff]  }
 0x586   :  { %1069 = vmatpush1.bf16.msra.mxu0 %v1760_v3  ;;  %1110 = vmatpush1.bf16.msra.mxu1 %v1762_v4  ;;  %v1601_v3 = vld [vmem:[#allocation5 + $0x4] ss:$16 sps:$4 sm:$0xff]   ;;  %v1602_v4 = vld [vmem:[#allocation5 + $0xc] ss:$16 sps:$4 sm:$0xff]  }
 0x587   :  { %1070 = vmatprep.subr.bf16.mxu0 %v1765_v5  ;;  %1111 = vmatprep.subr.bf16.mxu1 %v1769_v6 }
 0x588   :  { %1100 = vmatprep.mubr.bf16.mxu0 %v1711_v0  ;;  %1141 = vmatprep.mubr.bf16.mxu1 %v1711_v0 }
 0x58a   :  { %1071 = vmatpush1.bf16.msra.mxu0 %v1771_v7  ;;  %1112 = vmatpush1.bf16.msra.mxu1 %v1774_v8 }
 0x58b   :  { %1072 = vmatprep.subr.bf16.mxu0 %v1777_v9  ;;  %1113 = vmatprep.subr.bf16.mxu1 %v1779_v10 }
 0x58e   :  { %1073 = vmatpush1.bf16.msra.mxu0 %v1781_v11  ;;  %1114 = vmatpush1.bf16.msra.mxu1 %v1783_v12 }
 0x58f   :  { %1074 = vmatprep.subr.bf16.mxu0 %v1787_v13  ;;  %1115 = vmatprep.subr.bf16.mxu1 %v1791_v14 }
 0x592   :  { %1075 = vmatpush1.bf16.msra.mxu0 %v1793_v15  ;;  %1116 = vmatpush1.bf16.msra.mxu1 %v1797_v16 }
 0x593   :  { %1076 = vmatprep.subr.bf16.mxu0 %v1799_v17  ;;  %1117 = vmatprep.subr.bf16.mxu1 %v1803_v18  ;;  %v927_v17 = vld [vmem:[#allocation2 + $0x28] sm:$0xff] }
 0x596   :  { %1077 = vmatpush1.bf16.msra.mxu0 %v1805_v19  ;;  %1118 = vmatpush1.bf16.msra.mxu1 %v1807_v20 }
 0x597   :  { %1078 = vmatprep.subr.bf16.mxu0 %v1811_v21  ;;  %1119 = vmatprep.subr.bf16.mxu1 %v1815_v22 }
 0x59a   :  { %1079 = vmatpush1.bf16.msra.mxu0 %v1819_v23  ;;  %1120 = vmatpush1.bf16.msra.mxu1 %v1821_v24 }
 0x59b   :  { %1080 = vmatprep.subr.bf16.mxu0 %v1825_v25  ;;  %1121 = vmatprep.subr.bf16.mxu1 %v1827_v26 }
 0x59e   :  { %1081 = vmatpush1.bf16.msra.mxu0 %v1831_v27  ;;  %1122 = vmatpush1.bf16.msra.mxu1 %v1833_v28 }
 0x59f   :  { %1082 = vmatprep.subr.bf16.mxu0 %v1837_v29  ;;  %1123 = vmatprep.subr.bf16.mxu1 %v1839_v30 }
 0x5a2   :  { %1083 = vmatpush1.bf16.msra.mxu0 %v1843_v31  ;;  %1124 = vmatpush1.bf16.msra.mxu1 %v1845_v32 }
 0x5a3   :  { %1207 = vmatprep.subr.bf16.mxu0 %v1601_v3  ;;  %1248 = vmatprep.subr.bf16.mxu1 %v1602_v4  ;;  %v1627_v3 = vld [vmem:[#allocation5 + $0xc0] ss:$16 sps:$4 sm:$0xff]   ;;  %v1628_v4 = vld [vmem:[#allocation5 + $0xc8] ss:$16 sps:$4 sm:$0xff]  }
 0x658   :  { %v963_v5 = vpop.f32.mrb[20].mxu0  ;;  %v1004_v6 = vpop.f32.mrb[20].mxu1 }
 0x659   :  { %v965_v7 = vpop.f32.mrb[21].mxu0  ;;  %v1006_v8 = vpop.f32.mrb[21].mxu1 }
 0x65a   :  { %v1015_v9 = vcombine.low %v963_v5, %v965_v7  ;;  %v1016_v10 = vcombine.low %v1004_v6, %v1006_v8  ;;  %v967_v11 = vpop.f32.mrb[22].mxu0  ;;  %v1008_v12 = vpop.f32.mrb[22].mxu1  ;;  %v1629_v5 = vld [vmem:[#allocation5 + $0xe4] ss:$16 sps:$4 sm:$0xff]   ;;  %v1630_v6 = vld [vmem:[#allocation5 + $0xec] ss:$16 sps:$4 sm:$0xff]  }
 0x65b   :  { %v968_v13 = vpop.f32.mrb[23].mxu0  ;;  %v1009_v14 = vpop.f32.mrb[23].mxu1  ;;  %v1631_v7 = vld [vmem:[#allocation5 + $0xe0] ss:$16 sps:$4 sm:$0xff]   ;;  %v1632_v8 = vld [vmem:[#allocation5 + $0xe8] ss:$16 sps:$4 sm:$0xff]  }
 0x65c   :  { %v1023_v15 = vrot.slane %v1015_v9, %v1889_v40  ;;  %v1030_v16 = vrot.slane %v1016_v10, %v1889_v40 }
 0x65e   :  { %v1031_v18 = vcombine.low %v1023_v15, %v1030_v16 }
 0x660   :  { %v1033_v19 = vadd.f32 %v1031_v18, %v927_v17 }
 0x662   :  { %v1407_v20 = vmul.f32 -1.442695, %v1033_v19  ;;  %v1041_v21 = vrot.slane %v1033_v19, 2  ;;  %v1052_v23 = vrot.slane %v1033_v19, 6  ;;  %v1049_v26 = vrot.slane %v1033_v19, 4 }
 0x664   :  { %1553 = vpow2.f32 %v1407_v20  ;;  %v1408_v22 = vmul.f32 -1.442695, %v1041_v21  ;;  %v1409_v24 = vmul.f32 -1.442695, %v1052_v23  ;;  %v1066_v21 = vld [vmem:[#allocation2 + $0x30] sm:$0xff] }
 0x666   :  { %1555 = vpow2.f32 %v1408_v22 }
 0x667   :  { %1557 = vpow2.f32 %v1409_v24 }
 0x66e   :  { %v1554_v25 = vpop.eup %1553 }
 0x66f   :  { %v1037_v27 = vadd.f32 1.0, %v1554_v25 }
 0x670   :  { %v1556_v28 = vpop.eup %1555 }
 0x671   :  { %1559 = vrcp.f32 %v1037_v27  ;;  %v1046_v29 = vadd.f32 1.0, %v1556_v28  ;;  %v1558_v30 = vpop.eup %1557 }
 0x672   :  { %1561 = vtanh.f32 %v1049_v26  ;;  %v1057_v44 = vadd.f32 1.0, %v1558_v30 }
 0x673   :  { %1563 = vrcp.f32 %v1046_v29 }
 0x674   :  { %1565 = vrcp.f32 %v1057_v44 }
 0x67b   :  { %v1560_v31 = vpop.eup %1559 }
 0x67c   :  { %v1562_v32 = vpop.eup %1561 }
 0x67d   :  { %v1564_v63 = vpop.eup %1563  ;;  %v1061_v46 = vmul.f32 %v1562_v32, %v1560_v31 }
 0x67e   :  { %v1060_v45 = vmul.f32 %v1564_v63, %v2053_v37  ;;  %v1566_v48 = vpop.eup %1565  ;;  %v1622_v37 = vld [vmem:[#allocation5 + $0xac] ss:$16 sps:$4 sm:$0xff]  }
 0x680   :  { %v2091_v47 = vadd.f32 %v1061_v46, %v1060_v45 }
 0x682   :  { %1567 = vtanh.f32 %v2091_v47 }
 0x68c   :  { %v1568_v50 = vpop.eup %1567 }
 0x68d   :  { %v1064_v51 = vmul.f32 %v1568_v50, %v1566_v48 }
 0x68f   :  { %v1067_v52 = vpack.c.bf16 %v1064_v51, %v1064_v51 }
 0x691   :  { %1101 = vmatmul.mubr.bf16.vlgmr.msra.gmra.mrb[24].mxu0 %v1067_v52  ;;  %1142 = vmatmul.mubr.bf16.vlgmr.msra.gmra.mrb[24].mxu1 %v1067_v52 }
 0x692   :  { %1208 = vmatpush1.bf16.msra.mxu0 %v1603_v53  ;;  %1249 = vmatpush1.bf16.msra.mxu1 %v1604_v1 }
 0x693   :  { %1209 = vmatprep.subr.bf16.mxu0 %v1605_v41  ;;  %1250 = vmatprep.subr.bf16.mxu1 %v1606_v2 }
 0x694   :  { %1239 = vmatprep.mubr.bf16.mxu0 %v1711_v0  ;;  %1280 = vmatprep.mubr.bf16.mxu1 %v1711_v0  ;;  %v1617_v0 = vld [vmem:[#allocation5 + $0x84] ss:$16 sps:$4 sm:$0xff]  }
 0x696   :  { %1210 = vmatpush1.bf16.msra.mxu0 %v1607_v54  ;;  %1251 = vmatpush1.bf16.msra.mxu1 %v1608_v55 }
 0x697   :  { %1211 = vmatprep.subr.bf16.mxu0 %v1609_v57  ;;  %1252 = vmatprep.subr.bf16.mxu1 %v1610_v58 }
 0x69a   :  { %1212 = vmatpush1.bf16.msra.mxu0 %v1611_v59  ;;  %1253 = vmatpush1.bf16.msra.mxu1 %v1612_v60 }
 0x69b   :  { %1213 = vmatprep.subr.bf16.mxu0 %v1613_v49  ;;  %1254 = vmatprep.subr.bf16.mxu1 %v1614_v61 }
 0x69e   :  { %1214 = vmatpush1.bf16.msra.mxu0 %v1615_v62  ;;  %1255 = vmatpush1.bf16.msra.mxu1 %v1616_v33 }
 0x69f   :  { %1215 = vmatprep.subr.bf16.mxu0 %v1617_v0  ;;  %1256 = vmatprep.subr.bf16.mxu1 %v1618_v34 }
 0x6a2   :  { %1216 = vmatpush1.bf16.msra.mxu0 %v1619_v35  ;;  %1257 = vmatpush1.bf16.msra.mxu1 %v1620_v36  ;;  %v1205_v35 = vld [vmem:[#allocation2 + $0x38] sm:$0xff] }
 0x6a3   :  { %1217 = vmatprep.subr.bf16.mxu0 %v1621_v56  ;;  %1258 = vmatprep.subr.bf16.mxu1 %v1622_v37 }
 0x6a6   :  { %1218 = vmatpush1.bf16.msra.mxu0 %v1623_v38  ;;  %1259 = vmatpush1.bf16.msra.mxu1 %v1624_v39 }
 0x6a7   :  { %1219 = vmatprep.subr.bf16.mxu0 %v1625_v42  ;;  %1260 = vmatprep.subr.bf16.mxu1 %v1626_v43 }
 0x6aa   :  { %1220 = vmatpush1.bf16.msra.mxu0 %v1627_v3  ;;  %1261 = vmatpush1.bf16.msra.mxu1 %v1628_v4 }
 0x6ab   :  { %1221 = vmatprep.subr.bf16.mxu0 %v1629_v5  ;;  %1262 = vmatprep.subr.bf16.mxu1 %v1630_v6 }
 0x6ae   :  { %1222 = vmatpush1.bf16.msra.mxu0 %v1631_v7  ;;  %1263 = vmatpush1.bf16.msra.mxu1 %v1632_v8 }
 0x764   :  { %v1102_v9 = vpop.f32.mrb[24].mxu0  ;;  %v1143_v10 = vpop.f32.mrb[24].mxu1 }
 0x765   :  { %v1104_v11 = vpop.f32.mrb[25].mxu0  ;;  %v1145_v12 = vpop.f32.mrb[25].mxu1 }
 0x766   :  { %v1154_v13 = vcombine.low %v1102_v9, %v1104_v11  ;;  %v1155_v14 = vcombine.low %v1143_v10, %v1145_v12  ;;  %v1106_v15 = vpop.f32.mrb[26].mxu0  ;;  %v1147_v16 = vpop.f32.mrb[26].mxu1 }
 0x767   :  { %v1107_v17 = vpop.f32.mrb[27].mxu0  ;;  %v1148_v18 = vpop.f32.mrb[27].mxu1 }
 0x768   :  { %v1162_v19 = vrot.slane %v1154_v13, %v1889_v40  ;;  %v1169_v20 = vrot.slane %v1155_v14, %v1889_v40 }
 0x76a   :  { %v1170_v22 = vcombine.low %v1162_v19, %v1169_v20 }
 0x76c   :  { %v1172_v23 = vadd.f32 %v1170_v22, %v1066_v21 }
 0x76e   :  { %v1410_v24 = vmul.f32 -1.442695, %v1172_v23  ;;  %v1180_v25 = vrot.slane %v1172_v23, 2  ;;  %v1191_v27 = vrot.slane %v1172_v23, 6  ;;  %v1188_v30 = vrot.slane %v1172_v23, 4 }
 0x770   :  { %1569 = vpow2.f32 %v1410_v24  ;;  %v1411_v26 = vmul.f32 -1.442695, %v1180_v25  ;;  %v1412_v28 = vmul.f32 -1.442695, %v1191_v27 }
 0x772   :  { %1571 = vpow2.f32 %v1411_v26 }
 0x773   :  { %1573 = vpow2.f32 %v1412_v28 }
 0x77a   :  { %v1570_v29 = vpop.eup %1569 }
 0x77b   :  { %v1176_v31 = vadd.f32 1.0, %v1570_v29 }
 0x77c   :  { %v1572_v32 = vpop.eup %1571 }
 0x77d   :  { %1575 = vrcp.f32 %v1176_v31  ;;  %v1185_v63 = vadd.f32 1.0, %v1572_v32  ;;  %v1574_v44 = vpop.eup %1573 }
 0x77e   :  { %1577 = vtanh.f32 %v1188_v30  ;;  %v1196_v50 = vadd.f32 1.0, %v1574_v44 }
 0x77f   :  { %1579 = vrcp.f32 %v1185_v63 }
 0x780   :  { %1581 = vrcp.f32 %v1196_v50 }
 0x787   :  { %v1576_v45 = vpop.eup %1575 }
 0x788   :  { %v1578_v46 = vpop.eup %1577 }
 0x789   :  { %v1580_v48 = vpop.eup %1579  ;;  %v1200_v52 = vmul.f32 %v1578_v46, %v1576_v45 }
 0x78a   :  { %v1199_v51 = vmul.f32 %v1580_v48, %v2091_v47  ;;  %v1582_v1 = vpop.eup %1581 }
 0x78c   :  { %v1201_v53 = vadd.f32 %v1200_v52, %v1199_v51 }
 0x78e   :  { %1583 = vtanh.f32 %v1201_v53 }
 0x798   :  { %v1584_v41 = vpop.eup %1583 }
 0x799   :  { %v1203_v2 = vmul.f32 %v1584_v41, %v1582_v1 }
 0x79b   :  { %v1206_v54 = vpack.c.bf16 %v1203_v2, %v1203_v2 }
 0x79d   :  { %1240 = vmatmul.mubr.bf16.vlgmr.msra.gmra.mrb[28].mxu0 %v1206_v54  ;;  %1281 = vmatmul.mubr.bf16.vlgmr.msra.gmra.mrb[28].mxu1 %v1206_v54 }
 0x870   :  { %v1241_v55 = vpop.f32.mrb[28].mxu0  ;;  %v1282_v57 = vpop.f32.mrb[28].mxu1 }
 0x871   :  { %v1243_v58 = vpop.f32.mrb[29].mxu0  ;;  %v1284_v59 = vpop.f32.mrb[29].mxu1 }
 0x872   :  { %v1293_v60 = vcombine.low %v1241_v55, %v1243_v58  ;;  %v1294_v49 = vcombine.low %v1282_v57, %v1284_v59  ;;  %v1245_v61 = vpop.f32.mrb[30].mxu0  ;;  %v1286_v62 = vpop.f32.mrb[30].mxu1 }
 0x873   :  { %v1246_v33 = vpop.f32.mrb[31].mxu0  ;;  %v1287_v47 = vpop.f32.mrb[31].mxu1 }
 0x874   :  { %v1301_v0 = vrot.slane %v1293_v60, %v1889_v40  ;;  %v1308_v34 = vrot.slane %v1294_v49, %v1889_v40 }
 0x876   :  { %v1309_v36 = vcombine.low %v1301_v0, %v1308_v34 }
 0x878   :  { %v1311_v56 = vadd.f32 %v1309_v36, %v1205_v35 }
 0x87a   :  { %v1413_v37 = vmul.f32 -1.442695, %v1311_v56  ;;  %v1319_v38 = vrot.slane %v1311_v56, 2  ;;  %v1330_v42 = vrot.slane %v1311_v56, 6  ;;  %v1327_v4 = vrot.slane %v1311_v56, 4 }
 0x87c   :  { %1585 = vpow2.f32 %v1413_v37  ;;  %v1414_v39 = vmul.f32 -1.442695, %v1319_v38  ;;  %v1415_v43 = vmul.f32 -1.442695, %v1330_v42 }
 0x87e   :  { %1587 = vpow2.f32 %v1414_v39 }
 0x87f   :  { %1589 = vpow2.f32 %v1415_v43 }
 0x886   :  { %v1586_v3 = vpop.eup %1585 }
 0x887   :  { %v1315_v5 = vadd.f32 1.0, %v1586_v3 }
 0x888   :  { %v1588_v6 = vpop.eup %1587 }
 0x889   :  { %1591 = vrcp.f32 %v1315_v5  ;;  %v1324_v7 = vadd.f32 1.0, %v1588_v6  ;;  %v1590_v40 = vpop.eup %1589 }
 0x88a   :  { %1593 = vtanh.f32 %v1327_v4  ;;  %v1335_v11 = vadd.f32 1.0, %v1590_v40 }
 0x88b   :  { %1595 = vrcp.f32 %v1324_v7 }
 0x88c   :  { %1597 = vrcp.f32 %v1335_v11 }
 0x893   :  { %v1592_v8 = vpop.eup %1591 }
 0x894   :  { %v1594_v9 = vpop.eup %1593 }
 0x895   :  { %v1596_v10 = vpop.eup %1595  ;;  %v1339_v13 = vmul.f32 %v1594_v9, %v1592_v8 }
 0x896   :  { %v1338_v12 = vmul.f32 %v1596_v10, %v1201_v53  ;;  %v1598_v15 = vpop.eup %1597 }
 0x898   :  { %v1340_v14 = vadd.f32 %v1339_v13, %v1338_v12 }
 0x89a   :  { %1599 = vtanh.f32 %v1340_v14 }
 0x8a4   :  { %v1600_v16 = vpop.eup %1599 }
 0x8a5   :  { %v1342_v17 = vmul.f32 %v1600_v16, %v1598_v15 }
 0x8a7   :  { %1343 = vst [vmem:[#allocation7] sm:$0x3] %v1342_v17 }
 0x8a8   :  { %1688 = shalt.err (!%p1685_p6)
}
 0x8a9   :  { %s1689_s12 = scalar_lea.hbm %s2115_s2, 32 }
 0x8aa   :  { %p1690_p7 = scmp.ne.s32.totalorder %s2115_s2, %s1689_s12  ;;  %p1693_p8 = scmp.lt.u32.totalorder %s1689_s12, %s2115_s2 }
 0x8ac   :  { %p1695_p9 = pnand %p1693_p8, %p1690_p7 }
 0x8ae   :  { %1698 = shalt.err (!%p1695_p9)
}
 0x8af   :  { %1353 = dma.vmem_to_hbm [thread:$0]  %s1351_s8, 32, %s2115_s2, [#allocation4]  }
 0x8b0   :  { %1703 = dma.done.wait [#allocation4], 32  }
 0x8b1   :  { %1704 = vsyncadd [#allocation4], 4294967264 }
 0x8b2   :  { %1357 = vsyncpa [#allocation3], 1 }
 0x8b3   :  { %1358 = vsyncpa [#allocation6], 1 }
 0x8b4   :  { %1359 = vsyncpa [#allocation4], 1 }

// kernel: cnn_lstm_forward.11
= control target key start
LH: loop header
LB: loop body
LE: loop exit
PB: predicated region body
PF: predicated region fallthrough
CT: control target
= control target key end

     0   :  { %13 = vsyncpa [#allocation3], 0  ;;  %s2242_s0 = inlined_call_operand.hbm [shape: f32[2,128], index: 0, kind: input, shape index: {}]   ;;  %s2243_s1 = inlined_call_operand.hbm [shape: bf16[2,512], index: 1, kind: input, shape index: {}]   ;;  %s2244_s2 = inlined_call_operand.hbm [shape: bf16[512,512], index: 2, kind: input, shape index: {}]   ;;  %s2245_s3 = inlined_call_operand.hbm [shape: f32[1,512], index: 3, kind: input, shape index: {}]   ;;  %s2246_s4 = inlined_call_operand.hbm [shape: bf16[256,64], index: 4, kind: input, shape index: {}]   ;;  %s2247_s5 = inlined_call_operand.hbm [shape: f32[1,64], index: 5, kind: input, shape index: {}]   ;;  %s2248_s6 = inlined_call_operand.hbm [shape: bf16[64,2], index: 6, kind: input, shape index: {}]   ;;  %s2249_s7 = inlined_call_operand.hbm [shape: f32[1,2], index: 7, kind: input, shape index: {}]   ;;  %s2250_s8 = inlined_call_operand.hbm [shape: f32[2,2], index: 8, kind: output, shape index: {}]  }
   0x1   :  { %14 = vsyncpa [#allocation6], 0 }
   0x2   :  { %15 = vsyncpa [#allocation9], 0 }
   0x3   :  { %16 = vsyncpa [#allocation12], 0 }
   0x4   :  { %17 = vsyncpa [#allocation15], 0 }
   0x5   :  { %18 = vsyncpa [#allocation4], 0  ;;  %s2061_s27 = smov [#allocation5]   ;;  %s2062_s29 = smov [#allocation8]  }
   0x6   :  { %s35_s28 = sshll.u32 %s2061_s27, 4  ;;  %s57_s30 = sshll.u32 %s2062_s29, 4  ;;  %s36_s28 = int_to_ptr.vmem [resolvable:$true] %s35_s28  ;;  %s58_s30 = int_to_ptr.vmem [resolvable:$true] %s57_s30 }
   0x7   :  { %s1851_s11 = scalar_lea.hbm %s2243_s1, 64 }
   0x8   :  { %p1852_p0 = scmp.ne.s32.totalorder %s2243_s1, %s1851_s11  ;;  %p1855_p1 = scmp.lt.u32.totalorder %s1851_s11, %s2243_s1 }
   0xa   :  { %p1857_p2 = pnand %p1855_p1, %p1852_p0 }
   0xc   :  { %1860 = shalt.err (!%p1857_p2)
}
   0xd   :  { %s1861_s16 = scalar_lea.vmem %s36_s28, 64  ;;  %p1866_p4 = scmp.lt.s32.totalorder %s36_s28, %s36_s28 }
   0xe   :  { %p1862_p3 = scmp.ne.s32.totalorder %s36_s28, %s1861_s16  ;;  %p1867_p5 = scmp.lt.s32.totalorder %s1861_s16, %s1861_s16 }
  0x10   :  { %p1868_p6 = por %p1867_p5, %p1866_p4 }
  0x12   :  { %p1869_p7 = pnand %p1868_p6, %p1862_p3 }
  0x14   :  { %1872 = shalt.err (!%p1869_p7)
}
  0x15   :  { %38 = dma.hbm_to_vmem [thread:$0]  %s2243_s1, 64, %s36_s28, [#allocation6]  }
  0x16   :  { %s1873_s21 = scalar_lea.hbm %s2245_s3, 64 }
  0x17   :  { %p1874_p8 = scmp.ne.s32.totalorder %s2245_s3, %s1873_s21  ;;  %p1877_p9 = scmp.lt.u32.totalorder %s1873_s21, %s2245_s3 }
  0x19   :  { %p1879_p10 = pnand %p1877_p9, %p1874_p8 }
  0x1b   :  { %1882 = shalt.err (!%p1879_p10)
}
  0x1c   :  { %s1883_s26 = scalar_lea.vmem %s58_s30, 64  ;;  %p1888_p12 = scmp.lt.s32.totalorder %s58_s30, %s58_s30 }
  0x1d   :  { %p1884_p11 = scmp.ne.s32.totalorder %s58_s30, %s1883_s26  ;;  %p1889_p13 = scmp.lt.s32.totalorder %s1883_s26, %s1883_s26 }
  0x1f   :  { %p1890_p0 = por %p1889_p13, %p1888_p12 }
  0x21   :  { %p1891_p1 = pnand %p1890_p0, %p1884_p11 }
  0x23   :  { %1894 = shalt.err (!%p1891_p1)
}
  0x24   :  { %60 = dma.hbm_to_vmem [thread:$0]  %s2245_s3, 64, %s58_s30, [#allocation9]  }
  0x25   :  { %s2063_s28 = smov [#allocation11]   ;;  %s2064_s9 = smov [#allocation2]  }
  0x26   :  { %s79_s29 = sshll.u32 %s2063_s28, 4  ;;  %s25_s10 = sshll.u32 %s2064_s9, 4  ;;  %s80_s29 = int_to_ptr.vmem [resolvable:$true] %s79_s29  ;;  %s26_s10 = int_to_ptr.vmem [resolvable:$true] %s25_s10 }
  0x27   :  { %s1895_s13 = scalar_lea.hbm %s2247_s5, 16 }
  0x28   :  { %p1896_p2 = scmp.ne.s32.totalorder %s2247_s5, %s1895_s13  ;;  %p1899_p3 = scmp.lt.u32.totalorder %s1895_s13, %s2247_s5 }
  0x2a   :  { %p1901_p4 = pnand %p1899_p3, %p1896_p2 }
  0x2c   :  { %1904 = shalt.err (!%p1901_p4)
}
  0x2d   :  { %s1905_s3 = scalar_lea.vmem %s80_s29, 16  ;;  %s1909_s30 = scalar_lea.vmem %s80_s29, 32 }
  0x2e   :  { %p1906_p5 = scmp.ne.s32.totalorder %s80_s29, %s1905_s3  ;;  %p1910_p6 = scmp.lt.s32.totalorder %s80_s29, %s80_s29 }
  0x2f   :  { %p1911_p7 = scmp.lt.s32.totalorder %s1909_s30, %s1905_s3 }
  0x31   :  { %p1912_p8 = por %p1911_p7, %p1910_p6 }
  0x33   :  { %p1913_p9 = pnand %p1912_p8, %p1906_p5 }
  0x35   :  { %1916 = shalt.err (!%p1913_p9)
}
  0x36   :  { %82 = dma.hbm_to_vmem [thread:$0]  %s2247_s5, 16, %s80_s29, [#allocation12]  }
  0x37   :  { %s1917_s22 = scalar_lea.hbm %s2242_s0, 32 }
  0x38   :  { %p1918_p10 = scmp.ne.s32.totalorder %s2242_s0, %s1917_s22  ;;  %p1921_p11 = scmp.lt.u32.totalorder %s1917_s22, %s2242_s0 }
  0x3a   :  { %p1923_p12 = pnand %p1921_p11, %p1918_p10 }
  0x3c   :  { %1926 = shalt.err (!%p1923_p12)
}
  0x3d   :  { %s1927_s1 = scalar_lea.vmem %s26_s10, 32  ;;  %p1932_p0 = scmp.lt.s32.totalorder %s26_s10, %s26_s10 }
  0x3e   :  { %p1928_p13 = scmp.ne.s32.totalorder %s26_s10, %s1927_s1  ;;  %p1933_p1 = scmp.lt.s32.totalorder %s1927_s1, %s1927_s1 }
  0x40   :  { %p1934_p2 = por %p1933_p1, %p1932_p0 }
  0x42   :  { %p1935_p3 = pnand %p1934_p2, %p1928_p13 }
  0x44   :  { %1938 = shalt.err (!%p1935_p3)
}
  0x45   :  { %28 = dma.hbm_to_vmem [thread:$0]  %s2242_s0, 32, %s26_s10, [#allocation3]  }
  0x46   :  { %s2065_s28 = smov [#allocation7]   ;;  %s1939_s12 = scalar_lea.hbm %s2244_s2, 16384 }
  0x47   :  { %s44_s29 = sshll.u32 %s2065_s28, 4  ;;  %p1940_p4 = scmp.ne.s32.totalorder %s2244_s2, %s1939_s12  ;;  %s45_s29 = int_to_ptr.vmem [resolvable:$true] %s44_s29 }
  0x48   :  { %p1943_p5 = scmp.lt.u32.totalorder %s1939_s12, %s2244_s2 }
  0x4a   :  { %p1945_p6 = pnand %p1943_p5, %p1940_p4 }
  0x4c   :  { %1948 = shalt.err (!%p1945_p6)
}
  0x4d   :  { %s1949_s17 = scalar_lea.vmem %s45_s29, 16384  ;;  %p1954_p8 = scmp.lt.s32.totalorder %s45_s29, %s45_s29 }
  0x4e   :  { %p1950_p7 = scmp.ne.s32.totalorder %s45_s29, %s1949_s17  ;;  %p1955_p9 = scmp.lt.s32.totalorder %s1949_s17, %s1949_s17 }
  0x50   :  { %p1956_p10 = por %p1955_p9, %p1954_p8 }
  0x52   :  { %p1957_p11 = pnand %p1956_p10, %p1950_p7 }
  0x54   :  { %1960 = shalt.err (!%p1957_p11)
}
  0x55   :  { %s2066_s0 = smov 256   ;;  %s2067_s10 = smov 16  }
  0x56   :  { %50 = dma.hbm_to_vmem [thread:$0]  %s2244_s2, 16384, %s45_s29, [#allocation6], %s2066_s0, %s2066_s0, %s2067_s10  }
  0x57   :  { %s2068_s18 = smov [#allocation10]   ;;  %s1961_s22 = scalar_lea.hbm %s2246_s4, 2048 }
  0x58   :  { %s66_s19 = sshll.u32 %s2068_s18, 4  ;;  %p1962_p12 = scmp.ne.s32.totalorder %s2246_s4, %s1961_s22  ;;  %s67_s19 = int_to_ptr.vmem [resolvable:$true] %s66_s19 }
  0x59   :  { %p1965_p13 = scmp.lt.u32.totalorder %s1961_s22, %s2246_s4 }
  0x5b   :  { %p1967_p0 = pnand %p1965_p13, %p1962_p12 }
  0x5d   :  { %1970 = shalt.err (!%p1967_p0)
}
  0x5e   :  { %s1971_s1 = scalar_lea.vmem %s67_s19, 2048  ;;  %p1976_p2 = scmp.lt.s32.totalorder %s67_s19, %s67_s19 }
  0x5f   :  { %p1972_p1 = scmp.ne.s32.totalorder %s67_s19, %s1971_s1  ;;  %p1977_p3 = scmp.lt.s32.totalorder %s1971_s1, %s1971_s1 }
  0x61   :  { %p1978_p4 = por %p1977_p3, %p1976_p2 }
  0x63   :  { %p1979_p5 = pnand %p1978_p4, %p1972_p1 }
  0x65   :  { %1982 = shalt.err (!%p1979_p5)
}
  0x66   :  { %s2069_s2 = smov 64   ;;  %s2070_s5 = smov 4  }
  0x67   :  { %72 = dma.hbm_to_vmem [thread:$0]  %s2246_s4, 2048, %s67_s19, [#allocation9], %s2069_s2, %s2069_s2, %s2070_s5  }
  0x68   :  { %s2071_s29 = smov [#allocation13]   ;;  %s2072_s11 = smov [#allocation14]  }
  0x69   :  { %s88_s9 = sshll.u32 %s2071_s29, 4  ;;  %s101_s12 = sshll.u32 %s2072_s11, 4  ;;  %s89_s9 = int_to_ptr.vmem [resolvable:$true] %s88_s9  ;;  %s102_s12 = int_to_ptr.vmem [resolvable:$true] %s101_s12 }
  0x6a   :  { %s1983_s15 = scalar_lea.hbm %s2248_s6, 512 }
  0x6b   :  { %p1984_p6 = scmp.ne.s32.totalorder %s2248_s6, %s1983_s15  ;;  %p1987_p7 = scmp.lt.u32.totalorder %s1983_s15, %s2248_s6 }
  0x6d   :  { %p1989_p8 = pnand %p1987_p7, %p1984_p6 }
  0x6f   :  { %1992 = shalt.err (!%p1989_p8)
}
  0x70   :  { %s1993_s4 = scalar_lea.vmem %s89_s9, 512  ;;  %p1998_p10 = scmp.lt.s32.totalorder %s89_s9, %s89_s9 }
  0x71   :  { %p1994_p9 = scmp.ne.s32.totalorder %s89_s9, %s1993_s4  ;;  %p1999_p11 = scmp.lt.s32.totalorder %s1993_s4, %s1993_s4 }
  0x73   :  { %p2000_p12 = por %p1999_p11, %p1998_p10 }
  0x75   :  { %p2001_p13 = pnand %p2000_p12, %p1994_p9 }
  0x77   :  { %2004 = shalt.err (!%p2001_p13)
}
  0x78   :  { %94 = dma.hbm_to_vmem [thread:$0]  %s2248_s6, 512, %s89_s9, [#allocation12], %s2069_s2, %s2069_s2, %s2070_s5  }
  0x79   :  { %s2005_s20 = scalar_lea.hbm %s2249_s7, 16 }
  0x7a   :  { %p2006_p0 = scmp.ne.s32.totalorder %s2249_s7, %s2005_s20  ;;  %p2009_p1 = scmp.lt.u32.totalorder %s2005_s20, %s2249_s7 }
  0x7c   :  { %p2011_p2 = pnand %p2009_p1, %p2006_p0 }
  0x7e   :  { %2014 = shalt.err (!%p2011_p2)
}
  0x7f   :  { %s2015_s25 = scalar_lea.vmem %s102_s12, 16  ;;  %s2019_s26 = scalar_lea.vmem %s102_s12, 32 }
  0x80   :  { %p2016_p3 = scmp.ne.s32.totalorder %s102_s12, %s2015_s25  ;;  %p2020_p4 = scmp.lt.s32.totalorder %s102_s12, %s102_s12 }
  0x81   :  { %p2021_p5 = scmp.lt.s32.totalorder %s2019_s26, %s2015_s25 }
  0x83   :  { %p2022_p6 = por %p2021_p5, %p2020_p4 }
  0x85   :  { %p2023_p7 = pnand %p2022_p6, %p2016_p3 }
  0x87   :  { %2026 = shalt.err (!%p2023_p7)
}
  0x88   :  { %104 = dma.hbm_to_vmem [thread:$0]  %s2249_s7, 16, %s102_s12, [#allocation15]  }
  0x89   :  { %2049 = dma.done.wait [#allocation3], 32  }
  0x8a   :  { %2050 = vsyncadd [#allocation3], 4294967264 }
  0x8b   :  { %2051 = dma.done.wait [#allocation6], 16448  }
  0x8c   :  { %2052 = vsyncadd [#allocation6], 4294950848 }
  0x8d   :  { %2053 = dma.done.wait [#allocation9], 2112  }
  0x8e   :  { %2054 = vsyncadd [#allocation9], 4294965184 }
  0x8f   :  { %2055 = dma.done.wait [#allocation12], 528  }
  0x90   :  { %2056 = vsyncadd [#allocation12], 4294966768 }
  0x91   :  { %2057 = dma.done.wait [#allocation15], 16  }
  0x92   :  { %2058 = vsyncadd [#allocation15], 4294967280  ;;  %v1627_v0 = vld [vmem:[#allocation7 + $0x4] ss:$16 sps:$4 sm:$0xff]   ;;  %v1629_v1 = vld [vmem:[#allocation7 + $0xc] ss:$16 sps:$4 sm:$0xff]   ;;  %v261_v38 = vlaneseq }
  0x93   :  { %945 = vmatprep.subr.bf16.mxu0 %v1627_v0  ;;  %v1631_v2 = vld [vmem:[#allocation7] ss:$16 sps:$4 sm:$0xff]   ;;  %v1632_v3 = vld [vmem:[#allocation7 + $0x8] ss:$16 sps:$4 sm:$0xff]   ;;  %1025 = vmatprep.subr.bf16.mxu1 %v1629_v1  ;;  %v1633_v4 = vld [vmem:[#allocation7 + $0x24] ss:$16 sps:$4 sm:$0xff]  }
  0x94   :  { %946 = vmatpush1.bf16.msra.mxu0 %v1631_v2  ;;  %1026 = vmatpush1.bf16.msra.mxu1 %v1632_v3  ;;  %v1635_v5 = vld [vmem:[#allocation7 + $0x2c] ss:$16 sps:$4 sm:$0xff]   ;;  %v1637_v6 = vld [vmem:[#allocation7 + $0x20] ss:$16 sps:$4 sm:$0xff]   ;;  %v1638_v7 = vld [vmem:[#allocation7 + $0x28] ss:$16 sps:$4 sm:$0xff]  }
  0x95   :  { %947 = vmatprep.subr.bf16.mxu0 %v1633_v4  ;;  %1027 = vmatprep.subr.bf16.mxu1 %v1635_v5  ;;  %v1639_v8 = vld [vmem:[#allocation7 + $0x44] ss:$16 sps:$4 sm:$0xff]   ;;  %v1641_v9 = vld [vmem:[#allocation7 + $0x4c] ss:$16 sps:$4 sm:$0xff]   ;;  %v1643_v10 = vld [vmem:[#allocation7 + $0x40] ss:$16 sps:$4 sm:$0xff]  }
  0x96   :  { %v1644_v11 = vld [vmem:[#allocation7 + $0x48] ss:$16 sps:$4 sm:$0xff]   ;;  %v1645_v12 = vld [vmem:[#allocation7 + $0x64] ss:$16 sps:$4 sm:$0xff]   ;;  %v1647_v13 = vld [vmem:[#allocation7 + $0x6c] ss:$16 sps:$4 sm:$0xff]  }
  0x97   :  { %v1649_v14 = vld [vmem:[#allocation7 + $0x60] ss:$16 sps:$4 sm:$0xff]   ;;  %v1650_v15 = vld [vmem:[#allocation7 + $0x68] ss:$16 sps:$4 sm:$0xff]   ;;  %v1651_v16 = vld [vmem:[#allocation7 + $0x84] ss:$16 sps:$4 sm:$0xff]  }
  0x98   :  { %948 = vmatpush1.bf16.msra.mxu0 %v1637_v6  ;;  %1028 = vmatpush1.bf16.msra.mxu1 %v1638_v7  ;;  %v1653_v17 = vld [vmem:[#allocation7 + $0x8c] ss:$16 sps:$4 sm:$0xff]   ;;  %v1655_v18 = vld [vmem:[#allocation7 + $0x80] ss:$16 sps:$4 sm:$0xff]   ;;  %v1656_v19 = vld [vmem:[#allocation7 + $0x88] ss:$16 sps:$4 sm:$0xff]  }
  0x99   :  { %949 = vmatprep.subr.bf16.mxu0 %v1639_v8  ;;  %1029 = vmatprep.subr.bf16.mxu1 %v1641_v9  ;;  %v1657_v20 = vld [vmem:[#allocation7 + $0xa4] ss:$16 sps:$4 sm:$0xff]   ;;  %v1659_v21 = vld [vmem:[#allocation7 + $0xac] ss:$16 sps:$4 sm:$0xff]   ;;  %v1661_v22 = vld [vmem:[#allocation7 + $0xa0] ss:$16 sps:$4 sm:$0xff]  }
  0x9a   :  { %v1662_v23 = vld [vmem:[#allocation7 + $0xa8] ss:$16 sps:$4 sm:$0xff]   ;;  %v1663_v24 = vld [vmem:[#allocation7 + $0xc4] ss:$16 sps:$4 sm:$0xff]   ;;  %v1665_v25 = vld [vmem:[#allocation7 + $0xcc] ss:$16 sps:$4 sm:$0xff]  }
  0x9b   :  { %v1667_v26 = vld [vmem:[#allocation7 + $0xc0] ss:$16 sps:$4 sm:$0xff]   ;;  %v1668_v27 = vld [vmem:[#allocation7 + $0xc8] ss:$16 sps:$4 sm:$0xff]   ;;  %v1669_v28 = vld [vmem:[#allocation7 + $0xe4] ss:$16 sps:$4 sm:$0xff]  }
  0x9c   :  { %950 = vmatpush1.bf16.msra.mxu0 %v1643_v10  ;;  %1030 = vmatpush1.bf16.msra.mxu1 %v1644_v11  ;;  %v1671_v29 = vld [vmem:[#allocation7 + $0xec] ss:$16 sps:$4 sm:$0xff]   ;;  %v1673_v30 = vld [vmem:[#allocation7 + $0xe0] ss:$16 sps:$4 sm:$0xff]   ;;  %v1674_v31 = vld [vmem:[#allocation7 + $0xe8] ss:$16 sps:$4 sm:$0xff]  }
  0x9d   :  { %951 = vmatprep.subr.bf16.mxu0 %v1645_v12  ;;  %1031 = vmatprep.subr.bf16.mxu1 %v1647_v13  ;;  %v1675_v32 = vld [vmem:[#allocation7 + $0x104] ss:$16 sps:$4 sm:$0xff]   ;;  %v1677_v33 = vld [vmem:[#allocation7 + $0x10c] ss:$16 sps:$4 sm:$0xff]   ;;  %v1679_v34 = vld [vmem:[#allocation7 + $0x100] ss:$16 sps:$4 sm:$0xff]  }
  0x9e   :  { %v1680_v35 = vld [vmem:[#allocation7 + $0x108] ss:$16 sps:$4 sm:$0xff]   ;;  %v1681_v36 = vld [vmem:[#allocation7 + $0x124] ss:$16 sps:$4 sm:$0xff]   ;;  %v1683_v37 = vld [vmem:[#allocation7 + $0x12c] ss:$16 sps:$4 sm:$0xff]  }
  0x9f   :  { %v2073_v39 = vmov 1966171168   ;;  %v1685_v41 = vld [vmem:[#allocation7 + $0x120] ss:$16 sps:$4 sm:$0xff]   ;;  %v1686_v42 = vld [vmem:[#allocation7 + $0x128] ss:$16 sps:$4 sm:$0xff]  }
  0xa0   :  { %952 = vmatpush1.bf16.msra.mxu0 %v1649_v14  ;;  %1032 = vmatpush1.bf16.msra.mxu1 %v1650_v15  ;;  %v286_v40 = vunpack.c.l.s4 %v2073_v39  ;;  %v1687_v43 = vld [vmem:[#allocation7 + $0x144] ss:$16 sps:$4 sm:$0xff]   ;;  %v1689_v44 = vld [vmem:[#allocation7 + $0x14c] ss:$16 sps:$4 sm:$0xff]   ;;  %v2218_v45 = vshrl.u32 %v261_v38, 7  ;;  %vm2075_vm0 = vmmov 0  }
  0xa1   :  { %953 = vmatprep.subr.bf16.mxu0 %v1651_v16  ;;  %1033 = vmatprep.subr.bf16.mxu1 %v1653_v17  ;;  %v1691_v47 = vld [vmem:[#allocation7 + $0x140] ss:$16 sps:$4 sm:$0xff]   ;;  %v1692_v48 = vld [vmem:[#allocation7 + $0x148] ss:$16 sps:$4 sm:$0xff]   ;;  %v1693_v49 = vld [vmem:[#allocation7 + $0x164] ss:$16 sps:$4 sm:$0xff]  }
  0xa2   :  { %v287_v46 = vunpack.c.0.s8 %v286_v40  ;;  %v1695_v50 = vld [vmem:[#allocation7 + $0x16c] ss:$16 sps:$4 sm:$0xff]   ;;  %v1697_v53 = vld [vmem:[#allocation7 + $0x160] ss:$16 sps:$4 sm:$0xff]   ;;  %v1698_v54 = vld [vmem:[#allocation7 + $0x168] ss:$16 sps:$4 sm:$0xff]  }
  0xa3   :  { %v1407_v52 = vld.sshfl [vmem:[#allocation5] sm:$0x33 pattern:$0x75316420]  ;;  %v1699_v56 = vld [vmem:[#allocation7 + $0x184] ss:$16 sps:$4 sm:$0xff]  }
  0xa4   :  { %954 = vmatpush1.bf16.msra.mxu0 %v1655_v18  ;;  %1034 = vmatpush1.bf16.msra.mxu1 %v1656_v19  ;;  %v290_v51 = vsub.s32 %v287_v46, %v2218_v45  ;;  %v284_v55 = vcombine.high %v1407_v52, %v1407_v52  ;;  %v1701_v57 = vld [vmem:[#allocation7 + $0x18c] ss:$16 sps:$4 sm:$0xff]   ;;  %v1703_v59 = vld [vmem:[#allocation7 + $0x180] ss:$16 sps:$4 sm:$0xff]   ;;  %v1704_v60 = vld [vmem:[#allocation7 + $0x188] ss:$16 sps:$4 sm:$0xff]  }
  0xa5   :  { %955 = vmatprep.subr.bf16.mxu0 %v1657_v20  ;;  %1035 = vmatprep.subr.bf16.mxu1 %v1659_v21  ;;  %v1705_v61 = vld [vmem:[#allocation7 + $0x1a4] ss:$16 sps:$4 sm:$0xff]   ;;  %v1707_v62 = vld [vmem:[#allocation7 + $0x1ac] ss:$16 sps:$4 sm:$0xff]   ;;  %v1709_v63 = vld [vmem:[#allocation7 + $0x1a0] ss:$16 sps:$4 sm:$0xff]  }
  0xa6   :  { %v298_v58 = vrot.slane %v284_v55, %v290_v51  ;;  %v1710_v0 = vld [vmem:[#allocation7 + $0x1a8] ss:$16 sps:$4 sm:$0xff]   ;;  %v1711_v1 = vld [vmem:[#allocation7 + $0x1c4] ss:$16 sps:$4 sm:$0xff]   ;;  %v1713_v2 = vld [vmem:[#allocation7 + $0x1cc] ss:$16 sps:$4 sm:$0xff]   ;;  %v2221_v12 = vrot.slane %v1407_v52, %v290_v51 }
  0xa7   :  { %v1715_v3 = vld [vmem:[#allocation7 + $0x1c0] ss:$16 sps:$4 sm:$0xff]   ;;  %v1716_v4 = vld [vmem:[#allocation7 + $0x1c8] ss:$16 sps:$4 sm:$0xff]   ;;  %v1717_v5 = vld [vmem:[#allocation7 + $0x1e4] ss:$16 sps:$4 sm:$0xff]  }
  0xa8   :  { %956 = vmatpush1.bf16.msra.mxu0 %v1661_v22  ;;  %1036 = vmatpush1.bf16.msra.mxu1 %v1662_v23  ;;  %v1719_v6 = vld [vmem:[#allocation7 + $0x1ec] ss:$16 sps:$4 sm:$0xff]   ;;  %v1721_v7 = vld [vmem:[#allocation7 + $0x1e0] ss:$16 sps:$4 sm:$0xff]   ;;  %v1722_v8 = vld [vmem:[#allocation7 + $0x1e8] ss:$16 sps:$4 sm:$0xff]   ;;  %v300_v16 = vcombine.high %v298_v58, %v298_v58 }
  0xa9   :  { %957 = vmatprep.subr.bf16.mxu0 %v1663_v24  ;;  %1037 = vmatprep.subr.bf16.mxu1 %v1665_v25  ;;  %v1725_v9 = vld [vmem:[#allocation7 + $0x204] ss:$16 sps:$4 sm:$0xff]   ;;  %v1728_v10 = vld [vmem:[#allocation7 + $0x20c] ss:$16 sps:$4 sm:$0xff]   ;;  %v1723_v11 = vld [vmem:[#allocation7 + $0x200] ss:$16 sps:$4 sm:$0xff]  }
  0xaa   :  { %977 = vmatprep.mubr.bf16.mxu0 %v298_v58  ;;  %1057 = vmatprep.mubr.bf16.mxu1 %v298_v58  ;;  %v1726_v13 = vld [vmem:[#allocation7 + $0x208] ss:$16 sps:$4 sm:$0xff]   ;;  %v1731_v14 = vld [vmem:[#allocation7 + $0x224] ss:$16 sps:$4 sm:$0xff]   ;;  %v1734_v15 = vld [vmem:[#allocation7 + $0x22c] ss:$16 sps:$4 sm:$0xff]  }
  0xab   :  { %v1729_v17 = vld [vmem:[#allocation7 + $0x220] ss:$16 sps:$4 sm:$0xff]   ;;  %v1732_v18 = vld [vmem:[#allocation7 + $0x228] ss:$16 sps:$4 sm:$0xff]   ;;  %v1737_v19 = vld [vmem:[#allocation7 + $0x244] ss:$16 sps:$4 sm:$0xff]  }
  0xac   :  { %958 = vmatpush1.bf16.msra.mxu0 %v1667_v26  ;;  %1038 = vmatpush1.bf16.msra.mxu1 %v1668_v27  ;;  %v1740_v20 = vld [vmem:[#allocation7 + $0x24c] ss:$16 sps:$4 sm:$0xff]   ;;  %v1735_v21 = vld [vmem:[#allocation7 + $0x240] ss:$16 sps:$4 sm:$0xff]   ;;  %v1738_v22 = vld [vmem:[#allocation7 + $0x248] ss:$16 sps:$4 sm:$0xff]  }
  0xad   :  { %959 = vmatprep.subr.bf16.mxu0 %v1669_v28  ;;  %1039 = vmatprep.subr.bf16.mxu1 %v1671_v29  ;;  %v1743_v23 = vld [vmem:[#allocation7 + $0x264] ss:$16 sps:$4 sm:$0xff]   ;;  %v1746_v24 = vld [vmem:[#allocation7 + $0x26c] ss:$16 sps:$4 sm:$0xff]   ;;  %v1741_v25 = vld [vmem:[#allocation7 + $0x260] ss:$16 sps:$4 sm:$0xff]  }
  0xae   :  { %v1744_v26 = vld [vmem:[#allocation7 + $0x268] ss:$16 sps:$4 sm:$0xff]   ;;  %v1749_v27 = vld [vmem:[#allocation7 + $0x284] ss:$16 sps:$4 sm:$0xff]   ;;  %v1752_v28 = vld [vmem:[#allocation7 + $0x28c] ss:$16 sps:$4 sm:$0xff]  }
  0xaf   :  { %v1747_v29 = vld [vmem:[#allocation7 + $0x280] ss:$16 sps:$4 sm:$0xff]   ;;  %v1762_v38 = vld [vmem:[#allocation7 + $0x2c8] ss:$16 sps:$4 sm:$0xff]   ;;  %v1767_v39 = vld [vmem:[#allocation7 + $0x2e4] ss:$16 sps:$4 sm:$0xff]  }
  0xb0   :  { %960 = vmatpush1.bf16.msra.mxu0 %v1673_v30  ;;  %1040 = vmatpush1.bf16.msra.mxu1 %v1674_v31  ;;  %v1750_v30 = vld [vmem:[#allocation7 + $0x288] ss:$16 sps:$4 sm:$0xff]   ;;  %v1755_v31 = vld [vmem:[#allocation7 + $0x2a4] ss:$16 sps:$4 sm:$0xff]   ;;  %v1770_v40 = vld [vmem:[#allocation7 + $0x2ec] ss:$16 sps:$4 sm:$0xff]  }
  0xb1   :  { %961 = vmatprep.subr.bf16.mxu0 %v1675_v32  ;;  %1041 = vmatprep.subr.bf16.mxu1 %v1677_v33  ;;  %v1758_v32 = vld [vmem:[#allocation7 + $0x2ac] ss:$16 sps:$4 sm:$0xff]   ;;  %v1753_v33 = vld [vmem:[#allocation7 + $0x2a0] ss:$16 sps:$4 sm:$0xff]   ;;  %v1780_v51 = vld [vmem:[#allocation7 + $0x328] ss:$16 sps:$4 sm:$0xff]  }
  0xb2   :  { %v1771_v46 = vld [vmem:[#allocation7 + $0x300] ss:$16 sps:$4 sm:$0xff]   ;;  %v1785_v52 = vld [vmem:[#allocation7 + $0x344] ss:$16 sps:$4 sm:$0xff]   ;;  %v1786_v55 = vld [vmem:[#allocation7 + $0x348] ss:$16 sps:$4 sm:$0xff]  }
  0xb3   :  { %v1789_v58 = vld [vmem:[#allocation7 + $0x360] ss:$16 sps:$4 sm:$0xff]   ;;  %vm1342_vm1 = vcmask 523264   ;;  %s2076_s7 = smov [#allocation16]   ;;  %vm1386_vm2 = vcmask 9216  }
  0xb4   :  { %962 = vmatpush1.bf16.msra.mxu0 %v1679_v34  ;;  %1042 = vmatpush1.bf16.msra.mxu1 %v1680_v35  ;;  %v1756_v34 = vld [vmem:[#allocation7 + $0x2a8] ss:$16 sps:$4 sm:$0xff]   ;;  %v1761_v35 = vld [vmem:[#allocation7 + $0x2c4] ss:$16 sps:$4 sm:$0xff]   ;;  %s1394_s2 = sshll.u32 %s2076_s7, 4  ;;  %s1395_s2 = int_to_ptr.vmem [resolvable:$true] %s1394_s2 }
  0xb5   :  { %963 = vmatprep.subr.bf16.mxu0 %v1681_v36  ;;  %1043 = vmatprep.subr.bf16.mxu1 %v1683_v37  ;;  %v1764_v36 = vld [vmem:[#allocation7 + $0x2cc] ss:$16 sps:$4 sm:$0xff]   ;;  %v1759_v37 = vld [vmem:[#allocation7 + $0x2c0] ss:$16 sps:$4 sm:$0xff]   ;;  %s2027_s5 = scalar_lea.vmem %s1395_s2, 32  ;;  %p2032_p9 = scmp.lt.s32.totalorder %s1395_s2, %s1395_s2 }
  0xb6   :  { %p2028_p8 = scmp.ne.s32.totalorder %s1395_s2, %s2027_s5  ;;  %p2033_p10 = scmp.lt.s32.totalorder %s2027_s5, %s2027_s5 }
  0xb8   :  { %964 = vmatpush1.bf16.msra.mxu0 %v1685_v41  ;;  %1044 = vmatpush1.bf16.msra.mxu1 %v1686_v42  ;;  %v1765_v41 = vld [vmem:[#allocation7 + $0x2e0] ss:$16 sps:$4 sm:$0xff]   ;;  %v1768_v42 = vld [vmem:[#allocation7 + $0x2e8] ss:$16 sps:$4 sm:$0xff]   ;;  %p2034_p11 = por %p2033_p10, %p2032_p9 }
  0xb9   :  { %965 = vmatprep.subr.bf16.mxu0 %v1687_v43  ;;  %1045 = vmatprep.subr.bf16.mxu1 %v1689_v44  ;;  %v1773_v43 = vld [vmem:[#allocation7 + $0x304] ss:$16 sps:$4 sm:$0xff]   ;;  %v1776_v44 = vld [vmem:[#allocation7 + $0x30c] ss:$16 sps:$4 sm:$0xff]  }
  0xba   :  { %p2035_p12 = pnand %p2034_p11, %p2028_p8 }
  0xbc   :  { %966 = vmatpush1.bf16.msra.mxu0 %v1691_v47  ;;  %1046 = vmatpush1.bf16.msra.mxu1 %v1692_v48  ;;  %v1774_v47 = vld [vmem:[#allocation7 + $0x308] ss:$16 sps:$4 sm:$0xff]   ;;  %v1779_v48 = vld [vmem:[#allocation7 + $0x324] ss:$16 sps:$4 sm:$0xff]  }
  0xbd   :  { %967 = vmatprep.subr.bf16.mxu0 %v1693_v49  ;;  %1047 = vmatprep.subr.bf16.mxu1 %v1695_v50  ;;  %v1782_v49 = vld [vmem:[#allocation7 + $0x32c] ss:$16 sps:$4 sm:$0xff]   ;;  %v1777_v50 = vld [vmem:[#allocation7 + $0x320] ss:$16 sps:$4 sm:$0xff]  }
  0xc0   :  { %968 = vmatpush1.bf16.msra.mxu0 %v1697_v53  ;;  %1048 = vmatpush1.bf16.msra.mxu1 %v1698_v54  ;;  %v1788_v53 = vld [vmem:[#allocation7 + $0x34c] ss:$16 sps:$4 sm:$0xff]   ;;  %v1783_v54 = vld [vmem:[#allocation7 + $0x340] ss:$16 sps:$4 sm:$0xff]  }
  0xc1   :  { %969 = vmatprep.subr.bf16.mxu0 %v1699_v56  ;;  %1049 = vmatprep.subr.bf16.mxu1 %v1701_v57  ;;  %v1791_v56 = vld [vmem:[#allocation7 + $0x364] ss:$16 sps:$4 sm:$0xff]   ;;  %v1794_v57 = vld [vmem:[#allocation7 + $0x36c] ss:$16 sps:$4 sm:$0xff]  }
  0xc4   :  { %970 = vmatpush1.bf16.msra.mxu0 %v1703_v59  ;;  %1050 = vmatpush1.bf16.msra.mxu1 %v1704_v60  ;;  %v1792_v59 = vld [vmem:[#allocation7 + $0x368] ss:$16 sps:$4 sm:$0xff]   ;;  %v1797_v60 = vld [vmem:[#allocation7 + $0x384] ss:$16 sps:$4 sm:$0xff]  }
  0xc5   :  { %971 = vmatprep.subr.bf16.mxu0 %v1705_v61  ;;  %1051 = vmatprep.subr.bf16.mxu1 %v1707_v62  ;;  %v1800_v61 = vld [vmem:[#allocation7 + $0x38c] ss:$16 sps:$4 sm:$0xff]   ;;  %v1795_v62 = vld [vmem:[#allocation7 + $0x380] ss:$16 sps:$4 sm:$0xff]  }
  0xc8   :  { %972 = vmatpush1.bf16.msra.mxu0 %v1709_v63  ;;  %1052 = vmatpush1.bf16.msra.mxu1 %v1710_v0  ;;  %v1798_v63 = vld [vmem:[#allocation7 + $0x388] ss:$16 sps:$4 sm:$0xff]   ;;  %v1803_v0 = vld [vmem:[#allocation7 + $0x3a4] ss:$16 sps:$4 sm:$0xff]  }
  0xc9   :  { %973 = vmatprep.subr.bf16.mxu0 %v1711_v1  ;;  %1053 = vmatprep.subr.bf16.mxu1 %v1713_v2  ;;  %v1806_v1 = vld [vmem:[#allocation7 + $0x3ac] ss:$16 sps:$4 sm:$0xff]   ;;  %v1801_v2 = vld [vmem:[#allocation7 + $0x3a0] ss:$16 sps:$4 sm:$0xff]  }
  0xcc   :  { %974 = vmatpush1.bf16.msra.mxu0 %v1715_v3  ;;  %1054 = vmatpush1.bf16.msra.mxu1 %v1716_v4  ;;  %v1804_v3 = vld [vmem:[#allocation7 + $0x3a8] ss:$16 sps:$4 sm:$0xff]   ;;  %v1809_v4 = vld [vmem:[#allocation7 + $0x3c4] ss:$16 sps:$4 sm:$0xff]  }
  0xcd   :  { %975 = vmatprep.subr.bf16.mxu0 %v1717_v5  ;;  %1055 = vmatprep.subr.bf16.mxu1 %v1719_v6  ;;  %v1812_v5 = vld [vmem:[#allocation7 + $0x3cc] ss:$16 sps:$4 sm:$0xff]   ;;  %v1807_v6 = vld [vmem:[#allocation7 + $0x3c0] ss:$16 sps:$4 sm:$0xff]  }
  0xd0   :  { %976 = vmatpush1.bf16.msra.mxu0 %v1721_v7  ;;  %1056 = vmatpush1.bf16.msra.mxu1 %v1722_v8  ;;  %v1810_v7 = vld [vmem:[#allocation7 + $0x3c8] ss:$16 sps:$4 sm:$0xff]   ;;  %v1815_v8 = vld [vmem:[#allocation7 + $0x3e4] ss:$16 sps:$4 sm:$0xff]  }
  0xd1   :  { %985 = vmatprep.subr.bf16.mxu0 %v1725_v9  ;;  %1066 = vmatprep.subr.bf16.mxu1 %v1728_v10  ;;  %v1818_v9 = vld [vmem:[#allocation7 + $0x3ec] ss:$16 sps:$4 sm:$0xff]   ;;  %v1813_v10 = vld [vmem:[#allocation7 + $0x3e0] ss:$16 sps:$4 sm:$0xff]  }
  0xd3   :  { %978 = vmatmul.mubr.bf16.vlgmr.msra.gmra.mrb[0].mxu0 %v2221_v12  ;;  %1058 = vmatmul.mubr.bf16.vlgmr.msra.gmra.mrb[0].mxu1 %v2221_v12 }
  0xd4   :  { %986 = vmatpush1.bf16.msra.mxu0 %v1723_v11  ;;  %1067 = vmatpush1.bf16.msra.mxu1 %v1726_v13  ;;  %v1816_v11 = vld [vmem:[#allocation7 + $0x3e8] ss:$16 sps:$4 sm:$0xff]   ;;  %v299_v13 = vcombine.high %v2221_v12, %v2221_v12 }
  0xd5   :  { %987 = vmatprep.subr.bf16.mxu0 %v1731_v14  ;;  %1068 = vmatprep.subr.bf16.mxu1 %v1734_v15  ;;  %v1819_v14 = vld [vmem:[#allocation10 + $0x40] sm:$0xff]  }
  0xd6   :  { %1017 = vmatprep.mubr.bf16.mxu0 %v300_v16  ;;  %1098 = vmatprep.mubr.bf16.mxu1 %v300_v16  ;;  %v1820_v15 = vld [vmem:[#allocation10] sm:$0xff]   ;;  %v1821_v16 = vld [vmem:[#allocation10 + $0x48] sm:$0xff]  }
  0xd7   :  { %v1827_v12 = vld [vmem:[#allocation10 + $0x60] sm:$0xff]  }
  0xd8   :  { %988 = vmatpush1.bf16.msra.mxu0 %v1729_v17  ;;  %1069 = vmatpush1.bf16.msra.mxu1 %v1732_v18  ;;  %v1822_v17 = vld [vmem:[#allocation10 + $0x8] sm:$0xff]   ;;  %v1823_v18 = vld [vmem:[#allocation10 + $0x50] sm:$0xff]  }
  0xd9   :  { %989 = vmatprep.subr.bf16.mxu0 %v1737_v19  ;;  %1070 = vmatprep.subr.bf16.mxu1 %v1740_v20  ;;  %v1824_v19 = vld [vmem:[#allocation10 + $0x10] sm:$0xff]   ;;  %v1825_v20 = vld [vmem:[#allocation10 + $0x58] sm:$0xff]  }
  0xdc   :  { %990 = vmatpush1.bf16.msra.mxu0 %v1735_v21  ;;  %1071 = vmatpush1.bf16.msra.mxu1 %v1738_v22  ;;  %v1826_v21 = vld [vmem:[#allocation10 + $0x18] sm:$0xff]   ;;  %v1828_v22 = vld [vmem:[#allocation10 + $0x20] sm:$0xff]  }
  0xdd   :  { %991 = vmatprep.subr.bf16.mxu0 %v1743_v23  ;;  %1072 = vmatprep.subr.bf16.mxu1 %v1746_v24  ;;  %v1829_v23 = vld [vmem:[#allocation10 + $0x68] sm:$0xff]  }
  0xde   :  { %v1830_v24 = vld [vmem:[#allocation10 + $0x28] sm:$0xff]  }
  0xe0   :  { %992 = vmatpush1.bf16.msra.mxu0 %v1741_v25  ;;  %1073 = vmatpush1.bf16.msra.mxu1 %v1744_v26  ;;  %v1831_v25 = vld [vmem:[#allocation10 + $0x70] sm:$0xff]  }
  0xe1   :  { %993 = vmatprep.subr.bf16.mxu0 %v1749_v27  ;;  %1074 = vmatprep.subr.bf16.mxu1 %v1752_v28  ;;  %v1832_v26 = vld [vmem:[#allocation10 + $0x30] sm:$0xff]   ;;  %v1833_v27 = vld [vmem:[#allocation10 + $0x78] sm:$0xff]  }
  0xe2   :  { %v1834_v28 = vld [vmem:[#allocation10 + $0x38] sm:$0xff]  }
  0xe4   :  { %994 = vmatpush1.bf16.msra.mxu0 %v1747_v29  ;;  %1075 = vmatpush1.bf16.msra.mxu1 %v1750_v30  ;;  %v1835_v29 = vld [vmem:[#allocation13] sm:$0xff]   ;;  %v2074_v30 = vmov 0.0  }
  0xe5   :  { %995 = vmatprep.subr.bf16.mxu0 %v1755_v31  ;;  %1076 = vmatprep.subr.bf16.mxu1 %v1758_v32  ;;  %v1836_v31 = vld [vmem:[#allocation13 + $0x8] sm:$0xff]   ;;  %v263_v32 = vsub.s32 0, %v2218_v45 }
  0xe8   :  { %996 = vmatpush1.bf16.msra.mxu0 %v1753_v33  ;;  %1077 = vmatpush1.bf16.msra.mxu1 %v1756_v34  ;;  %v259_v33 = vld [vmem:[#allocation8] sm:$0xf] }
  0xe9   :  { %997 = vmatprep.subr.bf16.mxu0 %v1761_v35  ;;  %1078 = vmatprep.subr.bf16.mxu1 %v1764_v36  ;;  %v264_v34 = vrot.slane %v259_v33, %v263_v32  ;;  %v271_v35 = vsub.s32 3, %v2218_v45 }
  0xec   :  { %998 = vmatpush1.bf16.msra.mxu0 %v1759_v37  ;;  %1079 = vmatpush1.bf16.msra.mxu1 %v1762_v38 }
  0xed   :  { %999 = vmatprep.subr.bf16.mxu0 %v1767_v39  ;;  %1080 = vmatprep.subr.bf16.mxu1 %v1770_v40  ;;  %v272_v40 = vrot.slane %v259_v33, %v271_v35 }
  0xf0   :  { %1000 = vmatpush1.bf16.msra.mxu0 %v1765_v41  ;;  %1081 = vmatpush1.bf16.msra.mxu1 %v1768_v42 }
  0xf1   :  { %1001 = vmatprep.subr.bf16.mxu0 %v1773_v43  ;;  %1082 = vmatprep.subr.bf16.mxu1 %v1776_v44 }
  0xf4   :  { %1002 = vmatpush1.bf16.msra.mxu0 %v1771_v46  ;;  %1083 = vmatpush1.bf16.msra.mxu1 %v1774_v47 }
  0xf5   :  { %1003 = vmatprep.subr.bf16.mxu0 %v1779_v48  ;;  %1084 = vmatprep.subr.bf16.mxu1 %v1782_v49  ;;  %v267_v48 = vsub.s32 2, %v2218_v45 }
  0xf8   :  { %1004 = vmatpush1.bf16.msra.mxu0 %v1777_v50  ;;  %1085 = vmatpush1.bf16.msra.mxu1 %v1780_v51  ;;  %v268_v50 = vrot.slane %v259_v33, %v267_v48 }
  0xf9   :  { %1005 = vmatprep.subr.bf16.mxu0 %v1785_v52  ;;  %1086 = vmatprep.subr.bf16.mxu1 %v1788_v53 }
  0xfc   :  { %1006 = vmatpush1.bf16.msra.mxu0 %v1783_v54  ;;  %1087 = vmatpush1.bf16.msra.mxu1 %v1786_v55 }
  0xfd   :  { %1007 = vmatprep.subr.bf16.mxu0 %v1791_v56  ;;  %1088 = vmatprep.subr.bf16.mxu1 %v1794_v57 }
 0x100   :  { %1008 = vmatpush1.bf16.msra.mxu0 %v1789_v58  ;;  %1089 = vmatpush1.bf16.msra.mxu1 %v1792_v59 }
 0x101   :  { %1009 = vmatprep.subr.bf16.mxu0 %v1797_v60  ;;  %1090 = vmatprep.subr.bf16.mxu1 %v1800_v61  ;;  %v1123_v61 = vld [vmem:[#allocation2] sm:$0x3] }
 0x104   :  { %1010 = vmatpush1.bf16.msra.mxu0 %v1795_v62  ;;  %1091 = vmatpush1.bf16.msra.mxu1 %v1798_v63  ;;  %v1124_v63 = vpack.c.bf16 %v1123_v61, %v1123_v61 }
 0x105   :  { %1011 = vmatprep.subr.bf16.mxu0 %v1803_v0  ;;  %1092 = vmatprep.subr.bf16.mxu1 %v1806_v1  ;;  %v1837_v1 = vld [vmem:[#allocation13 + $0x10] sm:$0xff]  }
 0x108   :  { %1012 = vmatpush1.bf16.msra.mxu0 %v1801_v2  ;;  %1093 = vmatpush1.bf16.msra.mxu1 %v1804_v3  ;;  %v1838_v2 = vld [vmem:[#allocation13 + $0x18] sm:$0xff]  }
 0x109   :  { %1013 = vmatprep.subr.bf16.mxu0 %v1809_v4  ;;  %1094 = vmatprep.subr.bf16.mxu1 %v1812_v5  ;;  %v1538_v4 = vld [vmem:[#allocation11] ss:$0 sm:$0xff] }
 0x10c   :  { %1014 = vmatpush1.bf16.msra.mxu0 %v1807_v6  ;;  %1095 = vmatpush1.bf16.msra.mxu1 %v1810_v7 }
 0x10d   :  { %1015 = vmatprep.subr.bf16.mxu0 %v1815_v8  ;;  %1096 = vmatprep.subr.bf16.mxu1 %v1818_v9 }
 0x110   :  { %1016 = vmatpush1.bf16.msra.mxu0 %v1813_v10  ;;  %1097 = vmatpush1.bf16.msra.mxu1 %v1816_v11 }
 0x111   :  { %1561 = vmatprep.subr.bf16.mxu0 %v1819_v14  ;;  %1588 = vmatprep.subr.bf16.mxu1 %v2074_v30 }
 0x113   :  { %1018 = vmatmul.mubr.bf16.vlgmr.msra.gmra.mrb[0].mxu0 %v299_v13  ;;  %1099 = vmatmul.mubr.bf16.vlgmr.msra.gmra.mrb[0].mxu1 %v299_v13  ;;  %v1555_v13 = vld [vmem:[#allocation14] ss:$0 sm:$0xff] }
 0x114   :  { %1562 = vmatpush3.bf16.msra.mxu0 %v1820_v15  ;;  %1589 = vmatpush3.bf16.msra.mxu1 %v1835_v29 }
 0x115   :  { %1563 = vmatprep.subr.bf16.mxu0 %v1821_v16  ;;  %1590 = vmatprep.subr.bf16.mxu1 %v2074_v30 }
 0x116   :  { %1596 = vmatprep.mubr.msk.bf16.mxu1 %vm2075_vm0, %v2074_v30 }
 0x118   :  { %1564 = vmatpush3.bf16.msra.mxu0 %v1822_v17  ;;  %1591 = vmatpush3.bf16.msra.mxu1 %v1836_v31 }
 0x119   :  { %1565 = vmatprep.subr.bf16.mxu0 %v1823_v18  ;;  %1592 = vmatprep.subr.bf16.mxu1 %v2074_v30 }
 0x11c   :  { %1566 = vmatpush3.bf16.msra.mxu0 %v1824_v19  ;;  %1593 = vmatpush3.bf16.msra.mxu1 %v1837_v1 }
 0x11d   :  { %1567 = vmatprep.subr.bf16.mxu0 %v1825_v20  ;;  %1594 = vmatprep.subr.bf16.mxu1 %v2074_v30 }
 0x120   :  { %1568 = vmatpush3.bf16.msra.mxu0 %v1826_v21  ;;  %1595 = vmatpush3.bf16.msra.mxu1 %v1838_v2 }
 0x121   :  { %1569 = vmatprep.subr.bf16.mxu0 %v1827_v12 }
 0x124   :  { %1570 = vmatpush3.bf16.msra.mxu0 %v1828_v22 }
 0x125   :  { %1571 = vmatprep.subr.bf16.mxu0 %v1829_v23 }
 0x128   :  { %1572 = vmatpush3.bf16.msra.mxu0 %v1830_v24 }
 0x129   :  { %1573 = vmatprep.subr.bf16.mxu0 %v1831_v25 }
 0x12c   :  { %1574 = vmatpush3.bf16.msra.mxu0 %v1832_v26 }
 0x12d   :  { %1575 = vmatprep.subr.bf16.mxu0 %v1833_v27 }
 0x130   :  { %1576 = vmatpush3.bf16.msra.mxu0 %v1834_v28 }
 0x1e6   :  { %v1019_v36 = vpop.f32.mrb[0].mxu0  ;;  %v1100_v37 = vpop.f32.mrb[0].mxu1 }
 0x1e7   :  { %v1600_v38 = vadd.f32 %v1019_v36, %v264_v34  ;;  %v1021_v39 = vpop.f32.mrb[1].mxu0  ;;  %v1102_v41 = vpop.f32.mrb[1].mxu1  ;;  %v1601_v52 = vadd.f32 %v1100_v37, %v268_v50 }
 0x1e8   :  { %v1022_v42 = vpop.f32.mrb[2].mxu0  ;;  %v1104_v43 = vpop.f32.mrb[2].mxu1  ;;  %v1602_v49 = vadd.f32 %v1102_v41, %v272_v40 }
 0x1e9   :  { %v1536_v44 = vmul.f32 -1.442695, %v1600_v38  ;;  %v1023_v46 = vpop.f32.mrb[3].mxu0  ;;  %v1105_v47 = vpop.f32.mrb[3].mxu1 }
 0x1ea   :  { %v1537_v51 = vmul.f32 -1.442695, %v1602_v49 }
 0x1eb   :  { %1839 = vpow2.f32 %v1536_v44 }
 0x1ec   :  { %1841 = vpow2.f32 %v1537_v51 }
 0x1ed   :  { %1843 = vtanh.f32 %v1601_v52 }
 0x1f5   :  { %v1840_v53 = vpop.eup %1839 }
 0x1f6   :  { %v1110_v54 = vadd.f32 1.0, %v1840_v53  ;;  %v1842_v55 = vpop.eup %1841 }
 0x1f7   :  { %v1117_v56 = vadd.f32 1.0, %v1842_v55  ;;  %v1844_v57 = vpop.eup %1843 }
 0x1f8   :  { %1845 = vrcp.f32 %v1110_v54 }
 0x1f9   :  { %1847 = vrcp.f32 %v1117_v56 }
 0x202   :  { %v1846_v58 = vpop.eup %1845 }
 0x203   :  { %v1120_v59 = vmul.f32 %v1846_v58, %v1844_v57  ;;  %v1848_v60 = vpop.eup %1847 }
 0x205   :  { %1849 = vtanh.f32 %v1120_v59 }
 0x20f   :  { %v1850_v62 = vpop.eup %1849 }
 0x210   :  { %v1122_v45 = vmul.f32 %v1850_v62, %v1848_v60 }
 0x212   :  { %v1125_v0 = vpack.c.bf16 %v1122_v45, %v1122_v45 }
 0x214   :  { %1293 = vmatprep.mubr.bf16.mxu0 %v1125_v0 }
 0x215   :  { %1294 = vmatmul.mubr.bf16.vlgmr.msra.gmra.mrb[4].mxu0 %v1124_v63 }
 0x2e8   :  { %v1577_v3 = vpop.f32.mrb[4].mxu0 }
 0x2e9   :  { %v1578_v5 = vpop.f32.mrb[5].mxu0 }
 0x2ea   :  { %v1579_v6 = vadd.f32 %v1578_v5, %v1577_v3  ;;  %v1580_v7 = vpop.f32.mrb[6].mxu0 }
 0x2eb   :  { %v1581_v8 = vpop.f32.mrb[7].mxu0 }
 0x2ec   :  { %v1296_v9 = vadd.f32 %v1579_v6, %v1538_v4 }
 0x2ee   :  { %v1301_v10 = vmax.f32 %v1296_v9, 0.0 }
 0x2f0   :  { %v1302_v11 = vpack.c.bf16 %v1301_v10, %v1301_v10 }
 0x2f2   :  { %1597 = vmatmul.mubr.msk.bf16.vlgmr.msra.gmra.mrb[4].mxu1 %vm1342_vm1, %v1302_v11 }
 0x3c5   :  { %v1380_v14 = vpop.f32.mrb[4].mxu1 }
 0x3c6   :  { %v1381_v15 = vadd.f32 %v1555_v13, %v1380_v14  ;;  %v1598_v16 = vpop.f32.mrb[5].mxu1 }
 0x3c7   :  { %v1383_v17 = vpop.f32.mrb[6].mxu1 }
 0x3c8   :  { %v1599_v18 = vpop.f32.mrb[7].mxu1  ;;  %1387 = vst.msk [vmem:[#allocation16] sm:$0x3] %vm1386_vm2, %v1381_v15 }
 0x3c9   :  { %2038 = shalt.err (!%p2035_p12)
}
 0x3ca   :  { %s2039_s29 = scalar_lea.hbm %s2250_s8, 32 }
 0x3cb   :  { %p2040_p13 = scmp.ne.s32.totalorder %s2250_s8, %s2039_s29  ;;  %p2043_p0 = scmp.lt.u32.totalorder %s2039_s29, %s2250_s8 }
 0x3cd   :  { %p2045_p1 = pnand %p2043_p0, %p2040_p13 }
 0x3cf   :  { %2048 = shalt.err (!%p2045_p1)
}
 0x3d0   :  { %1397 = dma.vmem_to_hbm [thread:$0]  %s1395_s2, 32, %s2250_s8, [#allocation4]  }
 0x3d1   :  { %2059 = dma.done.wait [#allocation4], 32  }
 0x3d2   :  { %2060 = vsyncadd [#allocation4], 4294967264 }
 0x3d3   :  { %1401 = vsyncpa [#allocation3], 1 }
 0x3d4   :  { %1402 = vsyncpa [#allocation6], 1 }
 0x3d5   :  { %1403 = vsyncpa [#allocation9], 1 }
 0x3d6   :  { %1404 = vsyncpa [#allocation12], 1 }
 0x3d7   :  { %1405 = vsyncpa [#allocation15], 1 }
 0x3d8   :  { %1406 = vsyncpa [#allocation4], 1 }

</bundles_post_ra>
